<compile_context>
chip_gen: v6e
topology: v6e:2x2x1
jax: 0.10.0
libtpu: 0.0.40
codegen_flags: <defaults>
</compile_context>

<pallas_src>
import functools

import jax
import jax.numpy as jnp
from jax.experimental import pallas as pl
from jax.experimental.pallas import tpu as pltpu

TM_STEM = 256        # row tile for the stem (7x7) matmul
PART = 6

# (cin, planes, cout, stride) per stage; layer4 stride forced to 1 (PCB_test).
STAGES = [
    (16, 8, 32, 1),
    (32, 16, 64, 2),
    (64, 32, 128, 2),
    (128, 64, 256, 1),   # PCB modification: stride (2,2) -> (1,1)
]


# --------------------------- Pallas kernels ---------------------------------


def _matmul_bias_relu_kernel(x_ref, w_ref, b_ref, o_ref):
    """One (TM, K) x (K, N) tile: bf16 matmul -> f32 acc, bias + relu in f32."""
    acc = jnp.dot(x_ref[...], w_ref[...], preferred_element_type=jnp.float32)
    o_ref[...] = jnp.maximum(acc + b_ref[...], 0.0).astype(o_ref.dtype)


def _bottleneck_s1_kernel(x_ref, mk_ref, w1_ref, b1_ref, w2_ref, b2_ref,
                          w3_ref, b3_ref, wd_ref, bd_ref, *rest,
                          width, pooled):
    """Stride-1 ResNet bottleneck for one batch element, fully in VMEM.

    x_ref  : (1, M + 2*(W+1), cin) bf16 - block input flattened row-major and
             zero-extended by W+1 rows on each side (so every 3x3 tap of
             conv1's output is a static in-bounds row-offset slice).
    mk_ref : (1, M, 9) f32 - 1.0 where a tap lies inside the image, 0.0 on the
             zero-padding (keeps conv2's zero-padding of conv1's output exact;
             extension rows hold garbage conv1 values but are always masked).
    w*_ref : BN-folded bf16 weights, b*_ref : f32 biases.
    Optional pool_ref (part, M): AdaptiveAvgPool2d((part, 1)) fused for layer4.
    """
    if pooled:
        pool_ref, o_ref = rest
    else:
        (o_ref,) = rest

    x = x_ref[0]                         # (Me, cin) bf16, Me = M + 2*(W+1)
    mk = mk_ref[0]                       # (M, 9)    f32
    m = mk.shape[0]

    # conv1 (1x1) + bn1 + relu — computed ONCE over the row-extended input.
    a1 = jnp.dot(x, w1_ref[...],
                 preferred_element_type=jnp.float32) + b1_ref[...]
    t1e = jnp.maximum(a1, 0.0)           # (Me, planes) f32
    planes = t1e.shape[1]

    # conv2 (3x3, stride 1, pad 1): 9 static row-offset slices of t1e.
    acc2 = jnp.zeros((m, planes), jnp.float32)
    for t in range(9):
        di, dj = divmod(t, 3)
        off = (width + 1) + (di - 1) * width + (dj - 1)
        tap = t1e[off:off + m, :]
        if t != 4:                       # center tap never touches padding
            tap = tap * mk[:, t:t + 1]
        acc2 = acc2 + jnp.dot(tap.astype(jnp.bfloat16), w2_ref[t],
                              preferred_element_type=jnp.float32)
    t2 = jnp.maximum(acc2 + b2_ref[...], 0.0).astype(jnp.bfloat16)

    # conv3 (1x1) + bn3
    t3 = jnp.dot(t2, w3_ref[...],
                 preferred_element_type=jnp.float32) + b3_ref[...]

    # downsample 1x1 (+bn), stride 1 -> plain matmul on the un-extended rows.
    xc = x[width + 1:width + 1 + m, :]
    idn = jnp.dot(xc, wd_ref[...],
                  preferred_element_type=jnp.float32) + bd_ref[...]

    y = jnp.maximum(t3 + idn, 0.0)       # residual add + relu, f32

    if pooled:                           # fused AdaptiveAvgPool2d((part, 1))
        y = jnp.dot(pool_ref[...], y, preferred_element_type=jnp.float32)
    o_ref[0] = y.astype(o_ref.dtype)


def _bottleneck_s2_kernel(px_ref, mk_ref, w1_ref, b1_ref, w2_ref, b2_ref,
                          w3_ref, b3_ref, wd_ref, bd_ref, o_ref, *,
                          taps, cin):
    """Strided ResNet bottleneck for one batch element (tap-walk over im2col).

    px_ref : (1, M, taps*cin) bf16 - 3x3 patches of the *block input* at the
             output positions (stride already applied by the wrapper im2col).
    mk_ref : (1, M, taps) f32 - validity mask of each tap (zero-padding).
    """
    px = px_ref[0]                       # (M, taps*cin) bf16
    mk = mk_ref[0]                       # (M, taps)     f32
    w1 = w1_ref[...]
    b1 = b1_ref[...]
    m = px.shape[0]
    planes = w1.shape[1]

    # conv2 (3x3) accumulator; conv1 (1x1)+bn+relu is recomputed per tap so
    # its output never round-trips through HBM (fused im2col).
    acc2 = jnp.zeros((m, planes), jnp.float32)
    for t in range(taps):
        xt = px[:, t * cin:(t + 1) * cin]
        a1 = jnp.dot(xt, w1, preferred_element_type=jnp.float32) + b1
        t1 = jnp.maximum(a1, 0.0) * mk[:, t:t + 1]
        acc2 = acc2 + jnp.dot(t1.astype(jnp.bfloat16), w2_ref[t],
                              preferred_element_type=jnp.float32)
    t2 = jnp.maximum(acc2 + b2_ref[...], 0.0).astype(jnp.bfloat16)

    # conv3 (1x1) + bn3
    t3 = jnp.dot(t2, w3_ref[...],
                 preferred_element_type=jnp.float32) + b3_ref[...]

    # downsample 1x1 (+bn); stride handled by taking the patch center tap.
    ctr = taps // 2
    xc = px[:, ctr * cin:(ctr + 1) * cin]
    idn = jnp.dot(xc, wd_ref[...],
                  preferred_element_type=jnp.float32) + bd_ref[...]

    o_ref[0] = jnp.maximum(t3 + idn, 0.0).astype(o_ref.dtype)


def _maxpool_kernel(x_ref, o_ref, *, ho, wo, c):
    """3x3 / stride-2 / pad-1 max pool; input is parity-deinterleaved NHWC."""
    xb = x_ref[0].astype(jnp.float32)    # (ho+1, wo+1, 4*c)
    acc = None
    for i in range(3):
        for j in range(3):
            p = (i % 2) * 2 + (j % 2)
            v = xb[i // 2:i // 2 + ho, j // 2:j // 2 + wo, p * c:(p + 1) * c]
            acc = v if acc is None else jnp.maximum(acc, v)
    o_ref[0] = acc.astype(o_ref.dtype)


# --------------------------- wrappers ----------------------------------------


def _pad_rows(x, mult):
    pad = (-x.shape[0]) % mult
    if pad:
        x = jnp.pad(x, ((0, pad), (0, 0)))
    return x


def im2col(x, kh, kw, stride, pad):
    """x: (B,H,W,C) -> patches (B, Ho, Wo, kh*kw*C), taps ordered (kh, kw, C)."""
    B, H, W, C = x.shape
    xpad = jnp.pad(x, ((0, 0), (pad, pad), (pad, pad), (0, 0)))
    Ho = (H + 2 * pad - kh) // stride + 1
    Wo = (W + 2 * pad - kw) // stride + 1
    cols = []
    for i in range(kh):
        for j in range(kw):
            cols.append(xpad[:, i:i + stride * Ho:stride,
                             j:j + stride * Wo:stride, :])
    return jnp.concatenate(cols, axis=-1), Ho, Wo


def stem_conv(x, w, b):
    """7x7 / stride-2 / pad-3 conv + folded BN + relu.  x: (B,H,W,3) bf16."""
    B, _H, _W, C = x.shape
    patches, Ho, Wo = im2col(x, 7, 7, 2, 3)
    K = 7 * 7 * C
    N = w.shape[1]
    pm = _pad_rows(patches.reshape(B * Ho * Wo, K), TM_STEM)
    Mp = pm.shape[0]
    out = pl.pallas_call(
        _matmul_bias_relu_kernel,
        out_shape=jax.ShapeDtypeStruct((Mp, N), jnp.bfloat16),
        grid=(Mp // TM_STEM,),
        in_specs=[pl.BlockSpec((TM_STEM, K), lambda i: (i, 0)),
                  pl.BlockSpec((K, N), lambda i: (0, 0)),
                  pl.BlockSpec((1, N), lambda i: (0, 0))],
        out_specs=pl.BlockSpec((TM_STEM, N), lambda i: (i, 0)),
        compiler_params=pltpu.CompilerParams(
            dimension_semantics=("parallel",)),
    )(pm, w, b)
    return out[:B * Ho * Wo].reshape(B, Ho, Wo, N)


def maxpool_3x3_s2(x):
    """nn.MaxPool2d(3, stride=2, padding=1) on NHWC with even H, W."""
    B, H, W, C = x.shape
    assert H % 2 == 0 and W % 2 == 0
    Ho, Wo = H // 2, W // 2
    xp = jnp.pad(x, ((0, 0), (1, 1), (1, 1), (0, 0)),
                 constant_values=-jnp.inf)
    # parity deinterleave: d[b, a, c, (2r+s)*C + ch] = xp[b, 2a+r, 2c+s, ch]
    d = xp.reshape(B, Ho + 1, 2, Wo + 1, 2, C)
    d = jnp.transpose(d, (0, 1, 3, 2, 4, 5)).reshape(B, Ho + 1, Wo + 1, 4 * C)
    return pl.pallas_call(
        functools.partial(_maxpool_kernel, ho=Ho, wo=Wo, c=C),
        out_shape=jax.ShapeDtypeStruct((B, Ho, Wo, C), x.dtype),
        grid=(B,),
        in_specs=[pl.BlockSpec((1, Ho + 1, Wo + 1, 4 * C),
                               lambda b: (b, 0, 0, 0))],
        out_specs=pl.BlockSpec((1, Ho, Wo, C), lambda b: (b, 0, 0, 0)),
        compiler_params=pltpu.CompilerParams(
            dimension_semantics=("parallel",)),
    )(d)


def _bottleneck_stride1(x, p, pool_part):
    """Stride-1 bottleneck (+ optional fused adaptive avg-pool), raw-x path."""
    B, H, W, cin = x.shape
    planes = p["w1"].shape[1]
    cout = p["w3"].shape[1]
    M = H * W
    Me = M + 2 * (W + 1)
    # Row-extended flattened input: extension rows only ever feed masked taps.
    x_ext = jnp.pad(x.reshape(B, M, cin), ((0, 0), (W + 1, W + 1), (0, 0)))
    mask, _, _ = im2col(jnp.ones((1, H, W, 1), jnp.float32), 3, 3, 1, 1)
    mask = mask.reshape(1, M, 9)                       # batch-independent

    args = [x_ext, mask, p["w1"], p["b1"], p["w2"], p["b2"],
            p["w3"], p["b3"], p["wd"], p["bd"]]
    in_specs = [
        pl.BlockSpec((1, Me, cin), lambda b: (b, 0, 0)),
        pl.BlockSpec((1, M, 9), lambda b: (0, 0, 0)),
        pl.BlockSpec((cin, planes), lambda b: (0, 0)),
        pl.BlockSpec((1, planes), lambda b: (0, 0)),
        pl.BlockSpec((9, planes, planes), lambda b: (0, 0, 0)),
        pl.BlockSpec((1, planes), lambda b: (0, 0)),
        pl.BlockSpec((planes, cout), lambda b: (0, 0)),
        pl.BlockSpec((1, cout), lambda b: (0, 0)),
        pl.BlockSpec((cin, cout), lambda b: (0, 0)),
        pl.BlockSpec((1, cout), lambda b: (0, 0)),
    ]
    if pool_part is not None:
        assert H % pool_part == 0, "H must be divisible by part"
        bin_rows = (H // pool_part) * W
        pool = jnp.repeat(jnp.eye(pool_part, dtype=jnp.float32),
                          bin_rows, axis=1) / float(bin_rows)   # (part, M)
        args.append(pool)
        in_specs.append(pl.BlockSpec((pool_part, M), lambda b: (0, 0)))
        out_rows, out_dtype = pool_part, jnp.float32
    else:
        out_rows, out_dtype = M, jnp.bfloat16

    out = pl.pallas_call(
        functools.partial(_bottleneck_s1_kernel, width=W,
                          pooled=pool_part is not None),
        out_shape=jax.ShapeDtypeStruct((B, out_rows, cout), out_dtype),
        grid=(B,),
        in_specs=in_specs,
        out_specs=pl.BlockSpec((1, out_rows, cout), lambda b: (b, 0, 0)),
        compiler_params=pltpu.CompilerParams(
            dimension_semantics=("parallel",)),
    )(*args)

    if pool_part is not None:
        return out                                     # (B, part, cout) f32
    return out.reshape(B, H, W, cout)                  # bf16 NHWC


def _bottleneck_strided(x, p, stride):
    """Strided bottleneck: wrapper im2col + in-kernel tap-walk (proven path)."""
    B, H, W, cin = x.shape
    planes = p["w1"].shape[1]
    cout = p["w3"].shape[1]
    taps = 9
    patches, Ho, Wo = im2col(x, 3, 3, stride, 1)       # (B, Ho, Wo, 9*cin) bf16
    M = Ho * Wo
    px = patches.reshape(B, M, taps * cin)
    mask, _, _ = im2col(jnp.ones((1, H, W, 1), jnp.float32), 3, 3, stride, 1)
    mask = mask.reshape(1, M, taps)                    # batch-independent

    out = pl.pallas_call(
        functools.partial(_bottleneck_s2_kernel, taps=taps, cin=cin),
        out_shape=jax.ShapeDtypeStruct((B, M, cout), jnp.bfloat16),
        grid=(B,),
        in_specs=[
            pl.BlockSpec((1, M, taps * cin), lambda b: (b, 0, 0)),
            pl.BlockSpec((1, M, taps), lambda b: (0, 0, 0)),
            pl.BlockSpec((cin, planes), lambda b: (0, 0)),
            pl.BlockSpec((1, planes), lambda b: (0, 0)),
            pl.BlockSpec((taps, planes, planes), lambda b: (0, 0, 0)),
            pl.BlockSpec((1, planes), lambda b: (0, 0)),
            pl.BlockSpec((planes, cout), lambda b: (0, 0)),
            pl.BlockSpec((1, cout), lambda b: (0, 0)),
            pl.BlockSpec((cin, cout), lambda b: (0, 0)),
            pl.BlockSpec((1, cout), lambda b: (0, 0)),
        ],
        out_specs=pl.BlockSpec((1, M, cout), lambda b: (b, 0, 0)),
        compiler_params=pltpu.CompilerParams(
            dimension_semantics=("parallel",)),
    )(px, mask, p["w1"], p["b1"], p["w2"], p["b2"],
      p["w3"], p["b3"], p["wd"], p["bd"])
    return out.reshape(B, Ho, Wo, cout)                # bf16 NHWC


def fused_bottleneck(x, p, stride, pool_part=None):
    """One ResNet bottleneck (+ optional fused adaptive avg-pool) per call."""
    if stride == 1:
        return _bottleneck_stride1(x, p, pool_part)
    assert pool_part is None
    return _bottleneck_strided(x, p, stride)


# --------------------------- parameters --------------------------------------


def _conv_w(key, kh, kw, cin, cout):
    fan_in = kh * kw * cin
    return (jax.random.normal(key, (kh, kw, cin, cout), jnp.float32)
            * (2.0 / fan_in) ** 0.5)


def _bn_fold(key, c, eps=1e-5):
    k1, k2, k3, k4 = jax.random.split(key, 4)
    gamma = 1.0 + 0.1 * jax.random.normal(k1, (c,), jnp.float32)
    beta = 0.1 * jax.random.normal(k2, (c,), jnp.float32)
    mean = 0.1 * jax.random.normal(k3, (c,), jnp.float32)
    var = jnp.abs(1.0 + 0.1 * jax.random.normal(k4, (c,), jnp.float32))
    scale = gamma / jnp.sqrt(var + eps)
    bias = beta - mean * scale
    return scale, bias


def init_params(key):
    keys = iter(jax.random.split(key, 64))
    w = _conv_w(next(keys), 7, 7, 3, 16)
    s, b = _bn_fold(next(keys), 16)
    params = {
        "conv1_w": (w * s).reshape(7 * 7 * 3, 16).astype(jnp.bfloat16),
        "conv1_b": b.reshape(1, 16),
    }
    layers = []
    for (cin, planes, cout, _stride) in STAGES:
        p = {}
        w1 = _conv_w(next(keys), 1, 1, cin, planes)
        s1, b1 = _bn_fold(next(keys), planes)
        p["w1"] = (w1.reshape(cin, planes) * s1).astype(jnp.bfloat16)
        p["b1"] = b1.reshape(1, planes)
        w2 = _conv_w(next(keys), 3, 3, planes, planes)
        s2, b2 = _bn_fold(next(keys), planes)
        p["w2"] = (w2 * s2).reshape(9, planes, planes).astype(jnp.bfloat16)
        p["b2"] = b2.reshape(1, planes)
        w3 = _conv_w(next(keys), 1, 1, planes, cout)
        s3, b3 = _bn_fold(next(keys), cout)
        p["w3"] = (w3.reshape(planes, cout) * s3).astype(jnp.bfloat16)
        p["b3"] = b3.reshape(1, cout)
        wd = _conv_w(next(keys), 1, 1, cin, cout)
        sd, bd = _bn_fold(next(keys), cout)
        p["wd"] = (wd.reshape(cin, cout) * sd).astype(jnp.bfloat16)
        p["bd"] = bd.reshape(1, cout)
        layers.append(p)
    params["layers"] = layers
    return params


# --------------------------- forward (PCB_test) -------------------------------


def pcb_test_forward(x_nchw, params):
    x = jnp.transpose(x_nchw, (0, 2, 3, 1)).astype(jnp.bfloat16)  # NCHW->NHWC
    x = stem_conv(x, params["conv1_w"], params["conv1_b"])        # conv1/bn/relu
    x = maxpool_3x3_s2(x)                                         # maxpool
    last = len(STAGES) - 1
    for idx, (p, stage) in enumerate(zip(params["layers"], STAGES)):
        stride = stage[3]
        x = fused_bottleneck(x, p, stride,
                             pool_part=PART if idx == last else None)
    # x: (B, part, C) f32 ; reference returns x.view(B, C, part)
    return jnp.transpose(x, (0, 2, 1))


if __name__ == "__main__":
    key = jax.random.PRNGKey(0)
    kp, kx = jax.random.split(key)
    params = init_params(kp)
    # small NCHW input; spatial chosen so the final feature-map height is
    # divisible by 6 (96 -> 48 -> 24 -> 24 -> 12 -> 6 -> 6).
    x = jax.random.normal(kx, (2, 3, 96, 32), jnp.float32)
    y = jax.jit(pcb_test_forward)(x, params)
    y = jax.block_until_ready(y)
    assert y.shape == (2, STAGES[-1][2], PART), y.shape
    assert bool(jnp.all(jnp.isfinite(y)))
    print("KERNEL_OK")
</pallas_src>

<mosaic_0001>
module attributes {stable_mosaic.version = 11 : i64} {
  func.func @_matmul_bias_relu_kernel(%arg0: i32, %arg1: memref<256x147xbf16, #tpu.memory_space<vmem>>, %arg2: memref<147x16xbf16, #tpu.memory_space<vmem>>, %arg3: memref<1x16xf32, #tpu.memory_space<vmem>>, %arg4: memref<256x16xbf16, #tpu.memory_space<vmem>>) attributes {dimension_semantics = [#tpu.dimension_semantics<parallel>], iteration_bounds = array<i64: 6>, scalar_prefetch = 0 : i64, scratch_operands = 0 : i64, tpu.core_type = #tpu.core_type<tc>, window_params = [{transform_indices = @transform_0, window_bounds = array<i64: 256, 147>}, {pipeline_mode = #tpu.pipeline_mode<synchronous>, transform_indices = @transform_1, window_bounds = array<i64: 147, 16>}, {pipeline_mode = #tpu.pipeline_mode<synchronous>, transform_indices = @transform_2, window_bounds = array<i64: 1, 16>}, {transform_indices = @transform_3, window_bounds = array<i64: 256, 16>}]} {
    %c0 = arith.constant 0 : index
    %c0_0 = arith.constant 0 : index
    %0 = vector.load %arg1[%c0, %c0_0] : memref<256x147xbf16, #tpu.memory_space<vmem>>, vector<256x147xbf16>
    %c0_1 = arith.constant 0 : index
    %c0_2 = arith.constant 0 : index
    %1 = vector.load %arg2[%c0_1, %c0_2] : memref<147x16xbf16, #tpu.memory_space<vmem>>, vector<147x16xbf16>
    %cst = arith.constant dense<0.000000e+00> : vector<256x16xf32>
    %2 = tpu.matmul %0, %1, %cst {dimension_numbers = #tpu.dot_dimension_numbers<[1], [0], [0], [1], [0, 0, 1, 1], [], []>} : vector<256x147xbf16>, vector<147x16xbf16>, vector<256x16xf32> -> vector<256x16xf32>
    %c0_3 = arith.constant 0 : index
    %c0_4 = arith.constant 0 : index
    %3 = vector.load %arg3[%c0_3, %c0_4] : memref<1x16xf32, #tpu.memory_space<vmem>>, vector<1x16xf32>
    %4 = vector.broadcast %3 : vector<1x16xf32> to vector<256x16xf32>
    %5 = arith.addf %2, %4 : vector<256x16xf32>
    %cst_5 = arith.constant 0.000000e+00 : f32
    %6 = vector.broadcast %cst_5 : f32 to vector<256x16xf32>
    %7 = arith.maximumf %5, %6 : vector<256x16xf32>
    %8 = arith.truncf %7 : vector<256x16xf32> to vector<256x16xbf16>
    %c0_6 = arith.constant 0 : index
    %c0_7 = arith.constant 0 : index
    %9 = vector.load %arg4[%c0_6, %c0_7] : memref<256x16xbf16, #tpu.memory_space<vmem>>, vector<256x16xbf16>
    tpu.vector_store %arg4[%c0_6, %c0_7], %8 {strides = array<i32>} : memref<256x16xbf16, #tpu.memory_space<vmem>>, vector<256x16xbf16>,
    return
  }
  func.func @transform_0(%arg0: i32) -> (i32, i32) {
    %c0_i32 = arith.constant 0 : i32
    %c0_i32_0 = arith.constant 0 : i32
    return %arg0, %c0_i32 : i32, i32
  }
  func.func @transform_1(%arg0: i32) -> (i32, i32) {
    %c0_i32 = arith.constant 0 : i32
    %c0_i32_0 = arith.constant 0 : i32
    %c0_i32_1 = arith.constant 0 : i32
    return %c0_i32, %c0_i32_0 : i32, i32
  }
  func.func @transform_2(%arg0: i32) -> (i32, i32) {
    %c0_i32 = arith.constant 0 : i32
    %c0_i32_0 = arith.constant 0 : i32
    %c0_i32_1 = arith.constant 0 : i32
    return %c0_i32, %c0_i32_0 : i32, i32
  }
  func.func @transform_3(%arg0: i32) -> (i32, i32) {
    %c0_i32 = arith.constant 0 : i32
    %c0_i32_0 = arith.constant 0 : i32
    return %arg0, %c0_i32 : i32, i32
  }
}

module attributes {stable_mosaic.version = 11 : i64} {
  func.func @_maxpool_kernel(%arg0: i32, %arg1: memref<1x25x9x64xbf16, #tpu.memory_space<vmem>>, %arg2: memref<1x24x8x16xbf16, #tpu.memory_space<vmem>>) attributes {dimension_semantics = [#tpu.dimension_semantics<parallel>], iteration_bounds = array<i64: 2>, scalar_prefetch = 0 : i64, scratch_operands = 0 : i64, tpu.core_type = #tpu.core_type<tc>, window_params = [{transform_indices = @transform_0, window_bounds = array<i64: 1, 25, 9, 64>}, {transform_indices = @transform_1, window_bounds = array<i64: 1, 24, 8, 16>}]} {
    %c0 = arith.constant 0 : index
    %c0_0 = arith.constant 0 : index
    %c0_1 = arith.constant 0 : index
    %c0_2 = arith.constant 0 : index
    %0 = vector.load %arg1[%c0, %c0_0, %c0_1, %c0_2] : memref<1x25x9x64xbf16, #tpu.memory_space<vmem>>, vector<1x25x9x64xbf16>
    %1 = vector.shape_cast %0 : vector<1x25x9x64xbf16> to vector<25x9x64xbf16>
    %2 = arith.extf %1 : vector<25x9x64xbf16> to vector<25x9x64xf32>
    %3 = vector.extract_strided_slice %2 {offsets = [0, 0, 0], sizes = [24, 8, 16], strides = [1, 1, 1]} : vector<25x9x64xf32> to vector<24x8x16xf32>
    %4 = vector.extract_strided_slice %2 {offsets = [0, 0, 16], sizes = [24, 8, 16], strides = [1, 1, 1]} : vector<25x9x64xf32> to vector<24x8x16xf32>
    %5 = arith.maximumf %3, %4 : vector<24x8x16xf32>
    %6 = vector.extract_strided_slice %2 {offsets = [0, 1, 0], sizes = [24, 8, 16], strides = [1, 1, 1]} : vector<25x9x64xf32> to vector<24x8x16xf32>
    %7 = arith.maximumf %5, %6 : vector<24x8x16xf32>
    %8 = vector.extract_strided_slice %2 {offsets = [0, 0, 32], sizes = [24, 8, 16], strides = [1, 1, 1]} : vector<25x9x64xf32> to vector<24x8x16xf32>
    %9 = arith.maximumf %7, %8 : vector<24x8x16xf32>
    %10 = vector.extract_strided_slice %2 {offsets = [0, 0, 48], sizes = [24, 8, 16], strides = [1, 1, 1]} : vector<25x9x64xf32> to vector<24x8x16xf32>
    %11 = arith.maximumf %9, %10 : vector<24x8x16xf32>
    %12 = vector.extract_strided_slice %2 {offsets = [0, 1, 32], sizes = [24, 8, 16], strides = [1, 1, 1]} : vector<25x9x64xf32> to vector<24x8x16xf32>
    %13 = arith.maximumf %11, %12 : vector<24x8x16xf32>
    %14 = vector.extract_strided_slice %2 {offsets = [1, 0, 0], sizes = [24, 8, 16], strides = [1, 1, 1]} : vector<25x9x64xf32> to vector<24x8x16xf32>
    %15 = arith.maximumf %13, %14 : vector<24x8x16xf32>
    %16 = vector.extract_strided_slice %2 {offsets = [1, 0, 16], sizes = [24, 8, 16], strides = [1, 1, 1]} : vector<25x9x64xf32> to vector<24x8x16xf32>
    %17 = arith.maximumf %15, %16 : vector<24x8x16xf32>
    %18 = vector.extract_strided_slice %2 {offsets = [1, 1, 0], sizes = [24, 8, 16], strides = [1, 1, 1]} : vector<25x9x64xf32> to vector<24x8x16xf32>
    %19 = arith.maximumf %17, %18 : vector<24x8x16xf32>
    %20 = arith.truncf %19 : vector<24x8x16xf32> to vector<24x8x16xbf16>
    %c0_3 = arith.constant 0 : index
    %c0_4 = arith.constant 0 : index
    %c0_5 = arith.constant 0 : index
    %c0_6 = arith.constant 0 : index
    %21 = vector.load %arg2[%c0_3, %c0_4, %c0_5, %c0_6] : memref<1x24x8x16xbf16, #tpu.memory_space<vmem>>, vector<1x24x8x16xbf16>
    %22 = vector.shape_cast %21 : vector<1x24x8x16xbf16> to vector<24x8x16xbf16>
    %23 = vector.shape_cast %20 : vector<24x8x16xbf16> to vector<1x24x8x16xbf16>
    tpu.vector_store %arg2[%c0_3, %c0_4, %c0_5, %c0_6], %23 {strides = array<i32>} : memref<1x24x8x16xbf16, #tpu.memory_space<vmem>>, vector<1x24x8x16xbf16>,
    return
  }
  func.func @transform_0(%arg0: i32) -> (i32, i32, i32, i32) {
    %c0_i32 = arith.constant 0 : i32
    %c0_i32_0 = arith.constant 0 : i32
    %c0_i32_1 = arith.constant 0 : i32
    %c0_i32_2 = arith.constant 0 : i32
    return %arg0, %c0_i32, %c0_i32_0, %c0_i32_1 : i32, i32, i32, i32
  }
  func.func @transform_1(%arg0: i32) -> (i32, i32, i32, i32) {
    %c0_i32 = arith.constant 0 : i32
    %c0_i32_0 = arith.constant 0 : i32
    %c0_i32_1 = arith.constant 0 : i32
    %c0_i32_2 = arith.constant 0 : i32
    return %arg0, %c0_i32, %c0_i32_0, %c0_i32_1 : i32, i32, i32, i32
  }
}

module attributes {stable_mosaic.version = 11 : i64} {
  func.func @_bottleneck_s1_kernel(%arg0: i32, %arg1: memref<1x210x16xbf16, #tpu.memory_space<vmem>>, %arg2: memref<1x192x9xf32, #tpu.memory_space<vmem>>, %arg3: memref<16x8xbf16, #tpu.memory_space<vmem>>, %arg4: memref<1x8xf32, #tpu.memory_space<vmem>>, %arg5: memref<9x8x8xbf16, #tpu.memory_space<vmem>>, %arg6: memref<1x8xf32, #tpu.memory_space<vmem>>, %arg7: memref<8x32xbf16, #tpu.memory_space<vmem>>, %arg8: memref<1x32xf32, #tpu.memory_space<vmem>>, %arg9: memref<16x32xbf16, #tpu.memory_space<vmem>>, %arg10: memref<1x32xf32, #tpu.memory_space<vmem>>, %arg11: memref<1x192x32xbf16, #tpu.memory_space<vmem>>) attributes {dimension_semantics = [#tpu.dimension_semantics<parallel>], iteration_bounds = array<i64: 2>, scalar_prefetch = 0 : i64, scratch_operands = 0 : i64, tpu.core_type = #tpu.core_type<tc>, window_params = [{transform_indices = @transform_0, window_bounds = array<i64: 1, 210, 16>}, {pipeline_mode = #tpu.pipeline_mode<synchronous>, transform_indices = @transform_1, window_bounds = array<i64: 1, 192, 9>}, {pipeline_mode = #tpu.pipeline_mode<synchronous>, transform_indices = @transform_2, window_bounds = array<i64: 16, 8>}, {pipeline_mode = #tpu.pipeline_mode<synchronous>, transform_indices = @transform_3, window_bounds = array<i64: 1, 8>}, {pipeline_mode = #tpu.pipeline_mode<synchronous>, transform_indices = @transform_4, window_bounds = array<i64: 9, 8, 8>}, {pipeline_mode = #tpu.pipeline_mode<synchronous>, transform_indices = @transform_5, window_bounds = array<i64: 1, 8>}, {pipeline_mode = #tpu.pipeline_mode<synchronous>, transform_indices = @transform_6, window_bounds = array<i64: 8, 32>}, {pipeline_mode = #tpu.pipeline_mode<synchronous>, transform_indices = @transform_7, window_bounds = array<i64: 1, 32>}, {pipeline_mode = #tpu.pipeline_mode<synchronous>, transform_indices = @transform_8, window_bounds = array<i64: 16, 32>}, {pipeline_mode = #tpu.pipeline_mode<synchronous>, transform_indices = @transform_9, window_bounds = array<i64: 1, 32>}, {transform_indices = @transform_10, window_bounds = array<i64: 1, 192, 32>}]} {
    %c0 = arith.constant 0 : index
    %c0_0 = arith.constant 0 : index
    %c0_1 = arith.constant 0 : index
    %0 = vector.load %arg1[%c0, %c0_0, %c0_1] : memref<1x210x16xbf16, #tpu.memory_space<vmem>>, vector<1x210x16xbf16>
    %1 = vector.shape_cast %0 : vector<1x210x16xbf16> to vector<210x16xbf16>
    %c0_2 = arith.constant 0 : index
    %c0_3 = arith.constant 0 : index
    %c0_4 = arith.constant 0 : index
    %2 = vector.load %arg2[%c0_2, %c0_3, %c0_4] : memref<1x192x9xf32, #tpu.memory_space<vmem>>, vector<1x192x9xf32>
    %3 = vector.shape_cast %2 : vector<1x192x9xf32> to vector<192x9xf32>
    %c0_5 = arith.constant 0 : index
    %c0_6 = arith.constant 0 : index
    %4 = vector.load %arg3[%c0_5, %c0_6] : memref<16x8xbf16, #tpu.memory_space<vmem>>, vector<16x8xbf16>
    %cst = arith.constant dense<0.000000e+00> : vector<210x8xf32>
    %5 = tpu.matmul %1, %4, %cst {dimension_numbers = #tpu.dot_dimension_numbers<[1], [0], [0], [1], [0, 0, 1, 1], [], []>} : vector<210x16xbf16>, vector<16x8xbf16>, vector<210x8xf32> -> vector<210x8xf32>
    %c0_7 = arith.constant 0 : index
    %c0_8 = arith.constant 0 : index
    %6 = vector.load %arg4[%c0_7, %c0_8] : memref<1x8xf32, #tpu.memory_space<vmem>>, vector<1x8xf32>
    %7 = vector.broadcast %6 : vector<1x8xf32> to vector<210x8xf32>
    %8 = arith.addf %5, %7 : vector<210x8xf32>
    %cst_9 = arith.constant 0.000000e+00 : f32
    %9 = vector.broadcast %cst_9 : f32 to vector<210x8xf32>
    %10 = arith.maximumf %8, %9 : vector<210x8xf32>
    %cst_10 = arith.constant 0.000000e+00 : f32
    %11 = vector.broadcast %cst_10 : f32 to vector<192x8xf32>
    %12 = vector.extract_strided_slice %10 {offsets = [0, 0], sizes = [192, 8], strides = [1, 1]} : vector<210x8xf32> to vector<192x8xf32>
    %13 = vector.extract_strided_slice %3 {offsets = [0, 0], sizes = [192, 1], strides = [1, 1]} : vector<192x9xf32> to vector<192x1xf32>
    %14 = vector.broadcast %13 : vector<192x1xf32> to vector<192x8xf32>
    %15 = arith.mulf %12, %14 : vector<192x8xf32>
    %16 = arith.truncf %15 : vector<192x8xf32> to vector<192x8xbf16>
    %c0_11 = arith.constant 0 : index
    %c0_12 = arith.constant 0 : index
    %c0_13 = arith.constant 0 : index
    %17 = vector.load %arg5[%c0_11, %c0_12, %c0_13] : memref<9x8x8xbf16, #tpu.memory_space<vmem>>, vector<1x8x8xbf16>
    %18 = vector.shape_cast %17 : vector<1x8x8xbf16> to vector<8x8xbf16>
    %cst_14 = arith.constant dense<0.000000e+00> : vector<192x8xf32>
    %19 = tpu.matmul %16, %18, %cst_14 {dimension_numbers = #tpu.dot_dimension_numbers<[1], [0], [0], [1], [0, 0, 1, 1], [], []>} : vector<192x8xbf16>, vector<8x8xbf16>, vector<192x8xf32> -> vector<192x8xf32>
    %20 = arith.addf %11, %19 : vector<192x8xf32>
    %21 = vector.extract_strided_slice %10 {offsets = [1, 0], sizes = [192, 8], strides = [1, 1]} : vector<210x8xf32> to vector<192x8xf32>
    %22 = vector.extract_strided_slice %3 {offsets = [0, 1], sizes = [192, 1], strides = [1, 1]} : vector<192x9xf32> to vector<192x1xf32>
    %23 = vector.broadcast %22 : vector<192x1xf32> to vector<192x8xf32>
    %24 = arith.mulf %21, %23 : vector<192x8xf32>
    %25 = arith.truncf %24 : vector<192x8xf32> to vector<192x8xbf16>
    %c1 = arith.constant 1 : index
    %c0_15 = arith.constant 0 : index
    %c0_16 = arith.constant 0 : index
    %26 = vector.load %arg5[%c1, %c0_15, %c0_16] : memref<9x8x8xbf16, #tpu.memory_space<vmem>>, vector<1x8x8xbf16>
    %27 = vector.shape_cast %26 : vector<1x8x8xbf16> to vector<8x8xbf16>
    %cst_17 = arith.constant dense<0.000000e+00> : vector<192x8xf32>
    %28 = tpu.matmul %25, %27, %cst_17 {dimension_numbers = #tpu.dot_dimension_numbers<[1], [0], [0], [1], [0, 0, 1, 1], [], []>} : vector<192x8xbf16>, vector<8x8xbf16>, vector<192x8xf32> -> vector<192x8xf32>
    %29 = arith.addf %20, %28 : vector<192x8xf32>
    %30 = vector.extract_strided_slice %10 {offsets = [2, 0], sizes = [192, 8], strides = [1, 1]} : vector<210x8xf32> to vector<192x8xf32>
    %31 = vector.extract_strided_slice %3 {offsets = [0, 2], sizes = [192, 1], strides = [1, 1]} : vector<192x9xf32> to vector<192x1xf32>
    %32 = vector.broadcast %31 : vector<192x1xf32> to vector<192x8xf32>
    %33 = arith.mulf %30, %32 : vector<192x8xf32>
    %34 = arith.truncf %33 : vector<192x8xf32> to vector<192x8xbf16>
    %c2 = arith.constant 2 : index
    %c0_18 = arith.constant 0 : index
    %c0_19 = arith.constant 0 : index
    %35 = vector.load %arg5[%c2, %c0_18, %c0_19] : memref<9x8x8xbf16, #tpu.memory_space<vmem>>, vector<1x8x8xbf16>
    %36 = vector.shape_cast %35 : vector<1x8x8xbf16> to vector<8x8xbf16>
    %cst_20 = arith.constant dense<0.000000e+00> : vector<192x8xf32>
    %37 = tpu.matmul %34, %36, %cst_20 {dimension_numbers = #tpu.dot_dimension_numbers<[1], [0], [0], [1], [0, 0, 1, 1], [], []>} : vector<192x8xbf16>, vector<8x8xbf16>, vector<192x8xf32> -> vector<192x8xf32>
    %38 = arith.addf %29, %37 : vector<192x8xf32>
    %39 = vector.extract_strided_slice %10 {offsets = [8, 0], sizes = [192, 8], strides = [1, 1]} : vector<210x8xf32> to vector<192x8xf32>
    %40 = vector.extract_strided_slice %3 {offsets = [0, 3], sizes = [192, 1], strides = [1, 1]} : vector<192x9xf32> to vector<192x1xf32>
    %41 = vector.broadcast %40 : vector<192x1xf32> to vector<192x8xf32>
    %42 = arith.mulf %39, %41 : vector<192x8xf32>
    %43 = arith.truncf %42 : vector<192x8xf32> to vector<192x8xbf16>
    %c3 = arith.constant 3 : index
    %c0_21 = arith.constant 0 : index
    %c0_22 = arith.constant 0 : index
    %44 = vector.load %arg5[%c3, %c0_21, %c0_22] : memref<9x8x8xbf16, #tpu.memory_space<vmem>>, vector<1x8x8xbf16>
    %45 = vector.shape_cast %44 : vector<1x8x8xbf16> to vector<8x8xbf16>
    %cst_23 = arith.constant dense<0.000000e+00> : vector<192x8xf32>
    %46 = tpu.matmul %43, %45, %cst_23 {dimension_numbers = #tpu.dot_dimension_numbers<[1], [0], [0], [1], [0, 0, 1, 1], [], []>} : vector<192x8xbf16>, vector<8x8xbf16>, vector<192x8xf32> -> vector<192x8xf32>
    %47 = arith.addf %38, %46 : vector<192x8xf32>
    %48 = vector.extract_strided_slice %10 {offsets = [9, 0], sizes = [192, 8], strides = [1, 1]} : vector<210x8xf32> to vector<192x8xf32>
    %49 = arith.truncf %48 : vector<192x8xf32> to vector<192x8xbf16>
    %c4 = arith.constant 4 : index
    %c0_24 = arith.constant 0 : index
    %c0_25 = arith.constant 0 : index
    %50 = vector.load %arg5[%c4, %c0_24, %c0_25] : memref<9x8x8xbf16, #tpu.memory_space<vmem>>, vector<1x8x8xbf16>
    %51 = vector.shape_cast %50 : vector<1x8x8xbf16> to vector<8x8xbf16>
    %cst_26 = arith.constant dense<0.000000e+00> : vector<192x8xf32>
    %52 = tpu.matmul %49, %51, %cst_26 {dimension_numbers = #tpu.dot_dimension_numbers<[1], [0], [0], [1], [0, 0, 1, 1], [], []>} : vector<192x8xbf16>, vector<8x8xbf16>, vector<192x8xf32> -> vector<192x8xf32>
    %53 = arith.addf %47, %52 : vector<192x8xf32>
    %54 = vector.extract_strided_slice %10 {offsets = [10, 0], sizes = [192, 8], strides = [1, 1]} : vector<210x8xf32> to vector<192x8xf32>
    %55 = vector.extract_strided_slice %3 {offsets = [0, 5], sizes = [192, 1], strides = [1, 1]} : vector<192x9xf32> to vector<192x1xf32>
    %56 = vector.broadcast %55 : vector<192x1xf32> to vector<192x8xf32>
    %57 = arith.mulf %54, %56 : vector<192x8xf32>
    %58 = arith.truncf %57 : vector<192x8xf32> to vector<192x8xbf16>
    %c5 = arith.constant 5 : index
    %c0_27 = arith.constant 0 : index
    %c0_28 = arith.constant 0 : index
    %59 = vector.load %arg5[%c5, %c0_27, %c0_28] : memref<9x8x8xbf16, #tpu.memory_space<vmem>>, vector<1x8x8xbf16>
    %60 = vector.shape_cast %59 : vector<1x8x8xbf16> to vector<8x8xbf16>
    %cst_29 = arith.constant dense<0.000000e+00> : vector<192x8xf32>
    %61 = tpu.matmul %58, %60, %cst_29 {dimension_numbers = #tpu.dot_dimension_numbers<[1], [0], [0], [1], [0, 0, 1, 1], [], []>} : vector<192x8xbf16>, vector<8x8xbf16>, vector<192x8xf32> -> vector<192x8xf32>
    %62 = arith.addf %53, %61 : vector<192x8xf32>
    %63 = vector.extract_strided_slice %10 {offsets = [16, 0], sizes = [192, 8], strides = [1, 1]} : vector<210x8xf32> to vector<192x8xf32>
    %64 = vector.extract_strided_slice %3 {offsets = [0, 6], sizes = [192, 1], strides = [1, 1]} : vector<192x9xf32> to vector<192x1xf32>
    %65 = vector.broadcast %64 : vector<192x1xf32> to vector<192x8xf32>
    %66 = arith.mulf %63, %65 : vector<192x8xf32>
    %67 = arith.truncf %66 : vector<192x8xf32> to vector<192x8xbf16>
    %c6 = arith.constant 6 : index
    %c0_30 = arith.constant 0 : index
    %c0_31 = arith.constant 0 : index
    %68 = vector.load %arg5[%c6, %c0_30, %c0_31] : memref<9x8x8xbf16, #tpu.memory_space<vmem>>, vector<1x8x8xbf16>
    %69 = vector.shape_cast %68 : vector<1x8x8xbf16> to vector<8x8xbf16>
    %cst_32 = arith.constant dense<0.000000e+00> : vector<192x8xf32>
    %70 = tpu.matmul %67, %69, %cst_32 {dimension_numbers = #tpu.dot_dimension_numbers<[1], [0], [0], [1], [0, 0, 1, 1], [], []>} : vector<192x8xbf16>, vector<8x8xbf16>, vector<192x8xf32> -> vector<192x8xf32>
    %71 = arith.addf %62, %70 : vector<192x8xf32>
    %72 = vector.extract_strided_slice %10 {offsets = [17, 0], sizes = [192, 8], strides = [1, 1]} : vector<210x8xf32> to vector<192x8xf32>
    %73 = vector.extract_strided_slice %3 {offsets = [0, 7], sizes = [192, 1], strides = [1, 1]} : vector<192x9xf32> to vector<192x1xf32>
    %74 = vector.broadcast %73 : vector<192x1xf32> to vector<192x8xf32>
    %75 = arith.mulf %72, %74 : vector<192x8xf32>
    %76 = arith.truncf %75 : vector<192x8xf32> to vector<192x8xbf16>
    %c7 = arith.constant 7 : index
    %c0_33 = arith.constant 0 : index
    %c0_34 = arith.constant 0 : index
    %77 = vector.load %arg5[%c7, %c0_33, %c0_34] : memref<9x8x8xbf16, #tpu.memory_space<vmem>>, vector<1x8x8xbf16>
    %78 = vector.shape_cast %77 : vector<1x8x8xbf16> to vector<8x8xbf16>
    %cst_35 = arith.constant dense<0.000000e+00> : vector<192x8xf32>
    %79 = tpu.matmul %76, %78, %cst_35 {dimension_numbers = #tpu.dot_dimension_numbers<[1], [0], [0], [1], [0, 0, 1, 1], [], []>} : vector<192x8xbf16>, vector<8x8xbf16>, vector<192x8xf32> -> vector<192x8xf32>
    %80 = arith.addf %71, %79 : vector<192x8xf32>
    %81 = vector.extract_strided_slice %10 {offsets = [18, 0], sizes = [192, 8], strides = [1, 1]} : vector<210x8xf32> to vector<192x8xf32>
    %82 = vector.extract_strided_slice %3 {offsets = [0, 8], sizes = [192, 1], strides = [1, 1]} : vector<192x9xf32> to vector<192x1xf32>
    %83 = vector.broadcast %82 : vector<192x1xf32> to vector<192x8xf32>
    %84 = arith.mulf %81, %83 : vector<192x8xf32>
    %85 = arith.truncf %84 : vector<192x8xf32> to vector<192x8xbf16>
    %c8 = arith.constant 8 : index
    %c0_36 = arith.constant 0 : index
    %c0_37 = arith.constant 0 : index
    %86 = vector.load %arg5[%c8, %c0_36, %c0_37] : memref<9x8x8xbf16, #tpu.memory_space<vmem>>, vector<1x8x8xbf16>
    %87 = vector.shape_cast %86 : vector<1x8x8xbf16> to vector<8x8xbf16>
    %cst_38 = arith.constant dense<0.000000e+00> : vector<192x8xf32>
    %88 = tpu.matmul %85, %87, %cst_38 {dimension_numbers = #tpu.dot_dimension_numbers<[1], [0], [0], [1], [0, 0, 1, 1], [], []>} : vector<192x8xbf16>, vector<8x8xbf16>, vector<192x8xf32> -> vector<192x8xf32>
    %89 = arith.addf %80, %88 : vector<192x8xf32>
    %c0_39 = arith.constant 0 : index
    %c0_40 = arith.constant 0 : index
    %90 = vector.load %arg6[%c0_39, %c0_40] : memref<1x8xf32, #tpu.memory_space<vmem>>, vector<1x8xf32>
    %91 = vector.broadcast %90 : vector<1x8xf32> to vector<192x8xf32>
    %92 = arith.addf %89, %91 : vector<192x8xf32>
    %cst_41 = arith.constant 0.000000e+00 : f32
    %93 = vector.broadcast %cst_41 : f32 to vector<192x8xf32>
    %94 = arith.maximumf %92, %93 : vector<192x8xf32>
    %95 = arith.truncf %94 : vector<192x8xf32> to vector<192x8xbf16>
    %c0_42 = arith.constant 0 : index
    %c0_43 = arith.constant 0 : index
    %96 = vector.load %arg7[%c0_42, %c0_43] : memref<8x32xbf16, #tpu.memory_space<vmem>>, vector<8x32xbf16>
    %cst_44 = arith.constant dense<0.000000e+00> : vector<192x32xf32>
    %97 = tpu.matmul %95, %96, %cst_44 {dimension_numbers = #tpu.dot_dimension_numbers<[1], [0], [0], [1], [0, 0, 1, 1], [], []>} : vector<192x8xbf16>, vector<8x32xbf16>, vector<192x32xf32> -> vector<192x32xf32>
    %c0_45 = arith.constant 0 : index
    %c0_46 = arith.constant 0 : index
    %98 = vector.load %arg8[%c0_45, %c0_46] : memref<1x32xf32, #tpu.memory_space<vmem>>, vector<1x32xf32>
    %99 = vector.broadcast %98 : vector<1x32xf32> to vector<192x32xf32>
    %100 = arith.addf %97, %99 : vector<192x32xf32>
    %101 = vector.extract_strided_slice %1 {offsets = [9, 0], sizes = [192, 16], strides = [1, 1]} : vector<210x16xbf16> to vector<192x16xbf16>
    %c0_47 = arith.constant 0 : index
    %c0_48 = arith.constant 0 : index
    %102 = vector.load %arg9[%c0_47, %c0_48] : memref<16x32xbf16, #tpu.memory_space<vmem>>, vector<16x32xbf16>
    %cst_49 = arith.constant dense<0.000000e+00> : vector<192x32xf32>
    %103 = tpu.matmul %101, %102, %cst_49 {dimension_numbers = #tpu.dot_dimension_numbers<[1], [0], [0], [1], [0, 0, 1, 1], [], []>} : vector<192x16xbf16>, vector<16x32xbf16>, vector<192x32xf32> -> vector<192x32xf32>
    %c0_50 = arith.constant 0 : index
    %c0_51 = arith.constant 0 : index
    %104 = vector.load %arg10[%c0_50, %c0_51] : memref<1x32xf32, #tpu.memory_space<vmem>>, vector<1x32xf32>
    %105 = vector.broadcast %104 : vector<1x32xf32> to vector<192x32xf32>
    %106 = arith.addf %103, %105 : vector<192x32xf32>
    %107 = arith.addf %100, %106 : vector<192x32xf32>
    %cst_52 = arith.constant 0.000000e+00 : f32
    %108 = vector.broadcast %cst_52 : f32 to vector<192x32xf32>
    %109 = arith.maximumf %107, %108 : vector<192x32xf32>
    %110 = arith.truncf %109 : vector<192x32xf32> to vector<192x32xbf16>
    %c0_53 = arith.constant 0 : index
    %c0_54 = arith.constant 0 : index
    %c0_55 = arith.constant 0 : index
    %111 = vector.load %arg11[%c0_53, %c0_54, %c0_55] : memref<1x192x32xbf16, #tpu.memory_space<vmem>>, vector<1x192x32xbf16>
    %112 = vector.shape_cast %111 : vector<1x192x32xbf16> to vector<192x32xbf16>
    %113 = vector.shape_cast %110 : vector<192x32xbf16> to vector<1x192x32xbf16>
    tpu.vector_store %arg11[%c0_53, %c0_54, %c0_55], %113 {strides = array<i32>} : memref<1x192x32xbf16, #tpu.memory_space<vmem>>, vector<1x192x32xbf16>,
    return
  }
  func.func @transform_0(%arg0: i32) -> (i32, i32, i32) {
    %c0_i32 = arith.constant 0 : i32
    %c0_i32_0 = arith.constant 0 : i32
    %c0_i32_1 = arith.constant 0 : i32
    return %arg0, %c0_i32, %c0_i32_0 : i32, i32, i32
  }
  func.func @transform_1(%arg0: i32) -> (i32, i32, i32) {
    %c0_i32 = arith.constant 0 : i32
    %c0_i32_0 = arith.constant 0 : i32
    %c0_i32_1 = arith.constant 0 : i32
    %c0_i32_2 = arith.constant 0 : i32
    return %c0_i32, %c0_i32_0, %c0_i32_1 : i32, i32, i32
  }
  func.func @transform_2(%arg0: i32) -> (i32, i32) {
    %c0_i32 = arith.constant 0 : i32
    %c0_i32_0 = arith.constant 0 : i32
    %c0_i32_1 = arith.constant 0 : i32
    return %c0_i32, %c0_i32_0 : i32, i32
  }
  func.func @transform_3(%arg0: i32) -> (i32, i32) {
    %c0_i32 = arith.constant 0 : i32
    %c0_i32_0 = arith.constant 0 : i32
    %c0_i32_1 = arith.constant 0 : i32
    return %c0_i32, %c0_i32_0 : i32, i32
  }
  func.func @transform_4(%arg0: i32) -> (i32, i32, i32) {
    %c0_i32 = arith.constant 0 : i32
    %c0_i32_0 = arith.constant 0 : i32
    %c0_i32_1 = arith.constant 0 : i32
    %c0_i32_2 = arith.constant 0 : i32
    return %c0_i32, %c0_i32_0, %c0_i32_1 : i32, i32, i32
  }
  func.func @transform_5(%arg0: i32) -> (i32, i32) {
    %c0_i32 = arith.constant 0 : i32
    %c0_i32_0 = arith.constant 0 : i32
    %c0_i32_1 = arith.constant 0 : i32
    return %c0_i32, %c0_i32_0 : i32, i32
  }
  func.func @transform_6(%arg0: i32) -> (i32, i32) {
    %c0_i32 = arith.constant 0 : i32
    %c0_i32_0 = arith.constant 0 : i32
    %c0_i32_1 = arith.constant 0 : i32
    return %c0_i32, %c0_i32_0 : i32, i32
  }
  func.func @transform_7(%arg0: i32) -> (i32, i32) {
    %c0_i32 = arith.constant 0 : i32
    %c0_i32_0 = arith.constant 0 : i32
    %c0_i32_1 = arith.constant 0 : i32
    return %c0_i32, %c0_i32_0 : i32, i32
  }
  func.func @transform_8(%arg0: i32) -> (i32, i32) {
    %c0_i32 = arith.constant 0 : i32
    %c0_i32_0 = arith.constant 0 : i32
    %c0_i32_1 = arith.constant 0 : i32
    return %c0_i32, %c0_i32_0 : i32, i32
  }
  func.func @transform_9(%arg0: i32) -> (i32, i32) {
    %c0_i32 = arith.constant 0 : i32
    %c0_i32_0 = arith.constant 0 : i32
    %c0_i32_1 = arith.constant 0 : i32
    return %c0_i32, %c0_i32_0 : i32, i32
  }
  func.func @transform_10(%arg0: i32) -> (i32, i32, i32) {
    %c0_i32 = arith.constant 0 : i32
    %c0_i32_0 = arith.constant 0 : i32
    %c0_i32_1 = arith.constant 0 : i32
    return %arg0, %c0_i32, %c0_i32_0 : i32, i32, i32
  }
}

module attributes {stable_mosaic.version = 11 : i64} {
  func.func @_bottleneck_s2_kernel(%arg0: i32, %arg1: memref<1x48x288xbf16, #tpu.memory_space<vmem>>, %arg2: memref<1x48x9xf32, #tpu.memory_space<vmem>>, %arg3: memref<32x16xbf16, #tpu.memory_space<vmem>>, %arg4: memref<1x16xf32, #tpu.memory_space<vmem>>, %arg5: memref<9x16x16xbf16, #tpu.memory_space<vmem>>, %arg6: memref<1x16xf32, #tpu.memory_space<vmem>>, %arg7: memref<16x64xbf16, #tpu.memory_space<vmem>>, %arg8: memref<1x64xf32, #tpu.memory_space<vmem>>, %arg9: memref<32x64xbf16, #tpu.memory_space<vmem>>, %arg10: memref<1x64xf32, #tpu.memory_space<vmem>>, %arg11: memref<1x48x64xbf16, #tpu.memory_space<vmem>>) attributes {dimension_semantics = [#tpu.dimension_semantics<parallel>], iteration_bounds = array<i64: 2>, scalar_prefetch = 0 : i64, scratch_operands = 0 : i64, tpu.core_type = #tpu.core_type<tc>, window_params = [{transform_indices = @transform_0, window_bounds = array<i64: 1, 48, 288>}, {pipeline_mode = #tpu.pipeline_mode<synchronous>, transform_indices = @transform_1, window_bounds = array<i64: 1, 48, 9>}, {pipeline_mode = #tpu.pipeline_mode<synchronous>, transform_indices = @transform_2, window_bounds = array<i64: 32, 16>}, {pipeline_mode = #tpu.pipeline_mode<synchronous>, transform_indices = @transform_3, window_bounds = array<i64: 1, 16>}, {pipeline_mode = #tpu.pipeline_mode<synchronous>, transform_indices = @transform_4, window_bounds = array<i64: 9, 16, 16>}, {pipeline_mode = #tpu.pipeline_mode<synchronous>, transform_indices = @transform_5, window_bounds = array<i64: 1, 16>}, {pipeline_mode = #tpu.pipeline_mode<synchronous>, transform_indices = @transform_6, window_bounds = array<i64: 16, 64>}, {pipeline_mode = #tpu.pipeline_mode<synchronous>, transform_indices = @transform_7, window_bounds = array<i64: 1, 64>}, {pipeline_mode = #tpu.pipeline_mode<synchronous>, transform_indices = @transform_8, window_bounds = array<i64: 32, 64>}, {pipeline_mode = #tpu.pipeline_mode<synchronous>, transform_indices = @transform_9, window_bounds = array<i64: 1, 64>}, {transform_indices = @transform_10, window_bounds = array<i64: 1, 48, 64>}]} {
    %c0 = arith.constant 0 : index
    %c0_0 = arith.constant 0 : index
    %c0_1 = arith.constant 0 : index
    %0 = vector.load %arg1[%c0, %c0_0, %c0_1] : memref<1x48x288xbf16, #tpu.memory_space<vmem>>, vector<1x48x288xbf16>
    %1 = vector.shape_cast %0 : vector<1x48x288xbf16> to vector<48x288xbf16>
    %c0_2 = arith.constant 0 : index
    %c0_3 = arith.constant 0 : index
    %c0_4 = arith.constant 0 : index
    %2 = vector.load %arg2[%c0_2, %c0_3, %c0_4] : memref<1x48x9xf32, #tpu.memory_space<vmem>>, vector<1x48x9xf32>
    %3 = vector.shape_cast %2 : vector<1x48x9xf32> to vector<48x9xf32>
    %c0_5 = arith.constant 0 : index
    %c0_6 = arith.constant 0 : index
    %4 = vector.load %arg3[%c0_5, %c0_6] : memref<32x16xbf16, #tpu.memory_space<vmem>>, vector<32x16xbf16>
    %c0_7 = arith.constant 0 : index
    %c0_8 = arith.constant 0 : index
    %5 = vector.load %arg4[%c0_7, %c0_8] : memref<1x16xf32, #tpu.memory_space<vmem>>, vector<1x16xf32>
    %cst = arith.constant 0.000000e+00 : f32
    %6 = vector.broadcast %cst : f32 to vector<48x16xf32>
    %7 = vector.extract_strided_slice %1 {offsets = [0, 0], sizes = [48, 32], strides = [1, 1]} : vector<48x288xbf16> to vector<48x32xbf16>
    %cst_9 = arith.constant dense<0.000000e+00> : vector<48x16xf32>
    %8 = tpu.matmul %7, %4, %cst_9 {dimension_numbers = #tpu.dot_dimension_numbers<[1], [0], [0], [1], [0, 0, 1, 1], [], []>} : vector<48x32xbf16>, vector<32x16xbf16>, vector<48x16xf32> -> vector<48x16xf32>
    %9 = vector.broadcast %5 : vector<1x16xf32> to vector<48x16xf32>
    %10 = arith.addf %8, %9 : vector<48x16xf32>
    %cst_10 = arith.constant 0.000000e+00 : f32
    %11 = vector.broadcast %cst_10 : f32 to vector<48x16xf32>
    %12 = arith.maximumf %10, %11 : vector<48x16xf32>
    %13 = vector.extract_strided_slice %3 {offsets = [0, 0], sizes = [48, 1], strides = [1, 1]} : vector<48x9xf32> to vector<48x1xf32>
    %14 = vector.broadcast %13 : vector<48x1xf32> to vector<48x16xf32>
    %15 = arith.mulf %12, %14 : vector<48x16xf32>
    %16 = arith.truncf %15 : vector<48x16xf32> to vector<48x16xbf16>
    %c0_11 = arith.constant 0 : index
    %c0_12 = arith.constant 0 : index
    %c0_13 = arith.constant 0 : index
    %17 = vector.load %arg5[%c0_11, %c0_12, %c0_13] : memref<9x16x16xbf16, #tpu.memory_space<vmem>>, vector<1x16x16xbf16>
    %18 = vector.shape_cast %17 : vector<1x16x16xbf16> to vector<16x16xbf16>
    %cst_14 = arith.constant dense<0.000000e+00> : vector<48x16xf32>
    %19 = tpu.matmul %16, %18, %cst_14 {dimension_numbers = #tpu.dot_dimension_numbers<[1], [0], [0], [1], [0, 0, 1, 1], [], []>} : vector<48x16xbf16>, vector<16x16xbf16>, vector<48x16xf32> -> vector<48x16xf32>
    %20 = arith.addf %6, %19 : vector<48x16xf32>
    %21 = vector.extract_strided_slice %1 {offsets = [0, 32], sizes = [48, 32], strides = [1, 1]} : vector<48x288xbf16> to vector<48x32xbf16>
    %cst_15 = arith.constant dense<0.000000e+00> : vector<48x16xf32>
    %22 = tpu.matmul %21, %4, %cst_15 {dimension_numbers = #tpu.dot_dimension_numbers<[1], [0], [0], [1], [0, 0, 1, 1], [], []>} : vector<48x32xbf16>, vector<32x16xbf16>, vector<48x16xf32> -> vector<48x16xf32>
    %23 = vector.broadcast %5 : vector<1x16xf32> to vector<48x16xf32>
    %24 = arith.addf %22, %23 : vector<48x16xf32>
    %cst_16 = arith.constant 0.000000e+00 : f32
    %25 = vector.broadcast %cst_16 : f32 to vector<48x16xf32>
    %26 = arith.maximumf %24, %25 : vector<48x16xf32>
    %27 = vector.extract_strided_slice %3 {offsets = [0, 1], sizes = [48, 1], strides = [1, 1]} : vector<48x9xf32> to vector<48x1xf32>
    %28 = vector.broadcast %27 : vector<48x1xf32> to vector<48x16xf32>
    %29 = arith.mulf %26, %28 : vector<48x16xf32>
    %30 = arith.truncf %29 : vector<48x16xf32> to vector<48x16xbf16>
    %c1 = arith.constant 1 : index
    %c0_17 = arith.constant 0 : index
    %c0_18 = arith.constant 0 : index
    %31 = vector.load %arg5[%c1, %c0_17, %c0_18] : memref<9x16x16xbf16, #tpu.memory_space<vmem>>, vector<1x16x16xbf16>
    %32 = vector.shape_cast %31 : vector<1x16x16xbf16> to vector<16x16xbf16>
    %cst_19 = arith.constant dense<0.000000e+00> : vector<48x16xf32>
    %33 = tpu.matmul %30, %32, %cst_19 {dimension_numbers = #tpu.dot_dimension_numbers<[1], [0], [0], [1], [0, 0, 1, 1], [], []>} : vector<48x16xbf16>, vector<16x16xbf16>, vector<48x16xf32> -> vector<48x16xf32>
    %34 = arith.addf %20, %33 : vector<48x16xf32>
    %35 = vector.extract_strided_slice %1 {offsets = [0, 64], sizes = [48, 32], strides = [1, 1]} : vector<48x288xbf16> to vector<48x32xbf16>
    %cst_20 = arith.constant dense<0.000000e+00> : vector<48x16xf32>
    %36 = tpu.matmul %35, %4, %cst_20 {dimension_numbers = #tpu.dot_dimension_numbers<[1], [0], [0], [1], [0, 0, 1, 1], [], []>} : vector<48x32xbf16>, vector<32x16xbf16>, vector<48x16xf32> -> vector<48x16xf32>
    %37 = vector.broadcast %5 : vector<1x16xf32> to vector<48x16xf32>
    %38 = arith.addf %36, %37 : vector<48x16xf32>
    %cst_21 = arith.constant 0.000000e+00 : f32
    %39 = vector.broadcast %cst_21 : f32 to vector<48x16xf32>
    %40 = arith.maximumf %38, %39 : vector<48x16xf32>
    %41 = vector.extract_strided_slice %3 {offsets = [0, 2], sizes = [48, 1], strides = [1, 1]} : vector<48x9xf32> to vector<48x1xf32>
    %42 = vector.broadcast %41 : vector<48x1xf32> to vector<48x16xf32>
    %43 = arith.mulf %40, %42 : vector<48x16xf32>
    %44 = arith.truncf %43 : vector<48x16xf32> to vector<48x16xbf16>
    %c2 = arith.constant 2 : index
    %c0_22 = arith.constant 0 : index
    %c0_23 = arith.constant 0 : index
    %45 = vector.load %arg5[%c2, %c0_22, %c0_23] : memref<9x16x16xbf16, #tpu.memory_space<vmem>>, vector<1x16x16xbf16>
    %46 = vector.shape_cast %45 : vector<1x16x16xbf16> to vector<16x16xbf16>
    %cst_24 = arith.constant dense<0.000000e+00> : vector<48x16xf32>
    %47 = tpu.matmul %44, %46, %cst_24 {dimension_numbers = #tpu.dot_dimension_numbers<[1], [0], [0], [1], [0, 0, 1, 1], [], []>} : vector<48x16xbf16>, vector<16x16xbf16>, vector<48x16xf32> -> vector<48x16xf32>
    %48 = arith.addf %34, %47 : vector<48x16xf32>
    %49 = vector.extract_strided_slice %1 {offsets = [0, 96], sizes = [48, 32], strides = [1, 1]} : vector<48x288xbf16> to vector<48x32xbf16>
    %cst_25 = arith.constant dense<0.000000e+00> : vector<48x16xf32>
    %50 = tpu.matmul %49, %4, %cst_25 {dimension_numbers = #tpu.dot_dimension_numbers<[1], [0], [0], [1], [0, 0, 1, 1], [], []>} : vector<48x32xbf16>, vector<32x16xbf16>, vector<48x16xf32> -> vector<48x16xf32>
    %51 = vector.broadcast %5 : vector<1x16xf32> to vector<48x16xf32>
    %52 = arith.addf %50, %51 : vector<48x16xf32>
    %cst_26 = arith.constant 0.000000e+00 : f32
    %53 = vector.broadcast %cst_26 : f32 to vector<48x16xf32>
    %54 = arith.maximumf %52, %53 : vector<48x16xf32>
    %55 = vector.extract_strided_slice %3 {offsets = [0, 3], sizes = [48, 1], strides = [1, 1]} : vector<48x9xf32> to vector<48x1xf32>
    %56 = vector.broadcast %55 : vector<48x1xf32> to vector<48x16xf32>
    %57 = arith.mulf %54, %56 : vector<48x16xf32>
    %58 = arith.truncf %57 : vector<48x16xf32> to vector<48x16xbf16>
    %c3 = arith.constant 3 : index
    %c0_27 = arith.constant 0 : index
    %c0_28 = arith.constant 0 : index
    %59 = vector.load %arg5[%c3, %c0_27, %c0_28] : memref<9x16x16xbf16, #tpu.memory_space<vmem>>, vector<1x16x16xbf16>
    %60 = vector.shape_cast %59 : vector<1x16x16xbf16> to vector<16x16xbf16>
    %cst_29 = arith.constant dense<0.000000e+00> : vector<48x16xf32>
    %61 = tpu.matmul %58, %60, %cst_29 {dimension_numbers = #tpu.dot_dimension_numbers<[1], [0], [0], [1], [0, 0, 1, 1], [], []>} : vector<48x16xbf16>, vector<16x16xbf16>, vector<48x16xf32> -> vector<48x16xf32>
    %62 = arith.addf %48, %61 : vector<48x16xf32>
    %63 = vector.extract_strided_slice %1 {offsets = [0, 128], sizes = [48, 32], strides = [1, 1]} : vector<48x288xbf16> to vector<48x32xbf16>
    %cst_30 = arith.constant dense<0.000000e+00> : vector<48x16xf32>
    %64 = tpu.matmul %63, %4, %cst_30 {dimension_numbers = #tpu.dot_dimension_numbers<[1], [0], [0], [1], [0, 0, 1, 1], [], []>} : vector<48x32xbf16>, vector<32x16xbf16>, vector<48x16xf32> -> vector<48x16xf32>
    %65 = vector.broadcast %5 : vector<1x16xf32> to vector<48x16xf32>
    %66 = arith.addf %64, %65 : vector<48x16xf32>
    %cst_31 = arith.constant 0.000000e+00 : f32
    %67 = vector.broadcast %cst_31 : f32 to vector<48x16xf32>
    %68 = arith.maximumf %66, %67 : vector<48x16xf32>
    %69 = vector.extract_strided_slice %3 {offsets = [0, 4], sizes = [48, 1], strides = [1, 1]} : vector<48x9xf32> to vector<48x1xf32>
    %70 = vector.broadcast %69 : vector<48x1xf32> to vector<48x16xf32>
    %71 = arith.mulf %68, %70 : vector<48x16xf32>
    %72 = arith.truncf %71 : vector<48x16xf32> to vector<48x16xbf16>
    %c4 = arith.constant 4 : index
    %c0_32 = arith.constant 0 : index
    %c0_33 = arith.constant 0 : index
    %73 = vector.load %arg5[%c4, %c0_32, %c0_33] : memref<9x16x16xbf16, #tpu.memory_space<vmem>>, vector<1x16x16xbf16>
    %74 = vector.shape_cast %73 : vector<1x16x16xbf16> to vector<16x16xbf16>
    %cst_34 = arith.constant dense<0.000000e+00> : vector<48x16xf32>
    %75 = tpu.matmul %72, %74, %cst_34 {dimension_numbers = #tpu.dot_dimension_numbers<[1], [0], [0], [1], [0, 0, 1, 1], [], []>} : vector<48x16xbf16>, vector<16x16xbf16>, vector<48x16xf32> -> vector<48x16xf32>
    %76 = arith.addf %62, %75 : vector<48x16xf32>
    %77 = vector.extract_strided_slice %1 {offsets = [0, 160], sizes = [48, 32], strides = [1, 1]} : vector<48x288xbf16> to vector<48x32xbf16>
    %cst_35 = arith.constant dense<0.000000e+00> : vector<48x16xf32>
    %78 = tpu.matmul %77, %4, %cst_35 {dimension_numbers = #tpu.dot_dimension_numbers<[1], [0], [0], [1], [0, 0, 1, 1], [], []>} : vector<48x32xbf16>, vector<32x16xbf16>, vector<48x16xf32> -> vector<48x16xf32>
    %79 = vector.broadcast %5 : vector<1x16xf32> to vector<48x16xf32>
    %80 = arith.addf %78, %79 : vector<48x16xf32>
    %cst_36 = arith.constant 0.000000e+00 : f32
    %81 = vector.broadcast %cst_36 : f32 to vector<48x16xf32>
    %82 = arith.maximumf %80, %81 : vector<48x16xf32>
    %83 = vector.extract_strided_slice %3 {offsets = [0, 5], sizes = [48, 1], strides = [1, 1]} : vector<48x9xf32> to vector<48x1xf32>
    %84 = vector.broadcast %83 : vector<48x1xf32> to vector<48x16xf32>
    %85 = arith.mulf %82, %84 : vector<48x16xf32>
    %86 = arith.truncf %85 : vector<48x16xf32> to vector<48x16xbf16>
    %c5 = arith.constant 5 : index
    %c0_37 = arith.constant 0 : index
    %c0_38 = arith.constant 0 : index
    %87 = vector.load %arg5[%c5, %c0_37, %c0_38] : memref<9x16x16xbf16, #tpu.memory_space<vmem>>, vector<1x16x16xbf16>
    %88 = vector.shape_cast %87 : vector<1x16x16xbf16> to vector<16x16xbf16>
    %cst_39 = arith.constant dense<0.000000e+00> : vector<48x16xf32>
    %89 = tpu.matmul %86, %88, %cst_39 {dimension_numbers = #tpu.dot_dimension_numbers<[1], [0], [0], [1], [0, 0, 1, 1], [], []>} : vector<48x16xbf16>, vector<16x16xbf16>, vector<48x16xf32> -> vector<48x16xf32>
    %90 = arith.addf %76, %89 : vector<48x16xf32>
    %91 = vector.extract_strided_slice %1 {offsets = [0, 192], sizes = [48, 32], strides = [1, 1]} : vector<48x288xbf16> to vector<48x32xbf16>
    %cst_40 = arith.constant dense<0.000000e+00> : vector<48x16xf32>
    %92 = tpu.matmul %91, %4, %cst_40 {dimension_numbers = #tpu.dot_dimension_numbers<[1], [0], [0], [1], [0, 0, 1, 1], [], []>} : vector<48x32xbf16>, vector<32x16xbf16>, vector<48x16xf32> -> vector<48x16xf32>
    %93 = vector.broadcast %5 : vector<1x16xf32> to vector<48x16xf32>
    %94 = arith.addf %92, %93 : vector<48x16xf32>
    %cst_41 = arith.constant 0.000000e+00 : f32
    %95 = vector.broadcast %cst_41 : f32 to vector<48x16xf32>
    %96 = arith.maximumf %94, %95 : vector<48x16xf32>
    %97 = vector.extract_strided_slice %3 {offsets = [0, 6], sizes = [48, 1], strides = [1, 1]} : vector<48x9xf32> to vector<48x1xf32>
    %98 = vector.broadcast %97 : vector<48x1xf32> to vector<48x16xf32>
    %99 = arith.mulf %96, %98 : vector<48x16xf32>
    %100 = arith.truncf %99 : vector<48x16xf32> to vector<48x16xbf16>
    %c6 = arith.constant 6 : index
    %c0_42 = arith.constant 0 : index
    %c0_43 = arith.constant 0 : index
    %101 = vector.load %arg5[%c6, %c0_42, %c0_43] : memref<9x16x16xbf16, #tpu.memory_space<vmem>>, vector<1x16x16xbf16>
    %102 = vector.shape_cast %101 : vector<1x16x16xbf16> to vector<16x16xbf16>
    %cst_44 = arith.constant dense<0.000000e+00> : vector<48x16xf32>
    %103 = tpu.matmul %100, %102, %cst_44 {dimension_numbers = #tpu.dot_dimension_numbers<[1], [0], [0], [1], [0, 0, 1, 1], [], []>} : vector<48x16xbf16>, vector<16x16xbf16>, vector<48x16xf32> -> vector<48x16xf32>
    %104 = arith.addf %90, %103 : vector<48x16xf32>
    %105 = vector.extract_strided_slice %1 {offsets = [0, 224], sizes = [48, 32], strides = [1, 1]} : vector<48x288xbf16> to vector<48x32xbf16>
    %cst_45 = arith.constant dense<0.000000e+00> : vector<48x16xf32>
    %106 = tpu.matmul %105, %4, %cst_45 {dimension_numbers = #tpu.dot_dimension_numbers<[1], [0], [0], [1], [0, 0, 1, 1], [], []>} : vector<48x32xbf16>, vector<32x16xbf16>, vector<48x16xf32> -> vector<48x16xf32>
    %107 = vector.broadcast %5 : vector<1x16xf32> to vector<48x16xf32>
    %108 = arith.addf %106, %107 : vector<48x16xf32>
    %cst_46 = arith.constant 0.000000e+00 : f32
    %109 = vector.broadcast %cst_46 : f32 to vector<48x16xf32>
    %110 = arith.maximumf %108, %109 : vector<48x16xf32>
    %111 = vector.extract_strided_slice %3 {offsets = [0, 7], sizes = [48, 1], strides = [1, 1]} : vector<48x9xf32> to vector<48x1xf32>
    %112 = vector.broadcast %111 : vector<48x1xf32> to vector<48x16xf32>
    %113 = arith.mulf %110, %112 : vector<48x16xf32>
    %114 = arith.truncf %113 : vector<48x16xf32> to vector<48x16xbf16>
    %c7 = arith.constant 7 : index
    %c0_47 = arith.constant 0 : index
    %c0_48 = arith.constant 0 : index
    %115 = vector.load %arg5[%c7, %c0_47, %c0_48] : memref<9x16x16xbf16, #tpu.memory_space<vmem>>, vector<1x16x16xbf16>
    %116 = vector.shape_cast %115 : vector<1x16x16xbf16> to vector<16x16xbf16>
    %cst_49 = arith.constant dense<0.000000e+00> : vector<48x16xf32>
    %117 = tpu.matmul %114, %116, %cst_49 {dimension_numbers = #tpu.dot_dimension_numbers<[1], [0], [0], [1], [0, 0, 1, 1], [], []>} : vector<48x16xbf16>, vector<16x16xbf16>, vector<48x16xf32> -> vector<48x16xf32>
    %118 = arith.addf %104, %117 : vector<48x16xf32>
    %119 = vector.extract_strided_slice %1 {offsets = [0, 256], sizes = [48, 32], strides = [1, 1]} : vector<48x288xbf16> to vector<48x32xbf16>
    %cst_50 = arith.constant dense<0.000000e+00> : vector<48x16xf32>
    %120 = tpu.matmul %119, %4, %cst_50 {dimension_numbers = #tpu.dot_dimension_numbers<[1], [0], [0], [1], [0, 0, 1, 1], [], []>} : vector<48x32xbf16>, vector<32x16xbf16>, vector<48x16xf32> -> vector<48x16xf32>
    %121 = vector.broadcast %5 : vector<1x16xf32> to vector<48x16xf32>
    %122 = arith.addf %120, %121 : vector<48x16xf32>
    %cst_51 = arith.constant 0.000000e+00 : f32
    %123 = vector.broadcast %cst_51 : f32 to vector<48x16xf32>
    %124 = arith.maximumf %122, %123 : vector<48x16xf32>
    %125 = vector.extract_strided_slice %3 {offsets = [0, 8], sizes = [48, 1], strides = [1, 1]} : vector<48x9xf32> to vector<48x1xf32>
    %126 = vector.broadcast %125 : vector<48x1xf32> to vector<48x16xf32>
    %127 = arith.mulf %124, %126 : vector<48x16xf32>
    %128 = arith.truncf %127 : vector<48x16xf32> to vector<48x16xbf16>
    %c8 = arith.constant 8 : index
    %c0_52 = arith.constant 0 : index
    %c0_53 = arith.constant 0 : index
    %129 = vector.load %arg5[%c8, %c0_52, %c0_53] : memref<9x16x16xbf16, #tpu.memory_space<vmem>>, vector<1x16x16xbf16>
    %130 = vector.shape_cast %129 : vector<1x16x16xbf16> to vector<16x16xbf16>
    %cst_54 = arith.constant dense<0.000000e+00> : vector<48x16xf32>
    %131 = tpu.matmul %128, %130, %cst_54 {dimension_numbers = #tpu.dot_dimension_numbers<[1], [0], [0], [1], [0, 0, 1, 1], [], []>} : vector<48x16xbf16>, vector<16x16xbf16>, vector<48x16xf32> -> vector<48x16xf32>
    %132 = arith.addf %118, %131 : vector<48x16xf32>
    %c0_55 = arith.constant 0 : index
    %c0_56 = arith.constant 0 : index
    %133 = vector.load %arg6[%c0_55, %c0_56] : memref<1x16xf32, #tpu.memory_space<vmem>>, vector<1x16xf32>
    %134 = vector.broadcast %133 : vector<1x16xf32> to vector<48x16xf32>
    %135 = arith.addf %132, %134 : vector<48x16xf32>
    %cst_57 = arith.constant 0.000000e+00 : f32
    %136 = vector.broadcast %cst_57 : f32 to vector<48x16xf32>
    %137 = arith.maximumf %135, %136 : vector<48x16xf32>
    %138 = arith.truncf %137 : vector<48x16xf32> to vector<48x16xbf16>
    %c0_58 = arith.constant 0 : index
    %c0_59 = arith.constant 0 : index
    %139 = vector.load %arg7[%c0_58, %c0_59] : memref<16x64xbf16, #tpu.memory_space<vmem>>, vector<16x64xbf16>
    %cst_60 = arith.constant dense<0.000000e+00> : vector<48x64xf32>
    %140 = tpu.matmul %138, %139, %cst_60 {dimension_numbers = #tpu.dot_dimension_numbers<[1], [0], [0], [1], [0, 0, 1, 1], [], []>} : vector<48x16xbf16>, vector<16x64xbf16>, vector<48x64xf32> -> vector<48x64xf32>
    %c0_61 = arith.constant 0 : index
    %c0_62 = arith.constant 0 : index
    %141 = vector.load %arg8[%c0_61, %c0_62] : memref<1x64xf32, #tpu.memory_space<vmem>>, vector<1x64xf32>
    %142 = vector.broadcast %141 : vector<1x64xf32> to vector<48x64xf32>
    %143 = arith.addf %140, %142 : vector<48x64xf32>
    %144 = vector.extract_strided_slice %1 {offsets = [0, 128], sizes = [48, 32], strides = [1, 1]} : vector<48x288xbf16> to vector<48x32xbf16>
    %c0_63 = arith.constant 0 : index
    %c0_64 = arith.constant 0 : index
    %145 = vector.load %arg9[%c0_63, %c0_64] : memref<32x64xbf16, #tpu.memory_space<vmem>>, vector<32x64xbf16>
    %cst_65 = arith.constant dense<0.000000e+00> : vector<48x64xf32>
    %146 = tpu.matmul %144, %145, %cst_65 {dimension_numbers = #tpu.dot_dimension_numbers<[1], [0], [0], [1], [0, 0, 1, 1], [], []>} : vector<48x32xbf16>, vector<32x64xbf16>, vector<48x64xf32> -> vector<48x64xf32>
    %c0_66 = arith.constant 0 : index
    %c0_67 = arith.constant 0 : index
    %147 = vector.load %arg10[%c0_66, %c0_67] : memref<1x64xf32, #tpu.memory_space<vmem>>, vector<1x64xf32>
    %148 = vector.broadcast %147 : vector<1x64xf32> to vector<48x64xf32>
    %149 = arith.addf %146, %148 : vector<48x64xf32>
    %150 = arith.addf %143, %149 : vector<48x64xf32>
    %cst_68 = arith.constant 0.000000e+00 : f32
    %151 = vector.broadcast %cst_68 : f32 to vector<48x64xf32>
    %152 = arith.maximumf %150, %151 : vector<48x64xf32>
    %153 = arith.truncf %152 : vector<48x64xf32> to vector<48x64xbf16>
    %c0_69 = arith.constant 0 : index
    %c0_70 = arith.constant 0 : index
    %c0_71 = arith.constant 0 : index
    %154 = vector.load %arg11[%c0_69, %c0_70, %c0_71] : memref<1x48x64xbf16, #tpu.memory_space<vmem>>, vector<1x48x64xbf16>
    %155 = vector.shape_cast %154 : vector<1x48x64xbf16> to vector<48x64xbf16>
    %156 = vector.shape_cast %153 : vector<48x64xbf16> to vector<1x48x64xbf16>
    tpu.vector_store %arg11[%c0_69, %c0_70, %c0_71], %156 {strides = array<i32>} : memref<1x48x64xbf16, #tpu.memory_space<vmem>>, vector<1x48x64xbf16>,
    return
  }
  func.func @transform_0(%arg0: i32) -> (i32, i32, i32) {
    %c0_i32 = arith.constant 0 : i32
    %c0_i32_0 = arith.constant 0 : i32
    %c0_i32_1 = arith.constant 0 : i32
    return %arg0, %c0_i32, %c0_i32_0 : i32, i32, i32
  }
  func.func @transform_1(%arg0: i32) -> (i32, i32, i32) {
    %c0_i32 = arith.constant 0 : i32
    %c0_i32_0 = arith.constant 0 : i32
    %c0_i32_1 = arith.constant 0 : i32
    %c0_i32_2 = arith.constant 0 : i32
    return %c0_i32, %c0_i32_0, %c0_i32_1 : i32, i32, i32
  }
  func.func @transform_2(%arg0: i32) -> (i32, i32) {
    %c0_i32 = arith.constant 0 : i32
    %c0_i32_0 = arith.constant 0 : i32
    %c0_i32_1 = arith.constant 0 : i32
    return %c0_i32, %c0_i32_0 : i32, i32
  }
  func.func @transform_3(%arg0: i32) -> (i32, i32) {
    %c0_i32 = arith.constant 0 : i32
    %c0_i32_0 = arith.constant 0 : i32
    %c0_i32_1 = arith.constant 0 : i32
    return %c0_i32, %c0_i32_0 : i32, i32
  }
  func.func @transform_4(%arg0: i32) -> (i32, i32, i32) {
    %c0_i32 = arith.constant 0 : i32
    %c0_i32_0 = arith.constant 0 : i32
    %c0_i32_1 = arith.constant 0 : i32
    %c0_i32_2 = arith.constant 0 : i32
    return %c0_i32, %c0_i32_0, %c0_i32_1 : i32, i32, i32
  }
  func.func @transform_5(%arg0: i32) -> (i32, i32) {
    %c0_i32 = arith.constant 0 : i32
    %c0_i32_0 = arith.constant 0 : i32
    %c0_i32_1 = arith.constant 0 : i32
    return %c0_i32, %c0_i32_0 : i32, i32
  }
  func.func @transform_6(%arg0: i32) -> (i32, i32) {
    %c0_i32 = arith.constant 0 : i32
    %c0_i32_0 = arith.constant 0 : i32
    %c0_i32_1 = arith.constant 0 : i32
    return %c0_i32, %c0_i32_0 : i32, i32
  }
  func.func @transform_7(%arg0: i32) -> (i32, i32) {
    %c0_i32 = arith.constant 0 : i32
    %c0_i32_0 = arith.constant 0 : i32
    %c0_i32_1 = arith.constant 0 : i32
    return %c0_i32, %c0_i32_0 : i32, i32
  }
  func.func @transform_8(%arg0: i32) -> (i32, i32) {
    %c0_i32 = arith.constant 0 : i32
    %c0_i32_0 = arith.constant 0 : i32
    %c0_i32_1 = arith.constant 0 : i32
    return %c0_i32, %c0_i32_0 : i32, i32
  }
  func.func @transform_9(%arg0: i32) -> (i32, i32) {
    %c0_i32 = arith.constant 0 : i32
    %c0_i32_0 = arith.constant 0 : i32
    %c0_i32_1 = arith.constant 0 : i32
    return %c0_i32, %c0_i32_0 : i32, i32
  }
  func.func @transform_10(%arg0: i32) -> (i32, i32, i32) {
    %c0_i32 = arith.constant 0 : i32
    %c0_i32_0 = arith.constant 0 : i32
    %c0_i32_1 = arith.constant 0 : i32
    return %arg0, %c0_i32, %c0_i32_0 : i32, i32, i32
  }
}

module attributes {stable_mosaic.version = 11 : i64} {
  func.func @_bottleneck_s2_kernel(%arg0: i32, %arg1: memref<1x12x576xbf16, #tpu.memory_space<vmem>>, %arg2: memref<1x12x9xf32, #tpu.memory_space<vmem>>, %arg3: memref<64x32xbf16, #tpu.memory_space<vmem>>, %arg4: memref<1x32xf32, #tpu.memory_space<vmem>>, %arg5: memref<9x32x32xbf16, #tpu.memory_space<vmem>>, %arg6: memref<1x32xf32, #tpu.memory_space<vmem>>, %arg7: memref<32x128xbf16, #tpu.memory_space<vmem>>, %arg8: memref<1x128xf32, #tpu.memory_space<vmem>>, %arg9: memref<64x128xbf16, #tpu.memory_space<vmem>>, %arg10: memref<1x128xf32, #tpu.memory_space<vmem>>, %arg11: memref<1x12x128xbf16, #tpu.memory_space<vmem>>) attributes {dimension_semantics = [#tpu.dimension_semantics<parallel>], iteration_bounds = array<i64: 2>, scalar_prefetch = 0 : i64, scratch_operands = 0 : i64, tpu.core_type = #tpu.core_type<tc>, window_params = [{transform_indices = @transform_0, window_bounds = array<i64: 1, 12, 576>}, {pipeline_mode = #tpu.pipeline_mode<synchronous>, transform_indices = @transform_1, window_bounds = array<i64: 1, 12, 9>}, {pipeline_mode = #tpu.pipeline_mode<synchronous>, transform_indices = @transform_2, window_bounds = array<i64: 64, 32>}, {pipeline_mode = #tpu.pipeline_mode<synchronous>, transform_indices = @transform_3, window_bounds = array<i64: 1, 32>}, {pipeline_mode = #tpu.pipeline_mode<synchronous>, transform_indices = @transform_4, window_bounds = array<i64: 9, 32, 32>}, {pipeline_mode = #tpu.pipeline_mode<synchronous>, transform_indices = @transform_5, window_bounds = array<i64: 1, 32>}, {pipeline_mode = #tpu.pipeline_mode<synchronous>, transform_indices = @transform_6, window_bounds = array<i64: 32, 128>}, {pipeline_mode = #tpu.pipeline_mode<synchronous>, transform_indices = @transform_7, window_bounds = array<i64: 1, 128>}, {pipeline_mode = #tpu.pipeline_mode<synchronous>, transform_indices = @transform_8, window_bounds = array<i64: 64, 128>}, {pipeline_mode = #tpu.pipeline_mode<synchronous>, transform_indices = @transform_9, window_bounds = array<i64: 1, 128>}, {transform_indices = @transform_10, window_bounds = array<i64: 1, 12, 128>}]} {
    %c0 = arith.constant 0 : index
    %c0_0 = arith.constant 0 : index
    %c0_1 = arith.constant 0 : index
    %0 = vector.load %arg1[%c0, %c0_0, %c0_1] : memref<1x12x576xbf16, #tpu.memory_space<vmem>>, vector<1x12x576xbf16>
    %1 = vector.shape_cast %0 : vector<1x12x576xbf16> to vector<12x576xbf16>
    %c0_2 = arith.constant 0 : index
    %c0_3 = arith.constant 0 : index
    %c0_4 = arith.constant 0 : index
    %2 = vector.load %arg2[%c0_2, %c0_3, %c0_4] : memref<1x12x9xf32, #tpu.memory_space<vmem>>, vector<1x12x9xf32>
    %3 = vector.shape_cast %2 : vector<1x12x9xf32> to vector<12x9xf32>
    %c0_5 = arith.constant 0 : index
    %c0_6 = arith.constant 0 : index
    %4 = vector.load %arg3[%c0_5, %c0_6] : memref<64x32xbf16, #tpu.memory_space<vmem>>, vector<64x32xbf16>
    %c0_7 = arith.constant 0 : index
    %c0_8 = arith.constant 0 : index
    %5 = vector.load %arg4[%c0_7, %c0_8] : memref<1x32xf32, #tpu.memory_space<vmem>>, vector<1x32xf32>
    %cst = arith.constant 0.000000e+00 : f32
    %6 = vector.broadcast %cst : f32 to vector<12x32xf32>
    %7 = vector.extract_strided_slice %1 {offsets = [0, 0], sizes = [12, 64], strides = [1, 1]} : vector<12x576xbf16> to vector<12x64xbf16>
    %cst_9 = arith.constant dense<0.000000e+00> : vector<12x32xf32>
    %8 = tpu.matmul %7, %4, %cst_9 {dimension_numbers = #tpu.dot_dimension_numbers<[1], [0], [0], [1], [0, 0, 1, 1], [], []>} : vector<12x64xbf16>, vector<64x32xbf16>, vector<12x32xf32> -> vector<12x32xf32>
    %9 = vector.broadcast %5 : vector<1x32xf32> to vector<12x32xf32>
    %10 = arith.addf %8, %9 : vector<12x32xf32>
    %cst_10 = arith.constant 0.000000e+00 : f32
    %11 = vector.broadcast %cst_10 : f32 to vector<12x32xf32>
    %12 = arith.maximumf %10, %11 : vector<12x32xf32>
    %13 = vector.extract_strided_slice %3 {offsets = [0, 0], sizes = [12, 1], strides = [1, 1]} : vector<12x9xf32> to vector<12x1xf32>
    %14 = vector.broadcast %13 : vector<12x1xf32> to vector<12x32xf32>
    %15 = arith.mulf %12, %14 : vector<12x32xf32>
    %16 = arith.truncf %15 : vector<12x32xf32> to vector<12x32xbf16>
    %c0_11 = arith.constant 0 : index
    %c0_12 = arith.constant 0 : index
    %c0_13 = arith.constant 0 : index
    %17 = vector.load %arg5[%c0_11, %c0_12, %c0_13] : memref<9x32x32xbf16, #tpu.memory_space<vmem>>, vector<1x32x32xbf16>
    %18 = vector.shape_cast %17 : vector<1x32x32xbf16> to vector<32x32xbf16>
    %cst_14 = arith.constant dense<0.000000e+00> : vector<12x32xf32>
    %19 = tpu.matmul %16, %18, %cst_14 {dimension_numbers = #tpu.dot_dimension_numbers<[1], [0], [0], [1], [0, 0, 1, 1], [], []>} : vector<12x32xbf16>, vector<32x32xbf16>, vector<12x32xf32> -> vector<12x32xf32>
    %20 = arith.addf %6, %19 : vector<12x32xf32>
    %21 = vector.extract_strided_slice %1 {offsets = [0, 64], sizes = [12, 64], strides = [1, 1]} : vector<12x576xbf16> to vector<12x64xbf16>
    %cst_15 = arith.constant dense<0.000000e+00> : vector<12x32xf32>
    %22 = tpu.matmul %21, %4, %cst_15 {dimension_numbers = #tpu.dot_dimension_numbers<[1], [0], [0], [1], [0, 0, 1, 1], [], []>} : vector<12x64xbf16>, vector<64x32xbf16>, vector<12x32xf32> -> vector<12x32xf32>
    %23 = vector.broadcast %5 : vector<1x32xf32> to vector<12x32xf32>
    %24 = arith.addf %22, %23 : vector<12x32xf32>
    %cst_16 = arith.constant 0.000000e+00 : f32
    %25 = vector.broadcast %cst_16 : f32 to vector<12x32xf32>
    %26 = arith.maximumf %24, %25 : vector<12x32xf32>
    %27 = vector.extract_strided_slice %3 {offsets = [0, 1], sizes = [12, 1], strides = [1, 1]} : vector<12x9xf32> to vector<12x1xf32>
    %28 = vector.broadcast %27 : vector<12x1xf32> to vector<12x32xf32>
    %29 = arith.mulf %26, %28 : vector<12x32xf32>
    %30 = arith.truncf %29 : vector<12x32xf32> to vector<12x32xbf16>
    %c1 = arith.constant 1 : index
    %c0_17 = arith.constant 0 : index
    %c0_18 = arith.constant 0 : index
    %31 = vector.load %arg5[%c1, %c0_17, %c0_18] : memref<9x32x32xbf16, #tpu.memory_space<vmem>>, vector<1x32x32xbf16>
    %32 = vector.shape_cast %31 : vector<1x32x32xbf16> to vector<32x32xbf16>
    %cst_19 = arith.constant dense<0.000000e+00> : vector<12x32xf32>
    %33 = tpu.matmul %30, %32, %cst_19 {dimension_numbers = #tpu.dot_dimension_numbers<[1], [0], [0], [1], [0, 0, 1, 1], [], []>} : vector<12x32xbf16>, vector<32x32xbf16>, vector<12x32xf32> -> vector<12x32xf32>
    %34 = arith.addf %20, %33 : vector<12x32xf32>
    %35 = vector.extract_strided_slice %1 {offsets = [0, 128], sizes = [12, 64], strides = [1, 1]} : vector<12x576xbf16> to vector<12x64xbf16>
    %cst_20 = arith.constant dense<0.000000e+00> : vector<12x32xf32>
    %36 = tpu.matmul %35, %4, %cst_20 {dimension_numbers = #tpu.dot_dimension_numbers<[1], [0], [0], [1], [0, 0, 1, 1], [], []>} : vector<12x64xbf16>, vector<64x32xbf16>, vector<12x32xf32> -> vector<12x32xf32>
    %37 = vector.broadcast %5 : vector<1x32xf32> to vector<12x32xf32>
    %38 = arith.addf %36, %37 : vector<12x32xf32>
    %cst_21 = arith.constant 0.000000e+00 : f32
    %39 = vector.broadcast %cst_21 : f32 to vector<12x32xf32>
    %40 = arith.maximumf %38, %39 : vector<12x32xf32>
    %41 = vector.extract_strided_slice %3 {offsets = [0, 2], sizes = [12, 1], strides = [1, 1]} : vector<12x9xf32> to vector<12x1xf32>
    %42 = vector.broadcast %41 : vector<12x1xf32> to vector<12x32xf32>
    %43 = arith.mulf %40, %42 : vector<12x32xf32>
    %44 = arith.truncf %43 : vector<12x32xf32> to vector<12x32xbf16>
    %c2 = arith.constant 2 : index
    %c0_22 = arith.constant 0 : index
    %c0_23 = arith.constant 0 : index
    %45 = vector.load %arg5[%c2, %c0_22, %c0_23] : memref<9x32x32xbf16, #tpu.memory_space<vmem>>, vector<1x32x32xbf16>
    %46 = vector.shape_cast %45 : vector<1x32x32xbf16> to vector<32x32xbf16>
    %cst_24 = arith.constant dense<0.000000e+00> : vector<12x32xf32>
    %47 = tpu.matmul %44, %46, %cst_24 {dimension_numbers = #tpu.dot_dimension_numbers<[1], [0], [0], [1], [0, 0, 1, 1], [], []>} : vector<12x32xbf16>, vector<32x32xbf16>, vector<12x32xf32> -> vector<12x32xf32>
    %48 = arith.addf %34, %47 : vector<12x32xf32>
    %49 = vector.extract_strided_slice %1 {offsets = [0, 192], sizes = [12, 64], strides = [1, 1]} : vector<12x576xbf16> to vector<12x64xbf16>
    %cst_25 = arith.constant dense<0.000000e+00> : vector<12x32xf32>
    %50 = tpu.matmul %49, %4, %cst_25 {dimension_numbers = #tpu.dot_dimension_numbers<[1], [0], [0], [1], [0, 0, 1, 1], [], []>} : vector<12x64xbf16>, vector<64x32xbf16>, vector<12x32xf32> -> vector<12x32xf32>
    %51 = vector.broadcast %5 : vector<1x32xf32> to vector<12x32xf32>
    %52 = arith.addf %50, %51 : vector<12x32xf32>
    %cst_26 = arith.constant 0.000000e+00 : f32
    %53 = vector.broadcast %cst_26 : f32 to vector<12x32xf32>
    %54 = arith.maximumf %52, %53 : vector<12x32xf32>
    %55 = vector.extract_strided_slice %3 {offsets = [0, 3], sizes = [12, 1], strides = [1, 1]} : vector<12x9xf32> to vector<12x1xf32>
    %56 = vector.broadcast %55 : vector<12x1xf32> to vector<12x32xf32>
    %57 = arith.mulf %54, %56 : vector<12x32xf32>
    %58 = arith.truncf %57 : vector<12x32xf32> to vector<12x32xbf16>
    %c3 = arith.constant 3 : index
    %c0_27 = arith.constant 0 : index
    %c0_28 = arith.constant 0 : index
    %59 = vector.load %arg5[%c3, %c0_27, %c0_28] : memref<9x32x32xbf16, #tpu.memory_space<vmem>>, vector<1x32x32xbf16>
    %60 = vector.shape_cast %59 : vector<1x32x32xbf16> to vector<32x32xbf16>
    %cst_29 = arith.constant dense<0.000000e+00> : vector<12x32xf32>
    %61 = tpu.matmul %58, %60, %cst_29 {dimension_numbers = #tpu.dot_dimension_numbers<[1], [0], [0], [1], [0, 0, 1, 1], [], []>} : vector<12x32xbf16>, vector<32x32xbf16>, vector<12x32xf32> -> vector<12x32xf32>
    %62 = arith.addf %48, %61 : vector<12x32xf32>
    %63 = vector.extract_strided_slice %1 {offsets = [0, 256], sizes = [12, 64], strides = [1, 1]} : vector<12x576xbf16> to vector<12x64xbf16>
    %cst_30 = arith.constant dense<0.000000e+00> : vector<12x32xf32>
    %64 = tpu.matmul %63, %4, %cst_30 {dimension_numbers = #tpu.dot_dimension_numbers<[1], [0], [0], [1], [0, 0, 1, 1], [], []>} : vector<12x64xbf16>, vector<64x32xbf16>, vector<12x32xf32> -> vector<12x32xf32>
    %65 = vector.broadcast %5 : vector<1x32xf32> to vector<12x32xf32>
    %66 = arith.addf %64, %65 : vector<12x32xf32>
    %cst_31 = arith.constant 0.000000e+00 : f32
    %67 = vector.broadcast %cst_31 : f32 to vector<12x32xf32>
    %68 = arith.maximumf %66, %67 : vector<12x32xf32>
    %69 = vector.extract_strided_slice %3 {offsets = [0, 4], sizes = [12, 1], strides = [1, 1]} : vector<12x9xf32> to vector<12x1xf32>
    %70 = vector.broadcast %69 : vector<12x1xf32> to vector<12x32xf32>
    %71 = arith.mulf %68, %70 : vector<12x32xf32>
    %72 = arith.truncf %71 : vector<12x32xf32> to vector<12x32xbf16>
    %c4 = arith.constant 4 : index
    %c0_32 = arith.constant 0 : index
    %c0_33 = arith.constant 0 : index
    %73 = vector.load %arg5[%c4, %c0_32, %c0_33] : memref<9x32x32xbf16, #tpu.memory_space<vmem>>, vector<1x32x32xbf16>
    %74 = vector.shape_cast %73 : vector<1x32x32xbf16> to vector<32x32xbf16>
    %cst_34 = arith.constant dense<0.000000e+00> : vector<12x32xf32>
    %75 = tpu.matmul %72, %74, %cst_34 {dimension_numbers = #tpu.dot_dimension_numbers<[1], [0], [0], [1], [0, 0, 1, 1], [], []>} : vector<12x32xbf16>, vector<32x32xbf16>, vector<12x32xf32> -> vector<12x32xf32>
    %76 = arith.addf %62, %75 : vector<12x32xf32>
    %77 = vector.extract_strided_slice %1 {offsets = [0, 320], sizes = [12, 64], strides = [1, 1]} : vector<12x576xbf16> to vector<12x64xbf16>
    %cst_35 = arith.constant dense<0.000000e+00> : vector<12x32xf32>
    %78 = tpu.matmul %77, %4, %cst_35 {dimension_numbers = #tpu.dot_dimension_numbers<[1], [0], [0], [1], [0, 0, 1, 1], [], []>} : vector<12x64xbf16>, vector<64x32xbf16>, vector<12x32xf32> -> vector<12x32xf32>
    %79 = vector.broadcast %5 : vector<1x32xf32> to vector<12x32xf32>
    %80 = arith.addf %78, %79 : vector<12x32xf32>
    %cst_36 = arith.constant 0.000000e+00 : f32
    %81 = vector.broadcast %cst_36 : f32 to vector<12x32xf32>
    %82 = arith.maximumf %80, %81 : vector<12x32xf32>
    %83 = vector.extract_strided_slice %3 {offsets = [0, 5], sizes = [12, 1], strides = [1, 1]} : vector<12x9xf32> to vector<12x1xf32>
    %84 = vector.broadcast %83 : vector<12x1xf32> to vector<12x32xf32>
    %85 = arith.mulf %82, %84 : vector<12x32xf32>
    %86 = arith.truncf %85 : vector<12x32xf32> to vector<12x32xbf16>
    %c5 = arith.constant 5 : index
    %c0_37 = arith.constant 0 : index
    %c0_38 = arith.constant 0 : index
    %87 = vector.load %arg5[%c5, %c0_37, %c0_38] : memref<9x32x32xbf16, #tpu.memory_space<vmem>>, vector<1x32x32xbf16>
    %88 = vector.shape_cast %87 : vector<1x32x32xbf16> to vector<32x32xbf16>
    %cst_39 = arith.constant dense<0.000000e+00> : vector<12x32xf32>
    %89 = tpu.matmul %86, %88, %cst_39 {dimension_numbers = #tpu.dot_dimension_numbers<[1], [0], [0], [1], [0, 0, 1, 1], [], []>} : vector<12x32xbf16>, vector<32x32xbf16>, vector<12x32xf32> -> vector<12x32xf32>
    %90 = arith.addf %76, %89 : vector<12x32xf32>
    %91 = vector.extract_strided_slice %1 {offsets = [0, 384], sizes = [12, 64], strides = [1, 1]} : vector<12x576xbf16> to vector<12x64xbf16>
    %cst_40 = arith.constant dense<0.000000e+00> : vector<12x32xf32>
    %92 = tpu.matmul %91, %4, %cst_40 {dimension_numbers = #tpu.dot_dimension_numbers<[1], [0], [0], [1], [0, 0, 1, 1], [], []>} : vector<12x64xbf16>, vector<64x32xbf16>, vector<12x32xf32> -> vector<12x32xf32>
    %93 = vector.broadcast %5 : vector<1x32xf32> to vector<12x32xf32>
    %94 = arith.addf %92, %93 : vector<12x32xf32>
    %cst_41 = arith.constant 0.000000e+00 : f32
    %95 = vector.broadcast %cst_41 : f32 to vector<12x32xf32>
    %96 = arith.maximumf %94, %95 : vector<12x32xf32>
    %97 = vector.extract_strided_slice %3 {offsets = [0, 6], sizes = [12, 1], strides = [1, 1]} : vector<12x9xf32> to vector<12x1xf32>
    %98 = vector.broadcast %97 : vector<12x1xf32> to vector<12x32xf32>
    %99 = arith.mulf %96, %98 : vector<12x32xf32>
    %100 = arith.truncf %99 : vector<12x32xf32> to vector<12x32xbf16>
    %c6 = arith.constant 6 : index
    %c0_42 = arith.constant 0 : index
    %c0_43 = arith.constant 0 : index
    %101 = vector.load %arg5[%c6, %c0_42, %c0_43] : memref<9x32x32xbf16, #tpu.memory_space<vmem>>, vector<1x32x32xbf16>
    %102 = vector.shape_cast %101 : vector<1x32x32xbf16> to vector<32x32xbf16>
    %cst_44 = arith.constant dense<0.000000e+00> : vector<12x32xf32>
    %103 = tpu.matmul %100, %102, %cst_44 {dimension_numbers = #tpu.dot_dimension_numbers<[1], [0], [0], [1], [0, 0, 1, 1], [], []>} : vector<12x32xbf16>, vector<32x32xbf16>, vector<12x32xf32> -> vector<12x32xf32>
    %104 = arith.addf %90, %103 : vector<12x32xf32>
    %105 = vector.extract_strided_slice %1 {offsets = [0, 448], sizes = [12, 64], strides = [1, 1]} : vector<12x576xbf16> to vector<12x64xbf16>
    %cst_45 = arith.constant dense<0.000000e+00> : vector<12x32xf32>
    %106 = tpu.matmul %105, %4, %cst_45 {dimension_numbers = #tpu.dot_dimension_numbers<[1], [0], [0], [1], [0, 0, 1, 1], [], []>} : vector<12x64xbf16>, vector<64x32xbf16>, vector<12x32xf32> -> vector<12x32xf32>
    %107 = vector.broadcast %5 : vector<1x32xf32> to vector<12x32xf32>
    %108 = arith.addf %106, %107 : vector<12x32xf32>
    %cst_46 = arith.constant 0.000000e+00 : f32
    %109 = vector.broadcast %cst_46 : f32 to vector<12x32xf32>
    %110 = arith.maximumf %108, %109 : vector<12x32xf32>
    %111 = vector.extract_strided_slice %3 {offsets = [0, 7], sizes = [12, 1], strides = [1, 1]} : vector<12x9xf32> to vector<12x1xf32>
    %112 = vector.broadcast %111 : vector<12x1xf32> to vector<12x32xf32>
    %113 = arith.mulf %110, %112 : vector<12x32xf32>
    %114 = arith.truncf %113 : vector<12x32xf32> to vector<12x32xbf16>
    %c7 = arith.constant 7 : index
    %c0_47 = arith.constant 0 : index
    %c0_48 = arith.constant 0 : index
    %115 = vector.load %arg5[%c7, %c0_47, %c0_48] : memref<9x32x32xbf16, #tpu.memory_space<vmem>>, vector<1x32x32xbf16>
    %116 = vector.shape_cast %115 : vector<1x32x32xbf16> to vector<32x32xbf16>
    %cst_49 = arith.constant dense<0.000000e+00> : vector<12x32xf32>
    %117 = tpu.matmul %114, %116, %cst_49 {dimension_numbers = #tpu.dot_dimension_numbers<[1], [0], [0], [1], [0, 0, 1, 1], [], []>} : vector<12x32xbf16>, vector<32x32xbf16>, vector<12x32xf32> -> vector<12x32xf32>
    %118 = arith.addf %104, %117 : vector<12x32xf32>
    %119 = vector.extract_strided_slice %1 {offsets = [0, 512], sizes = [12, 64], strides = [1, 1]} : vector<12x576xbf16> to vector<12x64xbf16>
    %cst_50 = arith.constant dense<0.000000e+00> : vector<12x32xf32>
    %120 = tpu.matmul %119, %4, %cst_50 {dimension_numbers = #tpu.dot_dimension_numbers<[1], [0], [0], [1], [0, 0, 1, 1], [], []>} : vector<12x64xbf16>, vector<64x32xbf16>, vector<12x32xf32> -> vector<12x32xf32>
    %121 = vector.broadcast %5 : vector<1x32xf32> to vector<12x32xf32>
    %122 = arith.addf %120, %121 : vector<12x32xf32>
    %cst_51 = arith.constant 0.000000e+00 : f32
    %123 = vector.broadcast %cst_51 : f32 to vector<12x32xf32>
    %124 = arith.maximumf %122, %123 : vector<12x32xf32>
    %125 = vector.extract_strided_slice %3 {offsets = [0, 8], sizes = [12, 1], strides = [1, 1]} : vector<12x9xf32> to vector<12x1xf32>
    %126 = vector.broadcast %125 : vector<12x1xf32> to vector<12x32xf32>
    %127 = arith.mulf %124, %126 : vector<12x32xf32>
    %128 = arith.truncf %127 : vector<12x32xf32> to vector<12x32xbf16>
    %c8 = arith.constant 8 : index
    %c0_52 = arith.constant 0 : index
    %c0_53 = arith.constant 0 : index
    %129 = vector.load %arg5[%c8, %c0_52, %c0_53] : memref<9x32x32xbf16, #tpu.memory_space<vmem>>, vector<1x32x32xbf16>
    %130 = vector.shape_cast %129 : vector<1x32x32xbf16> to vector<32x32xbf16>
    %cst_54 = arith.constant dense<0.000000e+00> : vector<12x32xf32>
    %131 = tpu.matmul %128, %130, %cst_54 {dimension_numbers = #tpu.dot_dimension_numbers<[1], [0], [0], [1], [0, 0, 1, 1], [], []>} : vector<12x32xbf16>, vector<32x32xbf16>, vector<12x32xf32> -> vector<12x32xf32>
    %132 = arith.addf %118, %131 : vector<12x32xf32>
    %c0_55 = arith.constant 0 : index
    %c0_56 = arith.constant 0 : index
    %133 = vector.load %arg6[%c0_55, %c0_56] : memref<1x32xf32, #tpu.memory_space<vmem>>, vector<1x32xf32>
    %134 = vector.broadcast %133 : vector<1x32xf32> to vector<12x32xf32>
    %135 = arith.addf %132, %134 : vector<12x32xf32>
    %cst_57 = arith.constant 0.000000e+00 : f32
    %136 = vector.broadcast %cst_57 : f32 to vector<12x32xf32>
    %137 = arith.maximumf %135, %136 : vector<12x32xf32>
    %138 = arith.truncf %137 : vector<12x32xf32> to vector<12x32xbf16>
    %c0_58 = arith.constant 0 : index
    %c0_59 = arith.constant 0 : index
    %139 = vector.load %arg7[%c0_58, %c0_59] : memref<32x128xbf16, #tpu.memory_space<vmem>>, vector<32x128xbf16>
    %cst_60 = arith.constant dense<0.000000e+00> : vector<12x128xf32>
    %140 = tpu.matmul %138, %139, %cst_60 {dimension_numbers = #tpu.dot_dimension_numbers<[1], [0], [0], [1], [0, 0, 1, 1], [], []>} : vector<12x32xbf16>, vector<32x128xbf16>, vector<12x128xf32> -> vector<12x128xf32>
    %c0_61 = arith.constant 0 : index
    %c0_62 = arith.constant 0 : index
    %141 = vector.load %arg8[%c0_61, %c0_62] : memref<1x128xf32, #tpu.memory_space<vmem>>, vector<1x128xf32>
    %142 = vector.broadcast %141 : vector<1x128xf32> to vector<12x128xf32>
    %143 = arith.addf %140, %142 : vector<12x128xf32>
    %144 = vector.extract_strided_slice %1 {offsets = [0, 256], sizes = [12, 64], strides = [1, 1]} : vector<12x576xbf16> to vector<12x64xbf16>
    %c0_63 = arith.constant 0 : index
    %c0_64 = arith.constant 0 : index
    %145 = vector.load %arg9[%c0_63, %c0_64] : memref<64x128xbf16, #tpu.memory_space<vmem>>, vector<64x128xbf16>
    %cst_65 = arith.constant dense<0.000000e+00> : vector<12x128xf32>
    %146 = tpu.matmul %144, %145, %cst_65 {dimension_numbers = #tpu.dot_dimension_numbers<[1], [0], [0], [1], [0, 0, 1, 1], [], []>} : vector<12x64xbf16>, vector<64x128xbf16>, vector<12x128xf32> -> vector<12x128xf32>
    %c0_66 = arith.constant 0 : index
    %c0_67 = arith.constant 0 : index
    %147 = vector.load %arg10[%c0_66, %c0_67] : memref<1x128xf32, #tpu.memory_space<vmem>>, vector<1x128xf32>
    %148 = vector.broadcast %147 : vector<1x128xf32> to vector<12x128xf32>
    %149 = arith.addf %146, %148 : vector<12x128xf32>
    %150 = arith.addf %143, %149 : vector<12x128xf32>
    %cst_68 = arith.constant 0.000000e+00 : f32
    %151 = vector.broadcast %cst_68 : f32 to vector<12x128xf32>
    %152 = arith.maximumf %150, %151 : vector<12x128xf32>
    %153 = arith.truncf %152 : vector<12x128xf32> to vector<12x128xbf16>
    %c0_69 = arith.constant 0 : index
    %c0_70 = arith.constant 0 : index
    %c0_71 = arith.constant 0 : index
    %154 = vector.load %arg11[%c0_69, %c0_70, %c0_71] : memref<1x12x128xbf16, #tpu.memory_space<vmem>>, vector<1x12x128xbf16>
    %155 = vector.shape_cast %154 : vector<1x12x128xbf16> to vector<12x128xbf16>
    %156 = vector.shape_cast %153 : vector<12x128xbf16> to vector<1x12x128xbf16>
    tpu.vector_store %arg11[%c0_69, %c0_70, %c0_71], %156 {strides = array<i32>} : memref<1x12x128xbf16, #tpu.memory_space<vmem>>, vector<1x12x128xbf16>,
    return
  }
  func.func @transform_0(%arg0: i32) -> (i32, i32, i32) {
    %c0_i32 = arith.constant 0 : i32
    %c0_i32_0 = arith.constant 0 : i32
    %c0_i32_1 = arith.constant 0 : i32
    return %arg0, %c0_i32, %c0_i32_0 : i32, i32, i32
  }
  func.func @transform_1(%arg0: i32) -> (i32, i32, i32) {
    %c0_i32 = arith.constant 0 : i32
    %c0_i32_0 = arith.constant 0 : i32
    %c0_i32_1 = arith.constant 0 : i32
    %c0_i32_2 = arith.constant 0 : i32
    return %c0_i32, %c0_i32_0, %c0_i32_1 : i32, i32, i32
  }
  func.func @transform_2(%arg0: i32) -> (i32, i32) {
    %c0_i32 = arith.constant 0 : i32
    %c0_i32_0 = arith.constant 0 : i32
    %c0_i32_1 = arith.constant 0 : i32
    return %c0_i32, %c0_i32_0 : i32, i32
  }
  func.func @transform_3(%arg0: i32) -> (i32, i32) {
    %c0_i32 = arith.constant 0 : i32
    %c0_i32_0 = arith.constant 0 : i32
    %c0_i32_1 = arith.constant 0 : i32
    return %c0_i32, %c0_i32_0 : i32, i32
  }
  func.func @transform_4(%arg0: i32) -> (i32, i32, i32) {
    %c0_i32 = arith.constant 0 : i32
    %c0_i32_0 = arith.constant 0 : i32
    %c0_i32_1 = arith.constant 0 : i32
    %c0_i32_2 = arith.constant 0 : i32
    return %c0_i32, %c0_i32_0, %c0_i32_1 : i32, i32, i32
  }
  func.func @transform_5(%arg0: i32) -> (i32, i32) {
    %c0_i32 = arith.constant 0 : i32
    %c0_i32_0 = arith.constant 0 : i32
    %c0_i32_1 = arith.constant 0 : i32
    return %c0_i32, %c0_i32_0 : i32, i32
  }
  func.func @transform_6(%arg0: i32) -> (i32, i32) {
    %c0_i32 = arith.constant 0 : i32
    %c0_i32_0 = arith.constant 0 : i32
    %c0_i32_1 = arith.constant 0 : i32
    return %c0_i32, %c0_i32_0 : i32, i32
  }
  func.func @transform_7(%arg0: i32) -> (i32, i32) {
    %c0_i32 = arith.constant 0 : i32
    %c0_i32_0 = arith.constant 0 : i32
    %c0_i32_1 = arith.constant 0 : i32
    return %c0_i32, %c0_i32_0 : i32, i32
  }
  func.func @transform_8(%arg0: i32) -> (i32, i32) {
    %c0_i32 = arith.constant 0 : i32
    %c0_i32_0 = arith.constant 0 : i32
    %c0_i32_1 = arith.constant 0 : i32
    return %c0_i32, %c0_i32_0 : i32, i32
  }
  func.func @transform_9(%arg0: i32) -> (i32, i32) {
    %c0_i32 = arith.constant 0 : i32
    %c0_i32_0 = arith.constant 0 : i32
    %c0_i32_1 = arith.constant 0 : i32
    return %c0_i32, %c0_i32_0 : i32, i32
  }
  func.func @transform_10(%arg0: i32) -> (i32, i32, i32) {
    %c0_i32 = arith.constant 0 : i32
    %c0_i32_0 = arith.constant 0 : i32
    %c0_i32_1 = arith.constant 0 : i32
    return %arg0, %c0_i32, %c0_i32_0 : i32, i32, i32
  }
}

module attributes {stable_mosaic.version = 11 : i64} {
  func.func @_bottleneck_s1_kernel(%arg0: i32, %arg1: memref<1x18x128xbf16, #tpu.memory_space<vmem>>, %arg2: memref<1x12x9xf32, #tpu.memory_space<vmem>>, %arg3: memref<128x64xbf16, #tpu.memory_space<vmem>>, %arg4: memref<1x64xf32, #tpu.memory_space<vmem>>, %arg5: memref<9x64x64xbf16, #tpu.memory_space<vmem>>, %arg6: memref<1x64xf32, #tpu.memory_space<vmem>>, %arg7: memref<64x256xbf16, #tpu.memory_space<vmem>>, %arg8: memref<1x256xf32, #tpu.memory_space<vmem>>, %arg9: memref<128x256xbf16, #tpu.memory_space<vmem>>, %arg10: memref<1x256xf32, #tpu.memory_space<vmem>>, %arg11: memref<6x12xf32, #tpu.memory_space<vmem>>, %arg12: memref<1x6x256xf32, #tpu.memory_space<vmem>>) attributes {dimension_semantics = [#tpu.dimension_semantics<parallel>], iteration_bounds = array<i64: 2>, scalar_prefetch = 0 : i64, scratch_operands = 0 : i64, tpu.core_type = #tpu.core_type<tc>, window_params = [{transform_indices = @transform_0, window_bounds = array<i64: 1, 18, 128>}, {pipeline_mode = #tpu.pipeline_mode<synchronous>, transform_indices = @transform_1, window_bounds = array<i64: 1, 12, 9>}, {pipeline_mode = #tpu.pipeline_mode<synchronous>, transform_indices = @transform_2, window_bounds = array<i64: 128, 64>}, {pipeline_mode = #tpu.pipeline_mode<synchronous>, transform_indices = @transform_3, window_bounds = array<i64: 1, 64>}, {pipeline_mode = #tpu.pipeline_mode<synchronous>, transform_indices = @transform_4, window_bounds = array<i64: 9, 64, 64>}, {pipeline_mode = #tpu.pipeline_mode<synchronous>, transform_indices = @transform_5, window_bounds = array<i64: 1, 64>}, {pipeline_mode = #tpu.pipeline_mode<synchronous>, transform_indices = @transform_6, window_bounds = array<i64: 64, 256>}, {pipeline_mode = #tpu.pipeline_mode<synchronous>, transform_indices = @transform_7, window_bounds = array<i64: 1, 256>}, {pipeline_mode = #tpu.pipeline_mode<synchronous>, transform_indices = @transform_8, window_bounds = array<i64: 128, 256>}, {pipeline_mode = #tpu.pipeline_mode<synchronous>, transform_indices = @transform_9, window_bounds = array<i64: 1, 256>}, {pipeline_mode = #tpu.pipeline_mode<synchronous>, transform_indices = @transform_10, window_bounds = array<i64: 6, 12>}, {transform_indices = @transform_11, window_bounds = array<i64: 1, 6, 256>}]} {
    %c0 = arith.constant 0 : index
    %c0_0 = arith.constant 0 : index
    %c0_1 = arith.constant 0 : index
    %0 = vector.load %arg1[%c0, %c0_0, %c0_1] : memref<1x18x128xbf16, #tpu.memory_space<vmem>>, vector<1x18x128xbf16>
    %1 = vector.shape_cast %0 : vector<1x18x128xbf16> to vector<18x128xbf16>
    %c0_2 = arith.constant 0 : index
    %c0_3 = arith.constant 0 : index
    %c0_4 = arith.constant 0 : index
    %2 = vector.load %arg2[%c0_2, %c0_3, %c0_4] : memref<1x12x9xf32, #tpu.memory_space<vmem>>, vector<1x12x9xf32>
    %3 = vector.shape_cast %2 : vector<1x12x9xf32> to vector<12x9xf32>
    %c0_5 = arith.constant 0 : index
    %c0_6 = arith.constant 0 : index
    %4 = vector.load %arg3[%c0_5, %c0_6] : memref<128x64xbf16, #tpu.memory_space<vmem>>, vector<128x64xbf16>
    %cst = arith.constant dense<0.000000e+00> : vector<18x64xf32>
    %5 = tpu.matmul %1, %4, %cst {dimension_numbers = #tpu.dot_dimension_numbers<[1], [0], [0], [1], [0, 0, 1, 1], [], []>} : vector<18x128xbf16>, vector<128x64xbf16>, vector<18x64xf32> -> vector<18x64xf32>
    %c0_7 = arith.constant 0 : index
    %c0_8 = arith.constant 0 : index
    %6 = vector.load %arg4[%c0_7, %c0_8] : memref<1x64xf32, #tpu.memory_space<vmem>>, vector<1x64xf32>
    %7 = vector.broadcast %6 : vector<1x64xf32> to vector<18x64xf32>
    %8 = arith.addf %5, %7 : vector<18x64xf32>
    %cst_9 = arith.constant 0.000000e+00 : f32
    %9 = vector.broadcast %cst_9 : f32 to vector<18x64xf32>
    %10 = arith.maximumf %8, %9 : vector<18x64xf32>
    %cst_10 = arith.constant 0.000000e+00 : f32
    %11 = vector.broadcast %cst_10 : f32 to vector<12x64xf32>
    %12 = vector.extract_strided_slice %10 {offsets = [0, 0], sizes = [12, 64], strides = [1, 1]} : vector<18x64xf32> to vector<12x64xf32>
    %13 = vector.extract_strided_slice %3 {offsets = [0, 0], sizes = [12, 1], strides = [1, 1]} : vector<12x9xf32> to vector<12x1xf32>
    %14 = vector.broadcast %13 : vector<12x1xf32> to vector<12x64xf32>
    %15 = arith.mulf %12, %14 : vector<12x64xf32>
    %16 = arith.truncf %15 : vector<12x64xf32> to vector<12x64xbf16>
    %c0_11 = arith.constant 0 : index
    %c0_12 = arith.constant 0 : index
    %c0_13 = arith.constant 0 : index
    %17 = vector.load %arg5[%c0_11, %c0_12, %c0_13] : memref<9x64x64xbf16, #tpu.memory_space<vmem>>, vector<1x64x64xbf16>
    %18 = vector.shape_cast %17 : vector<1x64x64xbf16> to vector<64x64xbf16>
    %cst_14 = arith.constant dense<0.000000e+00> : vector<12x64xf32>
    %19 = tpu.matmul %16, %18, %cst_14 {dimension_numbers = #tpu.dot_dimension_numbers<[1], [0], [0], [1], [0, 0, 1, 1], [], []>} : vector<12x64xbf16>, vector<64x64xbf16>, vector<12x64xf32> -> vector<12x64xf32>
    %20 = arith.addf %11, %19 : vector<12x64xf32>
    %21 = vector.extract_strided_slice %10 {offsets = [1, 0], sizes = [12, 64], strides = [1, 1]} : vector<18x64xf32> to vector<12x64xf32>
    %22 = vector.extract_strided_slice %3 {offsets = [0, 1], sizes = [12, 1], strides = [1, 1]} : vector<12x9xf32> to vector<12x1xf32>
    %23 = vector.broadcast %22 : vector<12x1xf32> to vector<12x64xf32>
    %24 = arith.mulf %21, %23 : vector<12x64xf32>
    %25 = arith.truncf %24 : vector<12x64xf32> to vector<12x64xbf16>
    %c1 = arith.constant 1 : index
    %c0_15 = arith.constant 0 : index
    %c0_16 = arith.constant 0 : index
    %26 = vector.load %arg5[%c1, %c0_15, %c0_16] : memref<9x64x64xbf16, #tpu.memory_space<vmem>>, vector<1x64x64xbf16>
    %27 = vector.shape_cast %26 : vector<1x64x64xbf16> to vector<64x64xbf16>
    %cst_17 = arith.constant dense<0.000000e+00> : vector<12x64xf32>
    %28 = tpu.matmul %25, %27, %cst_17 {dimension_numbers = #tpu.dot_dimension_numbers<[1], [0], [0], [1], [0, 0, 1, 1], [], []>} : vector<12x64xbf16>, vector<64x64xbf16>, vector<12x64xf32> -> vector<12x64xf32>
    %29 = arith.addf %20, %28 : vector<12x64xf32>
    %30 = vector.extract_strided_slice %10 {offsets = [2, 0], sizes = [12, 64], strides = [1, 1]} : vector<18x64xf32> to vector<12x64xf32>
    %31 = vector.extract_strided_slice %3 {offsets = [0, 2], sizes = [12, 1], strides = [1, 1]} : vector<12x9xf32> to vector<12x1xf32>
    %32 = vector.broadcast %31 : vector<12x1xf32> to vector<12x64xf32>
    %33 = arith.mulf %30, %32 : vector<12x64xf32>
    %34 = arith.truncf %33 : vector<12x64xf32> to vector<12x64xbf16>
    %c2 = arith.constant 2 : index
    %c0_18 = arith.constant 0 : index
    %c0_19 = arith.constant 0 : index
    %35 = vector.load %arg5[%c2, %c0_18, %c0_19] : memref<9x64x64xbf16, #tpu.memory_space<vmem>>, vector<1x64x64xbf16>
    %36 = vector.shape_cast %35 : vector<1x64x64xbf16> to vector<64x64xbf16>
    %cst_20 = arith.constant dense<0.000000e+00> : vector<12x64xf32>
    %37 = tpu.matmul %34, %36, %cst_20 {dimension_numbers = #tpu.dot_dimension_numbers<[1], [0], [0], [1], [0, 0, 1, 1], [], []>} : vector<12x64xbf16>, vector<64x64xbf16>, vector<12x64xf32> -> vector<12x64xf32>
    %38 = arith.addf %29, %37 : vector<12x64xf32>
    %39 = vector.extract_strided_slice %10 {offsets = [2, 0], sizes = [12, 64], strides = [1, 1]} : vector<18x64xf32> to vector<12x64xf32>
    %40 = vector.extract_strided_slice %3 {offsets = [0, 3], sizes = [12, 1], strides = [1, 1]} : vector<12x9xf32> to vector<12x1xf32>
    %41 = vector.broadcast %40 : vector<12x1xf32> to vector<12x64xf32>
    %42 = arith.mulf %39, %41 : vector<12x64xf32>
    %43 = arith.truncf %42 : vector<12x64xf32> to vector<12x64xbf16>
    %c3 = arith.constant 3 : index
    %c0_21 = arith.constant 0 : index
    %c0_22 = arith.constant 0 : index
    %44 = vector.load %arg5[%c3, %c0_21, %c0_22] : memref<9x64x64xbf16, #tpu.memory_space<vmem>>, vector<1x64x64xbf16>
    %45 = vector.shape_cast %44 : vector<1x64x64xbf16> to vector<64x64xbf16>
    %cst_23 = arith.constant dense<0.000000e+00> : vector<12x64xf32>
    %46 = tpu.matmul %43, %45, %cst_23 {dimension_numbers = #tpu.dot_dimension_numbers<[1], [0], [0], [1], [0, 0, 1, 1], [], []>} : vector<12x64xbf16>, vector<64x64xbf16>, vector<12x64xf32> -> vector<12x64xf32>
    %47 = arith.addf %38, %46 : vector<12x64xf32>
    %48 = vector.extract_strided_slice %10 {offsets = [3, 0], sizes = [12, 64], strides = [1, 1]} : vector<18x64xf32> to vector<12x64xf32>
    %49 = arith.truncf %48 : vector<12x64xf32> to vector<12x64xbf16>
    %c4 = arith.constant 4 : index
    %c0_24 = arith.constant 0 : index
    %c0_25 = arith.constant 0 : index
    %50 = vector.load %arg5[%c4, %c0_24, %c0_25] : memref<9x64x64xbf16, #tpu.memory_space<vmem>>, vector<1x64x64xbf16>
    %51 = vector.shape_cast %50 : vector<1x64x64xbf16> to vector<64x64xbf16>
    %cst_26 = arith.constant dense<0.000000e+00> : vector<12x64xf32>
    %52 = tpu.matmul %49, %51, %cst_26 {dimension_numbers = #tpu.dot_dimension_numbers<[1], [0], [0], [1], [0, 0, 1, 1], [], []>} : vector<12x64xbf16>, vector<64x64xbf16>, vector<12x64xf32> -> vector<12x64xf32>
    %53 = arith.addf %47, %52 : vector<12x64xf32>
    %54 = vector.extract_strided_slice %10 {offsets = [4, 0], sizes = [12, 64], strides = [1, 1]} : vector<18x64xf32> to vector<12x64xf32>
    %55 = vector.extract_strided_slice %3 {offsets = [0, 5], sizes = [12, 1], strides = [1, 1]} : vector<12x9xf32> to vector<12x1xf32>
    %56 = vector.broadcast %55 : vector<12x1xf32> to vector<12x64xf32>
    %57 = arith.mulf %54, %56 : vector<12x64xf32>
    %58 = arith.truncf %57 : vector<12x64xf32> to vector<12x64xbf16>
    %c5 = arith.constant 5 : index
    %c0_27 = arith.constant 0 : index
    %c0_28 = arith.constant 0 : index
    %59 = vector.load %arg5[%c5, %c0_27, %c0_28] : memref<9x64x64xbf16, #tpu.memory_space<vmem>>, vector<1x64x64xbf16>
    %60 = vector.shape_cast %59 : vector<1x64x64xbf16> to vector<64x64xbf16>
    %cst_29 = arith.constant dense<0.000000e+00> : vector<12x64xf32>
    %61 = tpu.matmul %58, %60, %cst_29 {dimension_numbers = #tpu.dot_dimension_numbers<[1], [0], [0], [1], [0, 0, 1, 1], [], []>} : vector<12x64xbf16>, vector<64x64xbf16>, vector<12x64xf32> -> vector<12x64xf32>
    %62 = arith.addf %53, %61 : vector<12x64xf32>
    %63 = vector.extract_strided_slice %10 {offsets = [4, 0], sizes = [12, 64], strides = [1, 1]} : vector<18x64xf32> to vector<12x64xf32>
    %64 = vector.extract_strided_slice %3 {offsets = [0, 6], sizes = [12, 1], strides = [1, 1]} : vector<12x9xf32> to vector<12x1xf32>
    %65 = vector.broadcast %64 : vector<12x1xf32> to vector<12x64xf32>
    %66 = arith.mulf %63, %65 : vector<12x64xf32>
    %67 = arith.truncf %66 : vector<12x64xf32> to vector<12x64xbf16>
    %c6 = arith.constant 6 : index
    %c0_30 = arith.constant 0 : index
    %c0_31 = arith.constant 0 : index
    %68 = vector.load %arg5[%c6, %c0_30, %c0_31] : memref<9x64x64xbf16, #tpu.memory_space<vmem>>, vector<1x64x64xbf16>
    %69 = vector.shape_cast %68 : vector<1x64x64xbf16> to vector<64x64xbf16>
    %cst_32 = arith.constant dense<0.000000e+00> : vector<12x64xf32>
    %70 = tpu.matmul %67, %69, %cst_32 {dimension_numbers = #tpu.dot_dimension_numbers<[1], [0], [0], [1], [0, 0, 1, 1], [], []>} : vector<12x64xbf16>, vector<64x64xbf16>, vector<12x64xf32> -> vector<12x64xf32>
    %71 = arith.addf %62, %70 : vector<12x64xf32>
    %72 = vector.extract_strided_slice %10 {offsets = [5, 0], sizes = [12, 64], strides = [1, 1]} : vector<18x64xf32> to vector<12x64xf32>
    %73 = vector.extract_strided_slice %3 {offsets = [0, 7], sizes = [12, 1], strides = [1, 1]} : vector<12x9xf32> to vector<12x1xf32>
    %74 = vector.broadcast %73 : vector<12x1xf32> to vector<12x64xf32>
    %75 = arith.mulf %72, %74 : vector<12x64xf32>
    %76 = arith.truncf %75 : vector<12x64xf32> to vector<12x64xbf16>
    %c7 = arith.constant 7 : index
    %c0_33 = arith.constant 0 : index
    %c0_34 = arith.constant 0 : index
    %77 = vector.load %arg5[%c7, %c0_33, %c0_34] : memref<9x64x64xbf16, #tpu.memory_space<vmem>>, vector<1x64x64xbf16>
    %78 = vector.shape_cast %77 : vector<1x64x64xbf16> to vector<64x64xbf16>
    %cst_35 = arith.constant dense<0.000000e+00> : vector<12x64xf32>
    %79 = tpu.matmul %76, %78, %cst_35 {dimension_numbers = #tpu.dot_dimension_numbers<[1], [0], [0], [1], [0, 0, 1, 1], [], []>} : vector<12x64xbf16>, vector<64x64xbf16>, vector<12x64xf32> -> vector<12x64xf32>
    %80 = arith.addf %71, %79 : vector<12x64xf32>
    %81 = vector.extract_strided_slice %10 {offsets = [6, 0], sizes = [12, 64], strides = [1, 1]} : vector<18x64xf32> to vector<12x64xf32>
    %82 = vector.extract_strided_slice %3 {offsets = [0, 8], sizes = [12, 1], strides = [1, 1]} : vector<12x9xf32> to vector<12x1xf32>
    %83 = vector.broadcast %82 : vector<12x1xf32> to vector<12x64xf32>
    %84 = arith.mulf %81, %83 : vector<12x64xf32>
    %85 = arith.truncf %84 : vector<12x64xf32> to vector<12x64xbf16>
    %c8 = arith.constant 8 : index
    %c0_36 = arith.constant 0 : index
    %c0_37 = arith.constant 0 : index
    %86 = vector.load %arg5[%c8, %c0_36, %c0_37] : memref<9x64x64xbf16, #tpu.memory_space<vmem>>, vector<1x64x64xbf16>
    %87 = vector.shape_cast %86 : vector<1x64x64xbf16> to vector<64x64xbf16>
    %cst_38 = arith.constant dense<0.000000e+00> : vector<12x64xf32>
    %88 = tpu.matmul %85, %87, %cst_38 {dimension_numbers = #tpu.dot_dimension_numbers<[1], [0], [0], [1], [0, 0, 1, 1], [], []>} : vector<12x64xbf16>, vector<64x64xbf16>, vector<12x64xf32> -> vector<12x64xf32>
    %89 = arith.addf %80, %88 : vector<12x64xf32>
    %c0_39 = arith.constant 0 : index
    %c0_40 = arith.constant 0 : index
    %90 = vector.load %arg6[%c0_39, %c0_40] : memref<1x64xf32, #tpu.memory_space<vmem>>, vector<1x64xf32>
    %91 = vector.broadcast %90 : vector<1x64xf32> to vector<12x64xf32>
    %92 = arith.addf %89, %91 : vector<12x64xf32>
    %cst_41 = arith.constant 0.000000e+00 : f32
    %93 = vector.broadcast %cst_41 : f32 to vector<12x64xf32>
    %94 = arith.maximumf %92, %93 : vector<12x64xf32>
    %95 = arith.truncf %94 : vector<12x64xf32> to vector<12x64xbf16>
    %c0_42 = arith.constant 0 : index
    %c0_43 = arith.constant 0 : index
    %96 = vector.load %arg7[%c0_42, %c0_43] : memref<64x256xbf16, #tpu.memory_space<vmem>>, vector<64x256xbf16>
    %cst_44 = arith.constant dense<0.000000e+00> : vector<12x256xf32>
    %97 = tpu.matmul %95, %96, %cst_44 {dimension_numbers = #tpu.dot_dimension_numbers<[1], [0], [0], [1], [0, 0, 1, 1], [], []>} : vector<12x64xbf16>, vector<64x256xbf16>, vector<12x256xf32> -> vector<12x256xf32>
    %c0_45 = arith.constant 0 : index
    %c0_46 = arith.constant 0 : index
    %98 = vector.load %arg8[%c0_45, %c0_46] : memref<1x256xf32, #tpu.memory_space<vmem>>, vector<1x256xf32>
    %99 = vector.broadcast %98 : vector<1x256xf32> to vector<12x256xf32>
    %100 = arith.addf %97, %99 : vector<12x256xf32>
    %101 = vector.extract_strided_slice %1 {offsets = [3, 0], sizes = [12, 128], strides = [1, 1]} : vector<18x128xbf16> to vector<12x128xbf16>
    %c0_47 = arith.constant 0 : index
    %c0_48 = arith.constant 0 : index
    %102 = vector.load %arg9[%c0_47, %c0_48] : memref<128x256xbf16, #tpu.memory_space<vmem>>, vector<128x256xbf16>
    %cst_49 = arith.constant dense<0.000000e+00> : vector<12x256xf32>
    %103 = tpu.matmul %101, %102, %cst_49 {dimension_numbers = #tpu.dot_dimension_numbers<[1], [0], [0], [1], [0, 0, 1, 1], [], []>} : vector<12x128xbf16>, vector<128x256xbf16>, vector<12x256xf32> -> vector<12x256xf32>
    %c0_50 = arith.constant 0 : index
    %c0_51 = arith.constant 0 : index
    %104 = vector.load %arg10[%c0_50, %c0_51] : memref<1x256xf32, #tpu.memory_space<vmem>>, vector<1x256xf32>
    %105 = vector.broadcast %104 : vector<1x256xf32> to vector<12x256xf32>
    %106 = arith.addf %103, %105 : vector<12x256xf32>
    %107 = arith.addf %100, %106 : vector<12x256xf32>
    %cst_52 = arith.constant 0.000000e+00 : f32
    %108 = vector.broadcast %cst_52 : f32 to vector<12x256xf32>
    %109 = arith.maximumf %107, %108 : vector<12x256xf32>
    %c0_53 = arith.constant 0 : index
    %c0_54 = arith.constant 0 : index
    %110 = vector.load %arg11[%c0_53, %c0_54] : memref<6x12xf32, #tpu.memory_space<vmem>>, vector<6x12xf32>
    %cst_55 = arith.constant dense<0.000000e+00> : vector<6x256xf32>
    %111 = tpu.matmul %110, %109, %cst_55 {dimension_numbers = #tpu.dot_dimension_numbers<[1], [0], [0], [1], [0, 0, 1, 1], [], []>} : vector<6x12xf32>, vector<12x256xf32>, vector<6x256xf32> -> vector<6x256xf32>
    %c0_56 = arith.constant 0 : index
    %c0_57 = arith.constant 0 : index
    %c0_58 = arith.constant 0 : index
    %112 = vector.load %arg12[%c0_56, %c0_57, %c0_58] : memref<1x6x256xf32, #tpu.memory_space<vmem>>, vector<1x6x256xf32>
    %113 = vector.shape_cast %112 : vector<1x6x256xf32> to vector<6x256xf32>
    %114 = vector.shape_cast %111 : vector<6x256xf32> to vector<1x6x256xf32>
    tpu.vector_store %arg12[%c0_56, %c0_57, %c0_58], %114 {strides = array<i32>} : memref<1x6x256xf32, #tpu.memory_space<vmem>>, vector<1x6x256xf32>,
    return
  }
  func.func @transform_0(%arg0: i32) -> (i32, i32, i32) {
    %c0_i32 = arith.constant 0 : i32
    %c0_i32_0 = arith.constant 0 : i32
    %c0_i32_1 = arith.constant 0 : i32
    return %arg0, %c0_i32, %c0_i32_0 : i32, i32, i32
  }
  func.func @transform_1(%arg0: i32) -> (i32, i32, i32) {
    %c0_i32 = arith.constant 0 : i32
    %c0_i32_0 = arith.constant 0 : i32
    %c0_i32_1 = arith.constant 0 : i32
    %c0_i32_2 = arith.constant 0 : i32
    return %c0_i32, %c0_i32_0, %c0_i32_1 : i32, i32, i32
  }
  func.func @transform_2(%arg0: i32) -> (i32, i32) {
    %c0_i32 = arith.constant 0 : i32
    %c0_i32_0 = arith.constant 0 : i32
    %c0_i32_1 = arith.constant 0 : i32
    return %c0_i32, %c0_i32_0 : i32, i32
  }
  func.func @transform_3(%arg0: i32) -> (i32, i32) {
    %c0_i32 = arith.constant 0 : i32
    %c0_i32_0 = arith.constant 0 : i32
    %c0_i32_1 = arith.constant 0 : i32
    return %c0_i32, %c0_i32_0 : i32, i32
  }
  func.func @transform_4(%arg0: i32) -> (i32, i32, i32) {
    %c0_i32 = arith.constant 0 : i32
    %c0_i32_0 = arith.constant 0 : i32
    %c0_i32_1 = arith.constant 0 : i32
    %c0_i32_2 = arith.constant 0 : i32
    return %c0_i32, %c0_i32_0, %c0_i32_1 : i32, i32, i32
  }
  func.func @transform_5(%arg0: i32) -> (i32, i32) {
    %c0_i32 = arith.constant 0 : i32
    %c0_i32_0 = arith.constant 0 : i32
    %c0_i32_1 = arith.constant 0 : i32
    return %c0_i32, %c0_i32_0 : i32, i32
  }
  func.func @transform_6(%arg0: i32) -> (i32, i32) {
    %c0_i32 = arith.constant 0 : i32
    %c0_i32_0 = arith.constant 0 : i32
    %c0_i32_1 = arith.constant 0 : i32
    return %c0_i32, %c0_i32_0 : i32, i32
  }
  func.func @transform_7(%arg0: i32) -> (i32, i32) {
    %c0_i32 = arith.constant 0 : i32
    %c0_i32_0 = arith.constant 0 : i32
    %c0_i32_1 = arith.constant 0 : i32
    return %c0_i32, %c0_i32_0 : i32, i32
  }
  func.func @transform_8(%arg0: i32) -> (i32, i32) {
    %c0_i32 = arith.constant 0 : i32
    %c0_i32_0 = arith.constant 0 : i32
    %c0_i32_1 = arith.constant 0 : i32
    return %c0_i32, %c0_i32_0 : i32, i32
  }
  func.func @transform_9(%arg0: i32) -> (i32, i32) {
    %c0_i32 = arith.constant 0 : i32
    %c0_i32_0 = arith.constant 0 : i32
    %c0_i32_1 = arith.constant 0 : i32
    return %c0_i32, %c0_i32_0 : i32, i32
  }
  func.func @transform_10(%arg0: i32) -> (i32, i32) {
    %c0_i32 = arith.constant 0 : i32
    %c0_i32_0 = arith.constant 0 : i32
    %c0_i32_1 = arith.constant 0 : i32
    return %c0_i32, %c0_i32_0 : i32, i32
  }
  func.func @transform_11(%arg0: i32) -> (i32, i32, i32) {
    %c0_i32 = arith.constant 0 : i32
    %c0_i32_0 = arith.constant 0 : i32
    %c0_i32_1 = arith.constant 0 : i32
    return %arg0, %c0_i32, %c0_i32_0 : i32, i32, i32
  }
}

</mosaic_0001>

<bundles_post_ra>
// kernel: pcb_test_forward.6
= control target key start
LH: loop header
LB: loop body
LE: loop exit
PB: predicated region body
PF: predicated region fallthrough
CT: control target
= control target key end

     0   :  { %s1157_s12 = smov 0   ;;  %s1361_s0 = inlined_call_operand.vmem [shape: bf16[1536,147], index: 0, kind: input, shape index: {}]   ;;  %s1362_s1 = inlined_call_operand.vmem [shape: bf16[147,16], index: 1, kind: input, shape index: {}]   ;;  %s1363_s2 = inlined_call_operand.vmem [shape: f32[1,16], index: 2, kind: input, shape index: {}]   ;;  %s1364_s3 = inlined_call_operand.vmem [shape: bf16[1536,16], index: 3, kind: output, shape index: {}]  }
   0x1 LB: > { %s903_s13 = sadd.s32 4294967295, %s1133_s12   ;;  %p907_p0 = scmp.ge.s32.totalorder %s1133_s12, 1  ;;  %s1133_s12 = sphi %s1157_s12, %s13_s12  }
   0x2   : > { %p139_p1 = scmp.lt.s32.totalorder %s1133_s12, 7 }
   0x4   : > { %p140_p2 = pnand %p907_p0, %p139_p1 }
   0x5   : > { %s908_s20 = sshll.u32 (!%p140_p2), %s903_s13, 5 }
   0x6   : > { %143 = sbr.rel (%p140_p2) target bundleno = 312 (0x138), region = 32  ;;  %p165_p3 = scmp.lt.s32.totalorder (!%p140_p2), %s908_s20, 191 }
   0xb   : > { %v1069_v0 = vld [vmem:[%s1362_s1 + $0x38] sm:$0xff]   ;;  %v1135_v1 = vmov 0   ;;  %v1070_v2 = vld [vmem:[%s1362_s1 + $0x30] sm:$0xff]   ;;  %v1071_v3 = vld [vmem:[%s1362_s1 + $0x28] sm:$0xff]   ;;  %s1366_s20 = smov (!%p165_p3, %s908_s20), 191  ;;  %vm437_vm0 = vcmask 154624  }
   0xc   : > { %493 = vmatprep.subr.bf16.mxu0 %v1135_v1  ;;  %1039 = vmatprep.subr.bf16.mxu1 %v1135_v1  ;;  %v1072_v4 = vld [vmem:[%s1362_s1 + $0x20] sm:$0xff]   ;;  %s1006_s23 = sshll.u32 %s1366_s20, 3  ;;  %v1073_v5 = vld [vmem:[%s1362_s1 + $0x18] sm:$0xff]   ;;  %v1074_v8 = vld [vmem:[%s1362_s1 + $0x10] sm:$0xff]   ;;  %vm486_vm1 = vcmask 1040384   ;;  %vm487_vm2 = vcmask 1041408  }
   0xd   : > { %494 = vmatpush1.bf16.msra.mxu0 %v1069_v0  ;;  %1049 = vmatpush1.bf16.msra.mxu1 %v1069_v0  ;;  %s1183_s26 = scalar_lea.vmem %s1361_s0, %s1006_s23  ;;  %v1075_v9 = vld [vmem:[%s1362_s1 + $0x8] sm:$0xff]   ;;  %v1136_v10 = vmov 65535   ;;  %v1076_v12 = vld [vmem:[%s1362_s1] sm:$0xff]   ;;  %s912_s15 = sshll.u32 %s1366_s20, 2  ;;  %vm814_vm3 = vcmask 125952  }
   0xe   : > { %495 = vmatprep.subr.bf16.mxu0 %v1135_v1  ;;  %1040 = vmatprep.subr.bf16.mxu1 %v1135_v1  ;;  %v1081_v6 = vld [vmem:[%s1183_s26 + $0x4] ss:$8 sps:$4 sm:$0xff]   ;;  %v488_v11 = vsel %vm486_vm1, 4294967295, %v1136_v10  ;;  %v1077_v13 = vld [vmem:[%s1362_s1 + $0x48] ss:$0 sps:$4 sm:$0x33]   ;;  %s1262_s18 = scalar_lea.vmem %s1364_s3, %s912_s15 }
   0xf   : > { %v1084_v7 = vld [vmem:[%s1183_s26 + $0x84] ss:$8 sps:$4 sm:$0xff]   ;;  %956 = vmatprep.mubr.msk.bf16.mxu0 %vm437_vm0, %v1081_v6  ;;  %v489_v14 = vsel %vm487_vm2, %v488_v11, 0  ;;  %v1079_v17 = vld [vmem:[%s1183_s26] ss:$8 sps:$4 sm:$0xff]  }
  0x10   : > { %964 = vmatprep.mubr.msk.bf16.mxu1 %vm437_vm0, %v1084_v7  ;;  %v491_v15 = vand.u32 %v1077_v13, %v489_v14  ;;  %v1078_v16 = vld [vmem:[%s1362_s1 + $0x40] sm:$0xff]   ;;  %v1085_v19 = vld [vmem:[%s1183_s26 + $0x14] ss:$8 sps:$4 sm:$0xff]   ;;  %v1089_v21 = vld [vmem:[%s1183_s26 + $0x10] ss:$8 sps:$4 sm:$0xff]  }
  0x11   : > { %496 = vmatpush1.bf16.msra.mxu0 %v1070_v2  ;;  %1050 = vmatpush1.bf16.msra.mxu1 %v1070_v2  ;;  %v1082_v18 = vld [vmem:[%s1183_s26 + $0x80] ss:$8 sps:$4 sm:$0xff]   ;;  %v1087_v20 = vld [vmem:[%s1183_s26 + $0x94] ss:$8 sps:$4 sm:$0xff]   ;;  %v1090_v22 = vld [vmem:[%s1183_s26 + $0x90] ss:$8 sps:$4 sm:$0xff]  }
  0x12   : > { %497 = vmatprep.subr.bf16.mxu0 %v1135_v1  ;;  %1041 = vmatprep.subr.bf16.mxu1 %v1135_v1  ;;  %v1091_v23 = vld [vmem:[%s1183_s26 + $0x24] ss:$8 sps:$4 sm:$0xff]   ;;  %v1095_v25 = vld [vmem:[%s1183_s26 + $0x20] ss:$8 sps:$4 sm:$0xff]   ;;  %v1097_v27 = vld [vmem:[%s1183_s26 + $0x34] ss:$8 sps:$4 sm:$0xff]  }
  0x13   : > { %v1093_v24 = vld [vmem:[%s1183_s26 + $0xa4] ss:$8 sps:$4 sm:$0xff]   ;;  %v1096_v26 = vld [vmem:[%s1183_s26 + $0xa0] ss:$8 sps:$4 sm:$0xff]   ;;  %v1099_v28 = vld [vmem:[%s1183_s26 + $0xb4] ss:$8 sps:$4 sm:$0xff]  }
  0x14   : > { %v1101_v29 = vld [vmem:[%s1183_s26 + $0x30] ss:$8 sps:$4 sm:$0xff]   ;;  %v1103_v31 = vld [vmem:[%s1183_s26 + $0x44] ss:$8 sps:$4 sm:$0xff]   ;;  %v1107_v33 = vld [vmem:[%s1183_s26 + $0x40] ss:$8 sps:$4 sm:$0xff]  }
  0x15   : > { %498 = vmatpush1.bf16.msra.mxu0 %v1071_v3  ;;  %1051 = vmatpush1.bf16.msra.mxu1 %v1071_v3  ;;  %v1102_v30 = vld [vmem:[%s1183_s26 + $0xb0] ss:$8 sps:$4 sm:$0xff]   ;;  %v1105_v32 = vld [vmem:[%s1183_s26 + $0xc4] ss:$8 sps:$4 sm:$0xff]   ;;  %v1108_v34 = vld [vmem:[%s1183_s26 + $0xc0] ss:$8 sps:$4 sm:$0xff]  }
  0x16   : > { %499 = vmatprep.subr.bf16.mxu0 %v1135_v1  ;;  %1042 = vmatprep.subr.bf16.mxu1 %v1135_v1  ;;  %v1109_v35 = vld [vmem:[%s1183_s26 + $0x54] ss:$8 sps:$4 sm:$0xff]   ;;  %v1113_v37 = vld [vmem:[%s1183_s26 + $0x50] ss:$8 sps:$4 sm:$0xff]   ;;  %v1115_v39 = vld [vmem:[%s1183_s26 + $0x64] ss:$8 sps:$4 sm:$0xff]  }
  0x17   : > { %v1111_v36 = vld [vmem:[%s1183_s26 + $0xd4] ss:$8 sps:$4 sm:$0xff]   ;;  %v1114_v38 = vld [vmem:[%s1183_s26 + $0xd0] ss:$8 sps:$4 sm:$0xff]   ;;  %v1117_v40 = vld [vmem:[%s1183_s26 + $0xe4] ss:$8 sps:$4 sm:$0xff]  }
  0x18   : > { %v1119_v41 = vld [vmem:[%s1183_s26 + $0x60] ss:$8 sps:$4 sm:$0xff]   ;;  %v1121_v43 = vld [vmem:[%s1183_s26 + $0x74] ss:$8 sps:$4 sm:$0xff]   ;;  %v1125_v45 = vld [vmem:[%s1183_s26 + $0x70] ss:$8 sps:$4 sm:$0xff]  }
  0x19   : > { %500 = vmatpush1.bf16.msra.mxu0 %v1072_v4  ;;  %1052 = vmatpush1.bf16.msra.mxu1 %v1072_v4  ;;  %v1120_v42 = vld [vmem:[%s1183_s26 + $0xe0] ss:$8 sps:$4 sm:$0xff]   ;;  %v1123_v44 = vld [vmem:[%s1183_s26 + $0xf4] ss:$8 sps:$4 sm:$0xff]   ;;  %v1126_v46 = vld [vmem:[%s1183_s26 + $0xf0] ss:$8 sps:$4 sm:$0xff]  }
  0x1a   : > { %501 = vmatprep.subr.bf16.mxu0 %v1135_v1  ;;  %1043 = vmatprep.subr.bf16.mxu1 %v1135_v1  ;;  %v1254_v47 = vld [vmem:[%s1363_s2] ss:$0 sm:$0xff] }
  0x1d   : > { %502 = vmatpush1.bf16.msra.mxu0 %v1073_v5  ;;  %1053 = vmatpush1.bf16.msra.mxu1 %v1073_v5 }
  0x1e   : > { %503 = vmatprep.subr.bf16.mxu0 %v1135_v1  ;;  %1044 = vmatprep.subr.bf16.mxu1 %v1135_v1 }
  0x21   : > { %504 = vmatpush1.bf16.msra.mxu0 %v1074_v8  ;;  %1054 = vmatpush1.bf16.msra.mxu1 %v1074_v8 }
  0x22   : > { %505 = vmatprep.subr.bf16.mxu0 %v1135_v1  ;;  %1045 = vmatprep.subr.bf16.mxu1 %v1135_v1 }
  0x25   : > { %506 = vmatpush1.bf16.msra.mxu0 %v1075_v9  ;;  %1055 = vmatpush1.bf16.msra.mxu1 %v1075_v9 }
  0x26   : > { %507 = vmatprep.subr.bf16.mxu0 %v1135_v1  ;;  %1046 = vmatprep.subr.bf16.mxu1 %v1135_v1 }
  0x29   : > { %508 = vmatpush1.bf16.msra.mxu0 %v1076_v12  ;;  %1056 = vmatpush1.bf16.msra.mxu1 %v1076_v12 }
  0x2a   : > { %521 = vmatprep.subr.bf16.mxu0 %v1135_v1  ;;  %1047 = vmatprep.subr.bf16.mxu1 %v1135_v1 }
  0x2d   : > { %522 = vmatpush2.bf16.msra.mxu0 %v491_v15  ;;  %1057 = vmatpush2.bf16.msra.mxu1 %v491_v15 }
  0x2e   : > { %523 = vmatprep.subr.bf16.mxu0 %v1135_v1  ;;  %1048 = vmatprep.subr.bf16.mxu1 %v1135_v1 }
  0x31   : > { %524 = vmatpush2.bf16.msra.mxu0 %v1078_v16  ;;  %1058 = vmatpush2.bf16.msra.mxu1 %v1078_v16 }
  0x34   : > { %526 = vmatmul.mubr.bf16.vlgmr.msra.gmra.mxu0 %v1079_v17  ;;  %590 = vmatmul.mubr.bf16.vlgmr.msra.gmra.mxu1 %v1082_v18 }
  0x35   : > { %957 = vmatprep.mubr.msk.bf16.mxu0 %vm437_vm0, %v1085_v19  ;;  %965 = vmatprep.mubr.msk.bf16.mxu1 %vm437_vm0, %v1087_v20 }
  0x3c   : > { %534 = vmatmul.mubr.bf16.gmra.mxu0 %v1089_v21  ;;  %598 = vmatmul.mubr.bf16.gmra.mxu1 %v1090_v22 }
  0x3d   : > { %958 = vmatprep.mubr.msk.bf16.mxu0 %vm437_vm0, %v1091_v23  ;;  %966 = vmatprep.mubr.msk.bf16.mxu1 %vm437_vm0, %v1093_v24 }
  0x44   : > { %542 = vmatmul.mubr.bf16.gmra.mxu0 %v1095_v25  ;;  %606 = vmatmul.mubr.bf16.gmra.mxu1 %v1096_v26 }
  0x45   : > { %959 = vmatprep.mubr.msk.bf16.mxu0 %vm437_vm0, %v1097_v27  ;;  %967 = vmatprep.mubr.msk.bf16.mxu1 %vm437_vm0, %v1099_v28 }
  0x4c   : > { %550 = vmatmul.mubr.bf16.gmra.mxu0 %v1101_v29  ;;  %614 = vmatmul.mubr.bf16.gmra.mxu1 %v1102_v30 }
  0x4d   : > { %960 = vmatprep.mubr.msk.bf16.mxu0 %vm437_vm0, %v1103_v31  ;;  %968 = vmatprep.mubr.msk.bf16.mxu1 %vm437_vm0, %v1105_v32 }
  0x54   : > { %558 = vmatmul.mubr.bf16.gmra.mxu0 %v1107_v33  ;;  %622 = vmatmul.mubr.bf16.gmra.mxu1 %v1108_v34 }
  0x55   : > { %961 = vmatprep.mubr.msk.bf16.mxu0 %vm437_vm0, %v1109_v35  ;;  %969 = vmatprep.mubr.msk.bf16.mxu1 %vm437_vm0, %v1111_v36 }
  0x5c   : > { %566 = vmatmul.mubr.bf16.gmra.mxu0 %v1113_v37  ;;  %630 = vmatmul.mubr.bf16.gmra.mxu1 %v1114_v38 }
  0x5d   : > { %962 = vmatprep.mubr.msk.bf16.mxu0 %vm437_vm0, %v1115_v39  ;;  %970 = vmatprep.mubr.msk.bf16.mxu1 %vm437_vm0, %v1117_v40 }
  0x64   : > { %574 = vmatmul.mubr.bf16.gmra.mxu0 %v1119_v41  ;;  %638 = vmatmul.mubr.bf16.gmra.mxu1 %v1120_v42 }
  0x65   : > { %963 = vmatprep.mubr.msk.bf16.mxu0 %vm437_vm0, %v1121_v43  ;;  %971 = vmatprep.mubr.msk.bf16.mxu1 %vm437_vm0, %v1123_v44 }
  0x6c   : > { %582 = vmatmul.mubr.bf16.gmra.mxu0 %v1125_v45  ;;  %646 = vmatmul.mubr.bf16.gmra.mxu1 %v1126_v46 }
  0xf4   : > { %v527_v48 = vpop.f32.mrf.mxu0  ;;  %v591_v49 = vpop.f32.mrf.mxu1 }
  0xf5   : > { %v528_v50 = vadd.f32 %v1254_v47, %v527_v48  ;;  %v592_v51 = vadd.f32 %v1254_v47, %v591_v49 }
  0xf6   : > { %v529_v52 = vpop.f32.mrf.mxu0  ;;  %v593_v53 = vpop.f32.mrf.mxu1 }
  0xf7   : > { %v654_v54 = vmax.f32 %v528_v50, 0.0  ;;  %v670_v55 = vmax.f32 %v592_v51, 0.0 }
  0xf8   : > { %v530_v56 = vpop.f32.mrf.mxu0  ;;  %v594_v57 = vpop.f32.mrf.mxu1 }
  0xf9   : > { %v1007_v58 = vpack.c.bf16 %v654_v54, %v654_v54  ;;  %v1023_v59 = vpack.c.bf16 %v670_v55, %v670_v55  ;;  %v531_v60 = vadd.f32 %v1254_v47, %v530_v56  ;;  %v595_v61 = vadd.f32 %v1254_v47, %v594_v57 }
  0xfa   : > { %v532_v62 = vpop.f32.mrf.mxu0  ;;  %v596_v63 = vpop.f32.mrf.mxu1 }
  0xfb   : > { %815 = vst.msk [vmem:[%s1262_s18] sm:$0xf] %vm814_vm3, %v1007_v58  ;;  %831 = vst.msk [vmem:[%s1262_s18 + $0x40] sm:$0xf] %vm814_vm3, %v1023_v59  ;;  %v655_v0 = vmax.f32 %v531_v60, 0.0  ;;  %v671_v1 = vmax.f32 %v595_v61, 0.0 }
  0xfc   : > { %v535_v2 = vpop.f32.mrf.mxu0  ;;  %v599_v3 = vpop.f32.mrf.mxu1 }
  0xfd   : > { %v1008_v4 = vpack.c.bf16 %v655_v0, %v655_v0  ;;  %v1024_v5 = vpack.c.bf16 %v671_v1, %v671_v1  ;;  %v536_v6 = vadd.f32 %v1254_v47, %v535_v2  ;;  %v600_v7 = vadd.f32 %v1254_v47, %v599_v3 }
  0xfe   : > { %v537_v8 = vpop.f32.mrf.mxu0  ;;  %v601_v9 = vpop.f32.mrf.mxu1 }
  0xff   : > { %816 = vst.msk [vmem:[%s1262_s18 + $0x4] sm:$0xf] %vm814_vm3, %v1008_v4  ;;  %832 = vst.msk [vmem:[%s1262_s18 + $0x44] sm:$0xf] %vm814_vm3, %v1024_v5  ;;  %v656_v10 = vmax.f32 %v536_v6, 0.0  ;;  %v672_v11 = vmax.f32 %v600_v7, 0.0 }
 0x100   : > { %v538_v12 = vpop.f32.mrf.mxu0  ;;  %v602_v13 = vpop.f32.mrf.mxu1 }
 0x101   : > { %v1009_v14 = vpack.c.bf16 %v656_v10, %v656_v10  ;;  %v1025_v15 = vpack.c.bf16 %v672_v11, %v672_v11  ;;  %v539_v16 = vadd.f32 %v1254_v47, %v538_v12  ;;  %v603_v17 = vadd.f32 %v1254_v47, %v602_v13 }
 0x102   : > { %v540_v18 = vpop.f32.mrf.mxu0  ;;  %v604_v19 = vpop.f32.mrf.mxu1 }
 0x103   : > { %817 = vst.msk [vmem:[%s1262_s18 + $0x8] sm:$0xf] %vm814_vm3, %v1009_v14  ;;  %833 = vst.msk [vmem:[%s1262_s18 + $0x48] sm:$0xf] %vm814_vm3, %v1025_v15  ;;  %v657_v20 = vmax.f32 %v539_v16, 0.0  ;;  %v673_v21 = vmax.f32 %v603_v17, 0.0 }
 0x104   : > { %v543_v22 = vpop.f32.mrf.mxu0  ;;  %v607_v23 = vpop.f32.mrf.mxu1 }
 0x105   : > { %v1010_v24 = vpack.c.bf16 %v657_v20, %v657_v20  ;;  %v1026_v25 = vpack.c.bf16 %v673_v21, %v673_v21  ;;  %v544_v26 = vadd.f32 %v1254_v47, %v543_v22  ;;  %v608_v27 = vadd.f32 %v1254_v47, %v607_v23 }
 0x106   : > { %v545_v28 = vpop.f32.mrf.mxu0  ;;  %v609_v29 = vpop.f32.mrf.mxu1 }
 0x107   : > { %818 = vst.msk [vmem:[%s1262_s18 + $0xc] sm:$0xf] %vm814_vm3, %v1010_v24  ;;  %834 = vst.msk [vmem:[%s1262_s18 + $0x4c] sm:$0xf] %vm814_vm3, %v1026_v25  ;;  %v658_v30 = vmax.f32 %v544_v26, 0.0  ;;  %v674_v31 = vmax.f32 %v608_v27, 0.0 }
 0x108   : > { %v546_v32 = vpop.f32.mrf.mxu0  ;;  %v610_v33 = vpop.f32.mrf.mxu1 }
 0x109   : > { %v1011_v34 = vpack.c.bf16 %v658_v30, %v658_v30  ;;  %v1027_v35 = vpack.c.bf16 %v674_v31, %v674_v31  ;;  %v547_v36 = vadd.f32 %v1254_v47, %v546_v32  ;;  %v611_v37 = vadd.f32 %v1254_v47, %v610_v33 }
 0x10a   : > { %v548_v38 = vpop.f32.mrf.mxu0  ;;  %v612_v39 = vpop.f32.mrf.mxu1 }
 0x10b   : > { %819 = vst.msk [vmem:[%s1262_s18 + $0x10] sm:$0xf] %vm814_vm3, %v1011_v34  ;;  %835 = vst.msk [vmem:[%s1262_s18 + $0x50] sm:$0xf] %vm814_vm3, %v1027_v35  ;;  %v659_v40 = vmax.f32 %v547_v36, 0.0  ;;  %v675_v41 = vmax.f32 %v611_v37, 0.0 }
 0x10c   : > { %v551_v42 = vpop.f32.mrf.mxu0  ;;  %v615_v43 = vpop.f32.mrf.mxu1 }
 0x10d   : > { %v1012_v44 = vpack.c.bf16 %v659_v40, %v659_v40  ;;  %v1028_v45 = vpack.c.bf16 %v675_v41, %v675_v41  ;;  %v552_v46 = vadd.f32 %v1254_v47, %v551_v42  ;;  %v616_v48 = vadd.f32 %v1254_v47, %v615_v43 }
 0x10e   : > { %v553_v49 = vpop.f32.mrf.mxu0  ;;  %v617_v50 = vpop.f32.mrf.mxu1 }
 0x10f   : > { %820 = vst.msk [vmem:[%s1262_s18 + $0x14] sm:$0xf] %vm814_vm3, %v1012_v44  ;;  %836 = vst.msk [vmem:[%s1262_s18 + $0x54] sm:$0xf] %vm814_vm3, %v1028_v45  ;;  %v660_v51 = vmax.f32 %v552_v46, 0.0  ;;  %v676_v52 = vmax.f32 %v616_v48, 0.0 }
 0x110   : > { %v554_v53 = vpop.f32.mrf.mxu0  ;;  %v618_v54 = vpop.f32.mrf.mxu1 }
 0x111   : > { %v1013_v55 = vpack.c.bf16 %v660_v51, %v660_v51  ;;  %v1029_v56 = vpack.c.bf16 %v676_v52, %v676_v52  ;;  %v555_v57 = vadd.f32 %v1254_v47, %v554_v53  ;;  %v619_v58 = vadd.f32 %v1254_v47, %v618_v54 }
 0x112   : > { %v556_v59 = vpop.f32.mrf.mxu0  ;;  %v620_v60 = vpop.f32.mrf.mxu1 }
 0x113   : > { %821 = vst.msk [vmem:[%s1262_s18 + $0x18] sm:$0xf] %vm814_vm3, %v1013_v55  ;;  %837 = vst.msk [vmem:[%s1262_s18 + $0x58] sm:$0xf] %vm814_vm3, %v1029_v56  ;;  %v661_v61 = vmax.f32 %v555_v57, 0.0  ;;  %v677_v62 = vmax.f32 %v619_v58, 0.0 }
 0x114   : > { %v559_v63 = vpop.f32.mrf.mxu0  ;;  %v623_v0 = vpop.f32.mrf.mxu1 }
 0x115   : > { %v1014_v1 = vpack.c.bf16 %v661_v61, %v661_v61  ;;  %v1030_v2 = vpack.c.bf16 %v677_v62, %v677_v62  ;;  %v560_v3 = vadd.f32 %v1254_v47, %v559_v63  ;;  %v624_v4 = vadd.f32 %v1254_v47, %v623_v0 }
 0x116   : > { %v561_v5 = vpop.f32.mrf.mxu0  ;;  %v625_v6 = vpop.f32.mrf.mxu1 }
 0x117   : > { %822 = vst.msk [vmem:[%s1262_s18 + $0x1c] sm:$0xf] %vm814_vm3, %v1014_v1  ;;  %838 = vst.msk [vmem:[%s1262_s18 + $0x5c] sm:$0xf] %vm814_vm3, %v1030_v2  ;;  %v662_v7 = vmax.f32 %v560_v3, 0.0  ;;  %v678_v8 = vmax.f32 %v624_v4, 0.0 }
 0x118   : > { %v562_v9 = vpop.f32.mrf.mxu0  ;;  %v626_v10 = vpop.f32.mrf.mxu1 }
 0x119   : > { %v1015_v11 = vpack.c.bf16 %v662_v7, %v662_v7  ;;  %v1031_v12 = vpack.c.bf16 %v678_v8, %v678_v8  ;;  %v563_v13 = vadd.f32 %v1254_v47, %v562_v9  ;;  %v627_v14 = vadd.f32 %v1254_v47, %v626_v10 }
 0x11a   : > { %v564_v15 = vpop.f32.mrf.mxu0  ;;  %v628_v16 = vpop.f32.mrf.mxu1 }
 0x11b   : > { %823 = vst.msk [vmem:[%s1262_s18 + $0x20] sm:$0xf] %vm814_vm3, %v1015_v11  ;;  %839 = vst.msk [vmem:[%s1262_s18 + $0x60] sm:$0xf] %vm814_vm3, %v1031_v12  ;;  %v663_v17 = vmax.f32 %v563_v13, 0.0  ;;  %v679_v18 = vmax.f32 %v627_v14, 0.0 }
 0x11c   : > { %v567_v19 = vpop.f32.mrf.mxu0  ;;  %v631_v20 = vpop.f32.mrf.mxu1 }
 0x11d   : > { %v1016_v21 = vpack.c.bf16 %v663_v17, %v663_v17  ;;  %v1032_v22 = vpack.c.bf16 %v679_v18, %v679_v18  ;;  %v568_v23 = vadd.f32 %v1254_v47, %v567_v19  ;;  %v632_v24 = vadd.f32 %v1254_v47, %v631_v20 }
 0x11e   : > { %v569_v25 = vpop.f32.mrf.mxu0  ;;  %v633_v26 = vpop.f32.mrf.mxu1 }
 0x11f   : > { %824 = vst.msk [vmem:[%s1262_s18 + $0x24] sm:$0xf] %vm814_vm3, %v1016_v21  ;;  %840 = vst.msk [vmem:[%s1262_s18 + $0x64] sm:$0xf] %vm814_vm3, %v1032_v22  ;;  %v664_v27 = vmax.f32 %v568_v23, 0.0  ;;  %v680_v28 = vmax.f32 %v632_v24, 0.0 }
 0x120   : > { %v570_v29 = vpop.f32.mrf.mxu0  ;;  %v634_v30 = vpop.f32.mrf.mxu1 }
 0x121   : > { %v1017_v31 = vpack.c.bf16 %v664_v27, %v664_v27  ;;  %v1033_v32 = vpack.c.bf16 %v680_v28, %v680_v28  ;;  %v571_v33 = vadd.f32 %v1254_v47, %v570_v29  ;;  %v635_v34 = vadd.f32 %v1254_v47, %v634_v30 }
 0x122   : > { %v572_v35 = vpop.f32.mrf.mxu0  ;;  %v636_v36 = vpop.f32.mrf.mxu1 }
 0x123   : > { %825 = vst.msk [vmem:[%s1262_s18 + $0x28] sm:$0xf] %vm814_vm3, %v1017_v31  ;;  %841 = vst.msk [vmem:[%s1262_s18 + $0x68] sm:$0xf] %vm814_vm3, %v1033_v32  ;;  %v665_v37 = vmax.f32 %v571_v33, 0.0  ;;  %v681_v38 = vmax.f32 %v635_v34, 0.0 }
 0x124   : > { %v575_v39 = vpop.f32.mrf.mxu0  ;;  %v639_v40 = vpop.f32.mrf.mxu1 }
 0x125   : > { %v1018_v41 = vpack.c.bf16 %v665_v37, %v665_v37  ;;  %v1034_v42 = vpack.c.bf16 %v681_v38, %v681_v38  ;;  %v576_v43 = vadd.f32 %v1254_v47, %v575_v39  ;;  %v640_v44 = vadd.f32 %v1254_v47, %v639_v40 }
 0x126   : > { %v577_v45 = vpop.f32.mrf.mxu0  ;;  %v641_v46 = vpop.f32.mrf.mxu1 }
 0x127   : > { %826 = vst.msk [vmem:[%s1262_s18 + $0x2c] sm:$0xf] %vm814_vm3, %v1018_v41  ;;  %842 = vst.msk [vmem:[%s1262_s18 + $0x6c] sm:$0xf] %vm814_vm3, %v1034_v42  ;;  %v666_v48 = vmax.f32 %v576_v43, 0.0  ;;  %v682_v49 = vmax.f32 %v640_v44, 0.0 }
 0x128   : > { %v578_v50 = vpop.f32.mrf.mxu0  ;;  %v642_v51 = vpop.f32.mrf.mxu1 }
 0x129   : > { %v1019_v52 = vpack.c.bf16 %v666_v48, %v666_v48  ;;  %v1035_v53 = vpack.c.bf16 %v682_v49, %v682_v49  ;;  %v579_v54 = vadd.f32 %v1254_v47, %v578_v50  ;;  %v643_v55 = vadd.f32 %v1254_v47, %v642_v51 }
 0x12a   : > { %v580_v56 = vpop.f32.mrf.mxu0  ;;  %v644_v57 = vpop.f32.mrf.mxu1 }
 0x12b   : > { %827 = vst.msk [vmem:[%s1262_s18 + $0x30] sm:$0xf] %vm814_vm3, %v1019_v52  ;;  %843 = vst.msk [vmem:[%s1262_s18 + $0x70] sm:$0xf] %vm814_vm3, %v1035_v53  ;;  %v667_v58 = vmax.f32 %v579_v54, 0.0  ;;  %v683_v59 = vmax.f32 %v643_v55, 0.0 }
 0x12c   : > { %v583_v60 = vpop.f32.mrf.mxu0  ;;  %v647_v61 = vpop.f32.mrf.mxu1 }
 0x12d   : > { %v1020_v62 = vpack.c.bf16 %v667_v58, %v667_v58  ;;  %v1036_v63 = vpack.c.bf16 %v683_v59, %v683_v59  ;;  %v584_v0 = vadd.f32 %v1254_v47, %v583_v60  ;;  %v648_v1 = vadd.f32 %v1254_v47, %v647_v61 }
 0x12e   : > { %v585_v2 = vpop.f32.mrf.mxu0  ;;  %v649_v3 = vpop.f32.mrf.mxu1 }
 0x12f   : > { %828 = vst.msk [vmem:[%s1262_s18 + $0x34] sm:$0xf] %vm814_vm3, %v1020_v62  ;;  %844 = vst.msk [vmem:[%s1262_s18 + $0x74] sm:$0xf] %vm814_vm3, %v1036_v63  ;;  %v668_v4 = vmax.f32 %v584_v0, 0.0  ;;  %v684_v5 = vmax.f32 %v648_v1, 0.0 }
 0x130   : > { %v586_v6 = vpop.f32.mrf.mxu0  ;;  %v650_v7 = vpop.f32.mrf.mxu1 }
 0x131   : > { %v1021_v8 = vpack.c.bf16 %v668_v4, %v668_v4  ;;  %v1037_v9 = vpack.c.bf16 %v684_v5, %v684_v5  ;;  %v587_v10 = vadd.f32 %v1254_v47, %v586_v6  ;;  %v651_v11 = vadd.f32 %v1254_v47, %v650_v7 }
 0x132   : > { %v588_v12 = vpop.f32.mrf.mxu0  ;;  %v652_v13 = vpop.f32.mrf.mxu1 }
 0x133   : > { %829 = vst.msk [vmem:[%s1262_s18 + $0x38] sm:$0xf] %vm814_vm3, %v1021_v8  ;;  %845 = vst.msk [vmem:[%s1262_s18 + $0x78] sm:$0xf] %vm814_vm3, %v1037_v9  ;;  %v669_v14 = vmax.f32 %v587_v10, 0.0  ;;  %v685_v15 = vmax.f32 %v651_v11, 0.0 }
 0x135   : > { %v1022_v16 = vpack.c.bf16 %v669_v14, %v669_v14  ;;  %v1038_v17 = vpack.c.bf16 %v685_v15, %v685_v15 }
 0x137   : > { %830 = vst.msk [vmem:[%s1262_s18 + $0x3c] sm:$0xf] %vm814_vm3, %v1022_v16  ;;  %846 = vst.msk [vmem:[%s1262_s18 + $0x7c] sm:$0xf] %vm814_vm3, %v1038_v17 }
 0x138 PF: > { %s13_s12 = sadd.s32 1, %s1133_s12  }
 0x139   : > { %p10_p4 = scmp.ge.s32.totalorder %s13_s12, 8  }
 0x13b   :  { %12 = sbr.rel (!%p10_p4) target bundleno = 1 (0x1), region = 62 }

// kernel: pcb_test_forward.7
= control target key start
LH: loop header
LB: loop body
LE: loop exit
PB: predicated region body
PF: predicated region fallthrough
CT: control target
= control target key end

     0   :  { %s1238_s6 = smov 0   ;;  %s2080_s0 = inlined_call_operand.vmem [shape: bf16[2,25,9,64], index: 0, kind: input, shape index: {}]   ;;  %s2081_s1 = inlined_call_operand.vmem [shape: bf16[2,24,8,16], index: 1, kind: output, shape index: {}]  }
   0x1 LB: > { %s955_s7 = sadd.s32 4294967295, %s1223_s6   ;;  %p959_p0 = scmp.ge.s32.totalorder %s1223_s6, 1  ;;  %s1223_s6 = sphi %s1238_s6, %s11_s6  }
   0x2   : > { %p87_p1 = scmp.lt.s32.totalorder %s1223_s6, 3 }
   0x4   : > { %p88_p2 = pnand %p959_p0, %p87_p1 }
   0x6   : > { %91 = sbr.rel (%p88_p2) target bundleno = 257 (0x101), region = 24 }
   0xb   : > { %p107_p3 = scmp.lt.s32.totalorder %s955_s7, 1  ;;  %s1225_s12 = smov 112   ;;  %vm361_vm0 = vcmask 1046528   ;;  %vm875_vm1 = vcmask 125952  }
   0xc   : > { %s1226_s13 = smov 96   ;;  %s1227_s14 = smov 80  }
   0xd   : > { %s2345_s7 = smov (!%p107_p3, %s955_s7), 1 }
   0xe   : > { %s964_s8 = smul.u32 200, %s2345_s7 }
   0xf   : > { %s965_s15 = smul.u32 96, %s2345_s7 }
  0x10   : > { %s1252_s11 = scalar_lea.vmem %s2080_s0, %s964_s8 }
  0x11   : > { %v125_v0 = vld [vmem:[%s1252_s11 + $0x20] ss:$8 sps:$4 sm:$0xff]   ;;  %v129_v2 = vld [vmem:[%s1252_s11 + $0x30] ss:$8 sps:$4 sm:$0xff]   ;;  %v122_v48 = vld [vmem:[%s1252_s11 + $0x14] sm:$0x1]  ;;  %s1933_s18 = scalar_lea.vmem %s2081_s1, %s965_s15 }
  0x12   : > { %v117_v1 = vld [vmem:[%s1252_s11] ss:$8 sps:$4 sm:$0xff]   ;;  %v1257_v3 = vunpack.c.l.bf16 %v125_v0  ;;  %v1259_v4 = vunpack.c.h.bf16 %v125_v0  ;;  %v121_v7 = vld [vmem:[%s1252_s11 + $0x10] ss:$8 sps:$4 sm:$0xff]   ;;  %v1267_v9 = vunpack.c.l.bf16 %v129_v2  ;;  %v1269_v10 = vunpack.c.h.bf16 %v129_v2  ;;  %v124_v49 = vld [vmem:[%s1252_s11 + $0x1c] sm:$0x1] }
  0x13   : > { %v1261_v5 = vunpack.c.l.bf16 %v117_v1  ;;  %v1263_v6 = vunpack.c.h.bf16 %v117_v1  ;;  %v137_v8 = vld [vmem:[%s1252_s11 + $0x50] ss:$8 sps:$4 sm:$0xff]   ;;  %v1271_v11 = vunpack.c.l.bf16 %v121_v7  ;;  %v1273_v12 = vunpack.c.h.bf16 %v121_v7  ;;  %v133_v13 = vld [vmem:[%s1252_s11 + $0x40] ss:$8 sps:$4 sm:$0xff]   ;;  %v118_v50 = vld [vmem:[%s1252_s11 + $0x4] sm:$0x1] }
  0x14   : > { %2162 = vst [vmem:[#allocation2_spill] sm:$0xff] %v1259_v4  ;;  %2164 = vst [vmem:[#allocation4_spill] sm:$0xff] %v1267_v9  ;;  %v1278_v14 = vpack.i.bf16 %v1259_v4, %v1257_v3  ;;  %v1282_v16 = vunpack.c.l.bf16 %v137_v8  ;;  %v1284_v17 = vunpack.c.h.bf16 %v137_v8  ;;  %v992_v18 = vpack.i.bf16 %v1269_v10, %v1267_v9  ;;  %v145_v22 = vld [vmem:[%s1252_s11 + $0x70] ss:$8 sps:$4 sm:$0xff]   ;;  %v141_v23 = vld [vmem:[%s1252_s11 + $0x60] ss:$8 sps:$4 sm:$0xff]  }
  0x15   : > { %2163 = vst [vmem:[#allocation3_spill] sm:$0xff] %v1263_v6  ;;  %2165 = vst [vmem:[#allocation5_spill] sm:$0xff] %v1269_v10  ;;  %v977_v15 = vpack.i.bf16 %v1263_v6, %v1261_v5  ;;  %v982_v19 = vpack.i.bf16 %v1273_v12, %v1271_v11  ;;  %v1293_v20 = vunpack.c.l.bf16 %v133_v13  ;;  %v1295_v21 = vunpack.c.h.bf16 %v133_v13  ;;  %v153_v30 = vld [vmem:[%s1252_s11 + $0x90] ss:$8 sps:$4 sm:$0xff]   ;;  %v149_v31 = vld [vmem:[%s1252_s11 + $0x80] ss:$8 sps:$4 sm:$0xff]  }
  0x16   : > { %2166 = vst [vmem:[#allocation6_spill] sm:$0xff] %v1282_v16  ;;  %2167 = vst [vmem:[#allocation7_spill] sm:$0xff] %v1284_v17  ;;  %988 = vrot.lane.b32.xlu1 %v1278_v14, %s1225_s12  ;;  %v1301_v24 = vpack.i.bf16 %v1284_v17, %v1282_v16  ;;  %v1303_v25 = vunpack.c.l.bf16 %v145_v22  ;;  %v1311_v27 = vunpack.c.h.bf16 %v145_v22  ;;  %v1313_v28 = vunpack.c.l.bf16 %v141_v23  ;;  %v161_v38 = vld [vmem:[%s1252_s11 + $0xb0] ss:$8 sps:$4 sm:$0xff]   ;;  %v157_v39 = vld [vmem:[%s1252_s11 + $0xa0] ss:$8 sps:$4 sm:$0xff]  }
  0x17   : > { %978 = vrot.lane.b32.xlu0 %v977_v15, %s1225_s12  ;;  %2168 = vst [vmem:[#allocation8_spill] sm:$0xff] %v1293_v20  ;;  %2169 = vst [vmem:[#allocation9_spill] sm:$0xff] %v1295_v21  ;;  %v1309_v26 = vpack.i.bf16 %v1295_v21, %v1293_v20  ;;  %v1315_v29 = vunpack.c.h.bf16 %v141_v23  ;;  %v1319_v32 = vunpack.c.l.bf16 %v153_v30  ;;  %v1321_v33 = vunpack.c.h.bf16 %v153_v30  ;;  %v120_v51 = vld [vmem:[%s1252_s11 + $0xc] sm:$0x1]  ;;  %v130_v56 = vld [vmem:[%s1252_s11 + $0x34] sm:$0x1] }
  0x18   : > { %2170 = vst [vmem:[#allocation10_spill] sm:$0xff] %v1303_v25  ;;  %2171 = vst [vmem:[#allocation11_spill] sm:$0xff] %v1311_v27  ;;  %v1329_v34 = vpack.i.bf16 %v1311_v27, %v1303_v25  ;;  %v1335_v36 = vunpack.c.l.bf16 %v149_v31  ;;  %v1337_v37 = vunpack.c.h.bf16 %v149_v31  ;;  %v1345_v41 = vunpack.c.l.bf16 %v161_v38  ;;  %v132_v57 = vld [vmem:[%s1252_s11 + $0x3c] sm:$0x1]  ;;  %v126_v58 = vld [vmem:[%s1252_s11 + $0x24] sm:$0x1] }
  0x19   : > { %2172 = vst [vmem:[#allocation12_spill] sm:$0xff] %v1313_v28  ;;  %2173 = vst [vmem:[#allocation13_spill] sm:$0xff] %v1315_v29  ;;  %v1333_v35 = vpack.i.bf16 %v1315_v29, %v1313_v28  ;;  %v1343_v40 = vpack.i.bf16 %v1321_v33, %v1319_v32  ;;  %v1355_v43 = vunpack.c.h.bf16 %v161_v38  ;;  %v1357_v44 = vunpack.c.l.bf16 %v157_v39  ;;  %v128_v61 = vld [vmem:[%s1252_s11 + $0x2c] sm:$0x1]  ;;  %v138_v62 = vld [vmem:[%s1252_s11 + $0x54] sm:$0x1] }
  0x1a   : > { %993 = vrot.lane.b32.xlu1 %v992_v18, %s1225_s12  ;;  %2174 = vst [vmem:[#allocation14_spill] sm:$0xff] %v1319_v32  ;;  %2175 = vst [vmem:[#allocation15_spill] sm:$0xff] %v1321_v33  ;;  %v1353_v42 = vpack.i.bf16 %v1337_v37, %v1335_v36  ;;  %v1359_v45 = vunpack.c.h.bf16 %v157_v39  ;;  %v172_v52 = vunpack.c.l.bf16 %v122_v48  ;;  %v174_v53 = vunpack.c.l.bf16 %v124_v49  ;;  %v140_v2 = vld [vmem:[%s1252_s11 + $0x5c] sm:$0x1] }
  0x1b   : > { %983 = vrot.lane.b32.xlu0 %v982_v19, %s1225_s12  ;;  %2176 = vst [vmem:[#allocation16_spill] sm:$0xff] %v1335_v36  ;;  %2177 = vst [vmem:[#allocation17_spill] sm:$0xff] %v1337_v37  ;;  %v1367_v46 = vpack.i.bf16 %v1355_v43, %v1345_v41  ;;  %v168_v54 = vunpack.c.l.bf16 %v118_v50  ;;  %v170_v55 = vunpack.c.l.bf16 %v120_v51  ;;  %v368_v59 = vrot.slane %v1271_v11, 1  ;;  %v146_v51 = vld [vmem:[%s1252_s11 + $0x74] sm:$0x1] }
  0x1c   : > { %2178 = vst [vmem:[#allocation18_spill] sm:$0xff] %v1345_v41  ;;  %2179 = vst [vmem:[#allocation19_spill] sm:$0xff] %v1355_v43  ;;  %v1371_v47 = vpack.i.bf16 %v1359_v45, %v1357_v44  ;;  %v369_v60 = vrot.slane %v172_v52, 1  ;;  %v371_v63 = vrot.slane %v1273_v12, 1  ;;  %v372_v0 = vrot.slane %v174_v53, 1 }
  0x1d   : > { %2180 = vst [vmem:[#allocation20_spill] sm:$0xff] %v1357_v44  ;;  %2181 = vst [vmem:[#allocation21_spill] sm:$0xff] %v1359_v45  ;;  %v362_v1 = vrot.slane %v1261_v5, 1  ;;  %v363_v7 = vrot.slane %v168_v54, 1  ;;  %v365_v8 = vrot.slane %v1263_v6, 1  ;;  %v366_v13 = vrot.slane %v170_v55, 1 }
  0x1e   : > { %1003 = vrot.lane.b32.xlu1 %v1301_v24, %s1225_s12  ;;  %v1423_v22 = vsel %vm361_vm0, %v368_v59, %v369_v60  ;;  %v178_v23 = vunpack.c.l.bf16 %v128_v61  ;;  %v1431_v30 = vsel %vm361_vm0, %v371_v63, %v372_v0  ;;  %v380_v31 = vrot.slane %v1267_v9, 1  ;;  %v148_v55 = vld [vmem:[%s1252_s11 + $0x7c] sm:$0x1]  ;;  %v142_v60 = vld [vmem:[%s1252_s11 + $0x64] sm:$0x1] }
  0x1f   : > { %998 = vrot.lane.b32.xlu0 %v1309_v26, %s1225_s12  ;;  %2182 = vst [vmem:[#allocation22_spill] sm:$0xff] %v1423_v22  ;;  %2183 = vst [vmem:[#allocation23_spill] sm:$0xff] %v1431_v30  ;;  %v190_v38 = vunpack.c.l.bf16 %v140_v2  ;;  %v1435_v48 = vsel %vm361_vm0, %v362_v1, %v363_v7  ;;  %v1438_v49 = vsel %vm361_vm0, %v365_v8, %v366_v13  ;;  %v395_v61 = vrot.slane %v1284_v17, 1  ;;  %v144_v1 = vld [vmem:[%s1252_s11 + $0x6c] sm:$0x1] }
  0x20   : > { %2184 = vst [vmem:[#allocation24_spill] sm:$0xff] %v1438_v49  ;;  %v386_v63 = vrot.slane %v1293_v20, 1  ;;  %v1162_v2 = vpack.i.bf16 %v1431_v30, %v1423_v22  ;;  %v1157_v7 = vpack.i.bf16 %v1438_v49, %v1435_v48  ;;  %v196_v8 = vunpack.c.l.bf16 %v146_v51 }
  0x21   : > { %v389_v13 = vrot.slane %v1295_v21, 1  ;;  %v404_v51 = vrot.slane %v1303_v25, 1 }
  0x22   : > { %1013 = vrot.lane.b32.xlu1 %v1329_v34, %s1225_s12 }
  0x23   : > { %1008 = vrot.lane.b32.xlu0 %v1333_v35, %s1225_s12 }
  0x26   : > { %1023 = vrot.lane.b32.xlu1 %v1343_v40, %s1225_s12 }
  0x27   : > { %1018 = vrot.lane.b32.xlu0 %v1353_v42, %s1225_s12 }
  0x2a   : > { %1033 = vrot.lane.b32.xlu1 %v1367_v46, %s1225_s12 }
  0x2b   : > { %1028 = vrot.lane.b32.xlu0 %v1371_v47, %s1225_s12 }
  0x2e   : > { %1043 = vrot.lane.b32.xlu1 %v982_v19, %s1226_s13 }
  0x2f   : > { %1038 = vrot.lane.b32.xlu0 %v977_v15, %s1226_s13 }
  0x32   : > { %1053 = vrot.lane.b32.xlu1 %v992_v18, %s1226_s13 }
  0x33   : > { %1048 = vrot.lane.b32.xlu0 %v1278_v14, %s1226_s13 }
  0x36   : > { %1063 = vrot.lane.b32.xlu1 %v1301_v24, %s1226_s13 }
  0x37   : > { %1058 = vrot.lane.b32.xlu0 %v1309_v26, %s1226_s13 }
  0x3a   : > { %1073 = vrot.lane.b32.xlu1 %v1329_v34, %s1226_s13 }
  0x3b   : > { %1068 = vrot.lane.b32.xlu0 %v1333_v35, %s1226_s13 }
  0x3e   : > { %1083 = vrot.lane.b32.xlu1 %v1343_v40, %s1226_s13 }
  0x3f   : > { %1078 = vrot.lane.b32.xlu0 %v1353_v42, %s1226_s13 }
  0x42   : > { %1093 = vrot.lane.b32.xlu1 %v1367_v46, %s1226_s13 }
  0x43   : > { %1088 = vrot.lane.b32.xlu0 %v1371_v47, %s1226_s13 }
  0x46   : > { %1103 = vrot.lane.b32.xlu1 %v982_v19, %s1227_s14  ;;  %v176_v19 = vunpack.c.l.bf16 %v126_v58  ;;  %v392_v58 = vrot.slane %v1282_v16, 1 }
  0x47   : > { %1098 = vrot.lane.b32.xlu0 %v977_v15, %s1227_s14  ;;  %v134_v15 = vld [vmem:[%s1252_s11 + $0x44] sm:$0x1] }
  0x48   : > { %v184_v39 = vunpack.c.l.bf16 %v134_v15  ;;  %v375_v53 = vrot.slane %v176_v19, 1  ;;  %v192_v15 = vunpack.c.l.bf16 %v142_v60 }
  0x4a   : > { %1113 = vrot.lane.b32.xlu1 %v992_v18, %s1227_s14  ;;  %v182_v18 = vunpack.c.l.bf16 %v132_v57  ;;  %v378_v57 = vrot.slane %v178_v23, 1  ;;  %v387_v0 = vrot.slane %v184_v39, 1 }
  0x4b   : > { %1108 = vrot.lane.b32.xlu0 %v1278_v14, %s1227_s14  ;;  %v180_v14 = vunpack.c.l.bf16 %v130_v56  ;;  %v377_v56 = vrot.slane %v1259_v4, 1 }
  0x4c   : > { %v384_v52 = vrot.slane %v182_v18, 1  ;;  %v1483_v39 = vsel %vm361_vm0, %v386_v63, %v387_v0 }
  0x4d   : > { %v381_v50 = vrot.slane %v180_v14, 1  ;;  %v1469_v23 = vsel %vm361_vm0, %v377_v56, %v378_v57  ;;  %2190 = vst [vmem:[#allocation30_spill] sm:$0xff] %v1483_v39  ;;  %v401_v57 = vrot.slane %v1315_v29, 1 }
  0x4e   : > { %1123 = vrot.lane.b32.xlu1 %v1301_v24, %s1227_s14  ;;  %v188_v24 = vunpack.c.l.bf16 %v138_v62  ;;  %v396_v62 = vrot.slane %v190_v38, 1  ;;  %2187 = vst [vmem:[#allocation27_spill] sm:$0xff] %v1469_v23 }
  0x4f   : > { %1118 = vrot.lane.b32.xlu0 %v1309_v26, %s1227_s14  ;;  %v136_v26 = vld [vmem:[%s1252_s11 + $0x4c] sm:$0x1] }
  0x50   : > { %v186_v54 = vunpack.c.l.bf16 %v136_v26  ;;  %v393_v59 = vrot.slane %v188_v24, 1  ;;  %v194_v24 = vunpack.c.l.bf16 %v144_v1  ;;  %v154_v26 = vld [vmem:[%s1252_s11 + $0x94] sm:$0x1]  ;;  %v1480_v38 = vsel %vm361_vm0, %v395_v61, %v396_v62 }
  0x51   : > { %2189 = vst [vmem:[#allocation29_spill] sm:$0xff] %v1480_v38  ;;  %v204_v56 = vunpack.c.l.bf16 %v154_v26  ;;  %v419_v26 = vrot.slane %v1321_v33, 1 }
  0x52   : > { %1133 = vrot.lane.b32.xlu1 %v1329_v34, %s1227_s14  ;;  %v383_v34 = vrot.slane %v1269_v10, 1  ;;  %v390_v14 = vrot.slane %v186_v54, 1  ;;  %v398_v54 = vrot.slane %v1313_v28, 1 }
  0x53   : > { %1128 = vrot.lane.b32.xlu0 %v1333_v35, %s1227_s14  ;;  %v374_v35 = vrot.slane %v1257_v3, 1 }
  0x54   : > { %v1463_v18 = vsel %vm361_vm0, %v383_v34, %v384_v52  ;;  %v150_v34 = vld [vmem:[%s1252_s11 + $0x84] sm:$0x1]  ;;  %v405_v52 = vrot.slane %v196_v8, 1 }
  0x55   : > { %2186 = vst [vmem:[#allocation26_spill] sm:$0xff] %v1463_v18  ;;  %v1466_v19 = vsel %vm361_vm0, %v374_v35, %v375_v53  ;;  %v407_v35 = vrot.slane %v1311_v27, 1  ;;  %v152_v53 = vld [vmem:[%s1252_s11 + $0x8c] sm:$0x1]  ;;  %v200_v60 = vunpack.c.l.bf16 %v150_v34 }
  0x56   : > { %1143 = vrot.lane.b32.xlu1 %v1343_v40, %s1227_s14  ;;  %v198_v40 = vunpack.c.l.bf16 %v148_v55  ;;  %v399_v55 = vrot.slane %v192_v15, 1  ;;  %v1167_v62 = vpack.i.bf16 %v1469_v23, %v1466_v19  ;;  %v202_v63 = vunpack.c.l.bf16 %v152_v53 }
  0x57   : > { %1138 = vrot.lane.b32.xlu0 %v1353_v42, %s1227_s14  ;;  %v1459_v42 = vsel %vm361_vm0, %v380_v31, %v381_v50  ;;  %v1477_v31 = vsel %vm361_vm0, %v392_v58, %v393_v59  ;;  %v156_v50 = vld [vmem:[%s1252_s11 + $0x9c] sm:$0x1]  ;;  %v402_v58 = vrot.slane %v194_v24, 1  ;;  %v1506_v8 = vsel %vm361_vm0, %v404_v51, %v405_v52 }
  0x58   : > { %2185 = vst [vmem:[#allocation25_spill] sm:$0xff] %v1459_v42  ;;  %2188 = vst [vmem:[#allocation28_spill] sm:$0xff] %v1477_v31  ;;  %v206_v59 = vunpack.c.l.bf16 %v156_v50  ;;  %v1172_v61 = vpack.i.bf16 %v1463_v18, %v1459_v42  ;;  %v1182_v0 = vpack.i.bf16 %v1480_v38, %v1477_v31  ;;  %v416_v15 = vrot.slane %v1319_v32, 1  ;;  %v160_v50 = vld [vmem:[%s1252_s11 + $0xac] sm:$0x1] }
  0x59   : > { %2192 = vst [vmem:[#allocation32_spill] sm:$0xff] %v1506_v8  ;;  %v417_v24 = vrot.slane %v204_v56, 1  ;;  %v1521_v34 = vsel %vm361_vm0, %v401_v57, %v402_v58  ;;  %v410_v52 = vrot.slane %v1335_v36, 1  ;;  %v414_v53 = vrot.slane %v202_v63, 1 }
  0x5a   : > { %1153 = vrot.lane.b32.xlu1 %v1367_v46, %s1227_s14  ;;  %v408_v46 = vrot.slane %v198_v40, 1  ;;  %v164_v40 = vld [vmem:[%s1252_s11 + $0xbc] sm:$0x1]  ;;  %2195 = vst [vmem:[#allocation35_spill] sm:$0xff] %v1521_v34  ;;  %v420_v51 = vrot.slane %v206_v59, 1  ;;  %v210_v32 = vunpack.c.l.bf16 %v160_v50 }
  0x5b   : > { %1148 = vrot.lane.b32.xlu0 %v1371_v47, %s1227_s14  ;;  %v1491_v47 = vsel %vm361_vm0, %v389_v13, %v390_v14  ;;  %v158_v13 = vld [vmem:[%s1252_s11 + $0xa4] sm:$0x1]  ;;  %v1515_v14 = vsel %vm361_vm0, %v398_v54, %v399_v55  ;;  %v214_v55 = vunpack.c.l.bf16 %v164_v40  ;;  %v1532_v58 = vsel %vm361_vm0, %v416_v15, %v417_v24 }
  0x5c   : > { %2191 = vst [vmem:[#allocation31_spill] sm:$0xff] %v1491_v47  ;;  %v1177_v1 = vpack.i.bf16 %v1491_v47, %v1483_v39  ;;  %2194 = vst [vmem:[#allocation34_spill] sm:$0xff] %v1515_v14  ;;  %v208_v56 = vunpack.c.l.bf16 %v158_v13  ;;  %v1187_v57 = vpack.i.bf16 %v1521_v34, %v1515_v14  ;;  %v1535_v59 = vsel %vm361_vm0, %v419_v26, %v420_v51 }
  0x5d   : > { %2196 = vst [vmem:[#allocation36_spill] sm:$0xff] %v1532_v58  ;;  %2197 = vst [vmem:[#allocation37_spill] sm:$0xff] %v1535_v59  ;;  %v432_v40 = vrot.slane %v214_v55, 1  ;;  %v422_v13 = vrot.slane %v1357_v44, 1  ;;  %v425_v24 = vrot.slane %v1359_v45, 1  ;;  %v426_v26 = vrot.slane %v210_v32, 1 }
  0x5e   : > { %1163 = vrot.lane.b32.xlu1 %v1162_v2, %s1226_s13  ;;  %v1509_v2 = vsel %vm361_vm0, %v407_v35, %v408_v46  ;;  %v411_v35 = vrot.slane %v200_v60, 1  ;;  %v413_v46 = vrot.slane %v1337_v37, 1  ;;  %v423_v15 = vrot.slane %v208_v56, 1 }
  0x5f   : > { %1158 = vrot.lane.b32.xlu0 %v1157_v7, %s1226_s13  ;;  %2193 = vst [vmem:[#allocation33_spill] sm:$0xff] %v1509_v2  ;;  %v162_v7 = vld [vmem:[%s1252_s11 + $0xb4] sm:$0x1]  ;;  %v1192_v33 = vpack.i.bf16 %v1509_v2, %v1506_v8  ;;  %v1565_v32 = vsel %vm361_vm0, %v425_v24, %v426_v26 }
  0x60   : > { %v212_v54 = vunpack.c.l.bf16 %v162_v7  ;;  %v1538_v60 = vsel %vm361_vm0, %v410_v52, %v411_v35  ;;  %v431_v7 = vrot.slane %v1355_v43, 1  ;;  %v1562_v52 = vsel %vm361_vm0, %v422_v13, %v423_v15  ;;  %2203 = vst [vmem:[#allocation43_spill] sm:$0xff] %v1565_v32 }
  0x61   : > { %2198 = vst [vmem:[#allocation38_spill] sm:$0xff] %v1538_v60  ;;  %2202 = vst [vmem:[#allocation42_spill] sm:$0xff] %v1562_v52  ;;  %v1207_v35 = vpack.i.bf16 %v1565_v32, %v1562_v52 }
  0x62   : > { %1173 = vrot.lane.b32.xlu1 %v1172_v61, %s1226_s13  ;;  %v428_v61 = vrot.slane %v1345_v41, 1  ;;  %v429_v63 = vrot.slane %v212_v54, 1  ;;  %v1559_v51 = vsel %vm361_vm0, %v431_v7, %v432_v40 }
  0x63   : > { %1168 = vrot.lane.b32.xlu0 %v1167_v62, %s1226_s13  ;;  %v1544_v62 = vsel %vm361_vm0, %v413_v46, %v414_v53  ;;  %2201 = vst [vmem:[#allocation41_spill] sm:$0xff] %v1559_v51  ;;  %v165_v46 = vld [vmem:[%s1252_s11 + $0xc0] sm:$0xf] }
  0x64   : > { %2199 = vst [vmem:[#allocation39_spill] sm:$0xff] %v1544_v62  ;;  %v1556_v50 = vsel %vm361_vm0, %v428_v61, %v429_v63  ;;  %v1576_v53 = vunpack.c.l.bf16 %v165_v46 }
  0x65   : > { %2200 = vst [vmem:[#allocation40_spill] sm:$0xff] %v1556_v50 }
  0x66   : > { %1183 = vrot.lane.b32.xlu1 %v1182_v0, %s1226_s13  ;;  %v1202_v0 = vpack.i.bf16 %v1535_v59, %v1532_v58  ;;  %2204 = vst [vmem:[#allocation44_spill] sm:$0xff] %v1576_v53 }
  0x67   : > { %1178 = vrot.lane.b32.xlu0 %v1177_v1, %s1226_s13  ;;  %v1197_v1 = vpack.i.bf16 %v1544_v62, %v1538_v60  ;;  %v823_v60 = vrot.slane %v1576_v53, 1 }
  0x6a   : > { %1193 = vrot.lane.b32.xlu1 %v1192_v33, %s1226_s13  ;;  %v1212_v33 = vpack.i.bf16 %v1559_v51, %v1556_v50 }
  0x6b   : > { %1188 = vrot.lane.b32.xlu0 %v1187_v57, %s1226_s13 }
  0x6e   : > { %1203 = vrot.lane.b32.xlu1 %v1202_v0, %s1226_s13 }
  0x6f   : > { %1198 = vrot.lane.b32.xlu0 %v1197_v1, %s1226_s13 }
  0x72   : > { %1213 = vrot.lane.b32.xlu1 %v1212_v33, %s1226_s13  ;;  %v166_v33 = vld [vmem:[%s1252_s11 + $0xc4] sm:$0x1] }
  0x73   : > { %1208 = vrot.lane.b32.xlu0 %v1207_v35, %s1226_s13  ;;  %v216_v35 = vunpack.c.l.bf16 %v166_v33 }
  0x75   : > { %v824_v59 = vrot.slane %v216_v35, 1 }
  0x77   : > { %795 = vrot.lane.b32.xlu0 %v1576_v53, %s1225_s12  ;;  %v1645_v58 = vsel %vm361_vm0, %v823_v60, %v824_v59 }
  0x78   : > { %2224 = vst [vmem:[#allocation61_spill] sm:$0xff] %v1645_v58 }
  0x88   : > { %v1580_v54 = vpop.permute.xlu1 %988 }
  0x89   : > { %2205 = vst [vmem:[#allocation45_spill] sm:$0xff] %v1580_v54  ;;  %v1582_v55 = vpop.permute.xlu0 %978  ;;  %v2221_v51 = vunpack.i.h.bf16 %v1580_v54  ;;  %v2222_v53 = vunpack.i.l.bf16 %v1580_v54 }
  0x8a   : > { %2206 = vst [vmem:[#allocation46_spill] sm:$0xff] %v1582_v55  ;;  %v980_v62 = vunpack.i.l.bf16 %v1582_v55 }
  0x8b   : > { %v1629_v50 = vmax.f32 %v1259_v4, %v2221_v51  ;;  %v1634_v35 = vmax.f32 %v1257_v3, %v2222_v53 }
  0x8c   : > { %v1584_v56 = vpop.permute.xlu1 %993 }
  0x8d   : > { %2207 = vst [vmem:[#allocation47_spill] sm:$0xff] %v1584_v56  ;;  %v1586_v57 = vpop.permute.xlu0 %983  ;;  %v2226_v4 = vunpack.i.l.bf16 %v1584_v56 }
  0x8e   : > { %2208 = vst [vmem:[#allocation48_spill] sm:$0xff] %v1586_v57 }
  0x8f   : > { %v1655_v53 = vmax.f32 %v1267_v9, %v2226_v4 }
  0x90   : > { %v1588_v61 = vpop.permute.xlu1 %1003 }
  0x91   : > { %2209 = vst [vmem:[#allocation49_spill] sm:$0xff] %v1588_v61  ;;  %v1590_v63 = vpop.permute.xlu0 %998  ;;  %v2229_v4 = vunpack.i.h.bf16 %v1588_v61 }
  0x92   : > { %2210 = vst [vmem:[#allocation50_spill] sm:$0xff] %v1590_v63 }
  0x94   : > { %v1592_v7 = vpop.permute.xlu1 %1013 }
  0x95   : > { %2211 = vst [vmem:[#allocation51_spill] sm:$0xff] %v1592_v7  ;;  %v1594_v40 = vpop.permute.xlu0 %1008 }
  0x96   : > { %2212 = vst [vmem:[#allocation52_spill] sm:$0xff] %v1594_v40 }
  0x98   : > { %v1596_v13 = vpop.permute.xlu1 %1023 }
  0x99   : > { %2213 = vst [vmem:[#allocation53_spill] sm:$0xff] %v1596_v13  ;;  %v1598_v15 = vpop.permute.xlu0 %1018 }
  0x9a   : > { %2214 = vst [vmem:[#allocation54_spill] sm:$0xff] %v1598_v15 }
  0x9c   : > { %v1600_v24 = vpop.permute.xlu1 %1033 }
  0x9d   : > { %2215 = vst [vmem:[#allocation55_spill] sm:$0xff] %v1600_v24  ;;  %v1602_v26 = vpop.permute.xlu0 %1028 }
  0x9e   : > { %2216 = vst [vmem:[#allocation56_spill] sm:$0xff] %v1602_v26 }
  0xa0   : > { %v1604_v0 = vpop.permute.xlu1 %1043 }
  0xa1   : > { %v1606_v1 = vpop.permute.xlu0 %1038 }
  0xa2   : > { %2217 = vst [vmem:[#allocation57_spill] sm:$0xff] %v1606_v1  ;;  %v2223_v1 = vunpack.i.h.bf16 %v1582_v55  ;;  %v2227_v55 = vunpack.i.h.bf16 %v1586_v57 }
  0xa4   : > { %v1609_v46 = vpop.permute.xlu1 %1053  ;;  %v1639_v33 = vmax.f32 %v1263_v6, %v2223_v1  ;;  %v1660_v1 = vmax.f32 %v1273_v12, %v2227_v55 }
  0xa5   : > { %2218 = vst [vmem:[#allocation58_spill] sm:$0xff] %v1609_v46  ;;  %v1611_v32 = vpop.permute.xlu0 %1048  ;;  %v1642_v46 = vmax.f32 %v1261_v5, %v980_v62  ;;  %v2228_v5 = vunpack.i.l.bf16 %v1586_v57 }
  0xa6   : > { %2219 = vst [vmem:[#allocation59_spill] sm:$0xff] %v1611_v32  ;;  %v461_v9 = vmax.f32 %v1660_v1, %v1431_v30  ;;  %v2231_v1 = vunpack.i.h.bf16 %v1590_v63 }
  0xa7   : > { %v1665_v59 = vmax.f32 %v1271_v11, %v2228_v5 }
  0xa8   : > { %v1622_v32 = vpop.permute.xlu1 %1063  ;;  %v1712_v5 = vmax.f32 %v1295_v21, %v2231_v1  ;;  %v2234_v1 = vunpack.i.l.bf16 %v1592_v7 }
  0xa9   : > { %v1624_v52 = vpop.permute.xlu0 %1058  ;;  %v460_v55 = vmax.f32 %v1665_v59, %v1423_v22  ;;  %v2230_v59 = vunpack.i.l.bf16 %v1588_v61  ;;  %v2238_v61 = vld [vmem:[#allocation15_spill] sm:$0xff] }
  0xaa   : > { %2220 = vst [vmem:[#allocation60_spill] sm:$0xff] %v1624_v52  ;;  %v2225_v52 = vunpack.i.h.bf16 %v1584_v56  ;;  %v1702_v56 = vmax.f32 %v1284_v17, %v2229_v4  ;;  %v1731_v21 = vmax.f32 %v1303_v25, %v2234_v1  ;;  %v2236_v4 = vunpack.i.l.bf16 %v1594_v40 }
  0xab   : > { %v1707_v58 = vmax.f32 %v1282_v16, %v2230_v59  ;;  %v2233_v59 = vunpack.i.h.bf16 %v1592_v7 }
  0xac   : > { %v1650_v51 = vmax.f32 %v1269_v10, %v2225_v52  ;;  %v1667_v60 = vpop.permute.xlu1 %1073  ;;  %v2232_v10 = vunpack.i.l.bf16 %v1590_v63  ;;  %v1741_v17 = vmax.f32 %v1313_v28, %v2236_v4  ;;  %v2240_v28 = vld [vmem:[#allocation14_spill] sm:$0xff] }
  0xad   : > { %v1669_v62 = vpop.permute.xlu0 %1068  ;;  %v1726_v16 = vmax.f32 %v1311_v27, %v2233_v59  ;;  %v467_v59 = vmax.f32 %v1712_v5, %v1491_v47  ;;  %v2237_v27 = vunpack.i.h.bf16 %v1596_v13  ;;  %v472_v5 = vmax.f32 %v1731_v21, %v1506_v8  ;;  %v2248_v8 = vld [vmem:[#allocation36_spill] sm:$0xff] }
  0xae   : > { %v1717_v22 = vmax.f32 %v1293_v20, %v2232_v10  ;;  %v2235_v10 = vunpack.i.h.bf16 %v1594_v40  ;;  %v2239_v40 = vunpack.i.l.bf16 %v1596_v13  ;;  %v2245_v21 = vunpack.i.h.bf16 %v1602_v26 }
  0xaf   : > { %v1762_v7 = vmax.f32 %v2238_v61, %v2237_v27  ;;  %v473_v27 = vmax.f32 %v1726_v16, %v1509_v2  ;;  %v2251_v2 = vld [vmem:[#allocation39_spill] sm:$0xff] }
  0xb0   : > { %v1695_v54 = vpop.permute.xlu1 %1083  ;;  %v1736_v30 = vmax.f32 %v1315_v29, %v2235_v10  ;;  %v468_v10 = vmax.f32 %v1707_v58, %v1477_v31  ;;  %v469_v29 = vmax.f32 %v1702_v56, %v1480_v38  ;;  %v466_v4 = vmax.f32 %v1717_v22, %v1483_v39  ;;  %v2254_v39 = vld [vmem:[#allocation40_spill] sm:$0xff] }
  0xb1   : > { %v1697_v52 = vpop.permute.xlu0 %1078  ;;  %v1767_v63 = vmax.f32 %v2240_v28, %v2239_v40  ;;  %v2241_v58 = vunpack.i.h.bf16 %v1598_v15  ;;  %v2242_v22 = vunpack.i.l.bf16 %v1598_v15  ;;  %v470_v40 = vmax.f32 %v1741_v17, %v1515_v14  ;;  %v2253_v14 = vld [vmem:[#allocation59_spill] sm:$0xff] }
  0xb2   : > { %v471_v13 = vmax.f32 %v1736_v30, %v1521_v34  ;;  %v1800_v16 = vmax.f32 %v1359_v45, %v2245_v21  ;;  %v2246_v17 = vunpack.i.l.bf16 %v1602_v26  ;;  %v2249_v45 = vld [vmem:[#allocation37_spill] sm:$0xff]  ;;  %v1051_v38 = vunpack.i.h.bf16 %v2253_v14 }
  0xb3   : > { %v1772_v56 = vmax.f32 %v1337_v37, %v2241_v58  ;;  %v1777_v31 = vmax.f32 %v1335_v36, %v2242_v22  ;;  %v2243_v58 = vunpack.i.h.bf16 %v1600_v24  ;;  %v2244_v22 = vunpack.i.l.bf16 %v1600_v24  ;;  %v2252_v36 = vld [vmem:[#allocation58_spill] sm:$0xff] }
  0xb4   : > { %v1747_v1 = vpop.permute.xlu1 %1093  ;;  %v1805_v61 = vmax.f32 %v1357_v44, %v2246_v17  ;;  %v1045_v24 = vunpack.i.l.bf16 %v1604_v0  ;;  %v476_v21 = vmax.f32 %v1767_v63, %v2248_v8  ;;  %v477_v26 = vmax.f32 %v1762_v7, %v2249_v45  ;;  %v2250_v17 = vld [vmem:[#allocation38_spill] sm:$0xff]  ;;  %v2255_v8 = vld [vmem:[#allocation41_spill] sm:$0xff] }
  0xb5   : > { %v1749_v25 = vpop.permute.xlu0 %1088  ;;  %v1790_v37 = vmax.f32 %v1355_v43, %v2243_v58  ;;  %v1795_v28 = vmax.f32 %v1345_v41, %v2244_v22  ;;  %v1046_v58 = vunpack.i.h.bf16 %v1604_v0  ;;  %v2247_v22 = vld [vmem:[#allocation57_spill] sm:$0xff]  ;;  %v474_v44 = vmax.f32 %v1777_v31, %v2250_v17  ;;  %v2256_v45 = vld [vmem:[#allocation42_spill] sm:$0xff]  ;;  %v2257_v17 = vld [vmem:[#allocation43_spill] sm:$0xff] }
  0xb6   : > { %v1041_v41 = vunpack.i.h.bf16 %v2247_v22  ;;  %v1040_v43 = vunpack.i.l.bf16 %v2247_v22  ;;  %v475_v15 = vmax.f32 %v1772_v56, %v2251_v2  ;;  %v1056_v47 = vunpack.i.h.bf16 %v2252_v36 }
  0xb7   : > { %v1055_v0 = vunpack.i.l.bf16 %v2252_v36  ;;  %v1050_v22 = vunpack.i.l.bf16 %v2253_v14  ;;  %v480_v63 = vmax.f32 %v1795_v28, %v2254_v39  ;;  %v481_v7 = vmax.f32 %v1790_v37, %v2255_v8  ;;  %v2260_v8 = vld [vmem:[#allocation60_spill] sm:$0xff] }
  0xb8   : > { %v1807_v30 = vpop.permute.xlu1 %1103  ;;  %v478_v31 = vmax.f32 %v1805_v61, %v2256_v45  ;;  %v479_v56 = vmax.f32 %v1800_v16, %v2257_v17  ;;  %v556_v36 = vmax.f32 %v460_v55, %v1045_v24  ;;  %v557_v57 = vmax.f32 %v461_v9, %v1046_v58 }
  0xb9   : > { %v1809_v34 = vpop.permute.xlu0 %1098  ;;  %v2258_v14 = vmax.f32 %v1642_v46, %v1435_v48  ;;  %v2259_v28 = vmax.f32 %v1639_v33, %v1438_v49  ;;  %v1066_v39 = vunpack.i.h.bf16 %v1622_v32  ;;  %v1065_v61 = vunpack.i.l.bf16 %v1622_v32 }
  0xba   : > { %v1061_v16 = vunpack.i.h.bf16 %v2260_v8  ;;  %v1060_v17 = vunpack.i.l.bf16 %v2260_v8  ;;  %v2261_v24 = vmax.f32 %v1650_v51, %v1463_v18  ;;  %v2262_v48 = vmax.f32 %v1655_v53, %v1459_v42 }
  0xbb   : > { %v554_v6 = vmax.f32 %v2258_v14, %v1040_v43  ;;  %v555_v37 = vmax.f32 %v2259_v28, %v1041_v41  ;;  %v2263_v46 = vmax.f32 %v1629_v50, %v1469_v23  ;;  %v2264_v33 = vmax.f32 %v1634_v35, %v1466_v19 }
  0xbc   : > { %v1835_v2 = vpop.permute.xlu1 %1113  ;;  %v561_v9 = vmax.f32 %v2261_v24, %v1056_v47  ;;  %v560_v43 = vmax.f32 %v2262_v48, %v1055_v0  ;;  %v1076_v55 = vunpack.i.h.bf16 %v1667_v60  ;;  %v1075_v8 = vunpack.i.l.bf16 %v1667_v60 }
  0xbd   : > { %v1837_v20 = vpop.permute.xlu0 %1108  ;;  %v559_v41 = vmax.f32 %v2263_v46, %v1051_v38  ;;  %v558_v32 = vmax.f32 %v2264_v33, %v1050_v22  ;;  %v1071_v58 = vunpack.i.h.bf16 %v1669_v62  ;;  %v1070_v47 = vunpack.i.l.bf16 %v1669_v62 }
  0xbe   : > { %v1086_v53 = vunpack.i.h.bf16 %v1695_v54  ;;  %v1085_v0 = vunpack.i.l.bf16 %v1695_v54  ;;  %v1081_v38 = vunpack.i.h.bf16 %v1697_v52  ;;  %v1080_v50 = vunpack.i.l.bf16 %v1697_v52 }
  0xbf   : > { %v565_v35 = vmax.f32 %v469_v29, %v1066_v39  ;;  %v564_v22 = vmax.f32 %v468_v10, %v1065_v61  ;;  %v562_v28 = vmax.f32 %v466_v4, %v1060_v17  ;;  %v563_v24 = vmax.f32 %v467_v59, %v1061_v16 }
  0xc0   : > { %v1124_v51 = vpop.permute.xlu1 %1123  ;;  %v1096_v60 = vunpack.i.h.bf16 %v1747_v1  ;;  %v1095_v48 = vunpack.i.l.bf16 %v1747_v1  ;;  %v1091_v62 = vunpack.i.h.bf16 %v1749_v25  ;;  %v1090_v46 = vunpack.i.l.bf16 %v1749_v25 }
  0xc1   : > { %v1119_v14 = vpop.permute.xlu0 %1118  ;;  %v569_v33 = vmax.f32 %v473_v27, %v1076_v55  ;;  %v568_v45 = vmax.f32 %v472_v5, %v1075_v8  ;;  %v566_v23 = vmax.f32 %v470_v40, %v1070_v47  ;;  %v567_v54 = vmax.f32 %v471_v13, %v1071_v58 }
  0xc2   : > { %v573_v49 = vmax.f32 %v477_v26, %v1086_v53  ;;  %v572_v52 = vmax.f32 %v476_v21, %v1085_v0  ;;  %v570_v29 = vmax.f32 %v474_v44, %v1080_v50  ;;  %v571_v39 = vmax.f32 %v475_v15, %v1081_v38 }
  0xc3   : > { %v1106_v59 = vunpack.i.h.bf16 %v1807_v30  ;;  %v1105_v10 = vunpack.i.l.bf16 %v1807_v30  ;;  %v1101_v1 = vunpack.i.h.bf16 %v1809_v34  ;;  %v1100_v4 = vunpack.i.l.bf16 %v1809_v34 }
  0xc4   : > { %v1134_v42 = vpop.permute.xlu1 %1133  ;;  %v577_v17 = vmax.f32 %v481_v7, %v1096_v60  ;;  %v576_v25 = vmax.f32 %v480_v63, %v1095_v48  ;;  %v574_v27 = vmax.f32 %v478_v31, %v1090_v46  ;;  %v575_v5 = vmax.f32 %v479_v56, %v1091_v62 }
  0xc5   : > { %v1129_v18 = vpop.permute.xlu0 %1128  ;;  %v1116_v13 = vunpack.i.h.bf16 %v1835_v2  ;;  %v1115_v40 = vunpack.i.l.bf16 %v1835_v2  ;;  %v1111_v26 = vunpack.i.h.bf16 %v1837_v20  ;;  %v1110_v44 = vunpack.i.l.bf16 %v1837_v20 }
  0xc6   : > { %v1126_v61 = vunpack.i.h.bf16 %v1124_v51  ;;  %v1125_v30 = vunpack.i.l.bf16 %v1124_v51  ;;  %v1121_v16 = vunpack.i.h.bf16 %v1119_v14  ;;  %v1120_v55 = vunpack.i.l.bf16 %v1119_v14 }
  0xc7   : > { %v652_v8 = vmax.f32 %v556_v36, %v1105_v10  ;;  %v653_v34 = vmax.f32 %v557_v57, %v1106_v59  ;;  %v650_v7 = vmax.f32 %v554_v6, %v1100_v4  ;;  %v651_v63 = vmax.f32 %v555_v37, %v1101_v1 }
  0xc8   : > { %v1144_v15 = vpop.permute.xlu1 %1143  ;;  %v1136_v31 = vunpack.i.h.bf16 %v1134_v42  ;;  %v1135_v56 = vunpack.i.l.bf16 %v1134_v42  ;;  %v1131_v58 = vunpack.i.h.bf16 %v1129_v18  ;;  %v1130_v47 = vunpack.i.l.bf16 %v1129_v18 }
  0xc9   : > { %v1139_v21 = vpop.permute.xlu0 %1138  ;;  %v656_v53 = vmax.f32 %v560_v43, %v1115_v40  ;;  %v657_v2 = vmax.f32 %v561_v9, %v1116_v13  ;;  %v654_v0 = vmax.f32 %v558_v32, %v1110_v44  ;;  %v655_v38 = vmax.f32 %v559_v41, %v1111_v26 }
  0xca   : > { %v1881_v60 = vmax.f32 %v564_v22, %v1125_v30  ;;  %v1883_v48 = vmax.f32 %v565_v35, %v1126_v61  ;;  %v1885_v51 = vmax.f32 %v562_v28, %v1120_v55  ;;  %v1887_v36 = vmax.f32 %v563_v24, %v1121_v16  ;;  %v2265_v30 = vld [vmem:[#allocation3_spill] sm:$0xff] }
  0xcb   : > { %v1146_v6 = vunpack.i.h.bf16 %v1144_v15  ;;  %v1145_v57 = vunpack.i.l.bf16 %v1144_v15  ;;  %v1141_v37 = vunpack.i.h.bf16 %v1139_v21  ;;  %v1140_v42 = vunpack.i.l.bf16 %v1139_v21 }
  0xcc   : > { %v1154_v50 = vpop.permute.xlu1 %1153  ;;  %v1889_v14 = vmax.f32 %v568_v45, %v1135_v56  ;;  %v1891_v18 = vmax.f32 %v569_v33, %v1136_v31  ;;  %v1893_v9 = vmax.f32 %v566_v23, %v1130_v47  ;;  %v1895_v43 = vmax.f32 %v567_v54, %v1131_v58  ;;  %v2271_v58 = vld [vmem:[#allocation46_spill] sm:$0xff] }
  0xcd   : > { %v1149_v20 = vpop.permute.xlu0 %1148  ;;  %v1156_v41 = vunpack.i.h.bf16 %v1154_v50  ;;  %v1155_v32 = vunpack.i.l.bf16 %v1154_v50  ;;  %v1897_v1 = vmax.f32 %v572_v52, %v1145_v57  ;;  %v1899_v45 = vmax.f32 %v573_v49, %v1146_v6  ;;  %v2273_v57 = vld [vmem:[#allocation23_spill] sm:$0xff] }
  0xce   : > { %v1151_v35 = vunpack.i.h.bf16 %v1149_v20  ;;  %v1150_v22 = vunpack.i.l.bf16 %v1149_v20  ;;  %v1901_v33 = vmax.f32 %v570_v29, %v1140_v42  ;;  %v1903_v23 = vmax.f32 %v571_v39, %v1141_v37 }
  0xcf   : > { %v1905_v26 = vmax.f32 %v576_v25, %v1155_v32  ;;  %v1907_v44 = vmax.f32 %v577_v17, %v1156_v41  ;;  %v2274_v41 = vld [vmem:[#allocation22_spill] sm:$0xff] }
  0xd0   : > { %v1164_v28 = vpop.permute.xlu1 %1163  ;;  %v1909_v15 = vmax.f32 %v574_v27, %v1150_v22  ;;  %v1911_v52 = vmax.f32 %v575_v5, %v1151_v35  ;;  %v2268_v5 = vld [vmem:[#allocation45_spill] sm:$0xff]  ;;  %v2275_v35 = vld [vmem:[#allocation24_spill] sm:$0xff] }
  0xd1   : > { %v1159_v62 = vpop.permute.xlu0 %1158  ;;  %v1166_v24 = vunpack.i.h.bf16 %v1164_v28  ;;  %v1165_v46 = vunpack.i.l.bf16 %v1164_v28 }
  0xd2   : > { %v1161_v59 = vunpack.i.h.bf16 %v1159_v62  ;;  %v1160_v10 = vunpack.i.l.bf16 %v1159_v62 }
  0xd3   : > { %v748_v54 = vmax.f32 %v652_v8, %v1165_v46  ;;  %v749_v4 = vmax.f32 %v653_v34, %v1166_v24  ;;  %v2266_v34 = vld [vmem:[#allocation48_spill] sm:$0xff]  ;;  %v2279_v46 = vld [vmem:[#allocation2_spill] sm:$0xff] }
  0xd4   : > { %v747_v13 = vmax.f32 %v651_v63, %v1161_v59  ;;  %v746_v40 = vmax.f32 %v650_v7, %v1160_v10  ;;  %v1174_v49 = vpop.permute.xlu1 %1173  ;;  %v2267_v27 = vunpack.i.h.bf16 %v2266_v34  ;;  %v2269_v63 = vunpack.i.l.bf16 %v2268_v5  ;;  %v2276_v24 = vld [vmem:[#allocation8_spill] sm:$0xff] }
  0xd5   : > { %v1169_v21 = vpop.permute.xlu0 %1168  ;;  %v772_v29 = vmax.f32 %v748_v54, %v1273_v12  ;;  %v773_v39 = vmax.f32 %v749_v4, %v1257_v3  ;;  %v1176_v55 = vunpack.i.h.bf16 %v1174_v49  ;;  %v1175_v25 = vunpack.i.l.bf16 %v1174_v49 }
  0xd6   : > { %v771_v61 = vmax.f32 %v747_v13, %v1271_v11  ;;  %v770_v16 = vmax.f32 %v746_v40, %v2265_v30  ;;  %v1171_v8 = vunpack.i.h.bf16 %v1169_v21  ;;  %v1170_v17 = vunpack.i.l.bf16 %v1169_v21  ;;  %v2280_v40 = vld [vmem:[#allocation47_spill] sm:$0xff] }
  0xd7   : > { %v800_v7 = vmax.f32 %v772_v29, %v2267_v27  ;;  %v801_v31 = vmax.f32 %v773_v39, %v2269_v63  ;;  %v2270_v56 = vunpack.i.l.bf16 %v2266_v34  ;;  %v2272_v3 = vunpack.i.h.bf16 %v2271_v58  ;;  %v2282_v29 = vld [vmem:[#allocation50_spill] sm:$0xff] }
  0xd8   : > { %v753_v11 = vmax.f32 %v657_v2, %v1176_v55  ;;  %v752_v50 = vmax.f32 %v656_v53, %v1175_v25  ;;  %v751_v20 = vmax.f32 %v655_v38, %v1171_v8  ;;  %v750_v6 = vmax.f32 %v654_v0, %v1170_v17  ;;  %v1184_v28 = vpop.permute.xlu1 %1183  ;;  %v2277_v2 = vld [vmem:[#allocation5_spill] sm:$0xff] }
  0xd9   : > { %v799_v12 = vmax.f32 %v771_v61, %v2270_v56  ;;  %v798_v47 = vmax.f32 %v770_v16, %v2272_v3  ;;  %v829_v37 = vmax.f32 %v800_v7, %v2273_v57  ;;  %v830_v42 = vmax.f32 %v801_v31, %v1466_v19  ;;  %v1179_v62 = vpop.permute.xlu0 %1178  ;;  %v2278_v19 = vld [vmem:[#allocation4_spill] sm:$0xff]  ;;  %v2286_v7 = vld [vmem:[#allocation26_spill] sm:$0xff] }
  0xda   : > { %v777_v53 = vmax.f32 %v753_v11, %v2276_v24  ;;  %v776_v0 = vmax.f32 %v752_v50, %v2277_v2  ;;  %v775_v38 = vmax.f32 %v751_v20, %v2278_v19  ;;  %v774_v59 = vmax.f32 %v750_v6, %v2279_v46  ;;  %v2287_v31 = vld [vmem:[#allocation30_spill] sm:$0xff]  ;;  %v2294_v19 = vld [vmem:[#allocation49_spill] sm:$0xff] }
  0xdb   : > { %v828_v32 = vmax.f32 %v799_v12, %v2274_v41  ;;  %v827_v22 = vmax.f32 %v798_v47, %v2275_v35  ;;  %v853_v10 = vpack.c.bf16 %v829_v37, %v829_v37  ;;  %v854_v54 = vpack.c.bf16 %v830_v42, %v830_v42  ;;  %v2288_v12 = vld [vmem:[#allocation25_spill] sm:$0xff]  ;;  %v2290_v35 = vld [vmem:[#allocation12_spill] sm:$0xff]  ;;  %v2292_v24 = vld [vmem:[#allocation6_spill] sm:$0xff] }
  0xdc   : > { %v2281_v49 = vunpack.i.h.bf16 %v2280_v40  ;;  %v2283_v39 = vunpack.i.l.bf16 %v2282_v29  ;;  %v2284_v30 = vunpack.i.l.bf16 %v2280_v40  ;;  %v2285_v55 = vunpack.i.h.bf16 %v2268_v5  ;;  %v2289_v5 = vld [vmem:[#allocation27_spill] sm:$0xff]  ;;  %v1194_v6 = vpop.permute.xlu1 %1193 }
  0xdd   : > { %v852_v4 = vpack.c.bf16 %v828_v32, %v828_v32  ;;  %v851_v13 = vpack.c.bf16 %v827_v22, %v827_v22  ;;  %878 = vst.msk [vmem:[%s1933_s18 + $0x8] sm:$0xf] %vm875_vm1, %v853_v10  ;;  %879 = vst.msk [vmem:[%s1933_s18 + $0xc] sm:$0xf] %vm875_vm1, %v854_v54  ;;  %v1186_v8 = vunpack.i.h.bf16 %v1184_v28  ;;  %v1185_v17 = vunpack.i.l.bf16 %v1184_v28  ;;  %v1189_v57 = vpop.permute.xlu0 %1188  ;;  %v2291_v28 = vld [vmem:[#allocation7_spill] sm:$0xff] }
  0xde   : > { %v804_v21 = vmax.f32 %v776_v0, %v2281_v49  ;;  %v805_v61 = vmax.f32 %v777_v53, %v2283_v39  ;;  %v803_v16 = vmax.f32 %v775_v38, %v2284_v30  ;;  %v802_v25 = vmax.f32 %v774_v59, %v2285_v55  ;;  %v2293_v53 = vld [vmem:[#allocation9_spill] sm:$0xff]  ;;  %v2296_v59 = vld [vmem:[#allocation52_spill] sm:$0xff] }
  0xdf   : > { %877 = vst.msk [vmem:[%s1933_s18 + $0x4] sm:$0xf] %vm875_vm1, %v852_v4  ;;  %876 = vst.msk [vmem:[%s1933_s18] sm:$0xf] %vm875_vm1, %v851_v13  ;;  %v1181_v34 = vunpack.i.h.bf16 %v1179_v62  ;;  %v1180_v27 = vunpack.i.l.bf16 %v1179_v62  ;;  %v757_v47 = vmax.f32 %v1883_v48, %v1186_v8  ;;  %v756_v11 = vmax.f32 %v1881_v60, %v1185_v17  ;;  %v2302_v17 = vld [vmem:[#allocation28_spill] sm:$0xff] }
  0xe0   : > { %v833_v63 = vmax.f32 %v804_v21, %v2286_v7  ;;  %v834_v56 = vmax.f32 %v805_v61, %v2287_v31  ;;  %v832_v58 = vmax.f32 %v803_v16, %v2288_v12  ;;  %v831_v3 = vmax.f32 %v802_v25, %v2289_v5  ;;  %v2300_v16 = vld [vmem:[#allocation29_spill] sm:$0xff]  ;;  %v2301_v25 = vld [vmem:[#allocation34_spill] sm:$0xff]  ;;  %v2305_v31 = vld [vmem:[#allocation11_spill] sm:$0xff] }
  0xe1   : > { %v755_v50 = vmax.f32 %v1887_v36, %v1181_v34  ;;  %v754_v20 = vmax.f32 %v1885_v51, %v1180_v27  ;;  %v781_v22 = vmax.f32 %v757_v47, %v2290_v35  ;;  %v780_v62 = vmax.f32 %v756_v11, %v2291_v28  ;;  %v2303_v27 = vld [vmem:[#allocation31_spill] sm:$0xff]  ;;  %v2307_v12 = vld [vmem:[#allocation13_spill] sm:$0xff] }
  0xe2   : > { %v857_v37 = vpack.c.bf16 %v833_v63, %v833_v63  ;;  %v858_v42 = vpack.c.bf16 %v834_v56, %v834_v56  ;;  %v856_v41 = vpack.c.bf16 %v832_v58, %v832_v58  ;;  %v855_v32 = vpack.c.bf16 %v831_v3, %v831_v3  ;;  %v1199_v63 = vpop.permute.xlu0 %1198  ;;  %v2306_v56 = vld [vmem:[#allocation10_spill] sm:$0xff] }
  0xe3   : > { %v779_v48 = vmax.f32 %v755_v50, %v2292_v24  ;;  %v778_v2 = vmax.f32 %v754_v20, %v2293_v53  ;;  %v1196_v60 = vunpack.i.h.bf16 %v1194_v6  ;;  %v1195_v51 = vunpack.i.l.bf16 %v1194_v6  ;;  %v2308_v50 = vld [vmem:[#allocation51_spill] sm:$0xff]  ;;  %v2314_v53 = vld [vmem:[#allocation33_spill] sm:$0xff] }
  0xe4   : > { %882 = vst.msk [vmem:[%s1933_s18 + $0x18] sm:$0xf] %vm875_vm1, %v857_v37  ;;  %883 = vst.msk [vmem:[%s1933_s18 + $0x1c] sm:$0xf] %vm875_vm1, %v858_v42  ;;  %v1191_v36 = vunpack.i.h.bf16 %v1189_v57  ;;  %v1190_v0 = vunpack.i.l.bf16 %v1189_v57  ;;  %v2295_v38 = vunpack.i.h.bf16 %v2294_v19  ;;  %v2297_v10 = vunpack.i.l.bf16 %v2296_v59  ;;  %v2310_v57 = vld [vmem:[#allocation54_spill] sm:$0xff] }
  0xe5   : > { %881 = vst.msk [vmem:[%s1933_s18 + $0x14] sm:$0xf] %vm875_vm1, %v856_v41  ;;  %880 = vst.msk [vmem:[%s1933_s18 + $0x10] sm:$0xf] %vm875_vm1, %v855_v32  ;;  %v2298_v4 = vunpack.i.l.bf16 %v2294_v19  ;;  %v2299_v40 = vunpack.i.h.bf16 %v2282_v29  ;;  %v761_v21 = vmax.f32 %v1891_v18, %v1196_v60  ;;  %v760_v39 = vmax.f32 %v1889_v14, %v1195_v51  ;;  %v1204_v29 = vpop.permute.xlu1 %1203  ;;  %v2304_v18 = vld [vmem:[#allocation16_spill] sm:$0xff]  ;;  %v2315_v60 = vld [vmem:[#allocation38_spill] sm:$0xff] }
  0xe6   : > { %v808_v46 = vmax.f32 %v780_v62, %v2295_v38  ;;  %v809_v54 = vmax.f32 %v781_v22, %v2297_v10  ;;  %v759_v61 = vmax.f32 %v1895_v43, %v1191_v36  ;;  %v758_v30 = vmax.f32 %v1893_v9, %v1190_v0  ;;  %v2316_v36 = vld [vmem:[#allocation32_spill] sm:$0xff]  ;;  %v2317_v19 = vld [vmem:[#allocation35_spill] sm:$0xff] }
  0xe7   : > { %v807_v13 = vmax.f32 %v779_v48, %v2298_v4  ;;  %v806_v49 = vmax.f32 %v778_v2, %v2299_v40  ;;  %v785_v14 = vmax.f32 %v761_v21, %v2304_v18  ;;  %v784_v43 = vmax.f32 %v760_v39, %v2305_v31 }
  0xe8   : > { %v837_v55 = vmax.f32 %v808_v46, %v2300_v16  ;;  %v838_v8 = vmax.f32 %v809_v54, %v2301_v25  ;;  %v783_v9 = vmax.f32 %v759_v61, %v2306_v56  ;;  %v782_v58 = vmax.f32 %v758_v30, %v2307_v12  ;;  %v2318_v61 = vld [vmem:[#allocation20_spill] sm:$0xff]  ;;  %v2319_v16 = vld [vmem:[#allocation15_spill] sm:$0xff]  ;;  %v2320_v25 = vld [vmem:[#allocation14_spill] sm:$0xff] }
  0xe9   : > { %v836_v34 = vmax.f32 %v807_v13, %v2302_v17  ;;  %v835_v7 = vmax.f32 %v806_v49, %v2303_v27  ;;  %v2309_v20 = vunpack.i.h.bf16 %v2308_v50  ;;  %v2311_v37 = vunpack.i.l.bf16 %v2310_v57  ;;  %v1214_v4 = vpop.permute.xlu1 %1213  ;;  %v1209_v13 = vpop.permute.xlu0 %1208  ;;  %v2322_v27 = vld [vmem:[#allocation53_spill] sm:$0xff] }
  0xea   : > { %v861_v5 = vpack.c.bf16 %v837_v55, %v837_v55  ;;  %v862_v3 = vpack.c.bf16 %v838_v8, %v838_v8  ;;  %v2312_v41 = vunpack.i.l.bf16 %v2308_v50  ;;  %v2313_v35 = vunpack.i.h.bf16 %v2296_v59  ;;  %v2321_v8 = vld [vmem:[#allocation17_spill] sm:$0xff]  ;;  %v2329_v50 = vld [vmem:[#allocation42_spill] sm:$0xff] }
  0xeb   : > { %v860_v47 = vpack.c.bf16 %v836_v34, %v836_v34  ;;  %v859_v11 = vpack.c.bf16 %v835_v7, %v835_v7  ;;  %v812_v6 = vmax.f32 %v784_v43, %v2309_v20  ;;  %v813_v42 = vmax.f32 %v785_v14, %v2311_v37 }
  0xec   : > { %v811_v32 = vmax.f32 %v783_v9, %v2312_v41  ;;  %v810_v22 = vmax.f32 %v782_v58, %v2313_v35  ;;  %886 = vst.msk [vmem:[%s1933_s18 + $0x28] sm:$0xf] %vm875_vm1, %v861_v5  ;;  %887 = vst.msk [vmem:[%s1933_s18 + $0x2c] sm:$0xf] %vm875_vm1, %v862_v3  ;;  %v1206_v28 = vunpack.i.h.bf16 %v1204_v29  ;;  %v1205_v62 = vunpack.i.l.bf16 %v1204_v29 }
  0xed   : > { %885 = vst.msk [vmem:[%s1933_s18 + $0x24] sm:$0xf] %vm875_vm1, %v860_v47  ;;  %884 = vst.msk [vmem:[%s1933_s18 + $0x20] sm:$0xf] %vm875_vm1, %v859_v11  ;;  %v1201_v24 = vunpack.i.h.bf16 %v1199_v63  ;;  %v1200_v48 = vunpack.i.l.bf16 %v1199_v63  ;;  %v841_v2 = vmax.f32 %v812_v6, %v2314_v53  ;;  %v842_v51 = vmax.f32 %v813_v42, %v2315_v60  ;;  %v2324_v63 = vld [vmem:[#allocation56_spill] sm:$0xff]  ;;  %v2328_v47 = vld [vmem:[#allocation37_spill] sm:$0xff] }
  0xee   : > { %v840_v0 = vmax.f32 %v811_v32, %v2316_v36  ;;  %v839_v38 = vmax.f32 %v810_v22, %v2317_v19  ;;  %v765_v46 = vmax.f32 %v1899_v45, %v1206_v28  ;;  %v764_v59 = vmax.f32 %v1897_v1, %v1205_v62  ;;  %v2330_v6 = vld [vmem:[#allocation36_spill] sm:$0xff]  ;;  %v2331_v42 = vld [vmem:[#allocation39_spill] sm:$0xff] }
  0xef   : > { %v763_v10 = vmax.f32 %v1903_v23, %v1201_v24  ;;  %v762_v54 = vmax.f32 %v1901_v33, %v1200_v48  ;;  %v865_v40 = vpack.c.bf16 %v841_v2, %v841_v2  ;;  %v866_v49 = vpack.c.bf16 %v842_v51, %v842_v51  ;;  %v2332_v32 = vld [vmem:[#allocation19_spill] sm:$0xff] }
  0xf0   : > { %v864_v21 = vpack.c.bf16 %v840_v0, %v840_v0  ;;  %v863_v39 = vpack.c.bf16 %v839_v38, %v839_v38  ;;  %v789_v30 = vmax.f32 %v765_v46, %v2318_v61  ;;  %v788_v55 = vmax.f32 %v764_v59, %v2319_v16  ;;  %v2336_v2 = vld [vmem:[#allocation55_spill] sm:$0xff]  ;;  %v2340_v59 = vld [vmem:[#allocation41_spill] sm:$0xff] }
  0xf1   : > { %v787_v45 = vmax.f32 %v763_v10, %v2320_v25  ;;  %v786_v17 = vmax.f32 %v762_v54, %v2321_v8  ;;  %890 = vst.msk [vmem:[%s1933_s18 + $0x38] sm:$0xf] %vm875_vm1, %v865_v40  ;;  %891 = vst.msk [vmem:[%s1933_s18 + $0x3c] sm:$0xf] %vm875_vm1, %v866_v49  ;;  %v1216_v1 = vunpack.i.h.bf16 %v1214_v4  ;;  %v1215_v33 = vunpack.i.l.bf16 %v1214_v4  ;;  %v2341_v54 = vld [vmem:[#allocation40_spill] sm:$0xff]  ;;  %v2343_v49 = vld [vmem:[#allocation61_spill] sm:$0xff] }
  0xf2   : > { %889 = vst.msk [vmem:[%s1933_s18 + $0x34] sm:$0xf] %vm875_vm1, %v864_v21  ;;  %888 = vst.msk [vmem:[%s1933_s18 + $0x30] sm:$0xf] %vm875_vm1, %v863_v39  ;;  %v1211_v23 = vunpack.i.h.bf16 %v1209_v13  ;;  %v1210_v34 = vunpack.i.l.bf16 %v1209_v13  ;;  %v2323_v7 = vunpack.i.h.bf16 %v2322_v27  ;;  %v2325_v18 = vunpack.i.l.bf16 %v2324_v63  ;;  %v2342_v13 = vld [vmem:[#allocation43_spill] sm:$0xff] }
  0xf3   : > { %v2326_v31 = vunpack.i.l.bf16 %v2322_v27  ;;  %v2327_v56 = vunpack.i.h.bf16 %v2310_v57  ;;  %v769_v12 = vmax.f32 %v1907_v44, %v1216_v1  ;;  %v768_v58 = vmax.f32 %v1905_v26, %v1215_v33  ;;  %v796_v57 = vpop.permute.xlu0 %795  ;;  %v2333_v26 = vld [vmem:[#allocation18_spill] sm:$0xff] }
  0xf4   : > { %v816_v29 = vmax.f32 %v788_v55, %v2323_v7  ;;  %v817_v14 = vmax.f32 %v789_v30, %v2325_v18  ;;  %v767_v5 = vmax.f32 %v1911_v52, %v1211_v23  ;;  %v766_v3 = vmax.f32 %v1909_v15, %v1210_v34  ;;  %v2334_v52 = vld [vmem:[#allocation21_spill] sm:$0xff]  ;;  %v2335_v15 = vld [vmem:[#allocation44_spill] sm:$0xff] }
  0xf5   : > { %v815_v43 = vmax.f32 %v787_v45, %v2326_v31  ;;  %v814_v9 = vmax.f32 %v786_v17, %v2327_v56  ;;  %v792_v44 = vmax.f32 %v768_v58, %v2332_v32  ;;  %v793_v28 = vmax.f32 %v769_v12, %v2335_v15 }
  0xf6   : > { %v845_v11 = vmax.f32 %v816_v29, %v2328_v47  ;;  %v846_v20 = vmax.f32 %v817_v14, %v2329_v50  ;;  %v791_v35 = vmax.f32 %v767_v5, %v2333_v26  ;;  %v790_v22 = vmax.f32 %v766_v3, %v2334_v52 }
  0xf7   : > { %v844_v37 = vmax.f32 %v815_v43, %v2330_v6  ;;  %v843_v41 = vmax.f32 %v814_v9, %v2331_v42  ;;  %v2337_v60 = vunpack.i.h.bf16 %v2336_v2  ;;  %v2338_v36 = vunpack.i.l.bf16 %v2336_v2 }
  0xf8   : > { %v869_v62 = vpack.c.bf16 %v845_v11, %v845_v11  ;;  %v870_v24 = vpack.c.bf16 %v846_v20, %v846_v20  ;;  %v2339_v19 = vunpack.i.h.bf16 %v2324_v63  ;;  %v821_v46 = vmax.f32 %v793_v28, %v796_v57 }
  0xf9   : > { %v868_v48 = vpack.c.bf16 %v844_v37, %v844_v37  ;;  %v867_v53 = vpack.c.bf16 %v843_v41, %v843_v41  ;;  %v820_v51 = vmax.f32 %v792_v44, %v2337_v60  ;;  %v819_v0 = vmax.f32 %v791_v35, %v2338_v36 }
  0xfa   : > { %v818_v38 = vmax.f32 %v790_v22, %v2339_v19  ;;  %894 = vst.msk [vmem:[%s1933_s18 + $0x48] sm:$0xf] %vm875_vm1, %v869_v62  ;;  %895 = vst.msk [vmem:[%s1933_s18 + $0x4c] sm:$0xf] %vm875_vm1, %v870_v24  ;;  %v850_v21 = vmax.f32 %v821_v46, %v2343_v49 }
  0xfb   : > { %893 = vst.msk [vmem:[%s1933_s18 + $0x44] sm:$0xf] %vm875_vm1, %v868_v48  ;;  %892 = vst.msk [vmem:[%s1933_s18 + $0x40] sm:$0xf] %vm875_vm1, %v867_v53  ;;  %v849_v10 = vmax.f32 %v820_v51, %v2340_v59  ;;  %v848_v4 = vmax.f32 %v819_v0, %v2341_v54 }
  0xfc   : > { %v847_v40 = vmax.f32 %v818_v38, %v2342_v13  ;;  %v874_v16 = vpack.c.bf16 %v850_v21, %v850_v21 }
  0xfd   : > { %v873_v39 = vpack.c.bf16 %v849_v10, %v849_v10  ;;  %v872_v61 = vpack.c.bf16 %v848_v4, %v848_v4 }
  0xfe   : > { %v871_v30 = vpack.c.bf16 %v847_v40, %v847_v40  ;;  %899 = vst.msk [vmem:[%s1933_s18 + $0x5c] sm:$0xf] %vm875_vm1, %v874_v16 }
  0xff   : > { %898 = vst.msk [vmem:[%s1933_s18 + $0x58] sm:$0xf] %vm875_vm1, %v873_v39  ;;  %897 = vst.msk [vmem:[%s1933_s18 + $0x54] sm:$0xf] %vm875_vm1, %v872_v61 }
 0x100   : > { %896 = vst.msk [vmem:[%s1933_s18 + $0x50] sm:$0xf] %vm875_vm1, %v871_v30 }
 0x101 PF: > { %s11_s6 = sadd.s32 1, %s1223_s6  }
 0x102   : > { %p8_p4 = scmp.ge.s32.totalorder %s11_s6, 4  }
 0x104   :  { %10 = sbr.rel (!%p8_p4) target bundleno = 1 (0x1), region = 54 }

// kernel: pcb_test_forward.8
= control target key start
LH: loop header
LB: loop body
LE: loop exit
PB: predicated region body
PF: predicated region fallthrough
CT: control target
= control target key end

     0   :  { %s5855_s13 = smov 0   ;;  %s8376_s0 = inlined_call_operand.vmem [shape: bf16[2,210,16], index: 0, kind: input, shape index: {}]   ;;  %s8377_s1 = inlined_call_operand.vmem [shape: f32[1,192,9], index: 1, kind: input, shape index: {}]   ;;  %s8378_s2 = inlined_call_operand.vmem [shape: bf16[16,8], index: 2, kind: input, shape index: {}]   ;;  %s8379_s3 = inlined_call_operand.vmem [shape: f32[1,8], index: 3, kind: input, shape index: {}]   ;;  %s8380_s4 = inlined_call_operand.vmem [shape: bf16[9,8,8], index: 4, kind: input, shape index: {}]   ;;  %s8381_s5 = inlined_call_operand.vmem [shape: f32[1,8], index: 5, kind: input, shape index: {}]   ;;  %s8382_s6 = inlined_call_operand.vmem [shape: bf16[8,32], index: 6, kind: input, shape index: {}]   ;;  %s8383_s7 = inlined_call_operand.vmem [shape: f32[1,32], index: 7, kind: input, shape index: {}]   ;;  %s8384_s8 = inlined_call_operand.vmem [shape: bf16[16,32], index: 8, kind: input, shape index: {}]   ;;  %s8385_s9 = inlined_call_operand.vmem [shape: f32[1,32], index: 9, kind: input, shape index: {}]   ;;  %s8386_s10 = inlined_call_operand.vmem [shape: bf16[2,192,32], index: 10, kind: output, shape index: {}]  }
   0x1 LB: > { %s4929_s14 = sadd.s32 4294967295, %s5790_s13   ;;  %p4933_p0 = scmp.ge.s32.totalorder %s5790_s13, 1  ;;  %s5790_s13 = sphi %s5855_s13, %s20_s13  }
   0x2   : > { %p312_p1 = scmp.lt.s32.totalorder %s5790_s13, 3 }
   0x4   : > { %p313_p2 = pnand %p4933_p0, %p312_p1 }
   0x6   : > { %316 = sbr.rel (%p313_p2) target bundleno = 1052 (0x41c), region = 60 }
   0xb   : > { %v5866_v0 = vld [vmem:[%s8377_s1 + $0x10] sm:$0xff]  ;;  %v5871_v1 = vld [vmem:[%s8377_s1 + $0x8] sm:$0xff]  ;;  %p350_p3 = scmp.lt.s32.totalorder %s4929_s14, 1  ;;  %v5792_v2 = vmov 1   ;;  %v5793_v3 = vmov 0   ;;  %v5727_v4 = vld [vmem:[%s8378_s2] sm:$0xff]  }
   0xc   : > { %5677 = vset.pattern.permute.xlu0 %v5792_v2  ;;  %5675 = vset.pattern.permute.xlu1 %v5793_v3  ;;  %v5885_v5 = vld [vmem:[%s8377_s1 + $0x18] sm:$0xff]  ;;  %v5890_v6 = vld [vmem:[%s8377_s1 + $0x20] sm:$0xff]  ;;  %v5898_v7 = vld [vmem:[%s8377_s1 + $0x28] sm:$0xff]  ;;  %vm495_vm0 = vcmask 130048   ;;  %vm1189_vm1 = vcmask 1043456   ;;  %vm938_vm2 = vcmask 1040384  }
   0xd   : > { %721 = vperm.xlu1 %5675, %v5866_v0   ;;  %870 = vperm.xlu0 %5677, %v5871_v1   ;;  %s8748_s14 = smov (!%p350_p3, %s4929_s14), 1  ;;  %v5903_v8 = vld [vmem:[%s8377_s1 + $0x30] sm:$0xff]  ;;  %v5923_v19 = vld [vmem:[%s8377_s1 + $0x38] sm:$0xff]  ;;  %v5938_v27 = vld [vmem:[%s8377_s1 + $0x40] sm:$0xff]  ;;  %vm1562_vm3 = vcmask 1041408   ;;  %vm1688_vm4 = vcmask 1046528  }
   0xe   : > { %5331 = vmatprep.subr.bf16.mxu0 %v5727_v4  ;;  %s5657_s25 = smul.u32 108, %s8748_s14  ;;  %8479 = vst [vmem:[#allocation5_spill] sm:$0xff] %v5938_v27  ;;  %v5954_v35 = vld [vmem:[%s8377_s1 + $0x48] sm:$0xff]  ;;  %v5959_v36 = vld [vmem:[%s8377_s1 + $0x50] sm:$0xff]  ;;  %v5991_v55 = vld [vmem:[%s8377_s1 + $0x60] sm:$0xff]  ;;  %vm1152_vm5 = vcmask 64512  }
   0xf   : > { %5332 = vmatpush3.bf16.msra.mxu0 %v5727_v4  ;;  %v5997_v56 = vld [vmem:[%s8377_s1] sm:$0xff]  ;;  %v6006_v57 = vld [vmem:[%s8377_s1 + $0x70] sm:$0xff]  ;;  %vm1051_vm6 = vsmask.f32 7424  ;;  %s5658_s15 = smul.u32 96, %s8748_s14  ;;  %vm4849_vm7 = vcmask 257024  }
  0x10   : > { %s5908_s12 = scalar_lea.vmem %s8376_s0, %s5657_s25  ;;  %8489 = vst [vmem:[#allocation15_spill] sm:$0xff] %v6006_v57  ;;  %v6013_v60 = vld [vmem:[%s8377_s1 + $0x80] sm:$0xff]  ;;  %v6022_v61 = vld [vmem:[%s8377_s1 + $0x90] sm:$0xff] }
  0x11   : > { %726 = vperm.xlu1 %5675, %v5885_v5   ;;  %879 = vperm.xlu0 %5677, %v5890_v6   ;;  %v361_v9 = vld [vmem:[%s5908_s12] sm:$0xf]  ;;  %v362_v10 = vld [vmem:[%s5908_s12 + $0x4] sm:$0xf]  ;;  %v363_v11 = vld [vmem:[%s5908_s12 + $0x8] sm:$0xf]  ;;  %s8282_s18 = scalar_lea.vmem %s8386_s10, %s5658_s15 }
  0x12   : > { %v364_v12 = vld [vmem:[%s5908_s12 + $0xc] sm:$0xf]  ;;  %v365_v13 = vld [vmem:[%s5908_s12 + $0x10] sm:$0xf]  ;;  %v4937_v14 = vcombine.low %v361_v9, %v362_v10  ;;  %v5915_v15 = vcombine.low %v362_v10, %v363_v11  ;;  %v366_v16 = vld [vmem:[%s5908_s12 + $0x14] sm:$0xf] }
  0x13   : > { %v4938_v17 = vcombine.low %v363_v11, %v364_v12  ;;  %v5918_v18 = vcombine.low %v364_v12, %v365_v13  ;;  %v4939_v20 = vcombine.low %v365_v13, %v366_v16  ;;  %v367_v21 = vld [vmem:[%s5908_s12 + $0x18] sm:$0xf]  ;;  %v368_v22 = vld [vmem:[%s5908_s12 + $0x1c] sm:$0xf]  ;;  %v369_v24 = vld [vmem:[%s5908_s12 + $0x20] sm:$0xf] }
  0x14   : > { %8476 = vst [vmem:[#allocation2_spill] sm:$0xff] %v5915_v15  ;;  %v5929_v23 = vcombine.low %v366_v16, %v367_v21  ;;  %v370_v25 = vld [vmem:[%s5908_s12 + $0x24] sm:$0xf]  ;;  %v371_v26 = vld [vmem:[%s5908_s12 + $0x28] sm:$0xf]  ;;  %5333 = vmatprep.mubr.msk.bf16.mxu0 %vm495_vm0, %v4937_v14  ;;  %v5940_v28 = vcombine.low %v368_v22, %v369_v24  ;;  %v4940_v47 = vcombine.low %v367_v21, %v368_v22  ;;  %v6038_v4 = vld [vmem:[%s8377_s1 + $0xb0] sm:$0xff] }
  0x15   : > { %8477 = vst [vmem:[#allocation3_spill] sm:$0xff] %v5918_v18  ;;  %736 = vperm.xlu1 %5675, %v5898_v7   ;;  %885 = vperm.xlu0 %5677, %v5903_v8   ;;  %v372_v29 = vld [vmem:[%s5908_s12 + $0x2c] sm:$0xf]  ;;  %v5943_v30 = vcombine.low %v370_v25, %v371_v26  ;;  %v373_v31 = vld [vmem:[%s5908_s12 + $0x30] sm:$0xf]  ;;  %v4941_v52 = vcombine.low %v369_v24, %v370_v25  ;;  %v6046_v11 = vld [vmem:[%s8377_s1 + $0x58] sm:$0xff] }
  0x16   : > { %8478 = vst [vmem:[#allocation4_spill] sm:$0xff] %v5929_v23  ;;  %8480 = vst [vmem:[#allocation6_spill] sm:$0xff] %v5940_v28  ;;  %5334 = vmatmul.mubr.msk.bf16.vlgmr.msra.gmra.mxu0 %vm495_vm0, %v4938_v17  ;;  %v374_v32 = vld [vmem:[%s5908_s12 + $0x34] sm:$0xf]  ;;  %v5948_v33 = vcombine.low %v372_v29, %v373_v31  ;;  %v375_v34 = vld [vmem:[%s5908_s12 + $0x38] sm:$0xf]  ;;  %v4942_v58 = vcombine.low %v371_v26, %v372_v29 }
  0x17   : > { %8481 = vst [vmem:[#allocation7_spill] sm:$0xff] %v5943_v30  ;;  %5337 = vmatprep.mubr.msk.bf16.mxu0 %vm495_vm0, %v4939_v20  ;;  %v376_v37 = vld [vmem:[%s5908_s12 + $0x3c] sm:$0xf]  ;;  %v5963_v38 = vcombine.low %v374_v32, %v375_v34  ;;  %v377_v39 = vld [vmem:[%s5908_s12 + $0x40] sm:$0xf]  ;;  %v4943_v59 = vcombine.low %v373_v31, %v374_v32  ;;  %8490 = vst [vmem:[#allocation16_spill] sm:$0xff] %v6046_v11 }
  0x18   : > { %8482 = vst [vmem:[#allocation8_spill] sm:$0xff] %v5948_v33  ;;  %v378_v40 = vld [vmem:[%s5908_s12 + $0x44] sm:$0xf]  ;;  %v379_v41 = vld [vmem:[%s5908_s12 + $0x48] sm:$0xf]  ;;  %v5970_v42 = vcombine.low %v376_v37, %v377_v39  ;;  %v4944_v62 = vcombine.low %v375_v34, %v376_v37  ;;  %v5794_v12 = vmov 2  }
  0x19   : > { %8483 = vst [vmem:[#allocation9_spill] sm:$0xff] %v5963_v38  ;;  %746 = vperm.xlu1 %5675, %v5923_v19   ;;  %891 = vperm.xlu0 %5677, %v5938_v27   ;;  %v380_v43 = vld [vmem:[%s5908_s12 + $0x4c] sm:$0xf]  ;;  %v5973_v44 = vcombine.low %v378_v40, %v379_v41  ;;  %v381_v45 = vld [vmem:[%s5908_s12 + $0x50] sm:$0xf]  ;;  %v4945_v63 = vcombine.low %v377_v39, %v378_v40  ;;  %v6064_v20 = vld [vmem:[%s8377_s1 + $0x78] sm:$0xff] }
  0x1a   : > { %8484 = vst [vmem:[#allocation10_spill] sm:$0xff] %v5970_v42  ;;  %v382_v46 = vld [vmem:[%s5908_s12 + $0x54] sm:$0xf]  ;;  %v5977_v48 = vcombine.low %v380_v43, %v381_v45  ;;  %v383_v49 = vld [vmem:[%s5908_s12 + $0x58] sm:$0xf]  ;;  %v4946_v9 = vcombine.low %v379_v41, %v380_v43  ;;  %v6056_v14 = vld [vmem:[%s8377_s1 + $0x68] sm:$0xff] }
  0x1b   : > { %8485 = vst [vmem:[#allocation11_spill] sm:$0xff] %v5973_v44  ;;  %v384_v50 = vld [vmem:[%s5908_s12 + $0x5c] sm:$0xf]  ;;  %v385_v51 = vld [vmem:[%s5908_s12 + $0x60] sm:$0xf]  ;;  %v5982_v53 = vcombine.low %v382_v46, %v383_v49  ;;  %v4947_v10 = vcombine.low %v381_v45, %v382_v46  ;;  %v6072_v21 = vld [vmem:[%s8377_s1 + $0x88] sm:$0xff] }
  0x1c   : > { %8486 = vst [vmem:[#allocation12_spill] sm:$0xff] %v5977_v48  ;;  %v5984_v54 = vcombine.low %v384_v50, %v385_v51  ;;  %v386_v13 = vld [vmem:[%s5908_s12 + $0x64] sm:$0xf]  ;;  %v4948_v16 = vcombine.low %v383_v49, %v384_v50  ;;  %8491 = vst [vmem:[#allocation17_spill] sm:$0xff] %v6072_v21  ;;  %v6081_v24 = vld [vmem:[%s8377_s1 + $0x98] sm:$0xff]  ;;  %v5795_v46 = vmov 3  }
  0x1d   : > { %8487 = vst [vmem:[#allocation13_spill] sm:$0xff] %v5982_v53  ;;  %756 = vperm.xlu1 %5675, %v5954_v35   ;;  %897 = vperm.xlu0 %5677, %v5959_v36   ;;  %v4949_v17 = vcombine.low %v385_v51, %v386_v13  ;;  %v5754_v22 = vld [vmem:[%s5908_s12 + $0x68] ss:$0 sps:$4 sm:$0x11]   ;;  %v6095_v26 = vld [vmem:[%s8377_s1 + $0xb8] sm:$0xff] }
  0x1e   : > { %8488 = vst [vmem:[#allocation14_spill] sm:$0xff] %v5984_v54  ;;  %5338 = vmatmul.mubr.msk.bf16.gmra.mxu0 %vm495_vm0, %v4940_v47  ;;  %v6088_v25 = vld [vmem:[%s8377_s1 + $0xa8] sm:$0xff]  ;;  %v4966_v32 = vld [vmem:[%s8380_s4 + $0x4] sm:$0xf] }
  0x1f   : > { %5341 = vmatprep.mubr.msk.bf16.mxu0 %vm495_vm0, %v4941_v52  ;;  %8492 = vst [vmem:[#allocation18_spill] sm:$0xff] %v6088_v25  ;;  %v4991_v29 = vld [vmem:[%s8380_s4 + $0x8] sm:$0xf]  ;;  %5647 = vmatprep.subr.msk.bf16.mxu1 %vm1189_vm1, %v4966_v32  ;;  %v1191_v34 = vsel %vm1189_vm1, %v4966_v32, 0 }
  0x20   : > { %5649 = vmatprep.subr.msk.bf16.mxu0 %vm1189_vm1, %v4991_v29  ;;  %v1751_v31 = vsel %vm1189_vm1, %v4991_v29, 0  ;;  %5362 = vmatpush3.bf16.msra.mxu1 %v1191_v34 }
  0x21   : > { %5676 = vset.pattern.permute.xlu1 %v5792_v2  ;;  %903 = vperm.xlu0 %5677, %v5991_v55   ;;  %v6029_v2 = vld [vmem:[%s8377_s1 + $0xa0] sm:$0xff] }
  0x22   : > { %867 = vperm.xlu1 %5676, %v5997_v56   ;;  %5414 = vmatpush3.bf16.msra.mxu0 %v1751_v31 }
  0x25   : > { %909 = vperm.xlu0 %5677, %v6006_v57  }
  0x26   : > { %873 = vperm.xlu1 %5676, %v5866_v0   ;;  %5342 = vmatmul.mubr.msk.bf16.gmra.mxu0 %vm495_vm0, %v4942_v58 }
  0x27   : > { %5345 = vmatprep.mubr.msk.bf16.mxu0 %vm495_vm0, %v4943_v59 }
  0x29   : > { %915 = vperm.xlu0 %5677, %v6013_v60  }
  0x2a   : > { %876 = vperm.xlu1 %5676, %v5885_v5  }
  0x2d   : > { %921 = vperm.xlu0 %5677, %v6022_v61  }
  0x2e   : > { %882 = vperm.xlu1 %5676, %v5898_v7   ;;  %5346 = vmatmul.mubr.msk.bf16.gmra.mxu0 %vm495_vm0, %v4944_v62 }
  0x2f   : > { %5349 = vmatprep.mubr.msk.bf16.mxu0 %vm495_vm0, %v4945_v63 }
  0x31   : > { %927 = vperm.xlu0 %5677, %v6029_v2  }
  0x32   : > { %888 = vperm.xlu1 %5676, %v5923_v19  }
  0x35   : > { %933 = vperm.xlu0 %5677, %v6038_v4  }
  0x36   : > { %894 = vperm.xlu1 %5676, %v5954_v35   ;;  %5350 = vmatmul.mubr.msk.bf16.gmra.mxu0 %vm495_vm0, %v4946_v9 }
  0x37   : > { %5353 = vmatprep.mubr.msk.bf16.mxu0 %vm495_vm0, %v4947_v10 }
  0x39   : > { %5678 = vset.pattern.permute.xlu0 %v5794_v12 }
  0x3a   : > { %1491 = vperm.xlu0 %5678, %v5997_v56   ;;  %900 = vperm.xlu1 %5676, %v6046_v11  }
  0x3e   : > { %1500 = vperm.xlu0 %5678, %v5885_v5   ;;  %906 = vperm.xlu1 %5676, %v6056_v14  }
  0x3f   : > { %5354 = vmatmul.mubr.msk.bf16.gmra.mxu0 %vm495_vm0, %v4948_v16 }
  0x40   : > { %5357 = vmatprep.mubr.msk.bf16.mxu0 %vm495_vm0, %v4949_v17 }
  0x42   : > { %1506 = vperm.xlu0 %5678, %v5898_v7   ;;  %912 = vperm.xlu1 %5676, %v6064_v20  }
  0x46   : > { %1512 = vperm.xlu0 %5678, %v5923_v19   ;;  %918 = vperm.xlu1 %5676, %v6072_v21  }
  0x47   : > { %5358 = vmatmul.mubr.msk.bf16.gmra.mxu0 %vm495_vm0, %v5754_v22 }
  0x4a   : > { %1518 = vperm.xlu0 %5678, %v5954_v35   ;;  %924 = vperm.xlu1 %5676, %v6081_v24  }
  0x4e   : > { %1524 = vperm.xlu0 %5678, %v6046_v11   ;;  %930 = vperm.xlu1 %5676, %v6088_v25  }
  0x52   : > { %1530 = vperm.xlu0 %5678, %v6056_v14   ;;  %936 = vperm.xlu1 %5676, %v6095_v26  }
  0x56   : > { %1533 = vperm.xlu0 %5678, %v6006_v57   ;;  %5679 = vset.pattern.permute.xlu1 %v5794_v12 }
  0x57   : > { %1494 = vperm.xlu1 %5679, %v5871_v1  }
  0x5a   : > { %1539 = vperm.xlu0 %5678, %v6013_v60  }
  0x5b   : > { %1497 = vperm.xlu1 %5679, %v5866_v0  }
  0x5e   : > { %1548 = vperm.xlu0 %5678, %v6081_v24  }
  0x5f   : > { %1503 = vperm.xlu1 %5679, %v5890_v6  }
  0x62   : > { %1560 = vperm.xlu0 %5678, %v6095_v26  }
  0x63   : > { %1509 = vperm.xlu1 %5679, %v5903_v8  }
  0x66   : > { %5686 = vset.pattern.permute.xlu0 %v5793_v3 }
  0x67   : > { %711 = vperm.xlu0 %5686, %v5997_v56   ;;  %1515 = vperm.xlu1 %5679, %v5938_v27  }
  0x6b   : > { %716 = vperm.xlu0 %5686, %v5871_v1   ;;  %1521 = vperm.xlu1 %5679, %v5959_v36  }
  0x6f   : > { %731 = vperm.xlu0 %5686, %v5890_v6   ;;  %1527 = vperm.xlu1 %5679, %v5991_v55  }
  0x73   : > { %741 = vperm.xlu0 %5686, %v5903_v8   ;;  %5680 = vset.pattern.permute.xlu1 %v5793_v3 }
  0x74   : > { %766 = vperm.xlu1 %5680, %v6046_v11  }
  0x77   : > { %751 = vperm.xlu0 %5686, %v5938_v27  }
  0x78   : > { %5681 = vset.pattern.permute.xlu1 %v5794_v12 }
  0x79   : > { %1536 = vperm.xlu1 %5681, %v6064_v20  }
  0x7b   : > { %761 = vperm.xlu0 %5686, %v5959_v36  }
  0x7d   : > { %1542 = vperm.xlu1 %5681, %v6072_v21  }
  0x7f   : > { %771 = vperm.xlu0 %5686, %v5991_v55  }
  0x81   : > { %5682 = vset.pattern.permute.xlu1 %v5793_v3 }
  0x82   : > { %776 = vperm.xlu1 %5682, %v6056_v14  }
  0x83   : > { %786 = vperm.xlu0 %5686, %v6064_v20  }
  0x86   : > { %781 = vperm.xlu1 %5682, %v6006_v57  }
  0x87   : > { %791 = vperm.xlu0 %5686, %v6013_v60  }
  0x88   : > { %v6139_v37 = vpop.permute.xlu1 %721  ;;  %v6141_v39 = vpop.permute.xlu0 %870 }
  0x89   : > { %8493 = vst [vmem:[#allocation19_spill] sm:$0xff] %v6139_v37  ;;  %v940_v33 = vrot.slane %v6141_v39, 7 }
  0x8a   : > { %5683 = vset.pattern.permute.xlu1 %v5794_v12 }
  0x8b   : > { %806 = vperm.xlu0 %5686, %v6081_v24   ;;  %1545 = vperm.xlu1 %5683, %v6022_v61  }
  0x8c   : > { %v6146_v40 = vpop.permute.xlu1 %726  ;;  %v6148_v41 = vpop.permute.xlu0 %879 }
  0x8d   : > { %8494 = vst [vmem:[#allocation20_spill] sm:$0xff] %v6146_v40  ;;  %v946_v23 = vrot.slane %v6148_v41, 7 }
  0x8f   : > { %821 = vperm.xlu0 %5686, %v6038_v4   ;;  %1551 = vperm.xlu1 %5683, %v6029_v2  }
  0x90   : > { %v6152_v43 = vpop.permute.xlu1 %736  ;;  %v6154_v45 = vpop.permute.xlu0 %885 }
  0x91   : > { %8495 = vst [vmem:[#allocation21_spill] sm:$0xff] %v6152_v43  ;;  %v950_v15 = vrot.slane %v6154_v45, 7 }
  0x93   : > { %5689 = vset.pattern.permute.xlu0 %v5795_v46  ;;  %1554 = vperm.xlu1 %5683, %v6088_v25  }
  0x94   : > { %v6157_v47 = vpop.permute.xlu1 %746  ;;  %1911 = vperm.xlu0 %5689, %v5871_v1   ;;  %v6160_v49 = vpop.permute.xlu0 %891 }
  0x95   : > { %8496 = vst [vmem:[#allocation22_spill] sm:$0xff] %v6157_v47 }
  0x97   : > { %5684 = vset.pattern.permute.xlu1 %v5793_v3 }
  0x98   : > { %v6163_v50 = vpop.permute.xlu1 %756  ;;  %1923 = vperm.xlu0 %5689, %v5890_v6   ;;  %796 = vperm.xlu1 %5684, %v6072_v21   ;;  %v6167_v51 = vpop.permute.xlu0 %897 }
  0x99   : > { %8497 = vst [vmem:[#allocation23_spill] sm:$0xff] %v6163_v50  ;;  %v954_v50 = vrot.slane %v6160_v49, 7 }
  0x9c   : > { %1931 = vperm.xlu0 %5689, %v5903_v8   ;;  %801 = vperm.xlu1 %5684, %v6022_v61   ;;  %v6171_v52 = vpop.permute.xlu0 %903 }
  0x9d   : > { %v6173_v58 = vpop.permute.xlu1 %867  ;;  %v962_v45 = vrot.slane %v6171_v52, 7 }
  0x9e   : > { %v8498_v41 = vrot.slane %v6173_v58, 7 }
  0xa0   : > { %1939 = vperm.xlu0 %5689, %v5938_v27   ;;  %5685 = vset.pattern.permute.xlu1 %v5794_v12  ;;  %v6177_v59 = vpop.permute.xlu0 %909  ;;  %v6195_v12 = vld [vmem:[%s8380_s4] sm:$0xf] }
  0xa1   : > { %1557 = vperm.xlu1 %5685, %v6038_v4   ;;  %v6180_v62 = vpop.permute.xlu1 %873  ;;  %5648 = vmatprep.subr.msk.bf16.mxu1 %vm1189_vm1, %v6195_v12 }
  0xa2   : > { %v942_v18 = vrot.slane %v6180_v62, 7  ;;  %v6277_v62 = vld [vmem:[%s8379_s3] ss:$0 sm:$0xff] }
  0xa4   : > { %1947 = vperm.xlu0 %5689, %v5959_v36   ;;  %v6183_v63 = vpop.permute.xlu0 %915  ;;  %v6288_v47 = vsel %vm938_vm2, %v940_v33, %v942_v18 }
  0xa5   : > { %5687 = vset.pattern.permute.xlu1 %v5793_v3  ;;  %v6186_v9 = vpop.permute.xlu1 %876 }
  0xa6   : > { %811 = vperm.xlu1 %5687, %v6029_v2  }
  0xa8   : > { %1955 = vperm.xlu0 %5689, %v5991_v55   ;;  %v6190_v10 = vpop.permute.xlu0 %921 }
  0xa9   : > { %v6197_v13 = vpop.permute.xlu1 %882 }
  0xaa   : > { %816 = vperm.xlu1 %5687, %v6088_v25   ;;  %v948_v39 = vrot.slane %v6197_v13, 7 }
  0xac   : > { %1963 = vperm.xlu0 %5689, %v6006_v57   ;;  %v6203_v3 = vpop.permute.xlu0 %927 }
  0xad   : > { %v6205_v16 = vpop.permute.xlu1 %888 }
  0xae   : > { %826 = vperm.xlu1 %5687, %v6095_v26   ;;  %v952_v40 = vrot.slane %v6205_v16, 7 }
  0xb0   : > { %1971 = vperm.xlu0 %5689, %v6013_v60   ;;  %v6209_v55 = vpop.permute.xlu0 %933 }
  0xb1   : > { %v6211_v17 = vpop.permute.xlu1 %894 }
  0xb2   : > { %5688 = vset.pattern.permute.xlu1 %v5795_v46  ;;  %v8391_v46 = vmov 5   ;;  %v956_v52 = vrot.slane %v6211_v17, 7  ;;  %v6314_v17 = vld [vmem:[%s8380_s4 + $0x10] sm:$0xf] }
  0xb3   : > { %1907 = vperm.xlu1 %5688, %v5997_v56   ;;  %5651 = vmatprep.subr.msk.bf16.mxu0 %vm1189_vm1, %v6314_v17 }
  0xb4   : > { %1979 = vperm.xlu0 %5689, %v6022_v61  }
  0xb5   : > { %v6215_v22 = vpop.permute.xlu1 %900  ;;  %v6217_v29 = vpop.permute.xlu0 %1491 }
  0xb6   : > { %v960_v37 = vrot.slane %v6215_v22, 7 }
  0xb7   : > { %1915 = vperm.xlu1 %5688, %v5866_v0  }
  0xb8   : > { %1987 = vperm.xlu0 %5689, %v6029_v2  }
  0xb9   : > { %v6221_v31 = vpop.permute.xlu1 %906  ;;  %v6223_v60 = vpop.permute.xlu0 %1500 }
  0xbb   : > { %1919 = vperm.xlu1 %5688, %v5885_v5  }
  0xbc   : > { %1995 = vperm.xlu0 %5689, %v6038_v4  }
  0xbd   : > { %v6227_v32 = vpop.permute.xlu1 %912  ;;  %v6229_v34 = vpop.permute.xlu0 %1506 }
  0xbf   : > { %1927 = vperm.xlu1 %5688, %v5898_v7  }
  0xc0   : > { %5690 = vset.pattern.permute.xlu0 %v8391_v46 }
  0xc1   : > { %2540 = vperm.xlu0 %5690, %v5997_v56   ;;  %v6234_v2 = vpop.permute.xlu1 %918  ;;  %v6236_v54 = vpop.permute.xlu0 %1512 }
  0xc3   : > { %1935 = vperm.xlu1 %5688, %v5923_v19  }
  0xc5   : > { %2549 = vperm.xlu0 %5690, %v5885_v5   ;;  %v6240_v53 = vpop.permute.xlu1 %924  ;;  %v6242_v48 = vpop.permute.xlu0 %1518 }
  0xc7   : > { %1943 = vperm.xlu1 %5688, %v5954_v35  }
  0xc9   : > { %2555 = vperm.xlu0 %5690, %v5898_v7   ;;  %v6246_v44 = vpop.permute.xlu1 %930  ;;  %v6248_v46 = vpop.permute.xlu0 %1524 }
  0xcb   : > { %1951 = vperm.xlu1 %5688, %v6046_v11  }
  0xcd   : > { %2561 = vperm.xlu0 %5690, %v5923_v19   ;;  %v6252_v42 = vpop.permute.xlu1 %936  ;;  %v6254_v38 = vpop.permute.xlu0 %1530  ;;  %v944_v19 = vrot.slane %v6186_v9, 7  ;;  %v6283_v9 = vsel %vm938_vm2, %v8498_v41, %v940_v33  ;;  %v6300_v33 = vsel %vm938_vm2, %v946_v23, %v948_v39 }
  0xcf   : > { %1959 = vperm.xlu1 %5688, %v6056_v14   ;;  %v945_v43 = vsel %vm938_vm2, %v942_v18, %v944_v19  ;;  %v6295_v41 = vsel %vm938_vm2, %v944_v19, %v946_v23  ;;  %v6309_v19 = vsel %vm1189_vm1, %v6195_v12, 0  ;;  %v6317_v23 = vsel %vm938_vm2, %v948_v39, %v950_v15 }
  0xd0   : > { %v6327_v12 = vsel %vm938_vm2, %v950_v15, %v952_v40  ;;  %v6330_v18 = vsel %vm938_vm2, %v952_v40, %v954_v50  ;;  %v964_v39 = vrot.slane %v6221_v31, 7  ;;  %v972_v31 = vrot.slane %v6234_v2, 7 }
  0xd1   : > { %2570 = vperm.xlu0 %5690, %v5959_v36   ;;  %v6258_v5 = vpop.permute.xlu0 %1533  ;;  %v8509_v2 = vrot.slane %v6177_v59, 7  ;;  %v8513_v59 = vrot.slane %v6173_v58, 7  ;;  %v8515_v58 = vrot.slane %v6190_v10, 7 }
  0xd2   : > { %v6262_v28 = vpop.permute.xlu1 %1494 }
  0xd3   : > { %1967 = vperm.xlu1 %5688, %v6064_v20   ;;  %v958_v20 = vrot.slane %v6167_v51, 7  ;;  %v1564_v22 = vrot.slane %v6262_v28, 6  ;;  %v968_v28 = vrot.slane %v6227_v32, 7 }
  0xd5   : > { %2582 = vperm.xlu0 %5690, %v6006_v57   ;;  %v6272_v30 = vpop.permute.xlu0 %1539  ;;  %v6346_v40 = vsel %vm938_vm2, %v958_v20, %v960_v37 }
  0xd6   : > { %v1498_v13 = vpop.permute.xlu1 %1497  ;;  %v5335_v51 = vpop.f32.mrf.mxu0  ;;  %8502 = vst [vmem:[#allocation27_spill] sm:$0xff] %v6346_v40 }
  0xd7   : > { %1975 = vperm.xlu1 %5688, %v6072_v21   ;;  %v1566_v11 = vrot.slane %v1498_v13, 6  ;;  %v581_v49 = vadd.f32 %v5335_v51, %v6277_v62 }
  0xd8   : > { %v572_v27 = vpop.f32.mrf.mxu0 }
  0xd9   : > { %2594 = vperm.xlu0 %5690, %v6022_v61   ;;  %v6305_v16 = vpop.permute.xlu0 %1548  ;;  %v573_v61 = vadd.f32 %v6277_v62, %v572_v27  ;;  %v6333_v21 = vmax.f32 %v581_v49, 0.0  ;;  %v6337_v27 = vsel %vm938_vm2, %v954_v50, %v956_v52  ;;  %v1567_v57 = vsel %vm1562_vm3, %v1564_v22, %v1566_v11 }
  0xda   : > { %8499 = vst [vmem:[#allocation24_spill] sm:$0xff] %v6305_v16  ;;  %v6322_v51 = vpop.permute.xlu1 %1503  ;;  %v5336_v13 = vpop.f32.mrf.mxu0  ;;  %8501 = vst [vmem:[#allocation26_spill] sm:$0xff] %v6337_v27  ;;  %v6343_v16 = vsel %vm938_vm2, %v956_v52, %v958_v20  ;;  %v1563_v49 = vrot.slane %v6217_v29, 6  ;;  %v6362_v29 = vsel %vm938_vm2, %v960_v37, %v962_v45 }
  0xdb   : > { %8500 = vst [vmem:[#allocation25_spill] sm:$0xff] %v6333_v21  ;;  %1983 = vperm.xlu1 %5688, %v6081_v24   ;;  %v584_v15 = vadd.f32 %v5336_v13, %v6277_v62  ;;  %v6354_v27 = vmax.f32 %v573_v61, 0.0  ;;  %8506 = vst [vmem:[#allocation31_spill] sm:$0xff] %v6362_v29  ;;  %v1637_v32 = vmul.f32 %v1567_v57, %v6333_v21  ;;  %v8407_v57 = vmov 6  }
  0xdc   : > { %v575_v24 = vpop.f32.mrf.mxu0  ;;  %v6376_v29 = vsel %vm938_vm2, %v962_v45, %v964_v39  ;;  %v1572_v45 = vrot.slane %v6229_v34, 6 }
  0xdd   : > { %2606 = vperm.xlu0 %5690, %v6038_v4   ;;  %v6351_v50 = vpop.permute.xlu0 %1560  ;;  %8504 = vst [vmem:[#allocation29_spill] sm:$0xff] %v6354_v27  ;;  %v6356_v13 = vmax.f32 %v584_v15, 0.0  ;;  %v576_v52 = vadd.f32 %v6277_v62, %v575_v24  ;;  %v8507_v4 = vrot.slane %v6223_v60, 6  ;;  %v1635_v61 = vmul.f32 %v1563_v49, %v6354_v27 }
  0xde   : > { %8503 = vst [vmem:[#allocation28_spill] sm:$0xff] %v6351_v50  ;;  %v6359_v20 = vpop.permute.xlu1 %1509  ;;  %v5339_v40 = vpop.f32.mrf.mxu0 }
  0xdf   : > { %8505 = vst [vmem:[#allocation30_spill] sm:$0xff] %v6356_v13  ;;  %v1569_v50 = vsel %vm1562_vm3, %v1566_v11, %v8507_v4  ;;  %1991 = vperm.xlu1 %5688, %v6088_v25   ;;  %v6371_v15 = vmax.f32 %v576_v52, 0.0  ;;  %v1014_v37 = vmul.f32 %v945_v43, %v6356_v13  ;;  %v6381_v11 = vsel %vm938_vm2, %v964_v39, %v8509_v2 }
  0xe0   : > { %v1638_v24 = vmul.f32 %v1569_v50, %v6356_v13  ;;  %v1565_v4 = vsel %vm1562_vm3, %v1563_v49, %v1564_v22  ;;  %v588_v25 = vpop.f32.mrf.mxu0  ;;  %v1013_v52 = vmul.f32 %v6288_v47, %v6333_v21  ;;  %v8510_v50 = vmov %v8509_v2 }
  0xe1   : > { %8508 = vst [vmem:[#allocation32_spill] sm:$0xff] %v6371_v15  ;;  %5707 = vset.pattern.permute.xlu0 %v8407_v57  ;;  %v6390_v43 = vsel %vm938_vm2, %v8510_v50, %v968_v28  ;;  %v1636_v22 = vmul.f32 %v1565_v4, %v6371_v15  ;;  %v8512_v57 = vrot.slane %v6183_v63, 7  ;;  %v1011_v50 = vmul.f32 %v8513_v59, %v6354_v27 }
  0xe2   : > { %2958 = vperm.xlu0 %5707, %v5871_v1   ;;  %v6394_v39 = vpop.permute.xlu0 %711  ;;  %v6396_v2 = vpop.permute.xlu1 %1515  ;;  %v1661_v49 = vpack.c.bf16 %v1638_v24, %v1637_v32  ;;  %v1012_v13 = vmul.f32 %v6283_v9, %v6371_v15  ;;  %v589_v4 = vadd.f32 %v6277_v62, %v588_v25  ;;  %v6422_v59 = vsel %vm938_vm2, %v972_v31, %v8515_v58 }
  0xe3   : > { %8511 = vst [vmem:[#allocation33_spill] sm:$0xff] %v6394_v39  ;;  %v6402_v47 = vsel %vm938_vm2, %v968_v28, %v8512_v57  ;;  %v5340_v34 = vpop.f32.mrf.mxu0  ;;  %1999 = vperm.xlu1 %5688, %v6095_v26   ;;  %v6410_v39 = vpack.c.bf16 %v1014_v37, %v1013_v52  ;;  %v8514_v32 = vmov %v8512_v57  ;;  %v1660_v57 = vpack.c.bf16 %v1636_v22, %v1635_v61 }
  0xe4   : > { %v6415_v24 = vsel %vm938_vm2, %v8514_v32, %v972_v31  ;;  %v976_v26 = vrot.slane %v6240_v53, 7  ;;  %v980_v9 = vrot.slane %v6246_v44, 7  ;;  %v1036_v52 = vpack.c.bf16 %v1012_v13, %v1011_v50 }
  0xe5   : > { %v591_v37 = vpop.f32.mrf.mxu0  ;;  %v1570_v63 = vrot.slane %v6322_v51, 6  ;;  %v1689_v61 = vrot.slane %v1660_v57, 1  ;;  %v6433_v22 = vrot.slane %v1661_v49, 1  ;;  %v597_v31 = vadd.f32 %v5339_v40, %v6277_v62 }
  0xe6   : > { %v592_v32 = vadd.f32 %v6277_v62, %v591_v37  ;;  %2962 = vperm.xlu0 %5707, %v5866_v0   ;;  %v6429_v28 = vpop.permute.xlu0 %716  ;;  %v6431_v25 = vpop.permute.xlu1 %1521  ;;  %v600_v53 = vadd.f32 %v5340_v34, %v6277_v62  ;;  %v8517_v58 = vmov 5   ;;  %v1055_v13 = vshll.u32 %v1036_v52, 16 }
  0xe7   : > { %8516 = vst [vmem:[#allocation34_spill] sm:$0xff] %v6429_v28  ;;  %v5343_v44 = vpop.f32.mrf.mxu0  ;;  %5691 = vset.pattern.permute.xlu1 %v8517_v58  ;;  %v1060_v51 = vshll.u32 %v6410_v39, 16  ;;  %v1574_v50 = vrot.slane %v6359_v20, 6  ;;  %v6440_v37 = vmax.f32 %v589_v4, 0.0  ;;  %v1691_v49 = vsel %vm1688_vm4, %v1689_v61, %v6433_v22 }
  0xe8   : > { %v6442_v28 = vmax.f32 %v592_v32, 0.0  ;;  %2543 = vperm.xlu1 %5691, %v5871_v1   ;;  %5415 = vmatprep.mubr.msk.bf16.mxu0 %vm1152_vm5, %v1691_v49  ;;  %v1053_v27 = vshrl.u32 %v1036_v52, 16  ;;  %v1057_v21 = vrot.slane %v1055_v13, 1  ;;  %v8518_v20 = vrot.slane %v6190_v10, 7 }
  0xe9   : > { %v604_v57 = vpop.f32.mrf.mxu0  ;;  %v8519_v32 = vrot.slane %v6203_v3, 7  ;;  %v8520_v61 = vrot.slane %v6223_v60, 6  ;;  %v1573_v34 = vsel %vm1562_vm3, %v1570_v63, %v1572_v45  ;;  %v6469_v10 = vmax.f32 %v597_v31, 0.0 }
  0xea   : > { %v6453_v4 = vsel %vm938_vm2, %v8518_v20, %v976_v26  ;;  %2974 = vperm.xlu0 %5707, %v5898_v7   ;;  %v6465_v52 = vpop.permute.xlu0 %731  ;;  %v6467_v13 = vpop.permute.xlu1 %1527  ;;  %v6471_v49 = vmax.f32 %v600_v53, 0.0  ;;  %v1058_v15 = vor.u32 %v1057_v21, %v1053_v27  ;;  %v8521_v31 = vrot.slane %v6209_v55, 7 }
  0xeb   : > { %v6458_v1 = vsel %vm938_vm2, %v976_v26, %v8519_v32  ;;  %v1571_v40 = vsel %vm1562_vm3, %v8520_v61, %v1570_v63  ;;  %v5344_v20 = vpop.f32.mrf.mxu0  ;;  %v1062_v26 = vrot.slane %v1060_v51, 1  ;;  %v6476_v60 = vsel %vm938_vm2, %v8519_v32, %v980_v9 }
  0xec   : > { %v1575_v63 = vsel %vm1562_vm3, %v1572_v45, %v1574_v50  ;;  %2546 = vperm.xlu1 %5691, %v5866_v0   ;;  %v1639_v7 = vmul.f32 %v1571_v40, %v6440_v37  ;;  %v1640_v61 = vmul.f32 %v1573_v34, %v6442_v28  ;;  %v6485_v53 = vsel %vm938_vm2, %v980_v9, %v8521_v31 }
  0xed   : > { %v8522_v21 = vrot.slane %v6252_v42, 7  ;;  %v8523_v3 = vmov %v8521_v31  ;;  %v8524_v45 = vrot.slane %v6236_v54, 6  ;;  %v607_v51 = vpop.f32.mrf.mxu0  ;;  %v1063_v40 = vsel %vm1051_vm6, %v1058_v15, %v1062_v26 }
  0xee   : > { %v605_v32 = vadd.f32 %v6277_v62, %v604_v57  ;;  %v608_v9 = vadd.f32 %v6277_v62, %v607_v51  ;;  %5363 = vmatprep.mubr.msk.bf16.mxu1 %vm1152_vm5, %v1063_v40  ;;  %2978 = vperm.xlu0 %5707, %v5903_v8   ;;  %v6503_v55 = vpop.permute.xlu0 %741  ;;  %v1662_v31 = vpack.c.bf16 %v1640_v61, %v1639_v7  ;;  %v1578_v40 = vrot.slane %v6396_v2, 6 }
  0xef   : > { %v6492_v27 = vsel %vm938_vm2, %v8523_v3, %v8522_v21  ;;  %v1577_v0 = vsel %vm1562_vm3, %v1574_v50, %v8524_v45  ;;  %8525 = vst [vmem:[#allocation35_spill] sm:$0xff] %v6503_v55  ;;  %v6505_v21 = vpop.f32.mrf.mxu0  ;;  %v6507_v3 = vpop.permute.xlu1 %766  ;;  %v1641_v50 = vmul.f32 %v1575_v63, %v6469_v10  ;;  %v1015_v57 = vmul.f32 %v6295_v41, %v6440_v37 }
  0xf0   : > { %8526 = vst [vmem:[#allocation36_spill] sm:$0xff] %v6507_v3  ;;  %v1642_v15 = vmul.f32 %v1577_v0, %v6471_v49  ;;  %v1016_v45 = vmul.f32 %v6300_v33, %v6442_v28  ;;  %2552 = vperm.xlu1 %5691, %v5890_v6   ;;  %v1692_v7 = vrot.slane %v1662_v31, 1  ;;  %v2384_v61 = vsel %vm1189_vm1, %v6314_v17, 0 }
  0xf1   : > { %v613_v63 = vadd.f32 %v5343_v44, %v6277_v62  ;;  %v1064_v0 = vshrl.u32 %v6410_v39, 16  ;;  %v620_v34 = vpop.f32.mrf.mxu0  ;;  %v1582_v55 = vrot.slane %v6431_v25, 6  ;;  %v616_v33 = vadd.f32 %v5344_v20, %v6277_v62 }
  0xf2   : > { %v1663_v3 = vpack.c.bf16 %v1642_v15, %v1641_v50  ;;  %v1038_v41 = vpack.c.bf16 %v1016_v45, %v1015_v57  ;;  %v6524_v51 = vmax.f32 %v608_v9, 0.0  ;;  %v1693_v6 = vsel %vm1688_vm4, %v6433_v22, %v1692_v7  ;;  %2990 = vperm.xlu0 %5707, %v5954_v35   ;;  %v6529_v2 = vpop.permute.xlu0 %751 }
  0xf3   : > { %8528 = vst [vmem:[#allocation38_spill] sm:$0xff] %v6529_v2  ;;  %v6531_v17 = vmax.f32 %v605_v32, 0.0  ;;  %5416 = vmatmul.mubr.msk.bf16.vlgmr.msra.gmra.mxu0 %vm1152_vm5, %v1693_v6  ;;  %v5348_v44 = vpop.f32.mrf.mxu0  ;;  %v1018_v25 = vmul.f32 %v6327_v12, %v6471_v49  ;;  %v8416_v20 = vrot.slane %v6254_v38, 6  ;;  %v8529_v9 = vrot.slane %v6236_v54, 6 }
  0xf4   : > { %8527 = vst [vmem:[#allocation37_spill] sm:$0xff] %v6524_v51  ;;  %v1694_v39 = vrot.slane %v1663_v3, 1  ;;  %v1068_v31 = vshll.u32 %v1038_v41, 16  ;;  %v8530_v50 = vrot.slane %v6242_v48, 6  ;;  %2558 = vperm.xlu1 %5691, %v5903_v8   ;;  %v6544_v32 = vpop.permute.xlu1 %1536  ;;  %v1017_v3 = vmul.f32 %v6317_v23, %v6469_v10  ;;  %5466 = vmatpush3.bf16.msra.mxu0 %v2384_v61 }
  0xf5   : > { %v1579_v22 = vsel %vm1562_vm3, %v8529_v9, %v1578_v40  ;;  %v6548_v57 = vmax.f32 %v613_v63, 0.0  ;;  %v1066_v12 = vor.u32 %v1064_v0, %v1062_v26  ;;  %v623_v6 = vpop.f32.mrf.mxu0  ;;  %v6551_v9 = vmax.f32 %v616_v33, 0.0  ;;  %v6575_v33 = vld [vmem:[%s8380_s4 + $0xc] sm:$0xf] }
  0xf6   : > { %v1581_v15 = vsel %vm1562_vm3, %v1578_v40, %v8530_v50  ;;  %v1695_v45 = vsel %vm1688_vm4, %v1692_v7, %v1694_v39  ;;  %v1070_v54 = vrot.slane %v1068_v31, 1  ;;  %v6554_v40 = vpack.c.bf16 %v1018_v25, %v1017_v3  ;;  %2994 = vperm.xlu0 %5707, %v5959_v36   ;;  %v6557_v50 = vpop.permute.xlu0 %761 }
  0xf7   : > { %8531 = vst [vmem:[#allocation39_spill] sm:$0xff] %v6548_v57  ;;  %8532 = vst [vmem:[#allocation40_spill] sm:$0xff] %v6551_v9  ;;  %5419 = vmatprep.mubr.msk.bf16.mxu0 %vm1152_vm5, %v1695_v45  ;;  %v1072_v8 = vshrl.u32 %v1038_v41, 16  ;;  %v1644_v23 = vmul.f32 %v1581_v15, %v6524_v51  ;;  %v8534_v61 = vrot.slane %v6258_v5, 6  ;;  %v8535_v7 = vrot.slane %v6242_v48, 6  ;;  %v5351_v41 = vpop.f32.mrf.mxu0 }
  0xf8   : > { %8533 = vst [vmem:[#allocation41_spill] sm:$0xff] %v6557_v50  ;;  %v1071_v0 = vsel %vm1051_vm6, %v1066_v12, %v1070_v54  ;;  %v1643_v36 = vmul.f32 %v1579_v22, %v6531_v17  ;;  %v621_v31 = vadd.f32 %v6277_v62, %v620_v34  ;;  %v1076_v48 = vshll.u32 %v6554_v40, 16  ;;  %v6582_v12 = vpop.permute.xlu1 %1542 }
  0xf9   : > { %v6565_v26 = vsel %vm1562_vm3, %v8416_v20, %v8534_v61  ;;  %v1583_v63 = vsel %vm1562_vm3, %v8535_v7, %v1582_v55  ;;  %5364 = vmatmul.mubr.msk.bf16.vlgmr.msra.gmra.mxu1 %vm1152_vm5, %v1071_v0  ;;  %v1074_v15 = vor.u32 %v1072_v8, %v1070_v54  ;;  %v8536_v3 = vmov 6   ;;  %v636_v34 = vpop.f32.mrf.mxu0 }
  0xfa   : > { %5692 = vset.pattern.permute.xlu1 %v8536_v3  ;;  %v8537_v45 = vrot.slane %v6248_v46, 6  ;;  %v632_v7 = vadd.f32 %v5348_v44, %v6277_v62  ;;  %v1664_v20 = vpack.c.bf16 %v1644_v23, %v1643_v36  ;;  %5388 = vmatpush3.bf16.msra.mxu1 %v6309_v19  ;;  %v624_v54 = vadd.f32 %v6277_v62, %v623_v6  ;;  %v6595_v22 = vpop.permute.xlu0 %771 }
  0xfb   : > { %2954 = vperm.xlu1 %5692, %v5997_v56   ;;  %v1078_v8 = vrot.slane %v1076_v48, 1  ;;  %v1645_v0 = vmul.f32 %v1583_v63, %v6548_v57  ;;  %3006 = vperm.xlu0 %5707, %v6056_v14   ;;  %8538 = vst [vmem:[#allocation42_spill] sm:$0xff] %v6595_v22  ;;  %v1586_v56 = vrot.slane %v6467_v13, 6  ;;  %v629_v19 = vadd.f32 %v6505_v21, %v6277_v62  ;;  %v6603_v23 = vpop.f32.mrf.mxu0 }
  0xfc   : > { %v1585_v61 = vsel %vm1562_vm3, %v1582_v55, %v8537_v45  ;;  %5650 = vmatprep.subr.msk.bf16.mxu1 %vm1189_vm1, %v6575_v33  ;;  %v8539_v55 = vld [vmem:[#allocation24_spill] sm:$0xff]  ;;  %v1696_v6 = vrot.slane %v1664_v20, 1  ;;  %v6605_v63 = vmax.f32 %v621_v31, 0.0  ;;  %v8541_v36 = vrot.slane %v6544_v32, 6  ;;  %v8544_v20 = vld [vmem:[#allocation26_spill] sm:$0xff] }
  0xfd   : > { %v1646_v25 = vmul.f32 %v1585_v61, %v6551_v9  ;;  %v8542_v14 = vrot.slane %v6258_v5, 6  ;;  %v1079_v45 = vsel %vm1051_vm6, %v1074_v15, %v1078_v8  ;;  %v6613_v44 = vmax.f32 %v632_v7, 0.0  ;;  %v639_v22 = vpop.f32.mrf.mxu0  ;;  %v6622_v5 = vpop.permute.xlu1 %776 }
  0xfe   : > { %8540 = vst [vmem:[#allocation24_spill] sm:$0xff] %v6605_v63  ;;  %5367 = vmatprep.mubr.msk.bf16.mxu1 %vm1152_vm5, %v1079_v45  ;;  %v1697_v13 = vsel %vm1688_vm4, %v1694_v39, %v1696_v6  ;;  %v1019_v21 = vmul.f32 %v6330_v18, %v6531_v17  ;;  %v1020_v31 = vmul.f32 %v8544_v20, %v6524_v51  ;;  %8545 = vst [vmem:[#allocation26_spill] sm:$0xff] %v6622_v5  ;;  %v8547_v39 = vld [vmem:[#allocation27_spill] sm:$0xff]  ;;  %v8553_v5 = vld [vmem:[#allocation5_spill] sm:$0xff] }
  0xff   : > { %v1593_v48 = vsel %vm1562_vm3, %v8542_v14, %v8541_v36  ;;  %v1665_v61 = vpack.c.bf16 %v1646_v25, %v1645_v0  ;;  %8543 = vst [vmem:[#allocation43_spill] sm:$0xff] %v6613_v44  ;;  %5693 = vset.pattern.permute.xlu1 %v8517_v58  ;;  %v6624_v36 = vmax.f32 %v624_v54, 0.0  ;;  %5420 = vmatmul.mubr.msk.bf16.gmra.mxu0 %vm1152_vm5, %v1697_v13  ;;  %v8548_v18 = vld [vmem:[#allocation15_spill] sm:$0xff]  ;;  %v6632_v0 = vpop.permute.xlu0 %786  ;;  %v8550_v14 = vrot.slane %v6248_v46, 6 }
 0x100   : > { %v1021_v15 = vmul.f32 %v6343_v16, %v6548_v57  ;;  %v1022_v7 = vmul.f32 %v8547_v39, %v6551_v9  ;;  %3010 = vperm.xlu0 %5707, %v8548_v18   ;;  %8549 = vst [vmem:[#allocation27_spill] sm:$0xff] %v6632_v0  ;;  %v8551_v54 = vrot.slane %v6254_v38, 6  ;;  %v6640_v13 = vmax.f32 %v629_v19, 0.0  ;;  %2564 = vperm.xlu1 %5693, %v8553_v5   ;;  %v5355_v16 = vpop.f32.mrf.mxu0 }
 0x101   : > { %8546 = vst [vmem:[#allocation44_spill] sm:$0xff] %v6624_v36  ;;  %v1698_v25 = vrot.slane %v1665_v61, 1  ;;  %v1587_v45 = vsel %vm1562_vm3, %v8550_v14, %v1586_v56  ;;  %v1040_v61 = vpack.c.bf16 %v1020_v31, %v1019_v21  ;;  %v645_v39 = vadd.f32 %v5351_v41, %v6277_v62  ;;  %v6652_v31 = vpop.permute.xlu1 %781 }
 0x102   : > { %v1589_v20 = vsel %vm1562_vm3, %v1586_v56, %v8551_v54  ;;  %8552 = vst [vmem:[#allocation15_spill] sm:$0xff] %v6640_v13  ;;  %v6646_v50 = vpack.c.bf16 %v1022_v7, %v1021_v15  ;;  %v1650_v46 = vmul.f32 %v1593_v48, %v6613_v44  ;;  %v637_v38 = vadd.f32 %v6277_v62, %v636_v34  ;;  %v652_v21 = vpop.f32.mrf.mxu0  ;;  %v8555_v7 = vld [vmem:[#allocation17_spill] sm:$0xff] }
 0x103   : > { %v1699_v0 = vsel %vm1688_vm4, %v1696_v6, %v1698_v25  ;;  %v1080_v56 = vshrl.u32 %v6554_v40, 16  ;;  %v1084_v19 = vshll.u32 %v1040_v61, 16  ;;  %8554 = vst [vmem:[#allocation5_spill] sm:$0xff] %v6652_v31  ;;  %v640_v41 = vadd.f32 %v6277_v62, %v639_v22  ;;  %v6659_v48 = vpop.permute.xlu0 %791 }
 0x104   : > { %5423 = vmatprep.mubr.msk.bf16.mxu0 %vm1152_vm5, %v1699_v0  ;;  %v1092_v5 = vshll.u32 %v6646_v50, 16  ;;  %v1647_v6 = vmul.f32 %v1587_v45, %v6605_v63  ;;  %v1648_v15 = vmul.f32 %v1589_v20, %v6624_v36  ;;  %3022 = vperm.xlu0 %5707, %v8555_v7   ;;  %8556 = vst [vmem:[#allocation17_spill] sm:$0xff] %v6659_v48  ;;  %v1088_v14 = vshrl.u32 %v1040_v61, 16  ;;  %v5356_v54 = vpop.f32.mrf.mxu0 }
 0x105   : > { %v1082_v34 = vor.u32 %v1080_v56, %v1078_v8  ;;  %v1086_v0 = vrot.slane %v1084_v19, 1  ;;  %v1649_v40 = vmul.f32 %v6565_v26, %v6640_v13  ;;  %2567 = vperm.xlu1 %5693, %v5954_v35   ;;  %v8557_v22 = vrot.slane %v6272_v30, 6 }
 0x106   : > { %v8558_v18 = vrot.slane %v6544_v32, 6  ;;  %v6669_v20 = vmax.f32 %v645_v39, 0.0  ;;  %v8560_v7 = vrot.slane %v6582_v12, 6  ;;  %v1666_v56 = vpack.c.bf16 %v1648_v15, %v1647_v6  ;;  %v655_v31 = vpop.f32.mrf.mxu0  ;;  %v8563_v39 = vld [vmem:[#allocation31_spill] sm:$0xff]  ;;  %v1546_v6 = vpop.permute.xlu1 %1545 }
 0x107   : > { %v8561_v8 = vmov %v8557_v22  ;;  %v1087_v26 = vsel %vm1051_vm6, %v1082_v34, %v1086_v0  ;;  %v1090_v19 = vor.u32 %v1088_v14, %v1086_v0  ;;  %v1094_v35 = vrot.slane %v1092_v5, 1  ;;  %v6685_v15 = vpop.permute.xlu0 %806 }
 0x108   : > { %v1595_v45 = vsel %vm1562_vm3, %v8558_v18, %v8557_v22  ;;  %8559 = vst [vmem:[#allocation45_spill] sm:$0xff] %v6669_v20  ;;  %v1597_v61 = vsel %vm1562_vm3, %v8561_v8, %v8560_v7  ;;  %v1667_v48 = vpack.c.bf16 %v1650_v46, %v1649_v40  ;;  %v6677_v2 = vmax.f32 %v637_v38, 0.0  ;;  %5368 = vmatmul.mubr.msk.bf16.gmra.mxu1 %vm1152_vm5, %v1087_v26  ;;  %v8564_v22 = vld [vmem:[#allocation18_spill] sm:$0xff]  ;;  %v6695_v0 = vpop.f32.mrf.mxu0 }
 0x109   : > { %v1700_v32 = vrot.slane %v1666_v56, 1  ;;  %v1023_v18 = vmul.f32 %v8563_v39, %v6605_v63  ;;  %v1024_v30 = vmul.f32 %v6376_v29, %v6624_v36  ;;  %3038 = vperm.xlu0 %5707, %v8564_v22   ;;  %v648_v46 = vadd.f32 %v6603_v23, %v6277_v62  ;;  %5694 = vset.pattern.permute.xlu1 %v8536_v3  ;;  %v6725_v22 = vld [vmem:[%s8377_s1] sm:$0xff] }
 0x10a   : > { %8562 = vst [vmem:[#allocation46_spill] sm:$0xff] %v6677_v2  ;;  %v6689_v5 = vmax.f32 %v640_v41, 0.0  ;;  %v1095_v38 = vsel %vm1051_vm6, %v1090_v19, %v1094_v35  ;;  %v6692_v34 = vrot.slane %v1667_v48, 1  ;;  %8566 = vst [vmem:[#allocation18_spill] sm:$0xff] %v6695_v0  ;;  %v1025_v40 = vmul.f32 %v6381_v11, %v6640_v13  ;;  %v668_v11 = vpop.f32.mrf.mxu0  ;;  %v1552_v19 = vpop.permute.xlu1 %1551 }
 0x10b   : > { %5371 = vmatprep.mubr.msk.bf16.mxu1 %vm1152_vm5, %v1095_v38  ;;  %v1701_v29 = vsel %vm1688_vm4, %v1698_v25, %v1700_v32  ;;  %v1042_v14 = vpack.c.bf16 %v1024_v30, %v1023_v18  ;;  %v1026_v23 = vmul.f32 %v6390_v43, %v6613_v44  ;;  %v661_v41 = vadd.f32 %v5355_v16, %v6277_v62  ;;  %v6712_v25 = vld [vmem:[%s8377_s1 + $0x18] sm:$0xff] }
 0x10c   : > { %8565 = vst [vmem:[#allocation31_spill] sm:$0xff] %v6689_v5  ;;  %v653_v48 = vadd.f32 %v6277_v62, %v652_v21  ;;  %5424 = vmatmul.mubr.msk.bf16.gmra.mxu0 %vm1152_vm5, %v1701_v29  ;;  %v1703_v7 = vsel %vm1688_vm4, %v1700_v32, %v6692_v34  ;;  %v1096_v8 = vshrl.u32 %v6646_v50, 16  ;;  %2966 = vperm.xlu1 %5694, %v6712_v25   ;;  %v1598_v56 = vrot.slane %v1546_v6, 6  ;;  %v6718_v50 = vpop.permute.xlu0 %821 }
 0x10d   : > { %5427 = vmatprep.mubr.msk.bf16.mxu0 %vm1152_vm5, %v1703_v7  ;;  %v1100_v43 = vshll.u32 %v1042_v14, 16  ;;  %v656_v16 = vadd.f32 %v6277_v62, %v655_v31  ;;  %v1043_v21 = vpack.c.bf16 %v1026_v23, %v1025_v40  ;;  %v8417_v26 = vmov 7   ;;  %8567 = vst [vmem:[#allocation47_spill] sm:$0xff] %v6718_v50  ;;  %v5360_v31 = vpop.f32.mrf.mxu0 }
 0x10e   : > { %5712 = vset.pattern.permute.xlu0 %v8417_v26  ;;  %v1098_v32 = vor.u32 %v1096_v8, %v1094_v35  ;;  %v1104_v39 = vshrl.u32 %v1042_v14, 16  ;;  %v1651_v18 = vmul.f32 %v1595_v45, %v6677_v2  ;;  %v1652_v30 = vmul.f32 %v1597_v61, %v6689_v5  ;;  %v6743_v26 = vpop.permute.xlu1 %1554 }
 0x10f   : > { %3280 = vperm.xlu0 %5712, %v6725_v22   ;;  %v1102_v6 = vrot.slane %v1100_v43, 1  ;;  %v1108_v38 = vshll.u32 %v1043_v21, 16  ;;  %v8568_v29 = vrot.slane %v6582_v12, 6  ;;  %v8569_v35 = vrot.slane %v8539_v55, 6 }
 0x110   : > { %v6734_v14 = vmax.f32 %v648_v46, 0.0  ;;  %v6736_v61 = vmax.f32 %v661_v41, 0.0  ;;  %v664_v23 = vadd.f32 %v5356_v54, %v6277_v62  ;;  %5695 = vset.pattern.permute.xlu1 %v8517_v58  ;;  %v1668_v31 = vpack.c.bf16 %v1652_v30, %v1651_v18 }
 0x111   : > { %v1599_v40 = vsel %vm1562_vm3, %v8568_v29, %v1598_v56  ;;  %v1601_v45 = vsel %vm1562_vm3, %v1598_v56, %v8569_v35  ;;  %v1103_v8 = vsel %vm1051_vm6, %v1098_v32, %v1102_v6  ;;  %v1106_v43 = vor.u32 %v1104_v39, %v1102_v6  ;;  %v8572_v29 = vld [vmem:[#allocation16_spill] sm:$0xff]  ;;  %v6752_v32 = vpop.permute.xlu0 %1911 }
 0x112   : > { %8570 = vst [vmem:[#allocation48_spill] sm:$0xff] %v6734_v14  ;;  %8571 = vst [vmem:[#allocation49_spill] sm:$0xff] %v6736_v61  ;;  %v1653_v7 = vmul.f32 %v1599_v40, %v6669_v20  ;;  %v1110_v12 = vrot.slane %v1108_v38, 1  ;;  %2573 = vperm.xlu1 %5695, %v8572_v29   ;;  %5372 = vmatmul.mubr.msk.bf16.gmra.mxu1 %vm1152_vm5, %v1103_v8  ;;  %v1654_v46 = vmul.f32 %v1601_v45, %v6734_v14 }
 0x113   : > { %v1602_v41 = vrot.slane %v1552_v19, 6  ;;  %v1027_v54 = vmul.f32 %v6402_v47, %v6677_v2  ;;  %v1028_v56 = vmul.f32 %v6415_v24, %v6689_v5  ;;  %3289 = vperm.xlu0 %5712, %v6712_v25   ;;  %8573 = vst [vmem:[#allocation16_spill] sm:$0xff] %v6752_v32  ;;  %v6754_v39 = vmax.f32 %v653_v48, 0.0  ;;  %v6769_v48 = vld [vmem:[%s8380_s4 + $0x18] sm:$0xf] }
 0x114   : > { %v6756_v18 = vmax.f32 %v656_v16, 0.0  ;;  %v1111_v30 = vsel %vm1051_vm6, %v1106_v43, %v1110_v12  ;;  %v1704_v6 = vrot.slane %v1668_v31, 1  ;;  %v6759_v38 = vmax.f32 %v664_v23, 0.0  ;;  %5653 = vmatprep.subr.msk.bf16.mxu0 %vm1189_vm1, %v6769_v48 }
 0x115   : > { %8574 = vst [vmem:[#allocation50_spill] sm:$0xff] %v6754_v39  ;;  %5375 = vmatprep.mubr.msk.bf16.mxu1 %vm1152_vm5, %v1111_v30  ;;  %v1044_v19 = vpack.c.bf16 %v1028_v56, %v1027_v54  ;;  %v1029_v47 = vmul.f32 %v6422_v59, %v6669_v20  ;;  %v1030_v24 = vmul.f32 %v6453_v4, %v6734_v14  ;;  %v1112_v35 = vshrl.u32 %v1043_v21, 16  ;;  %v6790_v21 = vpop.permute.xlu0 %1923  ;;  %v6802_v54 = vld [vmem:[%s8377_s1 + $0x28] sm:$0xff]  ;;  %v8580_v30 = vld [vmem:[#allocation28_spill] sm:$0xff] }
 0x116   : > { %8575 = vst [vmem:[#allocation51_spill] sm:$0xff] %v6756_v18  ;;  %8576 = vst [vmem:[#allocation52_spill] sm:$0xff] %v6759_v38  ;;  %v669_v16 = vadd.f32 %v6277_v62, %v668_v11  ;;  %v1705_v40 = vsel %vm1688_vm4, %v6692_v34, %v1704_v6  ;;  %v8419_v45 = vrot.slane %v6743_v26, 6  ;;  %5696 = vset.pattern.permute.xlu1 %v8536_v3  ;;  %v8577_v59 = vrot.slane %v8539_v55, 6  ;;  %v6785_v62 = vld [vmem:[%s8377_s1 + $0x20] sm:$0xff]  ;;  %v6788_v11 = vpop.permute.xlu1 %796 }
 0x117   : > { %5428 = vmatmul.mubr.msk.bf16.gmra.mxu0 %vm1152_vm5, %v1705_v40  ;;  %v1116_v23 = vshll.u32 %v1044_v19, 16  ;;  %v1045_v8 = vpack.c.bf16 %v1030_v24, %v1029_v47  ;;  %8578 = vst [vmem:[#allocation53_spill] sm:$0xff] %v6785_v62  ;;  %2970 = vperm.xlu1 %5696, %v6785_v62   ;;  %v1669_v34 = vpack.c.bf16 %v1654_v46, %v1653_v7  ;;  %8579 = vst [vmem:[#allocation54_spill] sm:$0xff] %v6790_v21 }
 0x118   : > { %v1603_v4 = vsel %vm1562_vm3, %v8577_v59, %v1602_v41  ;;  %v1114_v43 = vor.u32 %v1112_v35, %v1110_v12  ;;  %v1605_v55 = vsel %vm1562_vm3, %v1602_v41, %v8419_v45  ;;  %v1031_v31 = vmul.f32 %v6458_v1, %v6754_v39  ;;  %3295 = vperm.xlu0 %5712, %v6802_v54  }
 0x119   : > { %v1032_v29 = vmul.f32 %v6476_v60, %v6756_v18  ;;  %v1118_v7 = vrot.slane %v1116_v23, 1  ;;  %v1120_v46 = vshrl.u32 %v1044_v19, 16  ;;  %v1124_v12 = vshll.u32 %v1045_v8, 16  ;;  %v6814_v19 = vpop.permute.xlu0 %1931 }
 0x11a   : > { %v1706_v56 = vrot.slane %v1669_v34, 1  ;;  %v1608_v47 = vrot.slane %v8580_v30, 6  ;;  %v6806_v41 = vmax.f32 %v669_v16, 0.0  ;;  %v1656_v1 = vmul.f32 %v1605_v55, %v6756_v18  ;;  %v6812_v45 = vpop.permute.xlu1 %801  ;;  %8581 = vst [vmem:[#allocation28_spill] sm:$0xff] %v6814_v19 }
 0x11b   : > { %v1046_v24 = vpack.c.bf16 %v1032_v29, %v1031_v31  ;;  %v1119_v60 = vsel %vm1051_vm6, %v1114_v43, %v1118_v7  ;;  %v1122_v40 = vor.u32 %v1120_v46, %v1118_v7  ;;  %v1126_v35 = vrot.slane %v1124_v12, 1  ;;  %5697 = vset.pattern.permute.xlu1 %v8517_v58  ;;  %v6827_v31 = vld [vmem:[%s8377_s1 + $0x60] sm:$0xff] }
 0x11c   : > { %v1707_v59 = vsel %vm1688_vm4, %v1704_v6, %v1706_v56  ;;  %v1655_v23 = vmul.f32 %v1603_v4, %v6754_v39  ;;  %5376 = vmatmul.mubr.msk.bf16.gmra.mxu1 %vm1152_vm5, %v1119_v60  ;;  %v1033_v34 = vmul.f32 %v6485_v53, %v6736_v61  ;;  %v1034_v43 = vmul.f32 %v6492_v27, %v6759_v38  ;;  %v6833_v4 = vld [vmem:[%s8377_s1 + $0x38] sm:$0xff] }
 0x11d   : > { %5431 = vmatprep.mubr.msk.bf16.mxu0 %vm1152_vm5, %v1707_v59  ;;  %v1132_v16 = vshll.u32 %v1046_v24, 16  ;;  %v1127_v6 = vsel %vm1051_vm6, %v1122_v40, %v1126_v35  ;;  %v1128_v55 = vshrl.u32 %v1045_v8, 16  ;;  %2576 = vperm.xlu1 %5697, %v6827_v31   ;;  %8582 = vst [vmem:[#allocation55_spill] sm:$0xff] %v6833_v4  ;;  %v1136_v29 = vshrl.u32 %v1046_v24, 16  ;;  %v6840_v30 = vpop.permute.xlu0 %1939  ;;  %v6847_v24 = vld [vmem:[%s8377_s1 + $0x68] sm:$0xff] }
 0x11e   : > { %3301 = vperm.xlu0 %5712, %v6833_v4   ;;  %5379 = vmatprep.mubr.msk.bf16.mxu1 %vm1152_vm5, %v1127_v6  ;;  %v1047_v27 = vpack.c.bf16 %v1034_v43, %v1033_v34  ;;  %v1670_v8 = vpack.c.bf16 %v1656_v1, %v1655_v23  ;;  %v8583_v46 = vrot.slane %v6252_v42, 7  ;;  %8584 = vst [vmem:[#allocation56_spill] sm:$0xff] %v6840_v30  ;;  %v1558_v0 = vpop.permute.xlu1 %1557  ;;  %8585 = vst [vmem:[#allocation57_spill] sm:$0xff] %v6847_v24  ;;  %v6853_v42 = vld [vmem:[%s8377_s1 + $0x58] sm:$0xff]  ;;  %v8587_v34 = vld [vmem:[#allocation32_spill] sm:$0xff] }
 0x11f   : > { %v1134_v53 = vrot.slane %v1132_v16, 1  ;;  %v1130_v7 = vor.u32 %v1128_v55, %v1126_v35  ;;  %v1659_v60 = vmul.f32 %v1608_v47, %v6806_v41  ;;  %8586 = vst [vmem:[#allocation58_spill] sm:$0xff] %v6853_v42  ;;  %v1606_v35 = vrot.slane %v1558_v0, 6  ;;  %v8588_v43 = vld [vmem:[#allocation25_spill] sm:$0xff] }
 0x120   : > { %v1035_v12 = vmul.f32 %v8583_v46, %v6806_v41  ;;  %v1140_v59 = vshll.u32 %v1047_v27, 16  ;;  %v1708_v19 = vrot.slane %v1670_v8, 1  ;;  %v2232_v6 = vpack.c.bf16 %v8588_v43, %v8587_v34  ;;  %v8592_v30 = vld [vmem:[#allocation33_spill] sm:$0xff] }
 0x121   : > { %v1138_v40 = vor.u32 %v1136_v29, %v1134_v53  ;;  %v1135_v62 = vsel %vm1051_vm6, %v1130_v7, %v1134_v53  ;;  %2579 = vperm.xlu1 %5697, %v6847_v24   ;;  %v1672_v16 = vpack.c.bf16 %v1659_v60, %v1659_v60  ;;  %v8589_v29 = vrot.slane %v6743_v26, 6  ;;  %v6863_v46 = vpop.permute.xlu0 %1947  ;;  %v8593_v60 = vld [vmem:[#allocation34_spill] sm:$0xff] }
 0x122   : > { %v1048_v1 = vpack.c.bf16 %v1035_v12, %v1035_v12  ;;  %3313 = vperm.xlu0 %5712, %v6853_v42   ;;  %v1142_v23 = vrot.slane %v1140_v59, 1  ;;  %v1709_v55 = vsel %vm1688_vm4, %v1706_v56, %v1708_v19  ;;  %v1609_v7 = vsel %vm1562_vm3, %v1606_v35, %v1608_v47  ;;  %8590 = vst [vmem:[#allocation25_spill] sm:$0xff] %v6863_v46  ;;  %v8591_v12 = vld [vmem:[#allocation29_spill] sm:$0xff]  ;;  %v6876_v59 = vpop.permute.xlu1 %811 }
 0x123   : > { %v1607_v8 = vsel %vm1562_vm3, %v8589_v29, %v1606_v35  ;;  %v829_v21 = vmul.f32 %v8592_v30, %v8591_v12  ;;  %5432 = vmatmul.mubr.msk.bf16.gmra.mxu0 %vm1152_vm5, %v1709_v55  ;;  %v830_v26 = vmul.f32 %v8593_v60, %v8587_v34  ;;  %v1658_v47 = vmul.f32 %v1609_v7, %v6759_v38  ;;  %v8594_v30 = vld [vmem:[#allocation30_spill] sm:$0xff] }
 0x124   : > { %v1148_v53 = vshll.u32 %v1048_v1, 16  ;;  %5380 = vmatmul.mubr.msk.bf16.gmra.mxu1 %vm1152_vm5, %v1135_v62  ;;  %v1143_v0 = vsel %vm1051_vm6, %v1138_v40, %v1142_v23  ;;  %v1657_v56 = vmul.f32 %v1607_v8, %v6736_v61  ;;  %v2233_v62 = vpack.c.bf16 %v6440_v37, %v8594_v30  ;;  %v6883_v40 = vld [vmem:[%s8377_s1 + $0x78] sm:$0xff] }
 0x125   : > { %5383 = vmatprep.mubr.msk.bf16.mxu1 %vm1152_vm5, %v1143_v0  ;;  %5698 = vset.pattern.permute.xlu1 %v8536_v3  ;;  %v1144_v1 = vshrl.u32 %v1047_v27, 16  ;;  %8595 = vst [vmem:[#allocation29_spill] sm:$0xff] %v6883_v40  ;;  %v2248_v35 = vshrl.u32 %v2232_v6, 16  ;;  %v2250_v55 = vshll.u32 %v2232_v6, 16  ;;  %v2234_v29 = vpack.c.bf16 %v6469_v10, %v6442_v28  ;;  %v6889_v7 = vpop.permute.xlu0 %1955 }
 0x126   : > { %3325 = vperm.xlu0 %5712, %v6883_v40   ;;  %2982 = vperm.xlu1 %5698, %v6833_v4   ;;  %v1150_v8 = vrot.slane %v1148_v53, 1  ;;  %8596 = vst [vmem:[#allocation33_spill] sm:$0xff] %v6889_v7  ;;  %v1671_v12 = vpack.c.bf16 %v1658_v47, %v1657_v56  ;;  %v1712_v0 = vrot.slane %v1672_v16, 1  ;;  %v2255_v27 = vshll.u32 %v2233_v62, 16  ;;  %v6895_v50 = vpop.permute.xlu1 %816  ;;  %v6900_v53 = vld [vmem:[%s8377_s1 + $0x98] sm:$0xff] }
 0x127   : > { %v2252_v60 = vrot.slane %v2250_v55, 1  ;;  %v6893_v46 = vpack.c.bf16 %v6531_v17, %v6471_v49  ;;  %v853_v34 = vpack.c.bf16 %v830_v26, %v829_v21  ;;  %v1146_v32 = vor.u32 %v1144_v1, %v1142_v23 }
 0x128   : > { %v1710_v4 = vrot.slane %v1671_v12, 1  ;;  %v2257_v6 = vrot.slane %v2255_v27, 1  ;;  %v2263_v56 = vshll.u32 %v2234_v29, 16  ;;  %v2259_v1 = vshrl.u32 %v2233_v62, 16 }
 0x129   : > { %v2253_v16 = vor.u32 %v2252_v60, %v2248_v35  ;;  %v1151_v47 = vsel %vm1051_vm6, %v1146_v32, %v1150_v8  ;;  %v6908_v26 = vpop.permute.xlu0 %1963  ;;  %v2267_v12 = vshrl.u32 %v2234_v29, 16  ;;  %v2271_v35 = vshll.u32 %v6893_v46, 16  ;;  %v8600_v60 = vld [vmem:[#allocation19_spill] sm:$0xff] }
 0x12a   : > { %3337 = vperm.xlu0 %5712, %v6900_v53   ;;  %5699 = vset.pattern.permute.xlu1 %v8517_v58  ;;  %v1711_v21 = vsel %vm1688_vm4, %v1708_v19, %v1710_v4  ;;  %v1713_v23 = vsel %vm1688_vm4, %v1710_v4, %v1712_v0  ;;  %8597 = vst [vmem:[#allocation34_spill] sm:$0xff] %v6908_v26  ;;  %v6916_v32 = vpop.permute.xlu1 %826  ;;  %v8598_v19 = vld [vmem:[#allocation20_spill] sm:$0xff]  ;;  %v8424_v8 = vmov 8   ;;  %v2265_v62 = vrot.slane %v2263_v56, 1  ;;  %v6935_v56 = vld [vmem:[%s8377_s1 + $0x40] sm:$0xff] }
 0x12b   : > { %2585 = vperm.xlu1 %5699, %v6883_v40   ;;  %5435 = vmatprep.mubr.msk.bf16.mxu0 %vm1152_vm5, %v1711_v21  ;;  %v2258_v55 = vsel %vm1051_vm6, %v2253_v16, %v2257_v6  ;;  %v832_v4 = vmul.f32 %v8598_v19, %v8594_v30  ;;  %v2236_v29 = vpack.c.bf16 %v6548_v57, %v6524_v51  ;;  %v2273_v21 = vrot.slane %v2271_v35, 1 }
 0x12c   : > { %5384 = vmatmul.mubr.msk.bf16.gmra.mxu1 %vm1152_vm5, %v1151_v47  ;;  %5436 = vmatmul.mubr.msk.bf16.gmra.mxu0 %vm1152_vm5, %v1713_v23  ;;  %v833_v0 = vmul.f32 %v6465_v52, %v6440_v37  ;;  %v2261_v27 = vor.u32 %v2259_v1, %v2257_v6  ;;  %v831_v16 = vmul.f32 %v8600_v60, %v8588_v43  ;;  %v2077_v60 = vsel %vm1189_vm1, %v6575_v33, 0  ;;  %v6961_v33 = vld [vmem:[%s8377_s1 + $0x80] sm:$0xff] }
 0x12d   : > { %5389 = vmatprep.mubr.msk.bf16.mxu1 %vm1152_vm5, %v853_v34  ;;  %5467 = vmatprep.mubr.msk.bf16.mxu0 %vm1152_vm5, %v2258_v55  ;;  %v6928_v34 = vpop.permute.xlu0 %1971  ;;  %8601 = vst [vmem:[#allocation20_spill] sm:$0xff] %v6935_v56  ;;  %v2269_v47 = vor.u32 %v2267_v12, %v2265_v62  ;;  %v6940_v52 = vpack.c.bf16 %v6605_v63, %v6551_v9  ;;  %v2279_v55 = vshll.u32 %v2236_v29, 16  ;;  %v2275_v35 = vshrl.u32 %v6893_v46, 16  ;;  %v8605_v46 = vld [vmem:[#allocation35_spill] sm:$0xff] }
 0x12e   : > { %5721 = vset.pattern.permute.xlu0 %v8424_v8  ;;  %8599 = vst [vmem:[#allocation30_spill] sm:$0xff] %v6928_v34  ;;  %v854_v6 = vpack.c.bf16 %v832_v4, %v831_v16  ;;  %v6944_v1 = vpop.permute.xlu1 %1907  ;;  %v2266_v12 = vsel %vm1051_vm6, %v2261_v27, %v2265_v62  ;;  %v2283_v16 = vshrl.u32 %v2236_v29, 16  ;;  %v835_v62 = vmul.f32 %v8605_v46, %v6469_v10 }
 0x12f   : > { %3756 = vperm.xlu0 %5721, %v6725_v22   ;;  %5700 = vset.pattern.permute.xlu1 %v8536_v3  ;;  %v8602_v22 = vld [vmem:[#allocation21_spill] sm:$0xff]  ;;  %v2274_v4 = vsel %vm1051_vm6, %v2269_v47, %v2273_v21  ;;  %v2281_v27 = vrot.slane %v2279_v55, 1  ;;  %v8606_v47 = vld [vmem:[#allocation38_spill] sm:$0xff]  ;;  %v8608_v55 = vld [vmem:[#allocation23_spill] sm:$0xff] }
 0x130   : > { %2986 = vperm.xlu1 %5700, %v6935_v56   ;;  %v834_v23 = vmul.f32 %v8602_v22, %v6442_v28  ;;  %8604 = vst [vmem:[#allocation21_spill] sm:$0xff] %v6961_v33  ;;  %v837_v22 = vmul.f32 %v8606_v47, %v6531_v17  ;;  %v7005_v47 = vld [vmem:[%s8377_s1 + $0x30] sm:$0xff] }
 0x131   : > { %v6953_v8 = vpop.permute.xlu0 %1979  ;;  %v2285_v56 = vor.u32 %v2283_v16, %v2281_v27  ;;  %v3124_v16 = vsel %vm1189_vm1, %v6769_v48, 0 }
 0x132   : > { %v855_v19 = vpack.c.bf16 %v834_v23, %v833_v0  ;;  %8603 = vst [vmem:[#allocation19_spill] sm:$0xff] %v6953_v8  ;;  %v2287_v0 = vshll.u32 %v6940_v52, 16  ;;  %v6971_v29 = vpop.permute.xlu1 %1915  ;;  %v2277_v23 = vor.u32 %v2275_v35, %v2273_v21  ;;  %v6994_v21 = vpack.c.bf16 %v6677_v2, %v6613_v44 }
 0x133   : > { %3765 = vperm.xlu0 %5721, %v6712_v25   ;;  %v6967_v25 = vld [vmem:[%s8380_s4 + $0x14] sm:$0xf] }
 0x134   : > { %5390 = vmatmul.mubr.msk.bf16.vlgmr.msra.gmra.mxu1 %vm1152_vm5, %v854_v6  ;;  %5701 = vset.pattern.permute.xlu1 %v8517_v58  ;;  %v2238_v6 = vpack.c.bf16 %v6640_v13, %v6624_v36  ;;  %v2289_v8 = vrot.slane %v2287_v0, 1 }
 0x135   : > { %5393 = vmatprep.mubr.msk.bf16.mxu1 %vm1152_vm5, %v855_v19  ;;  %2588 = vperm.xlu1 %5701, %v6961_v33   ;;  %v8607_v19 = vld [vmem:[#allocation22_spill] sm:$0xff]  ;;  %v6996_v35 = vpop.permute.xlu0 %1987 }
 0x136   : > { %5440 = vmatpush3.bf16.msra.mxu1 %v2077_v60  ;;  %5468 = vmatmul.mubr.msk.bf16.vlgmr.msra.gmra.mxu0 %vm1152_vm5, %v2266_v12  ;;  %v836_v46 = vmul.f32 %v8607_v19, %v6471_v49  ;;  %v838_v60 = vmul.f32 %v8608_v55, %v6524_v51  ;;  %8610 = vst [vmem:[#allocation38_spill] sm:$0xff] %v6996_v35  ;;  %8611 = vst [vmem:[#allocation22_spill] sm:$0xff] %v7005_v47  ;;  %v2291_v55 = vshrl.u32 %v6940_v52, 16 }
 0x137   : > { %3771 = vperm.xlu0 %5721, %v6802_v54   ;;  %5471 = vmatprep.mubr.msk.bf16.mxu0 %vm1152_vm5, %v2274_v4  ;;  %v6989_v54 = vld [vmem:[%s8377_s1 + $0x88] sm:$0xff]  ;;  %v6998_v4 = vpop.permute.xlu1 %1919  ;;  %v2282_v19 = vsel %vm1051_vm6, %v2277_v23, %v2281_v27  ;;  %v2299_v48 = vshrl.u32 %v2238_v6, 16  ;;  %v2240_v52 = vpack.c.bf16 %v6669_v20, %v6689_v5 }
 0x138   : > { %5652 = vmatprep.subr.msk.bf16.mxu1 %vm1189_vm1, %v6967_v25  ;;  %8609 = vst [vmem:[#allocation35_spill] sm:$0xff] %v6989_v54  ;;  %v856_v12 = vpack.c.bf16 %v836_v46, %v835_v62  ;;  %v857_v0 = vpack.c.bf16 %v838_v60, %v837_v22  ;;  %v2295_v62 = vshll.u32 %v2238_v6, 16  ;;  %5518 = vmatpush3.bf16.msra.mxu0 %v3124_v16  ;;  %v2303_v22 = vshll.u32 %v6994_v21, 16  ;;  %v8612_v60 = vld [vmem:[#allocation41_spill] sm:$0xff]  ;;  %v7030_v16 = vld [vmem:[%s8377_s1 + $0x48] sm:$0xff] }
 0x139   : > { %2591 = vperm.xlu1 %5701, %v6989_v54   ;;  %v2290_v46 = vsel %vm1051_vm6, %v2285_v56, %v2289_v8  ;;  %v8613_v56 = vld [vmem:[#allocation42_spill] sm:$0xff]  ;;  %8615 = vst [vmem:[#allocation23_spill] sm:$0xff] %v7030_v16  ;;  %v7036_v35 = vpop.permute.xlu0 %1995 }
 0x13a   : > { %v841_v23 = vmul.f32 %v8613_v56, %v6605_v63  ;;  %8617 = vst [vmem:[#allocation41_spill] sm:$0xff] %v7036_v35  ;;  %v7040_v56 = vpack.c.bf16 %v6754_v39, %v6734_v14  ;;  %v2305_v34 = vrot.slane %v2303_v22, 1  ;;  %v8619_v22 = vld [vmem:[#allocation27_spill] sm:$0xff]  ;;  %v2243_v35 = vpack.c.bf16 %v6806_v41, %v6759_v38 }
 0x13b   : > { %3774 = vperm.xlu0 %5721, %v7005_v47   ;;  %v839_v47 = vmul.f32 %v8612_v60, %v6548_v57  ;;  %v7018_v27 = vpop.permute.xlu1 %1927  ;;  %v8616_v60 = vld [vmem:[#allocation36_spill] sm:$0xff] }
 0x13c   : > { %5394 = vmatmul.mubr.msk.bf16.gmra.mxu1 %vm1152_vm5, %v856_v12  ;;  %v8614_v12 = vld [vmem:[#allocation26_spill] sm:$0xff] }
 0x13d   : > { %5397 = vmatprep.mubr.msk.bf16.mxu1 %vm1152_vm5, %v857_v0  ;;  %5702 = vset.pattern.permute.xlu1 %v8536_v3  ;;  %v842_v6 = vmul.f32 %v8614_v12, %v6624_v36  ;;  %v2293_v0 = vor.u32 %v2291_v55, %v2289_v8  ;;  %v7048_v8 = vld [vmem:[%s8377_s1 + $0x50] sm:$0xff] }
 0x13e   : > { %2998 = vperm.xlu1 %5702, %v6853_v42   ;;  %5472 = vmatmul.mubr.msk.bf16.gmra.mxu0 %vm1152_vm5, %v2282_v19  ;;  %v2297_v19 = vrot.slane %v2295_v62, 1  ;;  %v840_v42 = vmul.f32 %v8616_v60, %v6551_v9  ;;  %8618 = vst [vmem:[#allocation42_spill] sm:$0xff] %v7048_v8  ;;  %v2307_v62 = vshrl.u32 %v6994_v21, 16  ;;  %v8620_v60 = vld [vmem:[#allocation5_spill] sm:$0xff]  ;;  %v7064_v21 = vpop.permute.xlu0 %2540 }
 0x13f   : > { %3783 = vperm.xlu0 %5721, %v7030_v16   ;;  %5475 = vmatprep.mubr.msk.bf16.mxu0 %vm1152_vm5, %v2290_v46  ;;  %v7043_v7 = vpop.permute.xlu1 %1935  ;;  %v2311_v16 = vshll.u32 %v2240_v52, 16  ;;  %v859_v46 = vpack.c.bf16 %v842_v6, %v841_v23  ;;  %v844_v23 = vmul.f32 %v8619_v22, %v6613_v44  ;;  %8622 = vst [vmem:[#allocation26_spill] sm:$0xff] %v7064_v21 }
 0x140   : > { %v2301_v12 = vor.u32 %v2299_v48, %v2297_v19  ;;  %v858_v26 = vpack.c.bf16 %v840_v42, %v839_v47  ;;  %v2298_v55 = vsel %vm1051_vm6, %v2293_v0, %v2297_v19  ;;  %v671_v42 = vpop.f32.mrf.mxu0  ;;  %v2315_v47 = vshrl.u32 %v2240_v52, 16  ;;  %v8621_v0 = vld [vmem:[#allocation17_spill] sm:$0xff] }
 0x141   : > { %v2319_v48 = vshll.u32 %v7040_v56, 16  ;;  %v845_v19 = vmul.f32 %v8621_v0, %v6677_v2  ;;  %v2313_v52 = vrot.slane %v2311_v16, 1  ;;  %v2242_v22 = vpack.c.bf16 %v6736_v61, %v6756_v18 }
 0x142   : > { %5703 = vset.pattern.permute.xlu1 %v8517_v58  ;;  %v2306_v6 = vsel %vm1051_vm6, %v2301_v12, %v2305_v34  ;;  %v2309_v12 = vor.u32 %v2307_v62, %v2305_v34  ;;  %v7087_v34 = vld [vmem:[%s8377_s1 + $0x70] sm:$0xff] }
 0x143   : > { %3786 = vperm.xlu0 %5721, %v7048_v8   ;;  %2597 = vperm.xlu1 %5703, %v6900_v53   ;;  %v843_v8 = vmul.f32 %v8620_v60, %v6640_v13  ;;  %v5772_v60 = vld [vmem:[%s8379_s3] ss:$0 sm:$0xff]  ;;  %v2317_v16 = vor.u32 %v2315_v47, %v2313_v52  ;;  %v2323_v47 = vshrl.u32 %v7040_v56, 16  ;;  %v848_v56 = vmul.f32 %v6685_v15, %v6734_v14 }
 0x144   : > { %5398 = vmatmul.mubr.msk.bf16.gmra.mxu1 %vm1152_vm5, %v858_v26  ;;  %v7066_v26 = vpop.permute.xlu1 %1943  ;;  %v672_v0 = vadd.f32 %v5772_v60, %v671_v42  ;;  %v2314_v62 = vsel %vm1051_vm6, %v2309_v12, %v2313_v52  ;;  %v847_v52 = vmul.f32 %v6812_v45, %v6669_v20  ;;  %v849_v45 = vmul.f32 %v6876_v59, %v6754_v39 }
 0x145   : > { %5401 = vmatprep.mubr.msk.bf16.mxu1 %vm1152_vm5, %v859_v46  ;;  %v846_v46 = vmul.f32 %v6788_v11, %v6689_v5  ;;  %v860_v11 = vpack.c.bf16 %v844_v23, %v843_v8  ;;  %v7095_v8 = vpop.permute.xlu0 %2549  ;;  %v2331_v23 = vshrl.u32 %v2242_v22, 16 }
 0x146   : > { %5476 = vmatmul.mubr.msk.bf16.gmra.mxu0 %vm1152_vm5, %v2298_v55  ;;  %v2321_v55 = vrot.slane %v2319_v48, 1  ;;  %v7091_v42 = vmax.f32 %v672_v0, 0.0 }
 0x147   : > { %3795 = vperm.xlu0 %5721, %v6847_v24   ;;  %5704 = vset.pattern.permute.xlu1 %v8536_v3  ;;  %v2327_v24 = vshll.u32 %v2242_v22, 16  ;;  %v861_v5 = vpack.c.bf16 %v846_v46, %v845_v19  ;;  %v7103_v19 = vld [vmem:[%s8377_s1 + $0xa0] sm:$0xff] }
 0x148   : > { %3002 = vperm.xlu1 %5704, %v6827_v31   ;;  %5479 = vmatprep.mubr.msk.bf16.mxu0 %vm1152_vm5, %v2306_v6  ;;  %v7082_v21 = vpop.permute.xlu1 %1951  ;;  %8623 = vst [vmem:[#allocation36_spill] sm:$0xff] %v7091_v42  ;;  %v2322_v48 = vsel %vm1051_vm6, %v2317_v16, %v2321_v55  ;;  %v2335_v6 = vshll.u32 %v2243_v35, 16  ;;  %v2325_v12 = vor.u32 %v2323_v47, %v2321_v55  ;;  %v2339_v47 = vshrl.u32 %v2243_v35, 16  ;;  %v8627_v35 = vld [vmem:[#allocation16_spill] sm:$0xff] }
 0x149   : > { %v2329_v22 = vrot.slane %v2327_v24, 1  ;;  %v2244_v60 = vpack.c.bf16 %v7091_v42, %v7091_v42  ;;  %v7124_v24 = vld [vmem:[%s8377_s1 + $0xa8] sm:$0xff]  ;;  %v7127_v16 = vpop.permute.xlu0 %2555 }
 0x14a   : > { %v2337_v0 = vrot.slane %v2335_v6, 1  ;;  %8624 = vst [vmem:[#allocation27_spill] sm:$0xff] %v7124_v24  ;;  %v8626_v6 = vld [vmem:[#allocation47_spill] sm:$0xff] }
 0x14b   : > { %3798 = vperm.xlu0 %5721, %v7087_v34   ;;  %v2333_v15 = vor.u32 %v2331_v23, %v2329_v22  ;;  %v2330_v59 = vsel %vm1051_vm6, %v2325_v12, %v2329_v22  ;;  %v2003_v22 = vmul.f32 %v8627_v35, %v8588_v43  ;;  %v8628_v12 = vld [vmem:[#allocation32_spill] sm:$0xff]  ;;  %v2004_v35 = vmul.f32 %v6971_v29, %v8594_v30  ;;  %v8639_v42 = vld [vmem:[#allocation31_spill] sm:$0xff] }
 0x14c   : > { %5402 = vmatmul.mubr.msk.bf16.gmra.mxu1 %vm1152_vm5, %v860_v11  ;;  %5705 = vset.pattern.permute.xlu1 %v8517_v58  ;;  %v7110_v46 = vpop.permute.xlu1 %1959  ;;  %v8632_v29 = vld [vmem:[#allocation28_spill] sm:$0xff] }
 0x14d   : > { %5405 = vmatprep.mubr.msk.bf16.mxu1 %vm1152_vm5, %v861_v5  ;;  %2600 = vperm.xlu1 %5705, %v7103_v19   ;;  %v850_v5 = vmul.f32 %v6895_v50, %v6756_v18  ;;  %v862_v50 = vpack.c.bf16 %v848_v56, %v847_v52  ;;  %v2338_v23 = vsel %vm1051_vm6, %v2333_v15, %v2337_v0 }
 0x14e   : > { %5480 = vmatmul.mubr.msk.bf16.gmra.mxu0 %vm1152_vm5, %v2314_v62  ;;  %v7134_v62 = vld [vmem:[%s8377_s1 + $0x90] sm:$0xff]  ;;  %v851_v56 = vmul.f32 %v8626_v6, %v6736_v61  ;;  %v852_v52 = vmul.f32 %v6916_v32, %v6759_v38  ;;  %v2341_v15 = vor.u32 %v2339_v47, %v2337_v0  ;;  %v8629_v6 = vmov 7  }
 0x14f   : > { %3807 = vperm.xlu0 %5721, %v6989_v54   ;;  %5483 = vmatprep.mubr.msk.bf16.mxu0 %vm1152_vm5, %v2322_v48  ;;  %v863_v55 = vpack.c.bf16 %v850_v5, %v849_v45  ;;  %8625 = vst [vmem:[#allocation5_spill] sm:$0xff] %v7134_v62  ;;  %v2343_v48 = vshll.u32 %v2244_v60, 16  ;;  %v2002_v60 = vmul.f32 %v6944_v1, %v8628_v12  ;;  %v7165_v1 = vld [vmem:[%s8377_s1 + $0xb8] sm:$0xff] }
 0x150   : > { %v7129_v11 = vpop.permute.xlu1 %1967  ;;  %v864_v32 = vpack.c.bf16 %v852_v52, %v851_v56  ;;  %v2007_v52 = vmul.f32 %v7018_v27, %v6469_v10  ;;  %v2008_v27 = vmul.f32 %v8632_v29, %v6471_v49 }
 0x151   : > { %2603 = vperm.xlu1 %5705, %v7124_v24   ;;  %v2345_v45 = vrot.slane %v2343_v48, 1 }
 0x153   : > { %3810 = vperm.xlu0 %5721, %v7134_v62   ;;  %v2346_v0 = vsel %vm1051_vm6, %v2341_v15, %v2345_v45  ;;  %v2798_v15 = vsel %vm1189_vm1, %v6967_v25, 0  ;;  %v2011_v25 = vmul.f32 %v7066_v26, %v6548_v57 }
 0x154   : > { %5406 = vmatmul.mubr.msk.bf16.gmra.mxu1 %vm1152_vm5, %v862_v50  ;;  %v7147_v5 = vpop.permute.xlu1 %1975  ;;  %v7156_v50 = vpop.permute.xlu0 %2561 }
 0x155   : > { %5409 = vmatprep.mubr.msk.bf16.mxu1 %vm1152_vm5, %v863_v55  ;;  %5706 = vset.pattern.permute.xlu1 %v8536_v3 }
 0x156   : > { %3014 = vperm.xlu1 %5706, %v6883_v40   ;;  %5484 = vmatmul.mubr.msk.bf16.gmra.mxu0 %vm1152_vm5, %v2330_v59  ;;  %v2026_v59 = vpack.c.bf16 %v2003_v22, %v2002_v60 }
 0x157   : > { %3819 = vperm.xlu0 %5721, %v7124_v24   ;;  %5487 = vmatprep.mubr.msk.bf16.mxu0 %vm1152_vm5, %v2338_v23  ;;  %v8630_v23 = vld [vmem:[#allocation54_spill] sm:$0xff] }
 0x158   : > { %v7159_v55 = vpop.permute.xlu1 %1983  ;;  %v7174_v47 = vpop.permute.xlu0 %2570  ;;  %v2006_v56 = vmul.f32 %v8630_v23, %v6442_v28 }
 0x15a   : > { %5708 = vset.pattern.permute.xlu1 %v8517_v58  ;;  %v2005_v58 = vmul.f32 %v6998_v4, %v6440_v37  ;;  %v8631_v4 = vmov 8   ;;  %v2028_v45 = vpack.c.bf16 %v2007_v52, %v2006_v56 }
 0x15b   : > { %5724 = vset.pattern.permute.xlu0 %v8629_v6  ;;  %2609 = vperm.xlu1 %5708, %v7165_v1  }
 0x15c   : > { %5410 = vmatmul.mubr.msk.bf16.gmra.mxu1 %vm1152_vm5, %v864_v32  ;;  %3349 = vperm.xlu0 %5724, %v7165_v1   ;;  %v7176_v48 = vpop.permute.xlu1 %1991  ;;  %v2027_v22 = vpack.c.bf16 %v2005_v58, %v2004_v35  ;;  %v7192_v32 = vpop.permute.xlu0 %2582 }
 0x15d   : > { %5441 = vmatprep.mubr.msk.bf16.mxu1 %vm1152_vm5, %v2026_v59  ;;  %v2009_v59 = vmul.f32 %v7043_v7, %v6531_v17  ;;  %v7214_v7 = vld [vmem:[%s8377_s1 + $0x8] sm:$0xff] }
 0x15e   : > { %5488 = vmatmul.mubr.msk.bf16.gmra.mxu0 %vm1152_vm5, %v2346_v0  ;;  %v8633_v0 = vld [vmem:[#allocation56_spill] sm:$0xff] }
 0x15f   : > { %5709 = vset.pattern.permute.xlu1 %v8536_v3  ;;  %v2010_v58 = vmul.f32 %v8633_v0, %v6524_v51  ;;  %v2029_v56 = vpack.c.bf16 %v2009_v59, %v2008_v27  ;;  %v2015_v27 = vmul.f32 %v7110_v46, %v6640_v13  ;;  %v8638_v46 = vld [vmem:[#allocation34_spill] sm:$0xff] }
 0x160   : > { %3018 = vperm.xlu1 %5709, %v6961_v33   ;;  %5726 = vset.pattern.permute.xlu0 %v8631_v4  ;;  %v7188_v60 = vpop.permute.xlu1 %1999  ;;  %v7206_v52 = vpop.permute.xlu0 %2594 }
 0x161   : > { %v2030_v35 = vpack.c.bf16 %v2011_v25, %v2010_v58  ;;  %v7230_v58 = vld [vmem:[%s8377_s1 + $0x10] sm:$0xff] }
 0x164   : > { %5442 = vmatmul.mubr.msk.bf16.vlgmr.msra.gmra.mxu1 %vm1152_vm5, %v2027_v22  ;;  %3026 = vperm.xlu1 %5709, %v7134_v62   ;;  %v2544_v23 = vpop.permute.xlu1 %2543  ;;  %v7225_v0 = vpop.permute.xlu0 %2606  ;;  %v8640_v62 = vld [vmem:[#allocation30_spill] sm:$0xff] }
 0x165   : > { %5445 = vmatprep.mubr.msk.bf16.mxu1 %vm1152_vm5, %v2028_v45  ;;  %5492 = vmatpush3.bf16.msra.mxu1 %v2798_v15  ;;  %v2013_v15 = vmul.f32 %v7082_v21, %v6605_v63  ;;  %v8635_v45 = vld [vmem:[#allocation33_spill] sm:$0xff]  ;;  %8636 = vst [vmem:[#allocation17_spill] sm:$0xff] %v7225_v0  ;;  %v2018_v0 = vmul.f32 %v8640_v62, %v8639_v42  ;;  %v2612_v62 = vrot.slane %v2544_v23, 6  ;;  %v7262_v23 = vld [vmem:[%s8377_s1 + $0xb0] sm:$0xff] }
 0x166   : > { %v2014_v29 = vmul.f32 %v8635_v45, %v6624_v36  ;;  %v8637_v21 = vld [vmem:[#allocation53_spill] sm:$0xff]  ;;  %v2017_v45 = vmul.f32 %v7129_v11, %v6677_v2  ;;  %v8641_v11 = vld [vmem:[#allocation26_spill] sm:$0xff] }
 0x167   : > { %v2611_v40 = vrot.slane %v8641_v11, 6 }
 0x168   : > { %3030 = vperm.xlu1 %5709, %v6900_v53   ;;  %v2547_v22 = vpop.permute.xlu1 %2546  ;;  %v8634_v53 = vld [vmem:[#allocation25_spill] sm:$0xff]  ;;  %v2959_v24 = vpop.permute.xlu0 %2958 }
 0x169   : > { %v2012_v26 = vmul.f32 %v8634_v53, %v6551_v9  ;;  %v2016_v53 = vmul.f32 %v8638_v46, %v6613_v44 }
 0x16b   : > { %v2031_v25 = vpack.c.bf16 %v2013_v15, %v2012_v26  ;;  %v2019_v26 = vmul.f32 %v7147_v5, %v6669_v20  ;;  %v3050_v15 = vmul.f32 %v2959_v24, %v8594_v30  ;;  %v2033_v46 = vpack.c.bf16 %v2017_v45, %v2016_v53  ;;  %v8643_v53 = vld [vmem:[#allocation38_spill] sm:$0xff] }
 0x16c   : > { %5446 = vmatmul.mubr.msk.bf16.gmra.mxu1 %vm1152_vm5, %v2029_v56  ;;  %5710 = vset.pattern.permute.xlu1 %v8629_v6  ;;  %v2553_v59 = vpop.permute.xlu1 %2552  ;;  %v2032_v56 = vpack.c.bf16 %v2015_v27, %v2014_v29  ;;  %v2616_v27 = vrot.slane %v7095_v8, 6  ;;  %v2022_v45 = vmul.f32 %v8643_v53, %v6756_v18 }
 0x16d   : > { %5449 = vmatprep.mubr.msk.bf16.mxu1 %vm1152_vm5, %v2030_v35  ;;  %3283 = vperm.xlu1 %5710, %v7214_v7   ;;  %v2034_v54 = vpack.c.bf16 %v2019_v26, %v2018_v0  ;;  %v2620_v26 = vrot.slane %v7127_v16, 6 }
 0x170   : > { %v2559_v35 = vpop.permute.xlu1 %2558 }
 0x171   : > { %3286 = vperm.xlu1 %5710, %v7230_v58  }
 0x174   : > { %5450 = vmatmul.mubr.msk.bf16.gmra.mxu1 %vm1152_vm5, %v2031_v25  ;;  %v2614_v25 = vrot.slane %v2547_v22, 6  ;;  %v2021_v22 = vmul.f32 %v7159_v55, %v6754_v39 }
 0x175   : > { %5453 = vmatprep.mubr.msk.bf16.mxu1 %vm1152_vm5, %v2032_v56  ;;  %3292 = vperm.xlu1 %5710, %v8637_v21  }
 0x176   : > { %v2955_v29 = vpop.permute.xlu1 %2954  ;;  %v2615_v24 = vsel %vm1562_vm3, %v2612_v62, %v2614_v25  ;;  %v2617_v5 = vsel %vm1562_vm3, %v2614_v25, %v2616_v27  ;;  %v2624_v25 = vrot.slane %v7156_v50, 6 }
 0x177   : > { %v3049_v56 = vmul.f32 %v2955_v29, %v8588_v43  ;;  %v2685_v55 = vmul.f32 %v2615_v24, %v8594_v30  ;;  %v2618_v29 = vrot.slane %v2553_v59, 6 }
 0x179   : > { %5711 = vset.pattern.permute.xlu1 %v8536_v3  ;;  %v3073_v33 = vpack.c.bf16 %v3050_v15, %v3049_v56  ;;  %v8642_v3 = vld [vmem:[#allocation19_spill] sm:$0xff]  ;;  %v2686_v15 = vmul.f32 %v2617_v5, %v6440_v37  ;;  %v2622_v56 = vrot.slane %v2559_v35, 6  ;;  %v2621_v16 = vsel %vm1562_vm3, %v2618_v29, %v2620_v26 }
 0x17a   : > { %3034 = vperm.xlu1 %5711, %v7103_v19   ;;  %v2020_v8 = vmul.f32 %v8642_v3, %v6734_v14 }
 0x17b   : > { %5519 = vmatprep.mubr.msk.bf16.mxu0 %vm1152_vm5, %v3073_v33  ;;  %v2565_v0 = vpop.permute.xlu1 %2564  ;;  %v2023_v33 = vmul.f32 %v7176_v48, %v6736_v61  ;;  %v2709_v24 = vpack.c.bf16 %v2686_v15, %v2685_v55  ;;  %v2623_v59 = vsel %vm1562_vm3, %v2620_v26, %v2622_v56  ;;  %v2625_v50 = vsel %vm1562_vm3, %v2622_v56, %v2624_v25 }
 0x17c   : > { %5454 = vmatmul.mubr.msk.bf16.gmra.mxu1 %vm1152_vm5, %v2033_v46  ;;  %v2683_v46 = vmul.f32 %v2611_v40, %v8628_v12  ;;  %v2035_v11 = vpack.c.bf16 %v2021_v22, %v2020_v8  ;;  %v8644_v12 = vld [vmem:[#allocation41_spill] sm:$0xff]  ;;  %v2688_v22 = vmul.f32 %v2621_v16, %v6469_v10  ;;  %v2630_v56 = vrot.slane %v7174_v47, 6 }
 0x17d   : > { %5457 = vmatprep.mubr.msk.bf16.mxu1 %vm1152_vm5, %v2034_v54  ;;  %v2613_v54 = vsel %vm1562_vm3, %v2611_v40, %v2612_v62  ;;  %v2036_v53 = vpack.c.bf16 %v2023_v33, %v2022_v45  ;;  %v2619_v62 = vsel %vm1562_vm3, %v2616_v27, %v2618_v29  ;;  %v5056_v40 = vld [vmem:[%s8380_s4 + $0x1c] sm:$0xf]  ;;  %v2024_v35 = vmul.f32 %v8644_v12, %v6759_v38  ;;  %v2963_v45 = vpop.permute.xlu0 %2962 }
 0x17e   : > { %3042 = vperm.xlu1 %5711, %v7262_v23   ;;  %v2684_v3 = vmul.f32 %v2613_v54, %v8588_v43  ;;  %v2025_v27 = vmul.f32 %v7188_v60, %v6806_v41  ;;  %5654 = vmatprep.subr.msk.bf16.mxu1 %vm1189_vm1, %v5056_v40  ;;  %v2687_v8 = vmul.f32 %v2619_v62, %v6442_v28  ;;  %v2737_v26 = vrot.slane %v2709_v24, 1 }
 0x17f   : > { %v2689_v33 = vmul.f32 %v2623_v59, %v6471_v49  ;;  %v2690_v54 = vmul.f32 %v2625_v50, %v6531_v17  ;;  %v3051_v60 = vmul.f32 %v2963_v45, %v6440_v37 }
 0x180   : > { %v2568_v48 = vpop.permute.xlu1 %2567  ;;  %v2708_v5 = vpack.c.bf16 %v2684_v3, %v2683_v46  ;;  %v2037_v46 = vpack.c.bf16 %v2025_v27, %v2024_v35 }
 0x181   : > { %v2628_v55 = vrot.slane %v2568_v48, 6  ;;  %v2711_v16 = vpack.c.bf16 %v2690_v54, %v2689_v33  ;;  %v2975_v27 = vpop.permute.xlu0 %2974  ;;  %v3600_v33 = vsel %vm1189_vm1, %v5056_v40, 0 }
 0x182   : > { %3046 = vperm.xlu1 %5711, %v7165_v1   ;;  %v2736_v3 = vrot.slane %v2708_v5, 1 }
 0x183   : > { %v2741_v12 = vrot.slane %v2711_v16, 1 }
 0x184   : > { %5458 = vmatmul.mubr.msk.bf16.gmra.mxu1 %vm1152_vm5, %v2035_v11  ;;  %v2626_v11 = vrot.slane %v2565_v0, 6  ;;  %v2631_v0 = vsel %vm1562_vm3, %v2628_v55, %v2630_v56 }
 0x185   : > { %5461 = vmatprep.mubr.msk.bf16.mxu1 %vm1152_vm5, %v2036_v53  ;;  %v2710_v53 = vpack.c.bf16 %v2688_v22, %v2687_v8  ;;  %v2693_v8 = vmul.f32 %v2631_v0, %v6551_v9 }
 0x186   : > { %5713 = vset.pattern.permute.xlu1 %v8631_v4  ;;  %v2629_v48 = vsel %vm1562_vm3, %v2626_v11, %v2628_v55  ;;  %v2627_v47 = vsel %vm1562_vm3, %v2624_v25, %v2626_v11  ;;  %v3054_v25 = vmul.f32 %v2975_v27, %v6471_v49 }
 0x187   : > { %3759 = vperm.xlu1 %5713, %v7214_v7   ;;  %v2967_v15 = vpop.permute.xlu1 %2966  ;;  %v2738_v7 = vsel %vm1688_vm4, %v2736_v3, %v2737_v26  ;;  %v2739_v50 = vrot.slane %v2710_v53, 1  ;;  %v2691_v5 = vmul.f32 %v2627_v47, %v6524_v51  ;;  %v5069_v47 = vld [vmem:[%s8380_s4 + $0x20] sm:$0xf] }
 0x188   : > { %v3052_v29 = vmul.f32 %v2967_v15, %v6442_v28  ;;  %5655 = vmatprep.subr.msk.bf16.mxu0 %vm1189_vm1, %v5069_v47  ;;  %v4014_v0 = vsel %vm1189_vm1, %v5069_v47, 0  ;;  %v8650_v47 = vld [vmem:[#allocation57_spill] sm:$0xff] }
 0x189   : > { %v2740_v54 = vsel %vm1688_vm4, %v2737_v26, %v2739_v50  ;;  %v8646_v26 = vld [vmem:[#allocation20_spill] sm:$0xff] }
 0x18a   : > { %v3074_v62 = vpack.c.bf16 %v3052_v29, %v3051_v60  ;;  %v2742_v60 = vsel %vm1688_vm4, %v2739_v50, %v2741_v12  ;;  %v8645_v29 = vld [vmem:[#allocation22_spill] sm:$0xff] }
 0x18b   : > { %3762 = vperm.xlu1 %5713, %v7230_v58   ;;  %v2692_v58 = vmul.f32 %v2629_v48, %v6548_v57 }
 0x18c   : > { %5462 = vmatmul.mubr.msk.bf16.gmra.mxu1 %vm1152_vm5, %v2037_v46  ;;  %5520 = vmatmul.mubr.msk.bf16.vlgmr.msra.gmra.mxu0 %vm1152_vm5, %v3074_v62 }
 0x18d   : > { %5493 = vmatprep.mubr.msk.bf16.mxu1 %vm1152_vm5, %v2738_v7  ;;  %v2574_v24 = vpop.permute.xlu1 %2573  ;;  %v2712_v55 = vpack.c.bf16 %v2692_v58, %v2691_v5  ;;  %v8647_v7 = vld [vmem:[#allocation23_spill] sm:$0xff]  ;;  %5570 = vmatpush3.bf16.msra.mxu0 %v4014_v0 }
 0x18e   : > { %v2632_v59 = vrot.slane %v2574_v24, 6 }
 0x18f   : > { %3768 = vperm.xlu1 %5713, %v8637_v21   ;;  %v2743_v40 = vrot.slane %v2712_v55, 1 }
 0x190   : > { %v2633_v35 = vsel %vm1562_vm3, %v2630_v56, %v2632_v59 }
 0x191   : > { %v2694_v22 = vmul.f32 %v2633_v35, %v6605_v63  ;;  %v2744_v62 = vsel %vm1688_vm4, %v2741_v12, %v2743_v40  ;;  %v8648_v35 = vld [vmem:[#allocation55_spill] sm:$0xff] }
 0x192   : > { %v2971_v45 = vpop.permute.xlu1 %2970 }
 0x193   : > { %5714 = vset.pattern.permute.xlu1 %v8629_v6  ;;  %v3053_v21 = vmul.f32 %v2971_v45, %v6469_v10  ;;  %v2713_v15 = vpack.c.bf16 %v2694_v22, %v2693_v8 }
 0x194   : > { %5494 = vmatmul.mubr.msk.bf16.vlgmr.msra.gmra.mxu1 %vm1152_vm5, %v2740_v54  ;;  %3298 = vperm.xlu1 %5714, %v8645_v29  }
 0x195   : > { %5497 = vmatprep.mubr.msk.bf16.mxu1 %vm1152_vm5, %v2742_v60  ;;  %v3075_v56 = vpack.c.bf16 %v3054_v25, %v3053_v21  ;;  %5544 = vmatpush3.bf16.msra.mxu1 %v3600_v33  ;;  %v2745_v46 = vrot.slane %v2713_v15, 1  ;;  %v2638_v25 = vrot.slane %v7192_v32, 6 }
 0x197   : > { %5523 = vmatprep.mubr.msk.bf16.mxu0 %vm1152_vm5, %v3075_v56  ;;  %v2746_v53 = vsel %vm1688_vm4, %v2743_v40, %v2745_v46  ;;  %v8649_v56 = vld [vmem:[#allocation42_spill] sm:$0xff] }
 0x198   : > { %3304 = vperm.xlu1 %5714, %v8646_v26   ;;  %v2577_v11 = vpop.permute.xlu1 %2576 }
 0x199   : > { %v2634_v3 = vrot.slane %v2577_v11, 6 }
 0x19b   : > { %v2635_v16 = vsel %vm1562_vm3, %v2632_v59, %v2634_v3  ;;  %v2979_v59 = vpop.permute.xlu0 %2978 }
 0x19c   : > { %5498 = vmatmul.mubr.msk.bf16.gmra.mxu1 %vm1152_vm5, %v2744_v62  ;;  %3307 = vperm.xlu1 %5714, %v8647_v7   ;;  %v2580_v48 = vpop.permute.xlu1 %2579  ;;  %v2695_v58 = vmul.f32 %v2635_v16, %v6624_v36  ;;  %v3055_v5 = vmul.f32 %v2979_v59, %v6531_v17 }
 0x19d   : > { %5501 = vmatprep.mubr.msk.bf16.mxu1 %vm1152_vm5, %v2746_v53  ;;  %v2636_v24 = vrot.slane %v2580_v48, 6 }
 0x19f   : > { %v2637_v50 = vsel %vm1562_vm3, %v2634_v3, %v2636_v24  ;;  %v2639_v21 = vsel %vm1562_vm3, %v2636_v24, %v2638_v25  ;;  %v2991_v40 = vpop.permute.xlu0 %2990 }
 0x1a0   : > { %v2696_v12 = vmul.f32 %v2637_v50, %v6640_v13  ;;  %5715 = vset.pattern.permute.xlu1 %v8631_v4  ;;  %v2697_v32 = vmul.f32 %v2639_v21, %v6613_v44  ;;  %v3058_v11 = vmul.f32 %v2991_v40, %v6551_v9  ;;  %v2646_v21 = vrot.slane %v7206_v52, 6  ;;  %v8662_v9 = vld [vmem:[#allocation27_spill] sm:$0xff] }
 0x1a1   : > { %3777 = vperm.xlu1 %5715, %v8648_v35   ;;  %v2983_v27 = vpop.permute.xlu1 %2982  ;;  %v8651_v35 = vld [vmem:[#allocation58_spill] sm:$0xff] }
 0x1a2   : > { %v2714_v8 = vpack.c.bf16 %v2696_v12, %v2695_v58  ;;  %v3056_v22 = vmul.f32 %v2983_v27, %v6524_v51 }
 0x1a3   : > { %v2995_v16 = vpop.permute.xlu0 %2994 }
 0x1a4   : > { %v3076_v45 = vpack.c.bf16 %v3056_v22, %v3055_v5  ;;  %v2747_v33 = vrot.slane %v2714_v8, 1 }
 0x1a5   : > { %3780 = vperm.xlu1 %5715, %v8646_v26  }
 0x1a6   : > { %v2586_v54 = vpop.permute.xlu1 %2585  ;;  %5524 = vmatmul.mubr.msk.bf16.gmra.mxu0 %vm1152_vm5, %v3076_v45  ;;  %v2748_v55 = vsel %vm1688_vm4, %v2745_v46, %v2747_v33  ;;  %v3059_v45 = vmul.f32 %v2995_v16, %v6605_v63 }
 0x1a7   : > { %v2640_v15 = vrot.slane %v2586_v54, 6  ;;  %5502 = vmatmul.mubr.msk.bf16.gmra.mxu1 %vm1152_vm5, %v2748_v55  ;;  %v3007_v12 = vpop.permute.xlu0 %3006 }
 0x1a8   : > { %v3062_v16 = vmul.f32 %v3007_v12, %v6613_v44 }
 0x1a9   : > { %v2641_v60 = vsel %vm1562_vm3, %v2638_v25, %v2640_v15  ;;  %5716 = vset.pattern.permute.xlu1 %v8629_v6 }
 0x1aa   : > { %v2698_v29 = vmul.f32 %v2641_v60, %v6677_v2  ;;  %3310 = vperm.xlu1 %5716, %v8649_v56  }
 0x1ab   : > { %v2987_v26 = vpop.permute.xlu1 %2986 }
 0x1ac   : > { %v2715_v46 = vpack.c.bf16 %v2698_v29, %v2697_v32  ;;  %v3057_v3 = vmul.f32 %v2987_v26, %v6548_v57  ;;  %v3011_v29 = vpop.permute.xlu0 %3010 }
 0x1ae   : > { %v3077_v53 = vpack.c.bf16 %v3058_v11, %v3057_v3  ;;  %3316 = vperm.xlu1 %5716, %v6827_v31   ;;  %v2749_v62 = vrot.slane %v2715_v46, 1 }
 0x1b0   : > { %v2589_v7 = vpop.permute.xlu1 %2588  ;;  %5527 = vmatprep.mubr.msk.bf16.mxu0 %vm1152_vm5, %v3077_v53  ;;  %v2750_v48 = vsel %vm1688_vm4, %v2747_v33, %v2749_v62 }
 0x1b1   : > { %v2642_v24 = vrot.slane %v2589_v7, 6  ;;  %5505 = vmatprep.mubr.msk.bf16.mxu1 %vm1152_vm5, %v2750_v48 }
 0x1b2   : > { %3319 = vperm.xlu1 %5716, %v8650_v47  }
 0x1b3   : > { %v2643_v50 = vsel %vm1562_vm3, %v2640_v15, %v2642_v24  ;;  %v7365_v27 = vpop.f32.mrf.mxu0 }
 0x1b4   : > { %v2592_v0 = vpop.permute.xlu1 %2591  ;;  %v2699_v5 = vmul.f32 %v2643_v50, %v8639_v42 }
 0x1b5   : > { %v2644_v58 = vrot.slane %v2592_v0, 6  ;;  %v7369_v25 = vpop.f32.mrf.mxu0 }
 0x1b6   : > { %5717 = vset.pattern.permute.xlu1 %v8631_v4 }
 0x1b7   : > { %v2645_v59 = vsel %vm1562_vm3, %v2642_v24, %v2644_v58  ;;  %3789 = vperm.xlu1 %5717, %v8651_v35   ;;  %v7374_v55 = vpop.f32.mrf.mxu0  ;;  %v7397_v24 = vpop.permute.xlu0 %3022 }
 0x1b8   : > { %v2700_v8 = vmul.f32 %v2645_v59, %v6669_v20 }
 0x1b9   : > { %v2999_v22 = vpop.permute.xlu1 %2998  ;;  %v7377_v60 = vpop.f32.mrf.mxu1 }
 0x1ba   : > { %v2716_v33 = vpack.c.bf16 %v2700_v8, %v2699_v5  ;;  %v3060_v54 = vmul.f32 %v2999_v22, %v6624_v36  ;;  %v7381_v40 = vpop.f32.mrf.mxu0  ;;  %v8655_v8 = vld [vmem:[#allocation35_spill] sm:$0xff] }
 0x1bb   : > { %3792 = vperm.xlu1 %5717, %v6827_v31   ;;  %v7379_v56 = vpop.f32.mrf.mxu1  ;;  %8652 = vst [vmem:[#allocation47_spill] sm:$0xff] %v7381_v40  ;;  %v2647_v31 = vsel %vm1562_vm3, %v2644_v58, %v2646_v21 }
 0x1bc   : > { %v3078_v15 = vpack.c.bf16 %v3060_v54, %v3059_v45  ;;  %v2751_v32 = vrot.slane %v2716_v33, 1  ;;  %v2701_v7 = vmul.f32 %v2647_v31, %v6734_v14  ;;  %v7412_v54 = vpop.permute.xlu0 %3038 }
 0x1bd   : > { %v7389_v46 = vpop.f32.mrf.mxu1 }
 0x1be   : > { %5528 = vmatmul.mubr.msk.bf16.gmra.mxu0 %vm1152_vm5, %v3078_v15  ;;  %v2752_v26 = vsel %vm1688_vm4, %v2749_v62, %v2751_v32  ;;  %v2598_v11 = vpop.permute.xlu1 %2597 }
 0x1bf   : > { %5718 = vset.pattern.permute.xlu1 %v8629_v6  ;;  %5506 = vmatmul.mubr.msk.bf16.gmra.mxu1 %vm1152_vm5, %v2752_v26  ;;  %v2648_v52 = vrot.slane %v2598_v11, 6  ;;  %v7392_v53 = vpop.f32.mrf.mxu0  ;;  %v7403_v58 = vpop.f32.mrf.mxu1 }
 0x1c0   : > { %3322 = vperm.xlu1 %5718, %v7087_v34   ;;  %v8653_v34 = vld [vmem:[#allocation21_spill] sm:$0xff]  ;;  %8654 = vst [vmem:[#allocation16_spill] sm:$0xff] %v7403_v58 }
 0x1c1   : > { %v2649_v3 = vsel %vm1562_vm3, %v2646_v21, %v2648_v52  ;;  %v7399_v47 = vpop.f32.mrf.mxu0 }
 0x1c2   : > { %v2702_v62 = vmul.f32 %v2649_v3, %v6754_v39 }
 0x1c3   : > { %v3003_v48 = vpop.permute.xlu1 %3002  ;;  %v7405_v35 = vpop.f32.mrf.mxu0 }
 0x1c4   : > { %v3061_v0 = vmul.f32 %v3003_v48, %v6640_v13  ;;  %3328 = vperm.xlu1 %5718, %v8653_v34   ;;  %v2717_v50 = vpack.c.bf16 %v2702_v62, %v2701_v7  ;;  %v8657_v7 = vld [vmem:[#allocation29_spill] sm:$0xff] }
 0x1c5   : > { %v7409_v12 = vpop.f32.mrf.mxu0 }
 0x1c6   : > { %v3079_v59 = vpack.c.bf16 %v3062_v16, %v3061_v0  ;;  %v2753_v5 = vrot.slane %v2717_v50, 1  ;;  %8656 = vst [vmem:[#allocation32_spill] sm:$0xff] %v7409_v12  ;;  %v7429_v16 = vpop.permute.xlu0 %3280 }
 0x1c8   : > { %3331 = vperm.xlu1 %5718, %v8655_v8   ;;  %v2601_v22 = vpop.permute.xlu1 %2600  ;;  %5531 = vmatprep.mubr.msk.bf16.mxu0 %vm1152_vm5, %v3079_v59  ;;  %v2754_v33 = vsel %vm1688_vm4, %v2751_v32, %v2753_v5  ;;  %v7414_v21 = vpop.f32.mrf.mxu1 }
 0x1c9   : > { %v2650_v45 = vrot.slane %v2601_v22, 6  ;;  %5509 = vmatprep.mubr.msk.bf16.mxu1 %vm1152_vm5, %v2754_v33  ;;  %v3063_v22 = vmul.f32 %v3011_v29, %v6677_v2 }
 0x1ca   : > { %v7417_v15 = vpop.f32.mrf.mxu1 }
 0x1cb   : > { %v2651_v31 = vsel %vm1562_vm3, %v2648_v52, %v2650_v45 }
 0x1cc   : > { %5719 = vset.pattern.permute.xlu1 %v8631_v4  ;;  %v2604_v26 = vpop.permute.xlu1 %2603  ;;  %v7420_v11 = vpop.f32.mrf.mxu0  ;;  %v2703_v50 = vmul.f32 %v2651_v31, %v6756_v18 }
 0x1cd   : > { %v2652_v3 = vrot.slane %v2604_v26, 6  ;;  %3801 = vperm.xlu1 %5719, %v8657_v7   ;;  %v7424_v62 = vpop.f32.mrf.mxu1  ;;  %v8659_v7 = vld [vmem:[#allocation17_spill] sm:$0xff] }
 0x1ce   : > { %v7426_v32 = vpop.f32.mrf.mxu0 }
 0x1cf   : > { %v2653_v48 = vsel %vm1562_vm3, %v2650_v45, %v2652_v3  ;;  %v7431_v0 = vpop.f32.mrf.mxu1  ;;  %v2654_v45 = vrot.slane %v8659_v7, 6 }
 0x1d0   : > { %8658 = vst [vmem:[#allocation54_spill] sm:$0xff] %v7431_v0  ;;  %v2704_v59 = vmul.f32 %v2653_v48, %v6736_v61  ;;  %v7435_v8 = vpop.f32.mrf.mxu0  ;;  %v7448_v48 = vpop.permute.xlu0 %3289 }
 0x1d1   : > { %3804 = vperm.xlu1 %5719, %v8653_v34   ;;  %v3015_v52 = vpop.permute.xlu1 %3014  ;;  %v8660_v34 = vld [vmem:[#allocation5_spill] sm:$0xff] }
 0x1d2   : > { %v2718_v33 = vpack.c.bf16 %v2704_v59, %v2703_v50  ;;  %v3064_v26 = vmul.f32 %v3015_v52, %v8639_v42  ;;  %v7441_v44 = vpop.f32.mrf.mxu1  ;;  %v7443_v13 = vpop.f32.mrf.mxu0  ;;  %v2655_v59 = vsel %vm1562_vm3, %v2652_v3, %v2654_v45  ;;  %v8661_v42 = vld [vmem:[#allocation36_spill] sm:$0xff] }
 0x1d3   : > { %v2705_v2 = vmul.f32 %v2655_v59, %v6759_v38 }
 0x1d4   : > { %v3080_v12 = vpack.c.bf16 %v3064_v26, %v3063_v22  ;;  %v2755_v31 = vrot.slane %v2718_v33, 1  ;;  %v7445_v0 = vpop.f32.mrf.mxu1  ;;  %v7473_v40 = vpop.permute.xlu0 %3295 }
 0x1d5   : > { %5720 = vset.pattern.permute.xlu1 %v8629_v6 }
 0x1d6   : > { %3334 = vperm.xlu1 %5720, %v8660_v34   ;;  %v2610_v29 = vpop.permute.xlu1 %2609  ;;  %5532 = vmatmul.mubr.msk.bf16.gmra.mxu0 %vm1152_vm5, %v3080_v12  ;;  %v2756_v50 = vsel %vm1688_vm4, %v2753_v5, %v2755_v31  ;;  %v7454_v52 = vpop.f32.mrf.mxu1 }
 0x1d7   : > { %v7456_v7 = vpop.f32.mrf.mxu0  ;;  %v2656_v22 = vrot.slane %v2610_v29, 6  ;;  %5510 = vmatmul.mubr.msk.bf16.gmra.mxu1 %vm1152_vm5, %v2756_v50  ;;  %v3066_v29 = vmul.f32 %v7397_v24, %v6734_v14 }
 0x1d8   : > { %v7459_v33 = vpop.f32.mrf.mxu1 }
 0x1d9   : > { %v2657_v26 = vsel %vm1562_vm3, %v2654_v45, %v2656_v22  ;;  %v2707_v34 = vmul.f32 %v2656_v22, %v8661_v42  ;;  %v7464_v12 = vpop.f32.mrf.mxu0 }
 0x1da   : > { %v2706_v5 = vmul.f32 %v2657_v26, %v6806_v41  ;;  %3340 = vperm.xlu1 %5720, %v7103_v19  }
 0x1db   : > { %v2720_v3 = vpack.c.bf16 %v2707_v34, %v2707_v34  ;;  %v3019_v36 = vpop.permute.xlu1 %3018  ;;  %v7477_v58 = vpop.f32.mrf.mxu0 }
 0x1dc   : > { %v7470_v50 = vpop.f32.mrf.mxu1  ;;  %v2719_v63 = vpack.c.bf16 %v2706_v5, %v2705_v2  ;;  %v3065_v45 = vmul.f32 %v3019_v36, %v6669_v20 }
 0x1dd   : > { %v2759_v22 = vrot.slane %v2720_v3, 1  ;;  %v7486_v24 = vpop.f32.mrf.mxu0 }
 0x1de   : > { %v7475_v59 = vpop.f32.mrf.mxu1  ;;  %v3081_v26 = vpack.c.bf16 %v3066_v29, %v3065_v45  ;;  %3343 = vperm.xlu1 %5720, %v8662_v9   ;;  %v2757_v34 = vrot.slane %v2719_v63, 1  ;;  %v7492_v9 = vpop.permute.xlu0 %3301  ;;  %v5781_v63 = vld [vmem:[%s8377_s1 + $0x98] sm:$0xff] }
 0x1df   : > { %v3027_v57 = vpop.permute.xlu1 %3026 }
 0x1e0   : > { %v7480_v51 = vpop.f32.mrf.mxu1  ;;  %5535 = vmatprep.mubr.msk.bf16.mxu0 %vm1152_vm5, %v3081_v26  ;;  %v2758_v2 = vsel %vm1688_vm4, %v2755_v31, %v2757_v34  ;;  %v2760_v36 = vsel %vm1688_vm4, %v2757_v34, %v2759_v22  ;;  %v3067_v29 = vmul.f32 %v3027_v57, %v6754_v39 }
 0x1e1   : > { %5513 = vmatprep.mubr.msk.bf16.mxu1 %vm1152_vm5, %v2758_v2 }
 0x1e2   : > { %v7488_v5 = vpop.f32.mrf.mxu1  ;;  %5722 = vset.pattern.permute.xlu1 %v8631_v4  ;;  %5514 = vmatmul.mubr.msk.bf16.gmra.mxu1 %vm1152_vm5, %v2760_v36  ;;  %v7514_v57 = vpop.permute.xlu0 %3313 }
 0x1e3   : > { %3813 = vperm.xlu1 %5722, %v5781_v63   ;;  %v3031_v31 = vpop.permute.xlu1 %3030  ;;  %v7500_v45 = vpop.f32.mrf.mxu0  ;;  %v3351_v63 = vrot.slane %v7429_v16, 7  ;;  %8667 = vst [vmem:[#allocation53_spill] sm:$0xff] %v7514_v57 }
 0x1e4   : > { %v7497_v3 = vpop.f32.mrf.mxu1  ;;  %8663 = vst [vmem:[#allocation28_spill] sm:$0xff] %v7500_v45  ;;  %v3068_v22 = vmul.f32 %v3031_v31, %v6756_v18 }
 0x1e5   : > { %v7505_v34 = vpop.f32.mrf.mxu0  ;;  %v3423_v16 = vmul.f32 %v3351_v63, %v8588_v43 }
 0x1e6   : > { %v7503_v26 = vpop.f32.mrf.mxu1  ;;  %8664 = vst [vmem:[#allocation56_spill] sm:$0xff] %v7505_v34  ;;  %v3082_v2 = vpack.c.bf16 %v3068_v22, %v3067_v29 }
 0x1e7   : > { %3816 = vperm.xlu1 %5722, %v7103_v19   ;;  %v7510_v14 = vpop.f32.mrf.mxu0  ;;  %v3356_v19 = vrot.slane %v7448_v48, 7 }
 0x1e8   : > { %v7508_v36 = vpop.f32.mrf.mxu1  ;;  %8666 = vst [vmem:[#allocation33_spill] sm:$0xff] %v7510_v14  ;;  %5536 = vmatmul.mubr.msk.bf16.gmra.mxu0 %vm1152_vm5, %v3082_v2  ;;  %v3284_v39 = vpop.permute.xlu1 %3283 }
 0x1e9   : > { %8665 = vst [vmem:[#allocation25_spill] sm:$0xff] %v7508_v36  ;;  %v3352_v31 = vrot.slane %v3284_v39, 7  ;;  %v7518_v18 = vpop.f32.mrf.mxu0 }
 0x1ea   : > { %v7516_v20 = vpop.f32.mrf.mxu1  ;;  %8669 = vst [vmem:[#allocation30_spill] sm:$0xff] %v7518_v18 }
 0x1eb   : > { %8668 = vst [vmem:[#allocation34_spill] sm:$0xff] %v7516_v20  ;;  %5723 = vset.pattern.permute.xlu1 %v8629_v6  ;;  %v3353_v22 = vsel %vm938_vm2, %v3351_v63, %v3352_v31  ;;  %v7532_v20 = vpop.permute.xlu0 %3325 }
 0x1ec   : > { %v7522_v29 = vpop.f32.mrf.mxu1  ;;  %3346 = vperm.xlu1 %5723, %v7262_v23   ;;  %v3424_v2 = vmul.f32 %v3353_v22, %v8594_v30  ;;  %v3287_v57 = vpop.permute.xlu1 %3286  ;;  %8673 = vst [vmem:[#allocation41_spill] sm:$0xff] %v7532_v20 }
 0x1ed   : > { %8670 = vst [vmem:[#allocation26_spill] sm:$0xff] %v7522_v29  ;;  %v7528_v14 = vpop.f32.mrf.mxu0  ;;  %v3354_v18 = vrot.slane %v3287_v57, 7 }
 0x1ee   : > { %8671 = vst [vmem:[#allocation19_spill] sm:$0xff] %v7528_v14  ;;  %v7530_v39 = vpop.f32.mrf.mxu1  ;;  %v3448_v6 = vpack.c.bf16 %v3424_v2, %v3423_v16 }
 0x1ef   : > { %8672 = vst [vmem:[#allocation38_spill] sm:$0xff] %v7530_v39  ;;  %v7534_v48 = vpop.f32.mrf.mxu0  ;;  %v3355_v36 = vsel %vm938_vm2, %v3352_v31, %v3354_v18  ;;  %v3357_v63 = vsel %vm938_vm2, %v3354_v18, %v3356_v19  ;;  %v8678_v18 = vrot.slane %v7473_v40, 7 }
 0x1f0   : > { %8674 = vst [vmem:[#allocation22_spill] sm:$0xff] %v7534_v48  ;;  %v7537_v34 = vpop.f32.mrf.mxu1  ;;  %5725 = vset.pattern.permute.xlu1 %v8631_v4  ;;  %v3466_v22 = vshll.u32 %v3448_v6, 16  ;;  %v3425_v14 = vmul.f32 %v3355_v36, %v6440_v37  ;;  %v3426_v57 = vmul.f32 %v3357_v63, %v6442_v28  ;;  %v3293_v39 = vpop.permute.xlu1 %3292 }
 0x1f1   : > { %8675 = vst [vmem:[#allocation20_spill] sm:$0xff] %v7537_v34  ;;  %3822 = vperm.xlu1 %5725, %v7262_v23   ;;  %v7545_v16 = vpop.f32.mrf.mxu0  ;;  %v3358_v29 = vrot.slane %v3293_v39, 7  ;;  %v7555_v63 = vpop.permute.xlu0 %3337 }
 0x1f2   : > { %8676 = vst [vmem:[#allocation23_spill] sm:$0xff] %v7545_v16  ;;  %v7547_v2 = vpop.f32.mrf.mxu1  ;;  %v3449_v20 = vpack.c.bf16 %v3426_v57, %v3425_v14  ;;  %v3468_v36 = vrot.slane %v3466_v22, 1  ;;  %8680 = vst [vmem:[#allocation57_spill] sm:$0xff] %v7555_v63  ;;  %v3464_v57 = vshrl.u32 %v3448_v6, 16 }
 0x1f3   : > { %8677 = vst [vmem:[#allocation55_spill] sm:$0xff] %v7547_v2  ;;  %v3359_v31 = vsel %vm938_vm2, %v3356_v19, %v3358_v29  ;;  %v3361_v4 = vsel %vm938_vm2, %v3358_v29, %v8678_v18  ;;  %v7553_v34 = vpop.f32.mrf.mxu0  ;;  %v3070_v19 = vmul.f32 %v7412_v54, %v6759_v38 }
 0x1f4   : > { %v5391_v48 = vpop.f32.mrf.mxu1  ;;  %8679 = vst [vmem:[#allocation42_spill] sm:$0xff] %v7553_v34  ;;  %v3427_v16 = vmul.f32 %v3359_v31, %v6469_v10  ;;  %v3428_v2 = vmul.f32 %v3361_v4, %v6471_v49  ;;  %v3471_v18 = vshll.u32 %v3449_v20, 16  ;;  %v3469_v4 = vor.u32 %v3468_v36, %v3464_v57 }
 0x1f5   : > { %v1404_v23 = vadd.f32 %v5391_v48, %v7377_v60  ;;  %3825 = vperm.xlu1 %5725, %v7165_v1   ;;  %v3035_v14 = vpop.permute.xlu1 %3034  ;;  %v3475_v45 = vshrl.u32 %v3449_v20, 16 }
 0x1f6   : > { %v1395_v39 = vpop.f32.mrf.mxu1  ;;  %v3069_v29 = vmul.f32 %v3035_v14, %v6736_v61  ;;  %v7564_v22 = vpop.f32.mrf.mxu0  ;;  %v7567_v60 = vpack.c.bf16 %v3428_v2, %v3427_v16  ;;  %v3473_v34 = vrot.slane %v3471_v18, 1 }
 0x1f7   : > { %v1396_v63 = vadd.f32 %v1395_v39, %v7379_v56  ;;  %v7570_v48 = vadd.f32 %v7365_v27, %v1404_v23 }
 0x1f8   : > { %v5392_v31 = vpop.f32.mrf.mxu1  ;;  %v3083_v1 = vpack.c.bf16 %v3070_v19, %v3069_v29  ;;  %v3479_v14 = vshll.u32 %v7567_v60, 16  ;;  %v7577_v61 = vpop.f32.mrf.mxu0  ;;  %v3474_v27 = vsel %vm1051_vm6, %v3469_v4, %v3473_v34  ;;  %v3477_v2 = vor.u32 %v3475_v45, %v3473_v34 }
 0x1f9   : > { %v1407_v54 = vadd.f32 %v5392_v31, %v7389_v46  ;;  %v3043_v6 = vpop.permute.xlu1 %3042  ;;  %v7575_v38 = vadd.f32 %v7369_v25, %v1396_v63  ;;  %5545 = vmatprep.mubr.msk.bf16.mxu1 %vm1152_vm5, %v3474_v27  ;;  %v3757_v46 = vpop.permute.xlu0 %3756 }
 0x1fa   : > { %v7579_v56 = vpop.f32.mrf.mxu1  ;;  %5539 = vmatprep.mubr.msk.bf16.mxu0 %vm1152_vm5, %v3083_v1  ;;  %v7583_v16 = vrot.slane %v3479_v14, 1  ;;  %v7592_v19 = vpop.f32.mrf.mxu0  ;;  %v3071_v29 = vmul.f32 %v3043_v6, %v6806_v41  ;;  %v3827_v14 = vrot.slane %v3757_v46, 6 }
 0x1fb   : > { %v7587_v20 = vadd.f32 %v7374_v55, %v1407_v54 }
 0x1fc   : > { %v5395_v36 = vpop.f32.mrf.mxu1  ;;  %v3482_v23 = vsel %vm1051_vm6, %v3477_v2, %v7583_v16  ;;  %v7602_v31 = vpop.f32.mrf.mxu0 }
 0x1fd   : > { %v1420_v25 = vadd.f32 %v5395_v36, %v7414_v21  ;;  %v3047_v63 = vpop.permute.xlu1 %3046  ;;  %5546 = vmatmul.mubr.msk.bf16.vlgmr.msra.gmra.mxu1 %vm1152_vm5, %v3482_v23  ;;  %v3766_v6 = vpop.permute.xlu0 %3765 }
 0x1fe   : > { %v1411_v39 = vpop.f32.mrf.mxu1  ;;  %v3072_v45 = vmul.f32 %v3047_v63, %v8661_v42  ;;  %v3832_v2 = vrot.slane %v3766_v6, 6 }
 0x1ff   : > { %v1412_v55 = vadd.f32 %v1411_v39, %v7417_v15  ;;  %v7599_v34 = vadd.f32 %v7392_v53, %v1420_v25  ;;  %v7615_v25 = vpop.f32.mrf.mxu0 }
 0x200   : > { %v5396_v57 = vpop.f32.mrf.mxu1  ;;  %v3084_v21 = vpack.c.bf16 %v3072_v45, %v3071_v29 }
 0x201   : > { %v1423_v18 = vadd.f32 %v5396_v57, %v7424_v62  ;;  %v7605_v1 = vadd.f32 %v7399_v47, %v1412_v55  ;;  %v7623_v55 = vpop.permute.xlu0 %3771 }
 0x202   : > { %v7607_v4 = vpop.f32.mrf.mxu1  ;;  %v3760_v54 = vpop.permute.xlu1 %3759  ;;  %5540 = vmatmul.mubr.msk.bf16.gmra.mxu0 %vm1152_vm5, %v3084_v21  ;;  %v3836_v6 = vrot.slane %v7623_v55, 6 }
 0x203   : > { %v3828_v15 = vrot.slane %v3760_v54, 6  ;;  %v7611_v53 = vadd.f32 %v7405_v35, %v1423_v18  ;;  %v3899_v35 = vmul.f32 %v3827_v14, %v8588_v43  ;;  %v7628_v18 = vpop.f32.mrf.mxu0 }
 0x204   : > { %v5399_v27 = vpop.f32.mrf.mxu1 }
 0x205   : > { %v1436_v62 = vadd.f32 %v5399_v27, %v7441_v44  ;;  %v3829_v36 = vsel %vm1562_vm3, %v3827_v14, %v3828_v15 }
 0x206   : > { %v1427_v47 = vpop.f32.mrf.mxu1  ;;  %v3900_v63 = vmul.f32 %v3829_v36, %v8594_v30  ;;  %v3763_v23 = vpop.permute.xlu1 %3762 }
 0x207   : > { %v1428_v39 = vadd.f32 %v1427_v47, %v7445_v0  ;;  %v3830_v46 = vrot.slane %v3763_v23, 6  ;;  %v7620_v29 = vadd.f32 %v7420_v11, %v1436_v62  ;;  %v3364_v62 = vrot.slane %v7492_v9, 7 }
 0x208   : > { %v5400_v45 = vpop.f32.mrf.mxu1  ;;  %v3924_v54 = vpack.c.bf16 %v3900_v63, %v3899_v35 }
 0x209   : > { %v1439_v44 = vadd.f32 %v5400_v45, %v7454_v52  ;;  %v3831_v57 = vsel %vm1562_vm3, %v3828_v15, %v3830_v46  ;;  %v3833_v21 = vsel %vm1562_vm3, %v3830_v46, %v3832_v2  ;;  %v7631_v30 = vadd.f32 %v7426_v32, %v1428_v39 }
 0x20a   : > { %v1430_v0 = vpop.f32.mrf.mxu1  ;;  %v3901_v11 = vmul.f32 %v3831_v57, %v6440_v37  ;;  %v3902_v43 = vmul.f32 %v3833_v21, %v6442_v28  ;;  %v3769_v14 = vpop.permute.xlu1 %3768  ;;  %v3952_v39 = vrot.slane %v3924_v54, 1 }
 0x20b   : > { %v1431_v52 = vadd.f32 %v1430_v0, %v7459_v33  ;;  %v3834_v27 = vrot.slane %v3769_v14, 6  ;;  %v7638_v15 = vadd.f32 %v7435_v8, %v1439_v44  ;;  %v7646_v37 = vpop.f32.mrf.mxu0  ;;  %v8682_v14 = vld [vmem:[#allocation37_spill] sm:$0xff] }
 0x20c   : > { %v5403_v36 = vpop.f32.mrf.mxu1  ;;  %v3925_v32 = vpack.c.bf16 %v3902_v43, %v3901_v11 }
 0x20d   : > { %v1452_v47 = vadd.f32 %v5403_v36, %v7470_v50  ;;  %v3835_v63 = vsel %vm1562_vm3, %v3832_v2, %v3834_v27  ;;  %v3837_v28 = vsel %vm1562_vm3, %v3834_v27, %v3836_v6  ;;  %v7649_v33 = vadd.f32 %v7443_v13, %v1431_v52 }
 0x20e   : > { %v1443_v23 = vpop.f32.mrf.mxu1  ;;  %v3903_v8 = vmul.f32 %v3835_v63, %v6469_v10  ;;  %v3904_v9 = vmul.f32 %v3837_v28, %v6471_v49  ;;  %v3953_v46 = vrot.slane %v3925_v32, 1  ;;  %v7660_v10 = vpop.f32.mrf.mxu0 }
 0x20f   : > { %v1444_v50 = vadd.f32 %v1443_v23, %v7475_v59  ;;  %v3299_v35 = vpop.permute.xlu1 %3298  ;;  %v7655_v2 = vadd.f32 %v7456_v7, %v1452_v47  ;;  %v8681_v7 = vrot.slane %v7473_v40, 7  ;;  %v3775_v40 = vpop.permute.xlu0 %3774 }
 0x210   : > { %v5404_v45 = vpop.f32.mrf.mxu1  ;;  %v3926_v44 = vpack.c.bf16 %v3904_v9, %v3903_v8  ;;  %v3362_v57 = vrot.slane %v3299_v35, 7  ;;  %v3954_v21 = vsel %vm1688_vm4, %v3952_v39, %v3953_v46  ;;  %v3483_v39 = vshrl.u32 %v7567_v60, 16 }
 0x211   : > { %v1455_v13 = vadd.f32 %v5404_v45, %v7480_v51  ;;  %5571 = vmatprep.mubr.msk.bf16.mxu0 %vm1152_vm5, %v3954_v21  ;;  %v7663_v49 = vadd.f32 %v7464_v12, %v1444_v50  ;;  %v8684_v21 = vld [vmem:[#allocation25_spill] sm:$0xff] }
 0x212   : > { %v1446_v0 = vpop.f32.mrf.mxu1  ;;  %v7665_v59 = vrot.slane %v3926_v44, 1  ;;  %v3363_v54 = vsel %vm938_vm2, %v8681_v7, %v3362_v57  ;;  %v3365_v11 = vsel %vm938_vm2, %v3362_v57, %v3364_v62  ;;  %v8683_v44 = vld [vmem:[#allocation28_spill] sm:$0xff] }
 0x213   : > { %v1447_v43 = vadd.f32 %v1446_v0, %v7488_v5  ;;  %v3429_v51 = vmul.f32 %v3363_v54, %v6531_v17  ;;  %v3430_v52 = vmul.f32 %v3365_v11, %v8682_v14  ;;  %v3305_v27 = vpop.permute.xlu1 %3304  ;;  %v7675_v36 = vadd.f32 %v7477_v58, %v1455_v13  ;;  %v7681_v5 = vpop.f32.mrf.mxu0  ;;  %v8685_v7 = vld [vmem:[#allocation56_spill] sm:$0xff]  ;;  %v8686_v11 = vld [vmem:[#allocation34_spill] sm:$0xff] }
 0x214   : > { %v5407_v12 = vpop.f32.mrf.mxu1  ;;  %v3366_v32 = vrot.slane %v3305_v27, 7  ;;  %v3956_v47 = vsel %vm1688_vm4, %v3953_v46, %v7665_v59  ;;  %v3838_v46 = vrot.slane %v3775_v40, 6  ;;  %v3485_v13 = vor.u32 %v3483_v39, %v7583_v16  ;;  %v8688_v27 = vld [vmem:[#allocation40_spill] sm:$0xff] }
 0x215   : > { %v1468_v63 = vadd.f32 %v5407_v12, %v7497_v3  ;;  %v3451_v28 = vpack.c.bf16 %v3430_v52, %v3429_v51  ;;  %5572 = vmatmul.mubr.msk.bf16.vlgmr.msra.gmra.mxu0 %vm1152_vm5, %v3956_v47  ;;  %v7684_v23 = vadd.f32 %v7486_v24, %v1447_v43  ;;  %v8687_v51 = vld [vmem:[#allocation39_spill] sm:$0xff] }
 0x216   : > { %v1459_v8 = vpop.f32.mrf.mxu1  ;;  %v3367_v3 = vsel %vm938_vm2, %v3364_v62, %v3366_v32  ;;  %v3839_v16 = vsel %vm1562_vm3, %v3836_v6, %v3838_v46 }
 0x217   : > { %v1460_v58 = vadd.f32 %v1459_v8, %v7503_v26  ;;  %v7687_v9 = vpop.permute.xlu1 %3307  ;;  %v3487_v50 = vshll.u32 %v3451_v28, 16  ;;  %v7693_v57 = vadd.f32 %v8683_v44, %v1468_v63  ;;  %v7697_v26 = vpop.f32.mrf.mxu0  ;;  %v3431_v52 = vmul.f32 %v3367_v3, %v8687_v51  ;;  %v8689_v8 = vld [vmem:[#allocation33_spill] sm:$0xff]  ;;  %v8691_v44 = vld [vmem:[#allocation30_spill] sm:$0xff] }
 0x218   : > { %v5408_v35 = vpop.f32.mrf.mxu1  ;;  %v8472_v45 = vrot.slane %v7687_v9, 7  ;;  %v3905_v6 = vmul.f32 %v3839_v16, %v6531_v17 }
 0x219   : > { %v1471_v24 = vadd.f32 %v5408_v35, %v8684_v21  ;;  %v3489_v0 = vrot.slane %v3487_v50, 1  ;;  %v7700_v54 = vadd.f32 %v8685_v7, %v1460_v58  ;;  %v7719_v3 = vpop.f32.mrf.mxu0  ;;  %v7725_v7 = vpop.permute.xlu0 %3783 }
 0x21a   : > { %v1462_v60 = vpop.f32.mrf.mxu1  ;;  %v3369_v62 = vsel %vm938_vm2, %v3366_v32, %v8472_v45  ;;  %v8690_v32 = vld [vmem:[#allocation26_spill] sm:$0xff] }
 0x21b   : > { %v1463_v43 = vadd.f32 %v1462_v60, %v8686_v11  ;;  %v3432_v12 = vmul.f32 %v3369_v62, %v8688_v27  ;;  %v3490_v47 = vsel %vm1051_vm6, %v3485_v13, %v3489_v0  ;;  %v7714_v58 = vadd.f32 %v8689_v8, %v1471_v24  ;;  %v8692_v60 = vld [vmem:[#allocation38_spill] sm:$0xff] }
 0x21c   : > { %v5411_v40 = vpop.f32.mrf.mxu1  ;;  %v3778_v63 = vpop.permute.xlu1 %3777  ;;  %5549 = vmatprep.mubr.msk.bf16.mxu1 %vm1152_vm5, %v3490_v47  ;;  %v3491_v13 = vshrl.u32 %v3451_v28, 16  ;;  %v8694_v28 = vld [vmem:[#allocation20_spill] sm:$0xff] }
 0x21d   : > { %v1484_v39 = vadd.f32 %v5411_v40, %v8690_v32  ;;  %v7717_v50 = vpack.c.bf16 %v3432_v12, %v3431_v52  ;;  %v3840_v35 = vrot.slane %v3778_v63, 6  ;;  %v7722_v21 = vadd.f32 %v8691_v44, %v1463_v43  ;;  %v8693_v63 = vld [vmem:[#allocation19_spill] sm:$0xff]  ;;  %v7736_v44 = vpop.f32.mrf.mxu0 }
 0x21e   : > { %v1475_v55 = vpop.f32.mrf.mxu1  ;;  %v3493_v43 = vor.u32 %v3491_v13, %v3489_v0  ;;  %v8696_v52 = vld [vmem:[#allocation55_spill] sm:$0xff]  ;;  %v8697_v0 = vrot.slane %v7725_v7, 6 }
 0x21f   : > { %v1476_v62 = vadd.f32 %v1475_v55, %v8692_v60  ;;  %v3841_v24 = vsel %vm1562_vm3, %v3838_v46, %v3840_v35  ;;  %v3495_v11 = vshll.u32 %v7717_v50, 16  ;;  %v7733_v8 = vadd.f32 %v8693_v63, %v1484_v39  ;;  %v8695_v55 = vld [vmem:[#allocation22_spill] sm:$0xff]  ;;  %v8699_v63 = vld [vmem:[#allocation23_spill] sm:$0xff] }
 0x220   : > { %v5412_v12 = vpop.f32.mrf.mxu1  ;;  %v3906_v47 = vmul.f32 %v3841_v24, %v8682_v14  ;;  %v3781_v40 = vpop.permute.xlu1 %3780  ;;  %v8698_v24 = vld [vmem:[#allocation16_spill] sm:$0xff] }
 0x221   : > { %v1487_v17 = vadd.f32 %v5412_v12, %v8694_v28  ;;  %v3842_v16 = vrot.slane %v3781_v40, 6  ;;  %v3497_v32 = vrot.slane %v3495_v11, 1  ;;  %v7739_v46 = vadd.f32 %v8695_v55, %v1476_v62 }
 0x222   : > { %v1478_v60 = vpop.f32.mrf.mxu1  ;;  %v3927_v45 = vpack.c.bf16 %v3906_v47, %v3905_v6  ;;  %v1399_v11 = vadd.f32 %v7579_v56, %v8698_v24  ;;  %v7753_v47 = vpop.f32.mrf.mxu0  ;;  %v8701_v56 = vld [vmem:[#allocation53_spill] sm:$0xff] }
 0x223   : > { %v1479_v42 = vadd.f32 %v1478_v60, %v8696_v52  ;;  %v3843_v14 = vsel %vm1562_vm3, %v3840_v35, %v3842_v16  ;;  %v3845_v39 = vsel %vm1562_vm3, %v3842_v16, %v8697_v0  ;;  %v3498_v13 = vsel %vm1051_vm6, %v3493_v43, %v3497_v32  ;;  %v8700_v43 = vld [vmem:[#allocation42_spill] sm:$0xff]  ;;  %v8702_v0 = vld [vmem:[#allocation47_spill] sm:$0xff] }
 0x224   : > { %v5443_v12 = vpop.f32.mrf.mxu1  ;;  %v3907_v40 = vmul.f32 %v3843_v14, %v8687_v51  ;;  %v3908_v62 = vmul.f32 %v3845_v39, %v8688_v27  ;;  %5550 = vmatmul.mubr.msk.bf16.gmra.mxu1 %vm1152_vm5, %v3498_v13  ;;  %v3957_v6 = vrot.slane %v3927_v45, 1  ;;  %v7756_v28 = vadd.f32 %v8699_v63, %v1487_v17  ;;  %v7782_v63 = vpop.f32.mrf.mxu0 }
 0x225   : > { %v2210_v52 = vadd.f32 %v5443_v12, %v7570_v48  ;;  %v3311_v35 = vpop.permute.xlu1 %3310  ;;  %v7759_v16 = vadd.f32 %v8700_v43, %v1479_v42  ;;  %v3372_v55 = vrot.slane %v8701_v56, 7  ;;  %v1883_v39 = vadd.f32 %v8702_v0, %v1399_v11  ;;  %v3787_v56 = vpop.permute.xlu0 %3786 }
 0x226   : > { %v2113_v60 = vpop.f32.mrf.mxu1  ;;  %v3928_v51 = vpack.c.bf16 %v3908_v62, %v3907_v40  ;;  %v3370_v14 = vrot.slane %v3311_v35, 7  ;;  %v3958_v27 = vsel %vm1688_vm4, %v7665_v59, %v3957_v6  ;;  %v8703_v42 = vrot.slane %v7687_v9, 7  ;;  %v8705_v62 = vld [vmem:[#allocation44_spill] sm:$0xff] }
 0x227   : > { %v2208_v45 = vadd.f32 %v2113_v60, %v7575_v38  ;;  %v7766_v48 = vadd.f32 %v7564_v22, %v2210_v52  ;;  %5575 = vmatprep.mubr.msk.bf16.mxu0 %vm1152_vm5, %v3958_v27  ;;  %v8704_v22 = vld [vmem:[#allocation24_spill] sm:$0xff] }
 0x228   : > { %v5444_v17 = vpop.f32.mrf.mxu1  ;;  %v3371_v13 = vsel %vm938_vm2, %v8703_v42, %v3370_v14  ;;  %v3373_v24 = vsel %vm938_vm2, %v3370_v14, %v3372_v55  ;;  %v7774_v12 = vrot.slane %v3928_v51, 1  ;;  %v7800_v42 = vpop.f32.mrf.mxu0 }
 0x229   : > { %v2211_v59 = vadd.f32 %v5444_v17, %v7587_v20  ;;  %v7778_v38 = vadd.f32 %v7577_v61, %v2208_v45  ;;  %v3433_v40 = vmul.f32 %v3371_v13, %v8704_v22  ;;  %v3434_v52 = vmul.f32 %v3373_v24, %v8705_v62  ;;  %v3317_v35 = vpop.permute.xlu1 %3316  ;;  %v8706_v61 = vld [vmem:[#allocation54_spill] sm:$0xff] }
 0x22a   : > { %v2116_v11 = vpop.f32.mrf.mxu1  ;;  %v3374_v9 = vrot.slane %v3317_v35, 7  ;;  %v3960_v43 = vsel %vm1688_vm4, %v3957_v6, %v7774_v12  ;;  %v1415_v14 = vadd.f32 %v7607_v4, %v8706_v61  ;;  %v3499_v45 = vshrl.u32 %v7717_v50, 16 }
 0x22b   : > { %v2209_v60 = vadd.f32 %v2116_v11, %v1883_v39  ;;  %v7787_v51 = vadd.f32 %v7592_v19, %v2211_v59  ;;  %v3453_v20 = vpack.c.bf16 %v3434_v52, %v3433_v40  ;;  %5576 = vmatmul.mubr.msk.bf16.gmra.mxu0 %vm1152_vm5, %v3960_v43  ;;  %v3846_v13 = vrot.slane %v3787_v56, 6  ;;  %v8707_v52 = vld [vmem:[#allocation32_spill] sm:$0xff] }
 0x22c   : > { %v5447_v27 = vpop.f32.mrf.mxu1  ;;  %v3375_v6 = vsel %vm938_vm2, %v3372_v55, %v3374_v9  ;;  %v1887_v35 = vadd.f32 %v8707_v52, %v1415_v14  ;;  %v8708_v55 = vld [vmem:[#allocation15_spill] sm:$0xff] }
 0x22d   : > { %v2214_v17 = vadd.f32 %v5447_v27, %v7599_v34  ;;  %v7795_v0 = vadd.f32 %v7602_v31, %v2209_v60  ;;  %v7798_v39 = vpop.permute.xlu1 %3319  ;;  %v3503_v19 = vshll.u32 %v3453_v20, 16  ;;  %v3501_v34 = vor.u32 %v3499_v45, %v3497_v32  ;;  %v7818_v32 = vpop.f32.mrf.mxu0 }
 0x22e   : > { %v2129_v24 = vpop.f32.mrf.mxu1  ;;  %v3376_v59 = vrot.slane %v7798_v39, 7  ;;  %v3435_v11 = vmul.f32 %v3375_v6, %v8708_v55  ;;  %v8710_v27 = vrot.slane %v7725_v7, 6 }
 0x22f   : > { %v2212_v4 = vadd.f32 %v2129_v24, %v7605_v1  ;;  %v7805_v50 = vadd.f32 %v7615_v25, %v2214_v17  ;;  %v3505_v40 = vrot.slane %v3503_v19, 1  ;;  %v8709_v1 = vld [vmem:[#allocation43_spill] sm:$0xff]  ;;  %v7829_v24 = vpop.permute.xlu0 %3795  ;;  %v7837_v52 = vpop.f32.mrf.mxu0 }
 0x230   : > { %v5448_v31 = vpop.f32.mrf.mxu1  ;;  %v3377_v43 = vsel %vm938_vm2, %v3374_v9, %v3376_v59  ;;  %v3847_v14 = vsel %vm1562_vm3, %v8710_v27, %v3846_v13 }
 0x231   : > { %v2215_v56 = vadd.f32 %v5448_v31, %v7611_v53  ;;  %v7814_v60 = vadd.f32 %v7628_v18, %v2212_v4  ;;  %v3436_v61 = vmul.f32 %v3377_v43, %v8709_v1  ;;  %v3506_v25 = vsel %vm1051_vm6, %v3501_v34, %v3505_v40 }
 0x232   : > { %v2132_v45 = vpop.f32.mrf.mxu1  ;;  %v3790_v17 = vpop.permute.xlu1 %3789  ;;  %5553 = vmatprep.mubr.msk.bf16.mxu1 %vm1152_vm5, %v3506_v25 }
 0x233   : > { %v2213_v9 = vadd.f32 %v2132_v45, %v1887_v35  ;;  %v7825_v53 = vadd.f32 %v7646_v37, %v2215_v56  ;;  %v7827_v18 = vpack.c.bf16 %v3436_v61, %v3435_v11  ;;  %v3848_v6 = vrot.slane %v3790_v17, 6 }
 0x234   : > { %v5451_v19 = vpop.f32.mrf.mxu1  ;;  %v3909_v37 = vmul.f32 %v3847_v14, %v8704_v22  ;;  %v3852_v35 = vrot.slane %v7829_v24, 6  ;;  %v3507_v61 = vshrl.u32 %v3453_v20, 16 }
 0x235   : > { %8711 = vst [vmem:[#allocation58_spill] sm:$0xff] %v7825_v53  ;;  %v2218_v4 = vadd.f32 %v5451_v19, %v7620_v29  ;;  %v7833_v7 = vadd.f32 %v7660_v10, %v2213_v9  ;;  %v3849_v34 = vsel %vm1562_vm3, %v3846_v13, %v3848_v6  ;;  %v3511_v31 = vshll.u32 %v7827_v18, 16 }
 0x236   : > { %v2145_v11 = vpop.f32.mrf.mxu1  ;;  %v3910_v43 = vmul.f32 %v3849_v34, %v8705_v62  ;;  %v3793_v56 = vpop.permute.xlu1 %3792  ;;  %v3509_v17 = vor.u32 %v3507_v61, %v3505_v40  ;;  %v8713_v34 = vld [vmem:[#allocation41_spill] sm:$0xff] }
 0x237   : > { %8712 = vst [vmem:[#allocation21_spill] sm:$0xff] %v7833_v7  ;;  %v2216_v29 = vadd.f32 %v2145_v11, %v7631_v30  ;;  %v7844_v10 = vadd.f32 %v7681_v5, %v2218_v4  ;;  %v3850_v25 = vrot.slane %v3793_v56, 6  ;;  %v3513_v13 = vrot.slane %v3511_v31, 1  ;;  %v2484_v4 = vpop.f32.mrf.mxu0 }
 0x238   : > { %v5452_v27 = vpop.f32.mrf.mxu1  ;;  %v3929_v45 = vpack.c.bf16 %v3910_v43, %v3909_v37  ;;  %v3380_v31 = vrot.slane %v8713_v34, 7 }
 0x239   : > { %v2219_v9 = vadd.f32 %v5452_v27, %v7638_v15  ;;  %v7848_v22 = vadd.f32 %v7697_v26, %v2216_v29  ;;  %v3851_v14 = vsel %vm1562_vm3, %v3848_v6, %v3850_v25  ;;  %v3853_v62 = vsel %vm1562_vm3, %v3850_v25, %v3852_v35  ;;  %v5486_v29 = vpop.f32.mrf.mxu0 }
 0x23a   : > { %v2148_v30 = vpop.f32.mrf.mxu1  ;;  %v3911_v5 = vmul.f32 %v3851_v14, %v8708_v55  ;;  %v3912_v20 = vmul.f32 %v3853_v62, %v8709_v1  ;;  %v3514_v19 = vsel %vm1051_vm6, %v3509_v17, %v3513_v13  ;;  %v3961_v40 = vrot.slane %v3929_v45, 1  ;;  %v8715_v45 = vld [vmem:[#allocation31_spill] sm:$0xff] }
 0x23b   : > { %v2217_v15 = vadd.f32 %v2148_v30, %v7649_v33  ;;  %v7859_v26 = vadd.f32 %v7719_v3, %v2219_v9  ;;  %5554 = vmatmul.mubr.msk.bf16.gmra.mxu1 %vm1152_vm5, %v3514_v19  ;;  %v3323_v6 = vpop.permute.xlu1 %3322  ;;  %v3515_v19 = vshrl.u32 %v7827_v18, 16 }
 0x23c   : > { %v5455_v37 = vpop.f32.mrf.mxu1  ;;  %v3930_v11 = vpack.c.bf16 %v3912_v20, %v3911_v5  ;;  %v3378_v43 = vrot.slane %v3323_v6, 7  ;;  %v3962_v55 = vsel %vm1688_vm4, %v7774_v12, %v3961_v40  ;;  %v2487_v20 = vpop.f32.mrf.mxu0 }
 0x23d   : > { %v2222_v1 = vadd.f32 %v5455_v37, %v7655_v2  ;;  %v7867_v56 = vadd.f32 %v7736_v44, %v2217_v15  ;;  %5579 = vmatprep.mubr.msk.bf16.mxu0 %vm1152_vm5, %v3962_v55  ;;  %v8714_v2 = vld [vmem:[#allocation46_spill] sm:$0xff]  ;;  %v3517_v18 = vor.u32 %v3515_v19, %v3513_v13 }
 0x23e   : > { %v2161_v33 = vpop.f32.mrf.mxu1  ;;  %v3379_v3 = vsel %vm938_vm2, %v3376_v59, %v3378_v43  ;;  %v3381_v61 = vsel %vm938_vm2, %v3378_v43, %v3380_v31  ;;  %v7874_v25 = vrot.slane %v3930_v11, 1  ;;  %v3799_v59 = vpop.permute.xlu0 %3798 }
 0x23f   : > { %v2220_v27 = vadd.f32 %v2161_v33, %v7663_v49  ;;  %v7878_v12 = vadd.f32 %v7753_v47, %v2222_v1  ;;  %v3437_v44 = vmul.f32 %v3379_v3, %v8714_v2  ;;  %v3438_v17 = vmul.f32 %v3381_v61, %v8715_v45  ;;  %v3329_v9 = vpop.permute.xlu1 %3328  ;;  %v8716_v33 = vld [vmem:[#allocation45_spill] sm:$0xff]  ;;  %v5489_v3 = vpop.f32.mrf.mxu0 }
 0x240   : > { %v5456_v14 = vpop.f32.mrf.mxu1  ;;  %v3382_v62 = vrot.slane %v3329_v9, 7  ;;  %v3964_v39 = vsel %vm1688_vm4, %v3961_v40, %v7874_v25  ;;  %v3854_v37 = vrot.slane %v3799_v59, 6 }
 0x241   : > { %v2223_v30 = vadd.f32 %v5456_v14, %v7675_v36  ;;  %v7886_v5 = vadd.f32 %v7782_v63, %v2220_v27  ;;  %v3455_v49 = vpack.c.bf16 %v3438_v17, %v3437_v44  ;;  %5580 = vmatmul.mubr.msk.bf16.gmra.mxu0 %vm1152_vm5, %v3964_v39  ;;  %v8717_v44 = vld [vmem:[#allocation48_spill] sm:$0xff]  ;;  %v2500_v59 = vpop.f32.mrf.mxu0 }
 0x242   : > { %v2164_v47 = vpop.f32.mrf.mxu1  ;;  %v3383_v40 = vsel %vm938_vm2, %v3380_v31, %v3382_v62  ;;  %v3855_v13 = vsel %vm1562_vm3, %v3852_v35, %v3854_v37 }
 0x243   : > { %v2221_v15 = vadd.f32 %v2164_v47, %v7684_v23  ;;  %v7892_v6 = vadd.f32 %v7800_v42, %v2223_v30  ;;  %v7895_v34 = vpop.permute.xlu1 %3331  ;;  %v3519_v36 = vshll.u32 %v3455_v49, 16  ;;  %v3439_v42 = vmul.f32 %v3383_v40, %v8716_v33  ;;  %v7921_v30 = vpop.permute.xlu0 %3807 }
 0x244   : > { %v5459_v63 = vpop.f32.mrf.mxu1  ;;  %v3384_v11 = vrot.slane %v7895_v34, 7 }
 0x245   : > { %v2226_v43 = vadd.f32 %v5459_v63, %v7693_v57  ;;  %v7900_v55 = vadd.f32 %v7818_v32, %v2221_v15  ;;  %v3521_v1 = vrot.slane %v3519_v36, 1  ;;  %v3913_v15 = vmul.f32 %v3855_v13, %v8714_v2 }
 0x246   : > { %v2177_v23 = vpop.f32.mrf.mxu1  ;;  %v3385_v31 = vsel %vm938_vm2, %v3382_v62, %v3384_v11  ;;  %v3523_v63 = vshrl.u32 %v3455_v49, 16 }
 0x247   : > { %v2224_v61 = vadd.f32 %v2177_v23, %v7700_v54  ;;  %v7908_v27 = vadd.f32 %v7837_v52, %v2226_v43  ;;  %v3440_v57 = vmul.f32 %v3385_v31, %v8717_v44  ;;  %v3522_v32 = vsel %vm1051_vm6, %v3517_v18, %v3521_v1 }
 0x248   : > { %v5460_v17 = vpop.f32.mrf.mxu1  ;;  %v3802_v9 = vpop.permute.xlu1 %3801  ;;  %5557 = vmatprep.mubr.msk.bf16.mxu1 %vm1152_vm5, %v3522_v32  ;;  %v3525_v31 = vor.u32 %v3523_v63, %v3521_v1  ;;  %v8720_v63 = vld [vmem:[#allocation51_spill] sm:$0xff] }
 0x249   : > { %v2227_v14 = vadd.f32 %v5460_v17, %v7714_v58  ;;  %v7917_v62 = vadd.f32 %v2484_v4, %v2224_v61  ;;  %v7919_v54 = vpack.c.bf16 %v3440_v57, %v3439_v42  ;;  %v3856_v52 = vrot.slane %v3802_v9, 6  ;;  %v5490_v42 = vpop.f32.mrf.mxu0  ;;  %v7944_v17 = vpop.permute.xlu0 %3810  ;;  %v8718_v9 = vld [vmem:[#allocation57_spill] sm:$0xff] }
 0x24a   : > { %v2180_v39 = vpop.f32.mrf.mxu1  ;;  %v3860_v58 = vrot.slane %v7921_v30, 6 }
 0x24b   : > { %v2225_v47 = vadd.f32 %v2180_v39, %v7722_v21  ;;  %v7924_v24 = vadd.f32 %v5486_v29, %v2227_v14  ;;  %v3857_v35 = vsel %vm1562_vm3, %v3854_v37, %v3856_v52  ;;  %v3527_v19 = vshll.u32 %v7919_v54, 16  ;;  %v2503_v39 = vpop.f32.mrf.mxu0 }
 0x24c   : > { %v5463_v4 = vpop.f32.mrf.mxu1  ;;  %v3914_v40 = vmul.f32 %v3857_v35, %v8715_v45  ;;  %v3805_v36 = vpop.permute.xlu1 %3804  ;;  %v3388_v14 = vrot.slane %v8718_v9, 7 }
 0x24d   : > { %v2230_v43 = vadd.f32 %v5463_v4, %v7733_v8  ;;  %v7932_v18 = vadd.f32 %v2487_v20, %v2225_v47  ;;  %v3858_v21 = vrot.slane %v3805_v36, 6  ;;  %v3529_v29 = vrot.slane %v3527_v19, 1  ;;  %v8719_v36 = vld [vmem:[#allocation50_spill] sm:$0xff] }
 0x24e   : > { %v2193_v23 = vpop.f32.mrf.mxu1  ;;  %v3931_v37 = vpack.c.bf16 %v3914_v40, %v3913_v15 }
 0x24f   : > { %v2228_v61 = vadd.f32 %v2193_v23, %v7739_v46  ;;  %v7935_v2 = vadd.f32 %v5489_v3, %v2230_v43  ;;  %v3859_v57 = vsel %vm1562_vm3, %v3856_v52, %v3858_v21  ;;  %v3861_v45 = vsel %vm1562_vm3, %v3858_v21, %v3860_v58 }
 0x250   : > { %v5464_v49 = vpop.f32.mrf.mxu1  ;;  %v3915_v8 = vmul.f32 %v3859_v57, %v8716_v33  ;;  %v3916_v20 = vmul.f32 %v3861_v45, %v8717_v44  ;;  %v3530_v32 = vsel %vm1051_vm6, %v3525_v31, %v3529_v29  ;;  %v3965_v13 = vrot.slane %v3931_v37, 1  ;;  %v7973_v37 = vpop.permute.xlu0 %3819 }
 0x251   : > { %v2231_v46 = vadd.f32 %v5464_v49, %v7756_v28  ;;  %v7947_v1 = vadd.f32 %v2500_v59, %v2228_v61  ;;  %5558 = vmatmul.mubr.msk.bf16.gmra.mxu1 %vm1152_vm5, %v3530_v32  ;;  %v3335_v3 = vpop.permute.xlu1 %3334  ;;  %v7978_v31 = vpop.f32.mrf.mxu0  ;;  %v3862_v32 = vrot.slane %v7944_v17, 6  ;;  %v5782_v17 = vld [vmem:[%s8379_s3] ss:$0 sm:$0xff] }
 0x252   : > { %v2196_v52 = vpop.f32.mrf.mxu1  ;;  %v3932_v47 = vpack.c.bf16 %v3916_v20, %v3915_v8  ;;  %v3386_v33 = vrot.slane %v3335_v3, 7  ;;  %v3966_v44 = vsel %vm1688_vm4, %v7874_v25, %v3965_v13  ;;  %v3531_v8 = vshrl.u32 %v7919_v54, 16 }
 0x253   : > { %v2229_v35 = vadd.f32 %v2196_v52, %v7759_v16  ;;  %v7954_v19 = vadd.f32 %v5490_v42, %v2231_v46  ;;  %5583 = vmatprep.mubr.msk.bf16.mxu0 %vm1152_vm5, %v3966_v44  ;;  %v7989_v3 = vpop.f32.mrf.mxu0  ;;  %v8722_v44 = vld [vmem:[#allocation49_spill] sm:$0xff] }
 0x254   : > { %v7957_v28 = vpop.f32.mrf.mxu1  ;;  %v7959_v59 = vrot.slane %v3932_v47, 1  ;;  %v3387_v15 = vsel %vm938_vm2, %v3384_v11, %v3386_v33  ;;  %v3389_v4 = vsel %vm938_vm2, %v3386_v33, %v3388_v14  ;;  %v7994_v33 = vpop.permute.xlu0 %3349 }
 0x255   : > { %v7965_v40 = vadd.f32 %v2503_v39, %v2229_v35  ;;  %v3441_v25 = vmul.f32 %v3387_v15, %v8719_v36  ;;  %v3442_v16 = vmul.f32 %v3389_v4, %v8720_v63  ;;  %v3341_v43 = vpop.permute.xlu1 %3340  ;;  %v3533_v39 = vor.u32 %v3531_v8, %v3529_v29  ;;  %v8723_v35 = vld [vmem:[#allocation52_spill] sm:$0xff]  ;;  %v8724_v4 = vld [vmem:[#allocation18_spill] sm:$0xff] }
 0x256   : > { %v7969_v21 = vpop.f32.mrf.mxu1  ;;  %v3390_v23 = vrot.slane %v3341_v43, 7  ;;  %v3968_v42 = vsel %vm1688_vm4, %v3965_v13, %v7959_v59  ;;  %v8721_v13 = vld [vmem:[#allocation2_spill] sm:$0xff] }
 0x257   : > { %v3457_v34 = vpack.c.bf16 %v3442_v16, %v3441_v25  ;;  %5584 = vmatmul.mubr.msk.bf16.gmra.mxu0 %vm1152_vm5, %v3968_v42  ;;  %v4437_v46 = vshll.u32 %v8721_v13, 16  ;;  %v8003_v25 = vadd.f32 %v5782_v17, %v8724_v4 }
 0x258   : > { %v7976_v11 = vpop.f32.mrf.mxu1  ;;  %v3391_v45 = vsel %vm938_vm2, %v3388_v14, %v3390_v23 }
 0x259   : > { %v7980_v61 = vpop.permute.xlu1 %3343  ;;  %v3535_v20 = vshll.u32 %v3457_v34, 16  ;;  %v3443_v54 = vmul.f32 %v3391_v45, %v8722_v44  ;;  %v4435_v45 = vshrl.u32 %v8721_v13, 16  ;;  %v4439_v8 = vrot.slane %v4437_v46, 1 }
 0x25a   : > { %v7982_v57 = vpop.f32.mrf.mxu1  ;;  %v8474_v49 = vrot.slane %v7980_v61, 7 }
 0x25b   : > { %v3537_v47 = vrot.slane %v3535_v20, 1  ;;  %v8015_v20 = vpop.f32.mrf.mxu0 }
 0x25c   : > { %v5499_v9 = vpop.f32.mrf.mxu1  ;;  %v3393_v52 = vsel %vm938_vm2, %v3390_v23, %v8474_v49 }
 0x25d   : > { %v2935_v14 = vadd.f32 %v5499_v9, %v7805_v50  ;;  %v3444_v15 = vmul.f32 %v3393_v52, %v8723_v35  ;;  %v3538_v29 = vsel %vm1051_vm6, %v3533_v39, %v3537_v47  ;;  %v3863_v50 = vsel %vm1562_vm3, %v3860_v58, %v3862_v32  ;;  %v8035_v49 = vpop.f32.mrf.mxu0 }
 0x25e   : > { %v8005_v16 = vpop.f32.mrf.mxu1  ;;  %v3814_v43 = vpop.permute.xlu1 %3813  ;;  %5561 = vmatprep.mubr.msk.bf16.mxu1 %vm1152_vm5, %v3538_v29  ;;  %v3396_v9 = vrot.slane %v7994_v33, 7  ;;  %v3539_v52 = vshrl.u32 %v3457_v34, 16  ;;  %v8475_v58 = vmax.f32 %v8003_v25, 0.0  ;;  %v4236_v33 = vld [vmem:[%s8382_s6] sm:$0xf]  ;;  %v8726_v29 = vld [vmem:[#allocation4_spill] sm:$0xff] }
 0x25f   : > { %v8011_v23 = vpack.c.bf16 %v3444_v15, %v3443_v54  ;;  %v3864_v42 = vrot.slane %v3814_v43, 6  ;;  %v3917_v54 = vmul.f32 %v3863_v50, %v8719_v36  ;;  %v5755_v34 = vld [vmem:[%s8384_s8] sm:$0xff]   ;;  %5656 = vmatprep.subr.msk.bf16.mxu1 %vm1189_vm1, %v4236_v33  ;;  %v4281_v36 = vsel %vm1189_vm1, %v4236_v33, 0 }
 0x260   : > { %v8018_v17 = vpop.f32.mrf.mxu1  ;;  %v3541_v4 = vor.u32 %v3539_v52, %v3537_v47  ;;  %v4450_v50 = vshll.u32 %v8726_v29, 16  ;;  %5621 = vmatprep.subr.bf16.mxu0 %v5755_v34  ;;  %5596 = vmatpush3.bf16.msra.mxu1 %v4281_v36  ;;  %v8728_v52 = vrot.slane %v7973_v37, 6 }
 0x261   : > { %8725 = vst [vmem:[#allocation35_spill] sm:$0xff] %v8018_v17  ;;  %v3543_v39 = vshll.u32 %v8011_v23, 16  ;;  %v3865_v30 = vsel %vm1562_vm3, %v3862_v32, %v3864_v42  ;;  %5622 = vmatpush3.bf16.msra.mxu0 %v5755_v34 }
 0x262   : > { %v3918_v13 = vmul.f32 %v3865_v30, %v8720_v63  ;;  %v3817_v46 = vpop.permute.xlu1 %3816  ;;  %v3447_v30 = vmul.f32 %v3396_v9, %v8475_v58  ;;  %v8039_v15 = vpop.f32.mrf.mxu1  ;;  %v8729_v58 = vld [vmem:[#allocation3_spill] sm:$0xff] }
 0x263   : > { %v3866_v43 = vrot.slane %v3817_v46, 6  ;;  %v3545_v32 = vrot.slane %v3543_v39, 1  ;;  %8727 = vst [vmem:[#allocation29_spill] sm:$0xff] %v8039_v15  ;;  %v4442_v7 = vshll.u32 %v8729_v58, 16  ;;  %v4440_v15 = vor.u32 %v4439_v8, %v4435_v45 }
 0x264   : > { %v3933_v63 = vpack.c.bf16 %v3918_v13, %v3917_v54 }
 0x265   : > { %v3867_v47 = vsel %vm1562_vm3, %v3864_v42, %v3866_v43  ;;  %v3869_v39 = vsel %vm1562_vm3, %v3866_v43, %v8728_v52  ;;  %v3546_v46 = vsel %vm1051_vm6, %v3541_v4, %v3545_v32  ;;  %v4446_v42 = vshrl.u32 %v8729_v58, 16 }
 0x266   : > { %v3919_v33 = vmul.f32 %v3867_v47, %v8722_v44  ;;  %v3920_v54 = vmul.f32 %v3869_v39, %v8723_v35  ;;  %v5525_v13 = vpop.f32.mrf.mxu0  ;;  %5562 = vmatmul.mubr.msk.bf16.gmra.mxu1 %vm1152_vm5, %v3546_v46  ;;  %v3969_v36 = vrot.slane %v3933_v63, 1  ;;  %v4452_v35 = vrot.slane %v4450_v50, 1  ;;  %v8731_v46 = vld [vmem:[#allocation36_spill] sm:$0xff] }
 0x267   : > { %v8051_v17 = vadd.f32 %v5525_v13, %v2935_v14  ;;  %v3347_v53 = vpop.permute.xlu1 %3346  ;;  %v5503_v43 = vpop.f32.mrf.mxu1  ;;  %v3460_v47 = vpack.c.bf16 %v3447_v30, %v3447_v30  ;;  %v4444_v45 = vrot.slane %v4442_v7, 1  ;;  %v8730_v14 = vrot.slane %v7980_v61, 7 }
 0x268   : > { %v3934_v52 = vpack.c.bf16 %v3920_v54, %v3919_v33  ;;  %v3394_v4 = vrot.slane %v3347_v53, 7  ;;  %v8054_v34 = vadd.f32 %v5503_v43, %v7844_v10  ;;  %v3970_v44 = vsel %vm1688_vm4, %v7959_v59, %v3969_v36 }
 0x269   : > { %v2866_v63 = vpop.f32.mrf.mxu1  ;;  %5587 = vmatprep.mubr.msk.bf16.mxu0 %vm1152_vm5, %v3970_v44  ;;  %v4445_v50 = vsel %vm1051_vm6, %v4440_v15, %v4444_v45  ;;  %v4448_v13 = vor.u32 %v4446_v42, %v4444_v45 }
 0x26a   : > { %v3971_v8 = vrot.slane %v3934_v52, 1  ;;  %v3395_v58 = vsel %vm938_vm2, %v8730_v14, %v3394_v4  ;;  %v3397_v39 = vsel %vm938_vm2, %v3394_v4, %v3396_v9  ;;  %v2937_v53 = vadd.f32 %v2866_v63, %v7848_v22 }
 0x26b   : > { %v3445_v10 = vmul.f32 %v3395_v58, %v6806_v41  ;;  %v3446_v33 = vmul.f32 %v3397_v39, %v8731_v46  ;;  %v5504_v59 = vpop.f32.mrf.mxu1  ;;  %v3559_v9 = vshll.u32 %v3460_v47, 16  ;;  %v3547_v4 = vshrl.u32 %v8011_v23, 16 }
 0x26c   : > { %v2940_v30 = vadd.f32 %v5504_v59, %v7859_v26  ;;  %v3823_v54 = vpop.permute.xlu1 %3822  ;;  %v3972_v7 = vsel %vm1688_vm4, %v3969_v36, %v3971_v8  ;;  %v4453_v44 = vsel %vm1051_vm6, %v4448_v13, %v4452_v35  ;;  %v8732_v58 = vrot.slane %v7973_v37, 6  ;;  %v8080_v59 = vpop.f32.mrf.mxu0 }
 0x26d   : > { %v3459_v61 = vpack.c.bf16 %v3446_v33, %v3445_v10  ;;  %v3870_v43 = vrot.slane %v3823_v54, 6  ;;  %v2869_v52 = vpop.f32.mrf.mxu1  ;;  %5588 = vmatmul.mubr.msk.bf16.gmra.mxu0 %vm1152_vm5, %v3972_v7  ;;  %v3549_v14 = vor.u32 %v3547_v4, %v3545_v32  ;;  %v3561_v39 = vrot.slane %v3559_v9, 1 }
 0x26e   : > { %v2938_v22 = vadd.f32 %v2869_v52, %v7867_v56  ;;  %v8733_v47 = vmax.f32 %v8003_v25, 0.0  ;;  %v8087_v25 = vpop.f32.mrf.mxu0 }
 0x26f   : > { %v3551_v63 = vshll.u32 %v3459_v61, 16  ;;  %v3555_v26 = vshrl.u32 %v3459_v61, 16  ;;  %v3871_v36 = vsel %vm1562_vm3, %v8732_v58, %v3870_v43 }
 0x270   : > { %v3826_v15 = vpop.permute.xlu1 %3825  ;;  %v3921_v32 = vmul.f32 %v3871_v36, %v6806_v41  ;;  %v8734_v41 = vld [vmem:[#allocation6_spill] sm:$0xff]  ;;  %v8093_v4 = vpop.f32.mrf.mxu0 }
 0x271   : > { %v3872_v42 = vrot.slane %v3826_v15, 6  ;;  %v3553_v45 = vrot.slane %v3551_v63, 1  ;;  %v4454_v63 = vshrl.u32 %v8726_v29, 16  ;;  %v4458_v15 = vshll.u32 %v8734_v41, 16 }
 0x273   : > { %v3873_v10 = vsel %vm1562_vm3, %v3870_v43, %v3872_v42  ;;  %v3923_v56 = vmul.f32 %v3872_v42, %v8733_v47  ;;  %v3554_v23 = vsel %vm1051_vm6, %v3549_v14, %v3553_v45  ;;  %v3557_v33 = vor.u32 %v3555_v26, %v3553_v45  ;;  %v8735_v14 = vld [vmem:[#allocation7_spill] sm:$0xff] }
 0x274   : > { %v3922_v54 = vmul.f32 %v3873_v10, %v8731_v46  ;;  %5565 = vmatprep.mubr.msk.bf16.mxu1 %vm1152_vm5, %v3554_v23  ;;  %v4462_v46 = vshrl.u32 %v8734_v41, 16  ;;  %v4466_v26 = vshll.u32 %v8735_v14, 16  ;;  %v4460_v36 = vrot.slane %v4458_v15, 1 }
 0x275   : > { %v3936_v37 = vpack.c.bf16 %v3923_v56, %v3923_v56  ;;  %v3562_v7 = vsel %vm1051_vm6, %v3557_v33, %v3561_v39 }
 0x276   : > { %v3935_v13 = vpack.c.bf16 %v3922_v54, %v3921_v32  ;;  %5566 = vmatmul.mubr.msk.bf16.gmra.mxu1 %vm1152_vm5, %v3562_v7  ;;  %v4468_v42 = vrot.slane %v4466_v26, 1  ;;  %v4464_v29 = vor.u32 %v4462_v46, %v4460_v36 }
 0x277   : > { %v3975_v61 = vrot.slane %v3936_v37, 1 }
 0x278   : > { %v3973_v43 = vrot.slane %v3935_v13, 1 }
 0x27a   : > { %v3974_v52 = vsel %vm1688_vm4, %v3971_v8, %v3973_v43  ;;  %v3976_v9 = vsel %vm1688_vm4, %v3973_v43, %v3975_v61  ;;  %v4456_v8 = vor.u32 %v4454_v63, %v4452_v35  ;;  %v4469_v35 = vsel %vm1051_vm6, %v4464_v29, %v4468_v42 }
 0x27b   : > { %5591 = vmatprep.mubr.msk.bf16.mxu0 %vm1152_vm5, %v3974_v52  ;;  %v8737_v52 = vld [vmem:[#allocation9_spill] sm:$0xff] }
 0x27c   : > { %5592 = vmatmul.mubr.msk.bf16.gmra.mxu0 %vm1152_vm5, %v3976_v9  ;;  %v4461_v56 = vsel %vm1051_vm6, %v4456_v8, %v4460_v36 }
 0x27d   : > { %5623 = vmatprep.mubr.msk.bf16.mxu0 %vm495_vm0, %v4445_v50 }
 0x27e   : > { %v5529_v58 = vpop.f32.mrf.mxu0 }
 0x27f   : > { %v8101_v45 = vadd.f32 %v5529_v58, %v8054_v34  ;;  %v5507_v39 = vpop.f32.mrf.mxu1 }
 0x280   : > { %v2943_v10 = vadd.f32 %v5507_v39, %v7878_v12  ;;  %v3192_v47 = vpop.f32.mrf.mxu0 }
 0x281   : > { %v8105_v23 = vadd.f32 %v3192_v47, %v2937_v53  ;;  %v2882_v33 = vpop.f32.mrf.mxu1 }
 0x282   : > { %v2941_v32 = vadd.f32 %v2882_v33, %v7886_v5  ;;  %v5530_v50 = vpop.f32.mrf.mxu0  ;;  %v8736_v5 = vld [vmem:[#allocation8_spill] sm:$0xff] }
 0x283   : > { %v8109_v54 = vadd.f32 %v5530_v50, %v2940_v30  ;;  %v5508_v37 = vpop.f32.mrf.mxu1  ;;  %v4478_v61 = vshrl.u32 %v8736_v5, 16  ;;  %v4470_v30 = vshrl.u32 %v8735_v14, 16  ;;  %v4474_v43 = vshll.u32 %v8736_v5, 16 }
 0x284   : > { %v2944_v34 = vadd.f32 %v5508_v37, %v7892_v6  ;;  %v3195_v7 = vpop.f32.mrf.mxu0  ;;  %5624 = vmatmul.mubr.msk.bf16.vlgmr.msra.gmra.mxu0 %vm495_vm0, %v4453_v44  ;;  %v4482_v6 = vshll.u32 %v8737_v52, 16 }
 0x285   : > { %v8113_v12 = vadd.f32 %v3195_v7, %v2938_v22  ;;  %v2885_v13 = vpop.f32.mrf.mxu1  ;;  %5627 = vmatprep.mubr.msk.bf16.mxu0 %vm495_vm0, %v4461_v56  ;;  %v4472_v9 = vor.u32 %v4470_v30, %v4468_v42  ;;  %v4476_v41 = vrot.slane %v4474_v43, 1 }
 0x286   : > { %v2942_v53 = vadd.f32 %v2885_v13, %v7900_v55  ;;  %v4484_v44 = vrot.slane %v4482_v6, 1  ;;  %v8738_v13 = vld [vmem:[#allocation10_spill] sm:$0xff] }
 0x287   : > { %v4477_v46 = vsel %vm1051_vm6, %v4472_v9, %v4476_v41  ;;  %v4480_v63 = vor.u32 %v4478_v61, %v4476_v41  ;;  %v4486_v61 = vshrl.u32 %v8737_v52, 16 }
 0x289   : > { %v4485_v14 = vsel %vm1051_vm6, %v4480_v63, %v4484_v44 }
 0x28c   : > { %5628 = vmatmul.mubr.msk.bf16.gmra.mxu0 %vm495_vm0, %v4469_v35 }
 0x28d   : > { %5631 = vmatprep.mubr.msk.bf16.mxu0 %vm495_vm0, %v4477_v46 }
 0x294   : > { %5632 = vmatmul.mubr.msk.bf16.gmra.mxu0 %vm495_vm0, %v4485_v14 }
 0x296   : > { %v5533_v22 = vpop.f32.mrf.mxu0 }
 0x297   : > { %v8123_v15 = vadd.f32 %v5533_v22, %v2943_v10  ;;  %v5511_v55 = vpop.f32.mrf.mxu1 }
 0x298   : > { %v2947_v26 = vadd.f32 %v5511_v55, %v7908_v27  ;;  %v3208_v58 = vpop.f32.mrf.mxu0 }
 0x299   : > { %v8128_v8 = vadd.f32 %v3208_v58, %v2941_v32  ;;  %v2898_v36 = vpop.f32.mrf.mxu1 }
 0x29a   : > { %v2945_v42 = vadd.f32 %v2898_v36, %v7917_v62  ;;  %v5534_v39 = vpop.f32.mrf.mxu0  ;;  %v4494_v62 = vshrl.u32 %v8738_v13, 16 }
 0x29b   : > { %v8132_v47 = vadd.f32 %v5534_v39, %v2944_v34  ;;  %v5512_v10 = vpop.f32.mrf.mxu1  ;;  %v8741_v39 = vld [vmem:[#allocation13_spill] sm:$0xff] }
 0x29c   : > { %v2948_v56 = vadd.f32 %v5512_v10, %v7924_v24  ;;  %v3211_v29 = vpop.f32.mrf.mxu0  ;;  %v4490_v24 = vshll.u32 %v8738_v13, 16  ;;  %v4514_v10 = vshll.u32 %v8741_v39, 16 }
 0x29d   : > { %v8135_v33 = vadd.f32 %v3211_v29, %v2942_v53  ;;  %v2901_v27 = vpop.f32.mrf.mxu1  ;;  %v8739_v53 = vld [vmem:[#allocation11_spill] sm:$0xff] }
 0x29e   : > { %v2946_v50 = vadd.f32 %v2901_v27, %v7932_v18  ;;  %v4498_v30 = vshll.u32 %v8739_v53, 16  ;;  %v4492_v41 = vrot.slane %v4490_v24, 1  ;;  %v4502_v36 = vshrl.u32 %v8739_v53, 16  ;;  %v5783_v27 = vld [vmem:[%s5908_s12 + $0x64] sm:$0xf] }
 0x2a0   : > { %v4500_v22 = vrot.slane %v4498_v30, 1  ;;  %v4496_v52 = vor.u32 %v4494_v62, %v4492_v41 }
 0x2a2   : > { %v5515_v35 = vpop.f32.mrf.mxu1  ;;  %v4501_v58 = vsel %vm1051_vm6, %v4496_v52, %v4500_v22 }
 0x2a3   : > { %v2951_v32 = vadd.f32 %v5515_v35, %v7935_v2  ;;  %v4488_v2 = vor.u32 %v4486_v61, %v4484_v44  ;;  %v5109_v35 = vcombine.low %v5783_v27, %v5783_v27 }
 0x2a4   : > { %v2914_v37 = vpop.f32.mrf.mxu1 }
 0x2a5   : > { %v2949_v7 = vadd.f32 %v2914_v37, %v7947_v1  ;;  %v4504_v37 = vor.u32 %v4502_v36, %v4500_v22  ;;  %v4530_v53 = vshll.u32 %v5109_v35, 16  ;;  %v2929_v36 = vadd.f32 %v7969_v21, %v7778_v38  ;;  %v8196_v38 = vld [vmem:[%s8381_s5] ss:$0 sm:$0xff] }
 0x2a6   : > { %v5516_v5 = vpop.f32.mrf.mxu1 }
 0x2a7   : > { %v2952_v34 = vadd.f32 %v5516_v5, %v7954_v19  ;;  %v4493_v19 = vsel %vm1051_vm6, %v4488_v2, %v4492_v41  ;;  %v4516_v5 = vrot.slane %v4514_v10, 1  ;;  %v2932_v10 = vadd.f32 %v7976_v11, %v7787_v51 }
 0x2a8   : > { %v2917_v43 = vpop.f32.mrf.mxu1  ;;  %v5537_v6 = vpop.f32.mrf.mxu0  ;;  %5635 = vmatprep.mubr.msk.bf16.mxu0 %vm495_vm0, %v4493_v19 }
 0x2a9   : > { %v2950_v18 = vadd.f32 %v2917_v43, %v7965_v40  ;;  %v8146_v9 = vadd.f32 %v5537_v6, %v2947_v26  ;;  %5636 = vmatmul.mubr.msk.bf16.gmra.mxu0 %vm495_vm0, %v4501_v58  ;;  %v8740_v26 = vld [vmem:[#allocation12_spill] sm:$0xff]  ;;  %v4532_v58 = vrot.slane %v4530_v53, 1 }
 0x2aa   : > { %v3224_v1 = vpop.f32.mrf.mxu0  ;;  %v4510_v14 = vshrl.u32 %v8740_v26, 16 }
 0x2ab   : > { %v8148_v46 = vadd.f32 %v3224_v1, %v2945_v42  ;;  %v4506_v42 = vshll.u32 %v8740_v26, 16 }
 0x2ac   : > { %v5538_v63 = vpop.f32.mrf.mxu0 }
 0x2ad   : > { %v8152_v55 = vadd.f32 %v5538_v63, %v2948_v56  ;;  %v4508_v13 = vrot.slane %v4506_v42, 1 }
 0x2ae   : > { %v3227_v40 = vpop.f32.mrf.mxu0 }
 0x2af   : > { %v8156_v44 = vadd.f32 %v3227_v40, %v2946_v50  ;;  %v4509_v50 = vsel %vm1051_vm6, %v4504_v37, %v4508_v13  ;;  %v4512_v24 = vor.u32 %v4510_v14, %v4508_v13  ;;  %v2930_v37 = vadd.f32 %v7982_v57, %v7795_v0 }
 0x2b0   : > { %5639 = vmatprep.mubr.msk.bf16.mxu0 %vm495_vm0, %v4509_v50 }
 0x2b1   : > { %v4517_v6 = vsel %vm1051_vm6, %v4512_v24, %v4516_v5  ;;  %v3256_v51 = vadd.f32 %v8035_v49, %v2930_v37 }
 0x2b2   : > { %5640 = vmatmul.mubr.msk.bf16.gmra.mxu0 %vm495_vm0, %v4517_v6 }
 0x2bd   : > { %v5547_v19 = vpop.f32.mrf.mxu1 }
 0x2bf   : > { %v3636_v26 = vpop.f32.mrf.mxu1 }
 0x2c2   : > { %v5541_v29 = vpop.f32.mrf.mxu0 }
 0x2c3   : > { %v8163_v56 = vadd.f32 %v5541_v29, %v2951_v32  ;;  %v8742_v32 = vld [vmem:[#allocation14_spill] sm:$0xff]  ;;  %v3255_v29 = vadd.f32 %v7989_v3, %v2929_v36  ;;  %v8745_v36 = vld [vmem:[#allocation21_spill] sm:$0xff] }
 0x2c4   : > { %v3240_v62 = vpop.f32.mrf.mxu0  ;;  %v4526_v41 = vshrl.u32 %v8742_v32, 16  ;;  %v4522_v22 = vshll.u32 %v8742_v32, 16 }
 0x2c5   : > { %v8165_v61 = vadd.f32 %v3240_v62, %v2949_v7  ;;  %v4518_v7 = vshrl.u32 %v8741_v39, 16  ;;  %v5548_v39 = vpop.f32.mrf.mxu1 }
 0x2c6   : > { %v5542_v30 = vpop.f32.mrf.mxu0  ;;  %v4524_v63 = vrot.slane %v4522_v22, 1 }
 0x2c7   : > { %v8169_v43 = vadd.f32 %v5542_v30, %v2952_v34  ;;  %v4520_v52 = vor.u32 %v4518_v7, %v4516_v5  ;;  %v3639_v62 = vpop.f32.mrf.mxu1 }
 0x2c8   : > { %v3243_v2 = vpop.f32.mrf.mxu0  ;;  %v4528_v40 = vor.u32 %v4526_v41, %v4524_v63  ;;  %v3732_v5 = vadd.f32 %v3639_v62, %v3256_v51 }
 0x2c9   : > { %v8174_v1 = vadd.f32 %v3243_v2, %v2950_v18  ;;  %v4525_v34 = vsel %vm1051_vm6, %v4520_v52, %v4524_v63  ;;  %v2931_v18 = vadd.f32 %v7957_v28, %v7766_v48  ;;  %v3258_v48 = vadd.f32 %v8015_v20, %v2932_v10 }
 0x2ca   : > { %5643 = vmatprep.mubr.msk.bf16.mxu0 %vm495_vm0, %v4525_v34  ;;  %v4533_v14 = vsel %vm1051_vm6, %v4528_v40, %v4532_v58  ;;  %v3731_v28 = vadd.f32 %v3636_v26, %v3255_v29  ;;  %v2933_v52 = vadd.f32 %v8005_v16, %v7814_v60  ;;  %v8743_v58 = vld [vmem:[#allocation58_spill] sm:$0xff]  ;;  %v8744_v34 = vld [vmem:[#allocation35_spill] sm:$0xff] }
 0x2cb   : > { %5644 = vmatmul.mubr.msk.bf16.gmra.mxu0 %vm495_vm0, %v4533_v14  ;;  %v3257_v42 = vadd.f32 %v7978_v31, %v2931_v18  ;;  %v3734_v11 = vadd.f32 %v5548_v39, %v3258_v48  ;;  %v2936_v40 = vadd.f32 %v8744_v34, %v8743_v58 }
 0x2cc   : > { %v3259_v26 = vadd.f32 %v8080_v59, %v2933_v52 }
 0x2cd   : > { %v3733_v27 = vadd.f32 %v5547_v19, %v3257_v42  ;;  %v8746_v42 = vld [vmem:[#allocation29_spill] sm:$0xff]  ;;  %v3262_v10 = vadd.f32 %v8087_v25, %v2936_v40 }
 0x2ce   : > { %v2934_v39 = vadd.f32 %v8746_v42, %v8745_v36 }
 0x2d0   : > { %v3260_v60 = vadd.f32 %v8093_v4, %v2934_v39 }
 0x2d5   : > { %v5573_v35 = vpop.f32.mrf.mxu0 }
 0x2d6   : > { %v4147_v13 = vadd.f32 %v5573_v35, %v3733_v27 }
 0x2d7   : > { %v4050_v21 = vpop.f32.mrf.mxu0 }
 0x2d8   : > { %v4145_v31 = vadd.f32 %v4050_v21, %v3731_v28  ;;  %v4178_v50 = vadd.f32 %v8196_v38, %v4147_v13 }
 0x2d9   : > { %v5574_v3 = vpop.f32.mrf.mxu0 }
 0x2da   : > { %v4148_v0 = vadd.f32 %v5574_v3, %v3734_v11  ;;  %v4176_v20 = vadd.f32 %v8196_v38, %v4145_v31  ;;  %v4202_v53 = vmax.f32 %v4178_v50, 0.0 }
 0x2db   : > { %v4053_v57 = vpop.f32.mrf.mxu0 }
 0x2dc   : > { %v4179_v24 = vadd.f32 %v8196_v38, %v4148_v0  ;;  %v4146_v30 = vadd.f32 %v4053_v57, %v3732_v5  ;;  %v4200_v32 = vmax.f32 %v4176_v20, 0.0 }
 0x2de   : > { %v4203_v6 = vmax.f32 %v4179_v24, 0.0  ;;  %v4177_v2 = vadd.f32 %v8196_v38, %v4146_v30 }
 0x2e0   : > { %v4225_v41 = vpack.c.bf16 %v4203_v6, %v4202_v53  ;;  %v4201_v49 = vmax.f32 %v4177_v2, 0.0 }
 0x2e2   : > { %v4224_v7 = vpack.c.bf16 %v4201_v49, %v4200_v32 }
 0x2e4   : > { %v5551_v22 = vpop.f32.mrf.mxu1  ;;  %5597 = vmatprep.mubr.msk.bf16.mxu1 %vm1152_vm5, %v4224_v7 }
 0x2e5   : > { %5598 = vmatmul.mubr.msk.bf16.vlgmr.msra.gmra.mxu1 %vm1152_vm5, %v4225_v41  ;;  %v3737_v14 = vadd.f32 %v5551_v22, %v8051_v17 }
 0x2e6   : > { %v3652_v19 = vpop.f32.mrf.mxu1 }
 0x2e7   : > { %v3735_v29 = vadd.f32 %v3652_v19, %v3259_v26 }
 0x2e8   : > { %v5552_v63 = vpop.f32.mrf.mxu1 }
 0x2e9   : > { %v3738_v16 = vadd.f32 %v5552_v63, %v3262_v10 }
 0x2ea   : > { %v3655_v35 = vpop.f32.mrf.mxu1 }
 0x2eb   : > { %v5577_v18 = vpop.f32.mrf.mxu0  ;;  %v3736_v13 = vadd.f32 %v3655_v35, %v3260_v60 }
 0x2ec   : > { %v4151_v27 = vadd.f32 %v5577_v18, %v3737_v14 }
 0x2ed   : > { %v4066_v37 = vpop.f32.mrf.mxu0 }
 0x2ee   : > { %v4149_v48 = vadd.f32 %v4066_v37, %v3735_v29  ;;  %v4182_v59 = vadd.f32 %v8196_v38, %v4151_v27 }
 0x2ef   : > { %v5578_v28 = vpop.f32.mrf.mxu0 }
 0x2f0   : > { %v4152_v62 = vadd.f32 %v5578_v28, %v3738_v16  ;;  %v4180_v21 = vadd.f32 %v8196_v38, %v4149_v48  ;;  %v4206_v25 = vmax.f32 %v4182_v59, 0.0 }
 0x2f1   : > { %v4069_v17 = vpop.f32.mrf.mxu0 }
 0x2f2   : > { %v4183_v51 = vadd.f32 %v8196_v38, %v4152_v62  ;;  %v4150_v11 = vadd.f32 %v4069_v17, %v3736_v13  ;;  %v4204_v5 = vmax.f32 %v4180_v21, 0.0 }
 0x2f4   : > { %v4207_v31 = vmax.f32 %v4183_v51, 0.0  ;;  %v4181_v3 = vadd.f32 %v8196_v38, %v4150_v11 }
 0x2f6   : > { %v4227_v50 = vpack.c.bf16 %v4207_v31, %v4206_v25  ;;  %v4205_v4 = vmax.f32 %v4181_v3, 0.0 }
 0x2f8   : > { %v4226_v0 = vpack.c.bf16 %v4205_v4, %v4204_v5 }
 0x2fa   : > { %5601 = vmatprep.mubr.msk.bf16.mxu1 %vm1152_vm5, %v4226_v0 }
 0x2fb   : > { %v5555_v57 = vpop.f32.mrf.mxu1  ;;  %5602 = vmatmul.mubr.msk.bf16.gmra.mxu1 %vm1152_vm5, %v4227_v50 }
 0x2fc   : > { %v3741_v30 = vadd.f32 %v5555_v57, %v8101_v45 }
 0x2fd   : > { %v3668_v20 = vpop.f32.mrf.mxu1 }
 0x2fe   : > { %v3739_v6 = vadd.f32 %v3668_v20, %v8105_v23 }
 0x2ff   : > { %v5556_v24 = vpop.f32.mrf.mxu1 }
 0x300   : > { %v3742_v49 = vadd.f32 %v5556_v24, %v8109_v54 }
 0x301   : > { %v5581_v53 = vpop.f32.mrf.mxu0  ;;  %v3671_v32 = vpop.f32.mrf.mxu1 }
 0x302   : > { %v4155_v2 = vadd.f32 %v5581_v53, %v3741_v30  ;;  %v3740_v19 = vadd.f32 %v3671_v32, %v8113_v12 }
 0x303   : > { %v4082_v41 = vpop.f32.mrf.mxu0 }
 0x304   : > { %v4153_v7 = vadd.f32 %v4082_v41, %v3739_v6  ;;  %v4186_v52 = vadd.f32 %v8196_v38, %v4155_v2 }
 0x305   : > { %v5582_v22 = vpop.f32.mrf.mxu0 }
 0x306   : > { %v4156_v63 = vadd.f32 %v5582_v22, %v3742_v49  ;;  %v4184_v34 = vadd.f32 %v8196_v38, %v4153_v7  ;;  %v4210_v26 = vmax.f32 %v4186_v52, 0.0 }
 0x307   : > { %v4085_v58 = vpop.f32.mrf.mxu0 }
 0x308   : > { %v4187_v45 = vadd.f32 %v8196_v38, %v4156_v63  ;;  %v4154_v40 = vadd.f32 %v4085_v58, %v3740_v19  ;;  %v4208_v18 = vmax.f32 %v4184_v34, 0.0 }
 0x30a   : > { %v4211_v23 = vmax.f32 %v4187_v45, 0.0  ;;  %v4185_v14 = vadd.f32 %v8196_v38, %v4154_v40 }
 0x30c   : > { %v4229_v36 = vpack.c.bf16 %v4211_v23, %v4210_v26  ;;  %v4209_v54 = vmax.f32 %v4185_v14, 0.0 }
 0x30e   : > { %v4228_v42 = vpack.c.bf16 %v4209_v54, %v4208_v18 }
 0x310   : > { %5605 = vmatprep.mubr.msk.bf16.mxu1 %vm1152_vm5, %v4228_v42 }
 0x311   : > { %v5559_v12 = vpop.f32.mrf.mxu1  ;;  %5606 = vmatmul.mubr.msk.bf16.gmra.mxu1 %vm1152_vm5, %v4229_v36 }
 0x312   : > { %v3745_v29 = vadd.f32 %v5559_v12, %v8123_v15 }
 0x313   : > { %v3684_v39 = vpop.f32.mrf.mxu1 }
 0x314   : > { %v3743_v35 = vadd.f32 %v3684_v39, %v8128_v8 }
 0x315   : > { %v5560_v10 = vpop.f32.mrf.mxu1 }
 0x316   : > { %v3746_v48 = vadd.f32 %v5560_v10, %v8132_v47 }
 0x317   : > { %v5585_v27 = vpop.f32.mrf.mxu0  ;;  %v3687_v60 = vpop.f32.mrf.mxu1 }
 0x318   : > { %v4159_v37 = vadd.f32 %v5585_v27, %v3745_v29  ;;  %v3744_v59 = vadd.f32 %v3687_v60, %v8135_v33 }
 0x319   : > { %v4098_v16 = vpop.f32.mrf.mxu0 }
 0x31a   : > { %v4157_v28 = vadd.f32 %v4098_v16, %v3743_v35  ;;  %v4190_v62 = vadd.f32 %v8196_v38, %v4159_v37 }
 0x31b   : > { %v5586_v13 = vpop.f32.mrf.mxu0 }
 0x31c   : > { %v4160_v17 = vadd.f32 %v5586_v13, %v3746_v48  ;;  %v4188_v51 = vadd.f32 %v8196_v38, %v4157_v28  ;;  %v4214_v25 = vmax.f32 %v4190_v62, 0.0 }
 0x31d   : > { %v4101_v21 = vpop.f32.mrf.mxu0 }
 0x31e   : > { %v4191_v15 = vadd.f32 %v8196_v38, %v4160_v17  ;;  %v4158_v11 = vadd.f32 %v4101_v21, %v3744_v59  ;;  %v4212_v3 = vmax.f32 %v4188_v51, 0.0 }
 0x320   : > { %v4215_v8 = vmax.f32 %v4191_v15, 0.0  ;;  %v4189_v31 = vadd.f32 %v8196_v38, %v4158_v11  ;;  %v8264_v15 = vld [vmem:[%s8385_s9] ss:$0 sm:$0xff] }
 0x322   : > { %v4231_v5 = vpack.c.bf16 %v4215_v8, %v4214_v25  ;;  %v4213_v47 = vmax.f32 %v4189_v31, 0.0 }
 0x324   : > { %v4230_v50 = vpack.c.bf16 %v4213_v47, %v4212_v3 }
 0x326   : > { %v5563_v4 = vpop.f32.mrf.mxu1  ;;  %5609 = vmatprep.mubr.msk.bf16.mxu1 %vm1152_vm5, %v4230_v50 }
 0x327   : > { %5610 = vmatmul.mubr.msk.bf16.gmra.mxu1 %vm1152_vm5, %v4231_v5  ;;  %v3749_v57 = vadd.f32 %v5563_v4, %v8146_v9 }
 0x328   : > { %v3700_v33 = vpop.f32.mrf.mxu1 }
 0x329   : > { %v3747_v24 = vadd.f32 %v3700_v33, %v8148_v46 }
 0x32a   : > { %v5564_v0 = vpop.f32.mrf.mxu1 }
 0x32b   : > { %v3750_v2 = vadd.f32 %v5564_v0, %v8152_v55 }
 0x32c   : > { %v3703_v53 = vpop.f32.mrf.mxu1 }
 0x32d   : > { %v5589_v20 = vpop.f32.mrf.mxu0  ;;  %v3748_v49 = vadd.f32 %v3703_v53, %v8156_v44 }
 0x32e   : > { %v4163_v30 = vadd.f32 %v5589_v20, %v3749_v57 }
 0x32f   : > { %v4114_v6 = vpop.f32.mrf.mxu0 }
 0x330   : > { %v4161_v32 = vadd.f32 %v4114_v6, %v3747_v24  ;;  %v4194_v7 = vadd.f32 %v8196_v38, %v4163_v30 }
 0x331   : > { %v5590_v41 = vpop.f32.mrf.mxu0 }
 0x332   : > { %v4164_v22 = vadd.f32 %v5590_v41, %v3750_v2  ;;  %v4192_v52 = vadd.f32 %v8196_v38, %v4161_v32  ;;  %v4218_v58 = vmax.f32 %v4194_v7, 0.0 }
 0x333   : > { %v4117_v19 = vpop.f32.mrf.mxu0 }
 0x334   : > { %v4195_v9 = vadd.f32 %v8196_v38, %v4164_v22  ;;  %v4162_v63 = vadd.f32 %v4117_v19, %v3748_v49  ;;  %v4216_v40 = vmax.f32 %v4192_v52, 0.0 }
 0x336   : > { %v4219_v46 = vmax.f32 %v4195_v9, 0.0  ;;  %v4193_v34 = vadd.f32 %v8196_v38, %v4162_v63  ;;  %v5567_v45 = vpop.f32.mrf.mxu1 }
 0x337   : > { %v3753_v18 = vadd.f32 %v5567_v45, %v8163_v56 }
 0x338   : > { %v4233_v55 = vpack.c.bf16 %v4219_v46, %v4218_v58  ;;  %v4217_v26 = vmax.f32 %v4193_v34, 0.0  ;;  %v3716_v23 = vpop.f32.mrf.mxu1 }
 0x339   : > { %v3751_v54 = vadd.f32 %v3716_v23, %v8165_v61 }
 0x33a   : > { %v4232_v14 = vpack.c.bf16 %v4217_v26, %v4216_v40  ;;  %v5568_v44 = vpop.f32.mrf.mxu1 }
 0x33b   : > { %v3754_v10 = vadd.f32 %v5568_v44, %v8169_v43 }
 0x33c   : > { %v5593_v36 = vpop.f32.mrf.mxu0  ;;  %5613 = vmatprep.mubr.msk.bf16.mxu1 %vm1152_vm5, %v4232_v14  ;;  %v3719_v12 = vpop.f32.mrf.mxu1 }
 0x33d   : > { %v4167_v42 = vadd.f32 %v5593_v36, %v3753_v18  ;;  %5614 = vmatmul.mubr.msk.bf16.gmra.mxu1 %vm1152_vm5, %v4233_v55  ;;  %v3752_v35 = vadd.f32 %v3719_v12, %v8174_v1 }
 0x33e   : > { %v4130_v39 = vpop.f32.mrf.mxu0 }
 0x33f   : > { %v4165_v29 = vadd.f32 %v4130_v39, %v3751_v54  ;;  %v4198_v37 = vadd.f32 %v8196_v38, %v4167_v42 }
 0x340   : > { %v5594_v27 = vpop.f32.mrf.mxu0 }
 0x341   : > { %v4168_v60 = vadd.f32 %v5594_v27, %v3754_v10  ;;  %v4196_v16 = vadd.f32 %v8196_v38, %v4165_v29  ;;  %v4222_v28 = vmax.f32 %v4198_v37, 0.0 }
 0x342   : > { %v4133_v56 = vpop.f32.mrf.mxu0 }
 0x343   : > { %v4199_v48 = vadd.f32 %v8196_v38, %v4168_v60  ;;  %v4166_v61 = vadd.f32 %v4133_v56, %v3752_v35  ;;  %v4220_v62 = vmax.f32 %v4196_v16, 0.0 }
 0x344   : > { %v5625_v1 = vpop.f32.mrf.mxu0 }
 0x345   : > { %v4223_v13 = vmax.f32 %v4199_v48, 0.0  ;;  %v4197_v59 = vadd.f32 %v8196_v38, %v4166_v61  ;;  %v8269_v38 = vld [vmem:[%s8383_s7] ss:$0 sm:$0xff]  ;;  %v4619_v25 = vadd.f32 %v5625_v1, %v8264_v15 }
 0x346   : > { %v4610_v51 = vpop.f32.mrf.mxu0 }
 0x347   : > { %v4235_v43 = vpack.c.bf16 %v4223_v13, %v4222_v28  ;;  %v4221_v17 = vmax.f32 %v4197_v59, 0.0  ;;  %v4611_v3 = vadd.f32 %v8264_v15, %v4610_v51 }
 0x348   : > { %v5626_v11 = vpop.f32.mrf.mxu0 }
 0x349   : > { %v4234_v21 = vpack.c.bf16 %v4221_v17, %v4220_v62  ;;  %v4622_v33 = vadd.f32 %v5626_v11, %v8264_v15 }
 0x34a   : > { %v4613_v47 = vpop.f32.mrf.mxu0 }
 0x34b   : > { %5617 = vmatprep.mubr.msk.bf16.mxu1 %vm1152_vm5, %v4234_v21  ;;  %v4614_v30 = vadd.f32 %v8264_v15, %v4613_v47 }
 0x34c   : > { %5618 = vmatmul.mubr.msk.bf16.gmra.mxu1 %vm1152_vm5, %v4235_v43  ;;  %v5629_v9 = vpop.f32.mrf.mxu0 }
 0x34d   : > { %v4635_v34 = vadd.f32 %v5629_v9, %v8264_v15 }
 0x34e   : > { %v4626_v58 = vpop.f32.mrf.mxu0 }
 0x34f   : > { %v4627_v55 = vadd.f32 %v8264_v15, %v4626_v58 }
 0x350   : > { %v5630_v46 = vpop.f32.mrf.mxu0 }
 0x351   : > { %v4638_v18 = vadd.f32 %v5630_v46, %v8264_v15 }
 0x352   : > { %v4629_v23 = vpop.f32.mrf.mxu0 }
 0x353   : > { %v4630_v39 = vadd.f32 %v8264_v15, %v4629_v23 }
 0x354   : > { %v5633_v28 = vpop.f32.mrf.mxu0 }
 0x355   : > { %v4651_v43 = vadd.f32 %v5633_v28, %v8264_v15 }
 0x356   : > { %v4642_v59 = vpop.f32.mrf.mxu0 }
 0x357   : > { %v4643_v1 = vadd.f32 %v8264_v15, %v4642_v59 }
 0x358   : > { %v5634_v62 = vpop.f32.mrf.mxu0 }
 0x35a   : > { %v4645_v11 = vpop.f32.mrf.mxu0 }
 0x3a5   : > { %v5599_v8 = vpop.f32.mrf.mxu1 }
 0x3a6   : > { %v4326_v31 = vadd.f32 %v5599_v8, %v8269_v38 }
 0x3a7   : > { %v4317_v5 = vpop.f32.mrf.mxu1 }
 0x3a8   : > { %v4707_v50 = vadd.f32 %v4619_v25, %v4326_v31  ;;  %v4318_v4 = vadd.f32 %v8269_v38, %v4317_v5  ;;  %v4654_v31 = vadd.f32 %v5634_v62, %v8264_v15 }
 0x3a9   : > { %v5600_v0 = vpop.f32.mrf.mxu1 }
 0x3aa   : > { %v4731_v57 = vmax.f32 %v4707_v50, 0.0  ;;  %v4705_v20 = vadd.f32 %v4611_v3, %v4318_v4  ;;  %v4329_v24 = vadd.f32 %v5600_v0, %v8269_v38  ;;  %v4646_v4 = vadd.f32 %v8264_v15, %v4645_v11 }
 0x3ab   : > { %v4320_v53 = vpop.f32.mrf.mxu1 }
 0x3ac   : > { %v5151_v6 = vpack.c.bf16 %v4731_v57, %v4731_v57  ;;  %v4729_v2 = vmax.f32 %v4705_v20, 0.0  ;;  %v4708_v32 = vadd.f32 %v4622_v33, %v4329_v24  ;;  %v4321_v41 = vadd.f32 %v8269_v38, %v4320_v53 }
 0x3ae   : > { %4852 = vst.msk [vmem:[%s8282_s18 + $0x8] sm:$0xf] %vm4849_vm7, %v5151_v6  ;;  %v5149_v49 = vpack.c.bf16 %v4729_v2, %v4729_v2  ;;  %v4732_v7 = vmax.f32 %v4708_v32, 0.0  ;;  %v4706_v22 = vadd.f32 %v4614_v30, %v4321_v41  ;;  %v5637_v41 = vpop.f32.mrf.mxu0 }
 0x3b0   : > { %4850 = vst.msk [vmem:[%s8282_s18] sm:$0xf] %vm4849_vm7, %v5149_v49  ;;  %v5152_v19 = vpack.c.bf16 %v4732_v7, %v4732_v7  ;;  %v4730_v52 = vmax.f32 %v4706_v22, 0.0  ;;  %v4658_v7 = vpop.f32.mrf.mxu0 }
 0x3b2   : > { %4853 = vst.msk [vmem:[%s8282_s18 + $0xc] sm:$0xf] %vm4849_vm7, %v5152_v19  ;;  %v5150_v63 = vpack.c.bf16 %v4730_v52, %v4730_v52  ;;  %v5638_v22 = vpop.f32.mrf.mxu0  ;;  %v4667_v19 = vadd.f32 %v5637_v41, %v8264_v15 }
 0x3b4   : > { %4851 = vst.msk [vmem:[%s8282_s18 + $0x4] sm:$0xf] %vm4849_vm7, %v5150_v63  ;;  %v4659_v63 = vadd.f32 %v8264_v15, %v4658_v7  ;;  %v4661_v46 = vpop.f32.mrf.mxu0 }
 0x3bb   : > { %v5603_v45 = vpop.f32.mrf.mxu1 }
 0x3bc   : > { %v4342_v40 = vadd.f32 %v5603_v45, %v8269_v38 }
 0x3bd   : > { %v4333_v26 = vpop.f32.mrf.mxu1 }
 0x3be   : > { %v4711_v14 = vadd.f32 %v4635_v34, %v4342_v40  ;;  %v4334_v44 = vadd.f32 %v8269_v38, %v4333_v26  ;;  %v4670_v40 = vadd.f32 %v5638_v22, %v8264_v15 }
 0x3bf   : > { %v5604_v36 = vpop.f32.mrf.mxu1 }
 0x3c0   : > { %v4735_v54 = vmax.f32 %v4711_v14, 0.0  ;;  %v4709_v42 = vadd.f32 %v4627_v55, %v4334_v44  ;;  %v4345_v12 = vadd.f32 %v5604_v36, %v8269_v38  ;;  %v4662_v44 = vadd.f32 %v8264_v15, %v4661_v46 }
 0x3c1   : > { %v4336_v10 = vpop.f32.mrf.mxu1 }
 0x3c2   : > { %v5155_v29 = vpack.c.bf16 %v4735_v54, %v4735_v54  ;;  %v4733_v27 = vmax.f32 %v4709_v42, 0.0  ;;  %v4712_v35 = vadd.f32 %v4638_v18, %v4345_v12  ;;  %v4337_v37 = vadd.f32 %v8269_v38, %v4336_v10 }
 0x3c4   : > { %4856 = vst.msk [vmem:[%s8282_s18 + $0x18] sm:$0xf] %vm4849_vm7, %v5155_v29  ;;  %v5153_v60 = vpack.c.bf16 %v4733_v27, %v4733_v27  ;;  %v4736_v56 = vmax.f32 %v4712_v35, 0.0  ;;  %v4710_v16 = vadd.f32 %v4630_v39, %v4337_v37  ;;  %v5641_v37 = vpop.f32.mrf.mxu0 }
 0x3c6   : > { %4854 = vst.msk [vmem:[%s8282_s18 + $0x10] sm:$0xf] %vm4849_vm7, %v5153_v60  ;;  %v5156_v48 = vpack.c.bf16 %v4736_v56, %v4736_v56  ;;  %v4734_v61 = vmax.f32 %v4710_v16, 0.0  ;;  %v4674_v56 = vpop.f32.mrf.mxu0 }
 0x3c8   : > { %4857 = vst.msk [vmem:[%s8282_s18 + $0x1c] sm:$0xf] %vm4849_vm7, %v5156_v48  ;;  %v5154_v13 = vpack.c.bf16 %v4734_v61, %v4734_v61  ;;  %v5642_v16 = vpop.f32.mrf.mxu0  ;;  %v4683_v48 = vadd.f32 %v5641_v37, %v8264_v15 }
 0x3ca   : > { %4855 = vst.msk [vmem:[%s8282_s18 + $0x14] sm:$0xf] %vm4849_vm7, %v5154_v13  ;;  %v4675_v13 = vadd.f32 %v8264_v15, %v4674_v56  ;;  %v4677_v62 = vpop.f32.mrf.mxu0 }
 0x3d1   : > { %v5607_v17 = vpop.f32.mrf.mxu1 }
 0x3d2   : > { %v4358_v21 = vadd.f32 %v5607_v17, %v8269_v38 }
 0x3d3   : > { %v4349_v51 = vpop.f32.mrf.mxu1 }
 0x3d4   : > { %v4715_v25 = vadd.f32 %v4651_v43, %v4358_v21  ;;  %v4350_v8 = vadd.f32 %v8269_v38, %v4349_v51  ;;  %v4686_v21 = vadd.f32 %v5642_v16, %v8264_v15 }
 0x3d5   : > { %v5608_v3 = vpop.f32.mrf.mxu1 }
 0x3d6   : > { %v4739_v5 = vmax.f32 %v4715_v25, 0.0  ;;  %v4713_v47 = vadd.f32 %v4643_v1, %v4350_v8  ;;  %v4361_v50 = vadd.f32 %v5608_v3, %v8269_v38  ;;  %v4678_v8 = vadd.f32 %v8264_v15, %v4677_v62  ;;  %v5645_v3 = vpop.f32.mrf.mxu0 }
 0x3d7   : > { %v4352_v33 = vpop.f32.mrf.mxu1 }
 0x3d8   : > { %v5159_v0 = vpack.c.bf16 %v4739_v5, %v4739_v5  ;;  %v4737_v57 = vmax.f32 %v4713_v47, 0.0  ;;  %v4716_v20 = vadd.f32 %v4654_v31, %v4361_v50  ;;  %v4353_v24 = vadd.f32 %v8269_v38, %v4352_v33 }
 0x3da   : > { %4860 = vst.msk [vmem:[%s8282_s18 + $0x28] sm:$0xf] %vm4849_vm7, %v5159_v0  ;;  %v5157_v30 = vpack.c.bf16 %v4737_v57, %v4737_v57  ;;  %v4740_v53 = vmax.f32 %v4716_v20, 0.0  ;;  %v4714_v6 = vadd.f32 %v4646_v4, %v4353_v24  ;;  %v4690_v20 = vpop.f32.mrf.mxu0 }
 0x3db   : > { %v4691_v7 = vadd.f32 %v8264_v15, %v4690_v20 }
 0x3dc   : > { %4858 = vst.msk [vmem:[%s8282_s18 + $0x20] sm:$0xf] %vm4849_vm7, %v5157_v30  ;;  %v5160_v2 = vpack.c.bf16 %v4740_v53, %v4740_v53  ;;  %v4738_v32 = vmax.f32 %v4714_v6, 0.0  ;;  %v4699_v6 = vadd.f32 %v5645_v3, %v8264_v15 }
 0x3de   : > { %4861 = vst.msk [vmem:[%s8282_s18 + $0x2c] sm:$0xf] %vm4849_vm7, %v5160_v2  ;;  %v5158_v49 = vpack.c.bf16 %v4738_v32, %v4738_v32  ;;  %v5646_v2 = vpop.f32.mrf.mxu0 }
 0x3e0   : > { %4859 = vst.msk [vmem:[%s8282_s18 + $0x24] sm:$0xf] %vm4849_vm7, %v5158_v49 }
 0x3e7   : > { %v5611_v52 = vpop.f32.mrf.mxu1 }
 0x3e8   : > { %v4374_v9 = vadd.f32 %v5611_v52, %v8269_v38 }
 0x3e9   : > { %v4365_v58 = vpop.f32.mrf.mxu1 }
 0x3ea   : > { %v4719_v34 = vadd.f32 %v4667_v19, %v4374_v9  ;;  %v4366_v45 = vadd.f32 %v8269_v38, %v4365_v58  ;;  %v4693_v19 = vpop.f32.mrf.mxu0 }
 0x3eb   : > { %v5612_v55 = vpop.f32.mrf.mxu1 }
 0x3ec   : > { %v4743_v26 = vmax.f32 %v4719_v34, 0.0  ;;  %v4717_v23 = vadd.f32 %v4659_v63, %v4366_v45  ;;  %v4377_v14 = vadd.f32 %v5612_v55, %v8269_v38  ;;  %v4702_v63 = vadd.f32 %v5646_v2, %v8264_v15 }
 0x3ed   : > { %v4368_v18 = vpop.f32.mrf.mxu1  ;;  %v4694_v45 = vadd.f32 %v8264_v15, %v4693_v19 }
 0x3ee   : > { %v5163_v36 = vpack.c.bf16 %v4743_v26, %v4743_v26  ;;  %v4741_v54 = vmax.f32 %v4717_v23, 0.0  ;;  %v4720_v42 = vadd.f32 %v4670_v40, %v4377_v14  ;;  %v4369_v12 = vadd.f32 %v8269_v38, %v4368_v18 }
 0x3f0   : > { %4864 = vst.msk [vmem:[%s8282_s18 + $0x38] sm:$0xf] %vm4849_vm7, %v5163_v36  ;;  %v5161_v39 = vpack.c.bf16 %v4741_v54, %v4741_v54  ;;  %v4744_v10 = vmax.f32 %v4720_v42, 0.0  ;;  %v4718_v29 = vadd.f32 %v4662_v44, %v4369_v12 }
 0x3f2   : > { %4862 = vst.msk [vmem:[%s8282_s18 + $0x30] sm:$0xf] %vm4849_vm7, %v5161_v39  ;;  %v5164_v27 = vpack.c.bf16 %v4744_v10, %v4744_v10  ;;  %v4742_v35 = vmax.f32 %v4718_v29, 0.0 }
 0x3f4   : > { %4865 = vst.msk [vmem:[%s8282_s18 + $0x3c] sm:$0xf] %vm4849_vm7, %v5164_v27  ;;  %v5162_v60 = vpack.c.bf16 %v4742_v35, %v4742_v35 }
 0x3f6   : > { %4863 = vst.msk [vmem:[%s8282_s18 + $0x34] sm:$0xf] %vm4849_vm7, %v5162_v60 }
 0x3fd   : > { %v5615_v61 = vpop.f32.mrf.mxu1 }
 0x3fe   : > { %v4390_v28 = vadd.f32 %v5615_v61, %v8269_v38 }
 0x3ff   : > { %v4381_v59 = vpop.f32.mrf.mxu1 }
 0x400   : > { %v4723_v43 = vadd.f32 %v4683_v48, %v4390_v28  ;;  %v4382_v17 = vadd.f32 %v8269_v38, %v4381_v59 }
 0x401   : > { %v5616_v1 = vpop.f32.mrf.mxu1 }
 0x402   : > { %v4747_v51 = vmax.f32 %v4723_v43, 0.0  ;;  %v4721_v11 = vadd.f32 %v4675_v13, %v4382_v17  ;;  %v4393_v25 = vadd.f32 %v5616_v1, %v8269_v38 }
 0x403   : > { %v4384_v31 = vpop.f32.mrf.mxu1 }
 0x404   : > { %v5167_v5 = vpack.c.bf16 %v4747_v51, %v4747_v51  ;;  %v4745_v47 = vmax.f32 %v4721_v11, 0.0  ;;  %v4724_v50 = vadd.f32 %v4686_v21, %v4393_v25  ;;  %v4385_v4 = vadd.f32 %v8269_v38, %v4384_v31 }
 0x406   : > { %4868 = vst.msk [vmem:[%s8282_s18 + $0x48] sm:$0xf] %vm4849_vm7, %v5167_v5  ;;  %v5165_v33 = vpack.c.bf16 %v4745_v47, %v4745_v47  ;;  %v4748_v0 = vmax.f32 %v4724_v50, 0.0  ;;  %v4722_v57 = vadd.f32 %v4678_v8, %v4385_v4 }
 0x408   : > { %4866 = vst.msk [vmem:[%s8282_s18 + $0x40] sm:$0xf] %vm4849_vm7, %v5165_v33  ;;  %v5168_v24 = vpack.c.bf16 %v4748_v0, %v4748_v0  ;;  %v4746_v30 = vmax.f32 %v4722_v57, 0.0 }
 0x40a   : > { %4869 = vst.msk [vmem:[%s8282_s18 + $0x4c] sm:$0xf] %vm4849_vm7, %v5168_v24  ;;  %v5166_v53 = vpack.c.bf16 %v4746_v30, %v4746_v30 }
 0x40c   : > { %4867 = vst.msk [vmem:[%s8282_s18 + $0x44] sm:$0xf] %vm4849_vm7, %v5166_v53  ;;  %v5619_v32 = vpop.f32.mrf.mxu1 }
 0x40d   : > { %v4406_v41 = vadd.f32 %v5619_v32, %v8269_v38 }
 0x40e   : > { %v4397_v49 = vpop.f32.mrf.mxu1 }
 0x40f   : > { %v4727_v22 = vadd.f32 %v4699_v6, %v4406_v41  ;;  %v4398_v52 = vadd.f32 %v8269_v38, %v4397_v49 }
 0x410   : > { %v5620_v9 = vpop.f32.mrf.mxu1 }
 0x411   : > { %v4751_v58 = vmax.f32 %v4727_v22, 0.0  ;;  %v4725_v46 = vadd.f32 %v4691_v7, %v4398_v52  ;;  %v4409_v34 = vadd.f32 %v5620_v9, %v8269_v38 }
 0x412   : > { %v4400_v40 = vpop.f32.mrf.mxu1 }
 0x413   : > { %v5171_v55 = vpack.c.bf16 %v4751_v58, %v4751_v58  ;;  %v4749_v26 = vmax.f32 %v4725_v46, 0.0  ;;  %v4728_v23 = vadd.f32 %v4702_v63, %v4409_v34  ;;  %v4401_v14 = vadd.f32 %v8269_v38, %v4400_v40 }
 0x415   : > { %4872 = vst.msk [vmem:[%s8282_s18 + $0x58] sm:$0xf] %vm4849_vm7, %v5171_v55  ;;  %v5169_v44 = vpack.c.bf16 %v4749_v26, %v4749_v26  ;;  %v4752_v18 = vmax.f32 %v4728_v23, 0.0  ;;  %v4726_v36 = vadd.f32 %v4694_v45, %v4401_v14 }
 0x417   : > { %4870 = vst.msk [vmem:[%s8282_s18 + $0x50] sm:$0xf] %vm4849_vm7, %v5169_v44  ;;  %v5172_v54 = vpack.c.bf16 %v4752_v18, %v4752_v18  ;;  %v4750_v42 = vmax.f32 %v4726_v36, 0.0 }
 0x419   : > { %4873 = vst.msk [vmem:[%s8282_s18 + $0x5c] sm:$0xf] %vm4849_vm7, %v5172_v54  ;;  %v5170_v12 = vpack.c.bf16 %v4750_v42, %v4750_v42 }
 0x41b   : > { %4871 = vst.msk [vmem:[%s8282_s18 + $0x54] sm:$0xf] %vm4849_vm7, %v5170_v12 }
 0x41c PF: > { %s20_s13 = sadd.s32 1, %s5790_s13  }
 0x41d   : > { %p17_p4 = scmp.ge.s32.totalorder %s20_s13, 4  }
 0x41f   :  { %19 = sbr.rel (!%p17_p4) target bundleno = 1 (0x1), region = 98 }

// kernel: pcb_test_forward.9
= control target key start
LH: loop header
LB: loop body
LE: loop exit
PB: predicated region body
PF: predicated region fallthrough
CT: control target
= control target key end

     0   :  { %s3090_s13 = smov 0   ;;  %s3683_s0 = inlined_call_operand.vmem [shape: bf16[2,48,288], index: 0, kind: input, shape index: {}]   ;;  %s3684_s1 = inlined_call_operand.vmem [shape: f32[1,48,9], index: 1, kind: input, shape index: {}]   ;;  %s3685_s2 = inlined_call_operand.vmem [shape: bf16[32,16], index: 2, kind: input, shape index: {}]   ;;  %s3686_s3 = inlined_call_operand.vmem [shape: f32[1,16], index: 3, kind: input, shape index: {}]   ;;  %s3687_s4 = inlined_call_operand.vmem [shape: bf16[9,16,16], index: 4, kind: input, shape index: {}]   ;;  %s3688_s5 = inlined_call_operand.vmem [shape: f32[1,16], index: 5, kind: input, shape index: {}]   ;;  %s3689_s6 = inlined_call_operand.vmem [shape: bf16[16,64], index: 6, kind: input, shape index: {}]   ;;  %s3690_s7 = inlined_call_operand.vmem [shape: f32[1,64], index: 7, kind: input, shape index: {}]   ;;  %s3691_s8 = inlined_call_operand.vmem [shape: bf16[32,64], index: 8, kind: input, shape index: {}]   ;;  %s3692_s9 = inlined_call_operand.vmem [shape: f32[1,64], index: 9, kind: input, shape index: {}]   ;;  %s3693_s10 = inlined_call_operand.vmem [shape: bf16[2,48,64], index: 10, kind: output, shape index: {}]  }
   0x1 LB: > { %s2427_s14 = sadd.s32 4294967295, %s3019_s13   ;;  %p2431_p0 = scmp.ge.s32.totalorder %s3019_s13, 1  ;;  %s3019_s13 = sphi %s3090_s13, %s20_s13  }
   0x2   : > { %p312_p1 = scmp.lt.s32.totalorder %s3019_s13, 3 }
   0x4   : > { %p313_p2 = pnand %p2431_p0, %p312_p1 }
   0x5   : > { %p350_p3 = scmp.lt.s32.totalorder (!%p313_p2), %s2427_s14, 1  ;;  %s3023_s23 = smov (!%p313_p2), 96  }
   0x6   : > { %316 = sbr.rel (%p313_p2) target bundleno = 1136 (0x470), region = 60  ;;  %s3025_s18 = smov (!%p313_p2), 64  }
   0xb   : > { %v3101_v0 = vld [vmem:[%s3685_s2 + $0x8] sm:$0xff]   ;;  %v3021_v1 = vmov 0.0   ;;  %s3695_s14 = smov (!%p350_p3, %s2427_s14), 1  ;;  %v3112_v2 = vld [vmem:[%s3685_s2] sm:$0xff]   ;;  %vm3022_vm0 = vmmov 0   ;;  %vm417_vm1 = vcmask 261120  }
   0xc   : > { %2641 = vmatprep.subr.bf16.mxu0 %v3021_v1  ;;  %2657 = vmatprep.subr.bf16.mxu1 %v3021_v1  ;;  %s2941_s19 = smul.u32 72, %s3695_s14  ;;  %v3024_v6 = vmov 1   ;;  %v3142_v7 = vld [vmem:[%s3684_s1] sm:$0xff]  ;;  %v3147_v8 = vld [vmem:[%s3684_s1 + $0x8] sm:$0xff]  ;;  %v3152_v9 = vld [vmem:[%s3684_s1 + $0x10] sm:$0xff]  ;;  %v3026_v13 = vmov 0  }
   0xd   : > { %2642 = vmatpush3.bf16.msra.mxu0 %v3101_v0  ;;  %2658 = vmatpush3.bf16.msra.mxu1 %v3101_v0  ;;  %v3158_v10 = vld [vmem:[%s3684_s1 + $0x20] sm:$0xff]  ;;  %v3168_v11 = vld [vmem:[%s3684_s1 + $0x18] sm:$0xff]  ;;  %v3176_v12 = vld [vmem:[%s3684_s1 + $0x28] sm:$0xff]  ;;  %vm651_vm2 = vcmask 130048   ;;  %vm2365_vm3 = vcmask 519168  }
   0xe   : > { %2643 = vmatprep.subr.bf16.mxu0 %v3021_v1  ;;  %2659 = vmatprep.subr.bf16.mxu1 %v3021_v1  ;;  %s3124_s22 = scalar_lea.vmem %s3683_s0, %s2941_s19  ;;  %s3027_s19 = smov 32   ;;  %v2994_v15 = vld [vmem:[%s3687_s4 + $0x8] sm:$0xff]   ;;  %v2995_v40 = vld [vmem:[%s3687_s4] sm:$0xff]  }
   0xf   : > { %2645 = vmatprep.mubr.msk.bf16.mxu0 %vm3022_vm0, %v3021_v1  ;;  %2661 = vmatprep.mubr.msk.bf16.mxu1 %vm3022_vm0, %v3021_v1  ;;  %v2983_v3 = vld [vmem:[%s3124_s22] ss:$12 sps:$4 sm:$0xff]   ;;  %v2986_v4 = vld [vmem:[%s3124_s22 + $0x18] ss:$12 sps:$4 sm:$0xff]   ;;  %v2989_v5 = vld [vmem:[%s3124_s22 + $0x30] ss:$12 sps:$4 sm:$0xff]  }
  0x10   : > { %531 = vrot.lane.b32.xlu0 %v2983_v3, %s3023_s23  ;;  %535 = vrot.lane.b32.xlu1 %v2989_v5, %s3023_s23  ;;  %v3182_v14 = vld [vmem:[%s3124_s22 + $0x4] ss:$12 sps:$4 sm:$0xff]   ;;  %v3188_v16 = vld [vmem:[%s3124_s22 + $0x34] ss:$12 sps:$4 sm:$0xff]  }
  0x11   : > { %2644 = vmatpush3.bf16.msra.mxu0 %v3112_v2  ;;  %2660 = vmatpush3.bf16.msra.mxu1 %v3112_v2  ;;  %v3194_v17 = vld [vmem:[%s3124_s22 + $0x1c] ss:$12 sps:$4 sm:$0xff]   ;;  %v3268_v42 = vld [vmem:[%s3686_s3] ss:$0 sm:$0xff] }
  0x12   : > { %2673 = vmatprep.subr.bf16.mxu0 %v3021_v1  ;;  %2687 = vmatprep.subr.bf16.mxu1 %v3021_v1 }
  0x13   : > { %2965 = vset.pattern.permute.xlu1 %v3024_v6  ;;  %2966 = vset.pattern.permute.xlu0 %v3024_v6 }
  0x14   : > { %2646 = vmatmul.mubr.msk.bf16.vlgmr.msra.gmra.mxu0 %vm417_vm1, %v2983_v3  ;;  %533 = vrot.lane.b32.xlu0 %v2986_v4, %s3023_s23 }
  0x15   : > { %2649 = vmatprep.mubr.msk.bf16.mxu0 %vm3022_vm0, %v3021_v1  ;;  %610 = vperm.xlu1 %2965, %v3142_v7  }
  0x16   : > { %2674 = vmatpush3.bf16.msra.mxu0 %v2994_v15 }
  0x17   : > { %2701 = vmatprep.subr.bf16.mxu0 %v3021_v1 }
  0x18   : > { %614 = vperm.xlu0 %2966, %v3147_v8  }
  0x19   : > { %618 = vperm.xlu1 %2965, %v3152_v9  }
  0x1c   : > { %2650 = vmatmul.mubr.msk.bf16.gmra.mxu0 %vm417_vm1, %v2986_v4  ;;  %626 = vperm.xlu0 %2966, %v3158_v10  }
  0x1d   : > { %2653 = vmatprep.mubr.msk.bf16.mxu0 %vm3022_vm0, %v3021_v1  ;;  %622 = vperm.xlu1 %2965, %v3168_v11  }
  0x20   : > { %790 = vrot.lane.b32.xlu0 %v2983_v3, %s3025_s18 }
  0x21   : > { %2968 = vset.pattern.permute.xlu0 %v3026_v13  ;;  %630 = vperm.xlu1 %2965, %v3176_v12  }
  0x24   : > { %2654 = vmatmul.mubr.msk.bf16.gmra.mxu0 %vm417_vm1, %v2989_v5  ;;  %794 = vrot.lane.b32.xlu0 %v2989_v5, %s3025_s18 }
  0x25   : > { %2675 = vmatprep.mubr.msk.bf16.mxu0 %vm3022_vm0, %v3021_v1  ;;  %792 = vrot.lane.b32.xlu1 %v2986_v4, %s3025_s18 }
  0x26   : > { %2967 = vset.pattern.permute.xlu1 %v3026_v13 }
  0x28   : > { %984 = vrot.lane.b32.xlu0 %v2986_v4, %s3027_s19 }
  0x29   : > { %982 = vrot.lane.b32.xlu1 %v2983_v3, %s3027_s19 }
  0x2c   : > { %1369 = vrot.lane.b32.xlu0 %v3182_v14, %s3023_s23 }
  0x2d   : > { %986 = vrot.lane.b32.xlu1 %v2989_v5, %s3027_s19 }
  0x30   : > { %1373 = vrot.lane.b32.xlu0 %v3188_v16, %s3023_s23 }
  0x31   : > { %1371 = vrot.lane.b32.xlu1 %v3194_v17, %s3023_s23 }
  0x34   : > { %1563 = vrot.lane.b32.xlu0 %v3194_v17, %s3025_s18 }
  0x35   : > { %1561 = vrot.lane.b32.xlu1 %v3182_v14, %s3025_s18 }
  0x38   : > { %1753 = vrot.lane.b32.xlu0 %v3182_v14, %s3027_s19 }
  0x39   : > { %1565 = vrot.lane.b32.xlu1 %v3188_v16, %s3025_s18 }
  0x3c   : > { %1757 = vrot.lane.b32.xlu0 %v3188_v16, %s3027_s19 }
  0x3d   : > { %1755 = vrot.lane.b32.xlu1 %v3194_v17, %s3027_s19  ;;  %s2942_s19 = smul.u32 24, %s3695_s14 }
  0x3f   : > { %s3666_s23 = scalar_lea.vmem %s3693_s10, %s2942_s19 }
  0x40   : > { %497 = vperm.xlu0 %2968, %v3147_v8  }
  0x41   : > { %492 = vperm.xlu1 %2967, %v3142_v7  }
  0x44   : > { %512 = vperm.xlu0 %2968, %v3158_v10  }
  0x45   : > { %502 = vperm.xlu1 %2967, %v3152_v9  }
  0x49   : > { %507 = vperm.xlu1 %2967, %v3168_v11  }
  0x4d   : > { %517 = vperm.xlu1 %2967, %v3176_v12  }
  0x82   : > { %v532_v18 = vpop.permute.xlu0 %531  ;;  %v536_v20 = vpop.permute.xlu1 %535 }
  0x83   : > { %2662 = vmatmul.mubr.msk.bf16.vlgmr.msra.gmra.mxu1 %vm417_vm1, %v532_v18 }
  0x84   : > { %2665 = vmatprep.mubr.msk.bf16.mxu1 %vm3022_vm0, %v3021_v1  ;;  %2688 = vmatpush3.bf16.msra.mxu1 %v2995_v40 }
  0x85   : > { %2717 = vmatprep.subr.bf16.mxu1 %v3021_v1 }
  0x86   : > { %v534_v19 = vpop.permute.xlu0 %533 }
  0x8b   : > { %2666 = vmatmul.mubr.msk.bf16.gmra.mxu1 %vm417_vm1, %v534_v19 }
  0x8c   : > { %2669 = vmatprep.mubr.msk.bf16.mxu1 %vm3022_vm0, %v3021_v1 }
  0x90   : > { %v3218_v21 = vpop.permute.xlu1 %610 }
  0x93   : > { %2670 = vmatmul.mubr.msk.bf16.gmra.mxu1 %vm417_vm1, %v536_v20  ;;  %v3225_v23 = vpop.permute.xlu0 %614 }
  0x94   : > { %2689 = vmatprep.mubr.msk.bf16.mxu1 %vm3022_vm0, %v3021_v1  ;;  %v3223_v22 = vpop.permute.xlu1 %618 }
  0x97   : > { %v3229_v25 = vpop.permute.xlu0 %626 }
  0x98   : > { %v3227_v24 = vpop.permute.xlu1 %622 }
  0x9b   : > { %v3233_v27 = vpop.permute.xlu0 %790 }
  0x9c   : > { %v3231_v26 = vpop.permute.xlu1 %630 }
  0x9f   : > { %v3237_v29 = vpop.permute.xlu0 %794 }
  0xa0   : > { %v3235_v28 = vpop.permute.xlu1 %792 }
  0xa3   : > { %v3241_v31 = vpop.permute.xlu0 %984 }
  0xa4   : > { %v3239_v30 = vpop.permute.xlu1 %982 }
  0xa7   : > { %v3245_v33 = vpop.permute.xlu0 %1369 }
  0xa8   : > { %v3243_v32 = vpop.permute.xlu1 %986 }
  0xab   : > { %v3249_v35 = vpop.permute.xlu0 %1373 }
  0xac   : > { %v3247_v34 = vpop.permute.xlu1 %1371 }
  0xaf   : > { %v3253_v37 = vpop.permute.xlu0 %1563 }
  0xb0   : > { %v3251_v36 = vpop.permute.xlu1 %1561 }
  0xb3   : > { %v3257_v39 = vpop.permute.xlu0 %1753 }
  0xb4   : > { %v3255_v38 = vpop.permute.xlu1 %1565 }
  0xb7   : > { %v3270_v44 = vpop.permute.xlu0 %1757 }
  0xb8   : > { %v3262_v41 = vpop.permute.xlu1 %1755 }
  0xbb   : > { %v498_v52 = vpop.permute.xlu0 %497 }
  0xbc   : > { %v493_v47 = vpop.permute.xlu1 %492 }
  0xc0   : > { %v503_v56 = vpop.permute.xlu1 %502 }
  0xc4   : > { %v508_v4 = vpop.permute.xlu1 %507 }
  0xd4   : > { %v461_v43 = vpop.f32.mrf.mxu0 }
  0xd5   : > { %v462_v45 = vadd.f32 %v3268_v42, %v461_v43 }
  0xd6   : > { %v2647_v46 = vpop.f32.mrf.mxu0 }
  0xd7   : > { %v484_v48 = vmax.f32 %v462_v45, 0.0  ;;  %v513_v45 = vpop.permute.xlu0 %512 }
  0xd8   : > { %v464_v49 = vpop.f32.mrf.mxu0 }
  0xd9   : > { %v465_v50 = vadd.f32 %v3268_v42, %v464_v49  ;;  %v520_v54 = vmul.f32 %v493_v47, %v484_v48  ;;  %v518_v47 = vpop.permute.xlu1 %517 }
  0xda   : > { %v2648_v51 = vpop.f32.mrf.mxu0 }
  0xdb   : > { %v485_v53 = vmax.f32 %v465_v50, 0.0 }
  0xdc   : > { %v469_v55 = vpop.f32.mrf.mxu0 }
  0xdd   : > { %v521_v57 = vmul.f32 %v498_v52, %v485_v53  ;;  %v470_v58 = vadd.f32 %v3268_v42, %v469_v55  ;;  %v3028_v53 = vmov 2  }
  0xde   : > { %v2651_v59 = vpop.f32.mrf.mxu0  ;;  %2970 = vset.pattern.permute.xlu1 %v3028_v53  ;;  %2969 = vset.pattern.permute.xlu0 %v3028_v53 }
  0xdf   : > { %v526_v60 = vpack.c.bf16 %v521_v57, %v520_v54  ;;  %v486_v61 = vmax.f32 %v470_v58, 0.0  ;;  %873 = vperm.xlu1 %2970, %v3147_v8   ;;  %869 = vperm.xlu0 %2969, %v3142_v7   ;;  %v3029_v54 = vmov 3  }
  0xe0   : > { %v472_v62 = vpop.f32.mrf.mxu0 }
  0xe1   : > { %v473_v63 = vadd.f32 %v3268_v42, %v472_v62  ;;  %2690 = vmatmul.mubr.msk.bf16.vlgmr.msra.gmra.mxu1 %vm651_vm2, %v526_v60  ;;  %v522_v5 = vmul.f32 %v503_v56, %v486_v61 }
  0xe2   : > { %v2652_v3 = vpop.f32.mrf.mxu0  ;;  %2693 = vmatprep.mubr.msk.bf16.mxu1 %vm3022_vm0, %v3021_v1 }
  0xe3   : > { %v487_v6 = vmax.f32 %v473_v63, 0.0  ;;  %877 = vperm.xlu1 %2970, %v3152_v9   ;;  %881 = vperm.xlu0 %2969, %v3168_v11  }
  0xe4   : > { %v477_v13 = vpop.f32.mrf.mxu0 }
  0xe5   : > { %v523_v15 = vmul.f32 %v508_v4, %v487_v6  ;;  %v478_v18 = vadd.f32 %v3268_v42, %v477_v13 }
  0xe6   : > { %v2655_v19 = vpop.f32.mrf.mxu0 }
  0xe7   : > { %v527_v20 = vpack.c.bf16 %v523_v15, %v522_v5  ;;  %v488_v40 = vmax.f32 %v478_v18, 0.0  ;;  %885 = vperm.xlu1 %2970, %v3158_v10   ;;  %889 = vperm.xlu0 %2969, %v3176_v12  }
  0xe8   : > { %v480_v43 = vpop.f32.mrf.mxu0 }
  0xe9   : > { %v481_v46 = vadd.f32 %v3268_v42, %v480_v43  ;;  %2694 = vmatmul.mubr.msk.bf16.gmra.mxu1 %vm651_vm2, %v527_v20  ;;  %v524_v50 = vmul.f32 %v513_v45, %v488_v40 }
  0xea   : > { %2697 = vmatprep.mubr.msk.bf16.mxu1 %vm3022_vm0, %v3021_v1  ;;  %v2656_v48 = vpop.f32.mrf.mxu0 }
  0xeb   : > { %v489_v49 = vmax.f32 %v481_v46, 0.0  ;;  %2971 = vset.pattern.permute.xlu1 %v3029_v54  ;;  %2972 = vset.pattern.permute.xlu0 %v3029_v54 }
  0xec   : > { %1061 = vperm.xlu1 %2971, %v3142_v7   ;;  %1065 = vperm.xlu0 %2972, %v3147_v8  }
  0xed   : > { %v525_v51 = vmul.f32 %v518_v47, %v489_v49 }
  0xef   : > { %v528_v52 = vpack.c.bf16 %v525_v51, %v524_v50 }
  0xf0   : > { %1069 = vperm.xlu1 %2971, %v3152_v9   ;;  %1077 = vperm.xlu0 %2972, %v3158_v10  }
  0xf1   : > { %2698 = vmatmul.mubr.msk.bf16.gmra.mxu1 %vm651_vm2, %v528_v52 }
  0xf2   : > { %2719 = vmatprep.mubr.msk.bf16.mxu1 %vm3022_vm0, %v3021_v1 }
  0xf4   : > { %1073 = vperm.xlu1 %2971, %v3168_v11  }
  0xf8   : > { %1081 = vperm.xlu1 %2971, %v3176_v12  }
 0x143   : > { %v580_v55 = vpop.f32.mrf.mxu1 }
 0x144   : > { %v581_v56 = vadd.f32 %v3268_v42, %v580_v55 }
 0x145   : > { %v2663_v57 = vpop.f32.mrf.mxu1 }
 0x146   : > { %v603_v59 = vmax.f32 %v581_v56, 0.0 }
 0x147   : > { %v583_v58 = vpop.f32.mrf.mxu1 }
 0x148   : > { %v584_v60 = vadd.f32 %v3268_v42, %v583_v58  ;;  %v633_v3 = vmul.f32 %v3218_v21, %v603_v59 }
 0x149   : > { %v2664_v61 = vpop.f32.mrf.mxu1 }
 0x14a   : > { %v604_v62 = vmax.f32 %v584_v60, 0.0 }
 0x14b   : > { %v588_v63 = vpop.f32.mrf.mxu1 }
 0x14c   : > { %v634_v4 = vmul.f32 %v3225_v23, %v604_v62  ;;  %v589_v5 = vadd.f32 %v3268_v42, %v588_v63 }
 0x14d   : > { %v2667_v6 = vpop.f32.mrf.mxu1 }
 0x14e   : > { %v639_v13 = vpack.c.bf16 %v634_v4, %v633_v3  ;;  %v605_v18 = vmax.f32 %v589_v5, 0.0 }
 0x14f   : > { %v591_v15 = vpop.f32.mrf.mxu1 }
 0x150   : > { %v592_v19 = vadd.f32 %v3268_v42, %v591_v15  ;;  %2676 = vmatmul.mubr.msk.bf16.vlgmr.msra.gmra.mxu0 %vm651_vm2, %v639_v13  ;;  %v635_v23 = vmul.f32 %v3223_v22, %v605_v18  ;;  %v3030_v22 = vmov 4  }
 0x151   : > { %2702 = vmatpush3.bf16.msra.mxu0 %v3101_v0  ;;  %v2668_v20 = vpop.f32.mrf.mxu1  ;;  %2679 = vmatprep.mubr.msk.bf16.mxu0 %vm3022_vm0, %v3021_v1 }
 0x152   : > { %v606_v40 = vmax.f32 %v592_v19, 0.0  ;;  %2703 = vmatprep.subr.bf16.mxu0 %v3021_v1  ;;  %2974 = vset.pattern.permute.xlu1 %v3030_v22 }
 0x153   : > { %v596_v21 = vpop.f32.mrf.mxu1  ;;  %2973 = vset.pattern.permute.xlu0 %v3030_v22  ;;  %1260 = vperm.xlu1 %2974, %v3147_v8  }
 0x154   : > { %v636_v43 = vmul.f32 %v3227_v24, %v606_v40  ;;  %v597_v45 = vadd.f32 %v3268_v42, %v596_v21  ;;  %1256 = vperm.xlu0 %2973, %v3142_v7   ;;  %v3000_v21 = vld [vmem:[%s3687_s4 + $0x18] sm:$0xff]  }
 0x155   : > { %v2671_v46 = vpop.f32.mrf.mxu1  ;;  %2704 = vmatpush3.bf16.msra.mxu0 %v3112_v2 }
 0x156   : > { %v640_v47 = vpack.c.bf16 %v636_v43, %v635_v23  ;;  %2731 = vmatprep.subr.bf16.mxu0 %v3021_v1  ;;  %v607_v49 = vmax.f32 %v597_v45, 0.0 }
 0x157   : > { %v599_v48 = vpop.f32.mrf.mxu1  ;;  %1264 = vperm.xlu1 %2974, %v3152_v9  }
 0x158   : > { %v600_v50 = vadd.f32 %v3268_v42, %v599_v48  ;;  %2680 = vmatmul.mubr.msk.bf16.gmra.mxu0 %vm651_vm2, %v640_v47  ;;  %v637_v52 = vmul.f32 %v3229_v25, %v607_v49  ;;  %1268 = vperm.xlu0 %2973, %v3168_v11   ;;  %v3031_v25 = vmov 5  }
 0x159   : > { %v2672_v51 = vpop.f32.mrf.mxu1  ;;  %2683 = vmatprep.mubr.msk.bf16.mxu0 %vm3022_vm0, %v3021_v1 }
 0x15a   : > { %v608_v24 = vmax.f32 %v600_v50, 0.0  ;;  %v874_v5 = vpop.permute.xlu1 %873  ;;  %v870_v13 = vpop.permute.xlu0 %869 }
 0x15b   : > { %1272 = vperm.xlu1 %2974, %v3158_v10  }
 0x15c   : > { %v638_v53 = vmul.f32 %v3231_v26, %v608_v24  ;;  %1276 = vperm.xlu0 %2973, %v3176_v12   ;;  %v3032_v26 = vmov 6  }
 0x15e   : > { %v641_v54 = vpack.c.bf16 %v638_v53, %v637_v52  ;;  %v878_v48 = vpop.permute.xlu1 %877  ;;  %v882_v50 = vpop.permute.xlu0 %881 }
 0x15f   : > { %2975 = vset.pattern.permute.xlu1 %v3031_v25 }
 0x160   : > { %2684 = vmatmul.mubr.msk.bf16.gmra.mxu0 %vm651_vm2, %v641_v54  ;;  %1448 = vperm.xlu1 %2975, %v3142_v7  }
 0x161   : > { %2705 = vmatprep.mubr.msk.bf16.mxu0 %vm3022_vm0, %v3021_v1  ;;  %2976 = vset.pattern.permute.xlu0 %v3031_v25 }
 0x162   : > { %1452 = vperm.xlu0 %2976, %v3147_v8  }
 0x164   : > { %1456 = vperm.xlu1 %2975, %v3152_v9  }
 0x166   : > { %1464 = vperm.xlu0 %2976, %v3158_v10  }
 0x168   : > { %2706 = vmatmul.mubr.msk.bf16.vlgmr.msra.gmra.mxu0 %vm417_vm1, %v3233_v27  ;;  %1460 = vperm.xlu1 %2975, %v3168_v11  }
 0x169   : > { %2732 = vmatpush3.bf16.msra.mxu0 %v3101_v0  ;;  %2709 = vmatprep.mubr.msk.bf16.mxu0 %vm3022_vm0, %v3021_v1 }
 0x16a   : > { %2733 = vmatprep.subr.bf16.mxu0 %v3021_v1  ;;  %2977 = vset.pattern.permute.xlu0 %v3032_v26 }
 0x16b   : > { %1640 = vperm.xlu0 %2977, %v3142_v7  }
 0x16c   : > { %1468 = vperm.xlu1 %2975, %v3176_v12  }
 0x16d   : > { %2734 = vmatpush3.bf16.msra.mxu0 %v3112_v2 }
 0x16e   : > { %2761 = vmatprep.subr.bf16.mxu0 %v3021_v1 }
 0x16f   : > { %1652 = vperm.xlu0 %2977, %v3168_v11  }
 0x170   : > { %2710 = vmatmul.mubr.msk.bf16.gmra.mxu0 %vm417_vm1, %v3235_v28  ;;  %2978 = vset.pattern.permute.xlu1 %v3032_v26  ;;  %v2999_v28 = vld [vmem:[%s3687_s4 + $0x10] sm:$0xff]  }
 0x171   : > { %2713 = vmatprep.mubr.msk.bf16.mxu0 %vm3022_vm0, %v3021_v1  ;;  %1644 = vperm.xlu1 %2978, %v3147_v8  }
 0x172   : > { %2718 = vmatpush3.bf16.msra.mxu1 %v2999_v28 }
 0x173   : > { %1660 = vperm.xlu0 %2977, %v3176_v12   ;;  %2747 = vmatprep.subr.bf16.mxu1 %v3021_v1 }
 0x175   : > { %1648 = vperm.xlu1 %2978, %v3152_v9  }
 0x178   : > { %2714 = vmatmul.mubr.msk.bf16.gmra.mxu0 %vm417_vm1, %v3237_v29 }
 0x179   : > { %2735 = vmatprep.mubr.msk.bf16.mxu0 %vm3022_vm0, %v3021_v1  ;;  %1656 = vperm.xlu1 %2978, %v3158_v10  }
 0x180   : > { %2736 = vmatmul.mubr.msk.bf16.vlgmr.msra.gmra.mxu0 %vm417_vm1, %v3239_v30 }
 0x181   : > { %2762 = vmatpush3.bf16.msra.mxu0 %v3101_v0  ;;  %2739 = vmatprep.mubr.msk.bf16.mxu0 %vm3022_vm0, %v3021_v1 }
 0x182   : > { %2763 = vmatprep.subr.bf16.mxu0 %v3021_v1 }
 0x185   : > { %2764 = vmatpush3.bf16.msra.mxu0 %v3112_v2 }
 0x186   : > { %2791 = vmatprep.subr.bf16.mxu0 %v3021_v1 }
 0x188   : > { %2740 = vmatmul.mubr.msk.bf16.gmra.mxu0 %vm417_vm1, %v3241_v31 }
 0x189   : > { %2743 = vmatprep.mubr.msk.bf16.mxu0 %vm3022_vm0, %v3021_v1 }
 0x190   : > { %2744 = vmatmul.mubr.msk.bf16.gmra.mxu0 %vm417_vm1, %v3243_v32 }
 0x191   : > { %2765 = vmatprep.mubr.msk.bf16.mxu0 %vm3022_vm0, %v3021_v1 }
 0x198   : > { %2766 = vmatmul.mubr.msk.bf16.vlgmr.msra.gmra.mxu0 %vm417_vm1, %v3182_v14  ;;  %v3033_v14 = vmov 7  }
 0x199   : > { %2792 = vmatpush3.bf16.msra.mxu0 %v3101_v0  ;;  %2769 = vmatprep.mubr.msk.bf16.mxu0 %vm3022_vm0, %v3021_v1 }
 0x19a   : > { %2793 = vmatprep.subr.bf16.mxu0 %v3021_v1  ;;  %2979 = vset.pattern.permute.xlu1 %v3033_v14 }
 0x19b   : > { %1832 = vperm.xlu1 %2979, %v3142_v7   ;;  %2980 = vset.pattern.permute.xlu0 %v3033_v14  ;;  %v886_v14 = vpop.permute.xlu1 %885 }
 0x19c   : > { %1836 = vperm.xlu0 %2980, %v3147_v8  }
 0x19d   : > { %2794 = vmatpush3.bf16.msra.mxu0 %v3112_v2 }
 0x19e   : > { %2821 = vmatprep.subr.bf16.mxu0 %v3021_v1 }
 0x19f   : > { %1840 = vperm.xlu1 %2979, %v3152_v9  }
 0x1a0   : > { %2770 = vmatmul.mubr.msk.bf16.gmra.mxu0 %vm417_vm1, %v3194_v17  ;;  %1848 = vperm.xlu0 %2980, %v3158_v10  }
 0x1a1   : > { %v3381_v27 = vpop.f32.mrf.mxu1  ;;  %2773 = vmatprep.mubr.msk.bf16.mxu0 %vm3022_vm0, %v3021_v1 }
 0x1a3   : > { %v2691_v29 = vpop.f32.mrf.mxu1  ;;  %1844 = vperm.xlu1 %2979, %v3168_v11  }
 0x1a5   : > { %v3392_v30 = vpop.f32.mrf.mxu1 }
 0x1a7   : > { %v2692_v31 = vpop.f32.mrf.mxu1  ;;  %1852 = vperm.xlu1 %2979, %v3176_v12  }
 0x1a8   : > { %2774 = vmatmul.mubr.msk.bf16.gmra.mxu0 %vm417_vm1, %v3188_v16 }
 0x1a9   : > { %v3397_v32 = vpop.f32.mrf.mxu1  ;;  %2795 = vmatprep.mubr.msk.bf16.mxu0 %vm3022_vm0, %v3021_v1 }
 0x1ab   : > { %v2695_v17 = vpop.f32.mrf.mxu1 }
 0x1ac   : > { %v890_v17 = vpop.permute.xlu0 %889 }
 0x1ad   : > { %v3405_v55 = vpop.f32.mrf.mxu1 }
 0x1af   : > { %v2696_v56 = vpop.f32.mrf.mxu1 }
 0x1b0   : > { %2796 = vmatmul.mubr.msk.bf16.vlgmr.msra.gmra.mxu0 %vm417_vm1, %v3245_v33  ;;  %v3034_v33 = vmov 8  }
 0x1b1   : > { %v3408_v57 = vpop.f32.mrf.mxu1  ;;  %2822 = vmatpush3.bf16.msra.mxu0 %v3101_v0  ;;  %2799 = vmatprep.mubr.msk.bf16.mxu0 %vm3022_vm0, %v3021_v1 }
 0x1b2   : > { %2823 = vmatprep.subr.bf16.mxu0 %v3021_v1  ;;  %2982 = vset.pattern.permute.xlu1 %v3034_v33 }
 0x1b3   : > { %v2699_v58 = vpop.f32.mrf.mxu1  ;;  %2981 = vset.pattern.permute.xlu0 %v3034_v33  ;;  %2037 = vperm.xlu1 %2982, %v3147_v8  }
 0x1b4   : > { %2033 = vperm.xlu0 %2981, %v3142_v7   ;;  %v2998_v7 = vld [vmem:[%s3124_s22 + $0x38] ss:$12 sps:$4 sm:$0xff]  }
 0x1b5   : > { %v3415_v16 = vpop.f32.mrf.mxu1  ;;  %2824 = vmatpush3.bf16.msra.mxu0 %v3112_v2 }
 0x1b6   : > { %2851 = vmatprep.subr.bf16.mxu0 %v3021_v1 }
 0x1b7   : > { %v2700_v59 = vpop.f32.mrf.mxu1  ;;  %2041 = vperm.xlu1 %2982, %v3152_v9  }
 0x1b8   : > { %2800 = vmatmul.mubr.msk.bf16.gmra.mxu0 %vm417_vm1, %v3247_v34  ;;  %2045 = vperm.xlu0 %2981, %v3168_v11  }
 0x1b9   : > { %2803 = vmatprep.mubr.msk.bf16.mxu0 %vm3022_vm0, %v3021_v1 }
 0x1bb   : > { %2049 = vperm.xlu1 %2982, %v3158_v10  }
 0x1bc   : > { %2053 = vperm.xlu0 %2981, %v3176_v12  }
 0x1c0   : > { %2804 = vmatmul.mubr.msk.bf16.gmra.mxu0 %vm417_vm1, %v3249_v35 }
 0x1c1   : > { %2825 = vmatprep.mubr.msk.bf16.mxu0 %vm3022_vm0, %v3021_v1 }
 0x1c8   : > { %2826 = vmatmul.mubr.msk.bf16.vlgmr.msra.gmra.mxu0 %vm417_vm1, %v3251_v36 }
 0x1c9   : > { %2852 = vmatpush3.bf16.msra.mxu0 %v3101_v0  ;;  %2829 = vmatprep.mubr.msk.bf16.mxu0 %vm3022_vm0, %v3021_v1 }
 0x1ca   : > { %2853 = vmatprep.subr.bf16.mxu0 %v3021_v1 }
 0x1cd   : > { %2854 = vmatpush3.bf16.msra.mxu0 %v3112_v2 }
 0x1ce   : > { %2881 = vmatprep.subr.bf16.mxu0 %v3021_v1 }
 0x1d0   : > { %2830 = vmatmul.mubr.msk.bf16.gmra.mxu0 %vm417_vm1, %v3253_v37 }
 0x1d1   : > { %2833 = vmatprep.mubr.msk.bf16.mxu0 %vm3022_vm0, %v3021_v1 }
 0x1d8   : > { %2834 = vmatmul.mubr.msk.bf16.gmra.mxu0 %vm417_vm1, %v3255_v38 }
 0x1d9   : > { %2855 = vmatprep.mubr.msk.bf16.mxu0 %vm3022_vm0, %v3021_v1 }
 0x1e0   : > { %2856 = vmatmul.mubr.msk.bf16.vlgmr.msra.gmra.mxu0 %vm417_vm1, %v3257_v39 }
 0x1e1   : > { %2882 = vmatpush3.bf16.msra.mxu0 %v3101_v0  ;;  %2859 = vmatprep.mubr.msk.bf16.mxu0 %vm3022_vm0, %v3021_v1  ;;  %v2996_v0 = vld [vmem:[%s3124_s22 + $0x8] ss:$12 sps:$4 sm:$0xff]  }
 0x1e2   : > { %2883 = vmatprep.subr.bf16.mxu0 %v3021_v1 }
 0x1e5   : > { %2884 = vmatpush3.bf16.msra.mxu0 %v3112_v2  ;;  %v2997_v2 = vld [vmem:[%s3124_s22 + $0x20] ss:$12 sps:$4 sm:$0xff]  }
 0x1e6   : > { %2911 = vmatprep.subr.bf16.mxu0 %v3021_v1 }
 0x1e8   : > { %2860 = vmatmul.mubr.msk.bf16.gmra.mxu0 %vm417_vm1, %v3262_v41 }
 0x1e9   : > { %2863 = vmatprep.mubr.msk.bf16.mxu0 %vm3022_vm0, %v3021_v1 }
 0x1f0   : > { %2864 = vmatmul.mubr.msk.bf16.gmra.mxu0 %vm417_vm1, %v3270_v44 }
 0x1f1   : > { %2885 = vmatprep.mubr.msk.bf16.mxu0 %vm3022_vm0, %v3021_v1 }
 0x1f8   : > { %2886 = vmatmul.mubr.msk.bf16.vlgmr.msra.gmra.mxu0 %vm417_vm1, %v2996_v0 }
 0x1f9   : > { %2889 = vmatprep.mubr.msk.bf16.mxu0 %vm3022_vm0, %v3021_v1 }
 0x200   : > { %2890 = vmatmul.mubr.msk.bf16.gmra.mxu0 %vm417_vm1, %v2997_v2 }
 0x201   : > { %2893 = vmatprep.mubr.msk.bf16.mxu0 %vm3022_vm0, %v3021_v1 }
 0x208   : > { %2894 = vmatmul.mubr.msk.bf16.gmra.mxu0 %vm417_vm1, %v2998_v7  ;;  %v1062_v7 = vpop.permute.xlu1 %1061 }
 0x209   : > { %2913 = vmatprep.mubr.msk.bf16.mxu0 %vm3022_vm0, %v3021_v1 }
 0x210   : > { %v3478_v8 = vpop.f32.mrf.mxu0 }
 0x212   : > { %v2677_v9 = vpop.f32.mrf.mxu0 }
 0x214   : > { %v3480_v10 = vpop.f32.mrf.mxu0 }
 0x216   : > { %v2678_v11 = vpop.f32.mrf.mxu0 }
 0x218   : > { %v3482_v12 = vpop.f32.mrf.mxu0 }
 0x21a   : > { %v2681_v34 = vpop.f32.mrf.mxu0 }
 0x21c   : > { %v3484_v35 = vpop.f32.mrf.mxu0 }
 0x21e   : > { %v2682_v36 = vpop.f32.mrf.mxu0 }
 0x220   : > { %v3486_v37 = vpop.f32.mrf.mxu0 }
 0x222   : > { %v2685_v38 = vpop.f32.mrf.mxu0 }
 0x224   : > { %v3488_v39 = vpop.f32.mrf.mxu0 }
 0x226   : > { %v2686_v41 = vpop.f32.mrf.mxu0 }
 0x227   : > { %v1066_v41 = vpop.permute.xlu0 %1065 }
 0x228   : > { %v839_v44 = vpop.f32.mrf.mxu0 }
 0x229   : > { %v840_v60 = vadd.f32 %v3268_v42, %v839_v44 }
 0x22a   : > { %v2707_v61 = vpop.f32.mrf.mxu0 }
 0x22b   : > { %v862_v63 = vmax.f32 %v840_v60, 0.0 }
 0x22c   : > { %v842_v62 = vpop.f32.mrf.mxu0 }
 0x22d   : > { %v843_v3 = vadd.f32 %v3268_v42, %v842_v62  ;;  %v892_v18 = vmul.f32 %v870_v13, %v862_v63  ;;  %v1070_v63 = vpop.permute.xlu1 %1069 }
 0x22e   : > { %v2708_v4 = vpop.f32.mrf.mxu0 }
 0x22f   : > { %v863_v6 = vmax.f32 %v843_v3, 0.0  ;;  %v3001_v4 = vld [vmem:[%s3687_s4 + $0x20] sm:$0xff]  }
 0x230   : > { %v847_v15 = vpop.f32.mrf.mxu0 }
 0x231   : > { %v893_v19 = vmul.f32 %v874_v5, %v863_v6  ;;  %v848_v20 = vadd.f32 %v3268_v42, %v847_v15 }
 0x232   : > { %v2711_v40 = vpop.f32.mrf.mxu0 }
 0x233   : > { %v898_v23 = vpack.c.bf16 %v893_v19, %v892_v18  ;;  %v864_v45 = vmax.f32 %v848_v20, 0.0  ;;  %v1074_v20 = vpop.permute.xlu1 %1073 }
 0x234   : > { %v850_v43 = vpop.f32.mrf.mxu0 }
 0x235   : > { %v851_v46 = vadd.f32 %v3268_v42, %v850_v43  ;;  %2720 = vmatmul.mubr.msk.bf16.vlgmr.msra.gmra.mxu1 %vm651_vm2, %v898_v23  ;;  %v894_v22 = vmul.f32 %v878_v48, %v864_v45 }
 0x236   : > { %2748 = vmatpush3.bf16.msra.mxu1 %v3000_v21  ;;  %v2712_v47 = vpop.f32.mrf.mxu0  ;;  %2723 = vmatprep.mubr.msk.bf16.mxu1 %vm3022_vm0, %v3021_v1 }
 0x237   : > { %v865_v49 = vmax.f32 %v851_v46, 0.0  ;;  %2777 = vmatprep.subr.bf16.mxu1 %v3021_v1 }
 0x238   : > { %v855_v51 = vpop.f32.mrf.mxu0 }
 0x239   : > { %v895_v24 = vmul.f32 %v882_v50, %v865_v49  ;;  %v856_v52 = vadd.f32 %v3268_v42, %v855_v51  ;;  %v1082_v51 = vpop.permute.xlu1 %1081 }
 0x23a   : > { %v2715_v53 = vpop.f32.mrf.mxu0 }
 0x23b   : > { %v899_v54 = vpack.c.bf16 %v895_v24, %v894_v22  ;;  %v866_v26 = vmax.f32 %v856_v52, 0.0  ;;  %v1078_v24 = vpop.permute.xlu0 %1077 }
 0x23c   : > { %v858_v25 = vpop.f32.mrf.mxu0 }
 0x23d   : > { %v859_v28 = vadd.f32 %v3268_v42, %v858_v25  ;;  %2724 = vmatmul.mubr.msk.bf16.gmra.mxu1 %vm651_vm2, %v899_v54  ;;  %v896_v58 = vmul.f32 %v886_v14, %v866_v26 }
 0x23e   : > { %v2716_v29 = vpop.f32.mrf.mxu0  ;;  %2727 = vmatprep.mubr.msk.bf16.mxu1 %vm3022_vm0, %v3021_v1 }
 0x23f   : > { %v867_v31 = vmax.f32 %v859_v28, 0.0 }
 0x240   : > { %v1031_v56 = vpop.f32.mrf.mxu0 }
 0x241   : > { %v897_v59 = vmul.f32 %v890_v17, %v867_v31  ;;  %v1032_v33 = vadd.f32 %v3268_v42, %v1031_v56  ;;  %v1261_v56 = vpop.permute.xlu1 %1260 }
 0x242   : > { %v2737_v0 = vpop.f32.mrf.mxu0 }
 0x243   : > { %v900_v2 = vpack.c.bf16 %v897_v59, %v896_v58  ;;  %v1054_v11 = vmax.f32 %v1032_v33, 0.0  ;;  %v1257_v59 = vpop.permute.xlu0 %1256 }
 0x244   : > { %v1034_v9 = vpop.f32.mrf.mxu0 }
 0x245   : > { %v1035_v34 = vadd.f32 %v3268_v42, %v1034_v9  ;;  %2728 = vmatmul.mubr.msk.bf16.gmra.mxu1 %vm651_vm2, %v900_v2  ;;  %v1084_v60 = vmul.f32 %v1062_v7, %v1054_v11  ;;  %v3002_v11 = vld [vmem:[%s3687_s4 + $0x28] sm:$0xff]  }
 0x246   : > { %v2738_v36 = vpop.f32.mrf.mxu0  ;;  %2749 = vmatprep.mubr.msk.bf16.mxu1 %vm3022_vm0, %v3021_v1 }
 0x247   : > { %v1055_v38 = vmax.f32 %v1035_v34, 0.0 }
 0x248   : > { %v1039_v44 = vpop.f32.mrf.mxu0 }
 0x249   : > { %v1085_v61 = vmul.f32 %v1066_v41, %v1055_v38  ;;  %v1040_v62 = vadd.f32 %v3268_v42, %v1039_v44 }
 0x24a   : > { %v2741_v3 = vpop.f32.mrf.mxu0 }
 0x24b   : > { %v1090_v5 = vpack.c.bf16 %v1085_v61, %v1084_v60  ;;  %v1056_v13 = vmax.f32 %v1040_v62, 0.0  ;;  %v1265_v60 = vpop.permute.xlu1 %1264  ;;  %v1269_v62 = vpop.permute.xlu0 %1268 }
 0x24c   : > { %v1042_v6 = vpop.f32.mrf.mxu0 }
 0x24d   : > { %v1043_v15 = vadd.f32 %v3268_v42, %v1042_v6  ;;  %2750 = vmatmul.mubr.msk.bf16.vlgmr.msra.gmra.mxu1 %vm651_vm2, %v1090_v5  ;;  %v1086_v21 = vmul.f32 %v1070_v63, %v1056_v13 }
 0x24e   : > { %2778 = vmatpush3.bf16.msra.mxu1 %v3001_v4  ;;  %v2742_v18 = vpop.f32.mrf.mxu0  ;;  %2753 = vmatprep.mubr.msk.bf16.mxu1 %vm3022_vm0, %v3021_v1 }
 0x24f   : > { %v1057_v19 = vmax.f32 %v1043_v15, 0.0  ;;  %2807 = vmatprep.subr.bf16.mxu1 %v3021_v1 }
 0x250   : > { %v1047_v40 = vpop.f32.mrf.mxu0 }
 0x251   : > { %v1087_v23 = vmul.f32 %v1074_v20, %v1057_v19  ;;  %v1048_v43 = vadd.f32 %v3268_v42, %v1047_v40  ;;  %v1273_v40 = vpop.permute.xlu1 %1272 }
 0x252   : > { %v2745_v45 = vpop.f32.mrf.mxu0 }
 0x253   : > { %v1091_v46 = vpack.c.bf16 %v1087_v23, %v1086_v21  ;;  %v1058_v48 = vmax.f32 %v1048_v43, 0.0  ;;  %v1277_v23 = vpop.permute.xlu0 %1276 }
 0x254   : > { %v1050_v47 = vpop.f32.mrf.mxu0 }
 0x255   : > { %v1051_v49 = vadd.f32 %v3268_v42, %v1050_v47  ;;  %2754 = vmatmul.mubr.msk.bf16.gmra.mxu1 %vm651_vm2, %v1091_v46  ;;  %v1088_v53 = vmul.f32 %v1078_v24, %v1058_v48 }
 0x256   : > { %v2746_v50 = vpop.f32.mrf.mxu0  ;;  %2757 = vmatprep.mubr.msk.bf16.mxu1 %vm3022_vm0, %v3021_v1 }
 0x257   : > { %v1059_v22 = vmax.f32 %v1051_v49, 0.0  ;;  %v1449_v50 = vpop.permute.xlu1 %1448 }
 0x258   : > { %v1226_v52 = vpop.f32.mrf.mxu0 }
 0x259   : > { %v1089_v54 = vmul.f32 %v1082_v51, %v1059_v22  ;;  %v1227_v25 = vadd.f32 %v3268_v42, %v1226_v52 }
 0x25a   : > { %v2767_v26 = vpop.f32.mrf.mxu0 }
 0x25b   : > { %v1092_v28 = vpack.c.bf16 %v1089_v54, %v1088_v53  ;;  %v1249_v14 = vmax.f32 %v1227_v25, 0.0  ;;  %v1453_v54 = vpop.permute.xlu0 %1452 }
 0x25c   : > { %v1229_v29 = vpop.f32.mrf.mxu0 }
 0x25d   : > { %v1230_v31 = vadd.f32 %v3268_v42, %v1229_v29  ;;  %2758 = vmatmul.mubr.msk.bf16.gmra.mxu1 %vm651_vm2, %v1092_v28  ;;  %v1279_v0 = vmul.f32 %v1257_v59, %v1249_v14  ;;  %v1457_v14 = vpop.permute.xlu1 %1456 }
 0x25e   : > { %v2768_v17 = vpop.f32.mrf.mxu0  ;;  %2779 = vmatprep.mubr.msk.bf16.mxu1 %vm3022_vm0, %v3021_v1 }
 0x25f   : > { %v1250_v58 = vmax.f32 %v1230_v31, 0.0  ;;  %v3003_v17 = vld [vmem:[%s3687_s4 + $0x30] sm:$0xff]  }
 0x260   : > { %v1234_v33 = vpop.f32.mrf.mxu0 }
 0x261   : > { %v1280_v2 = vmul.f32 %v1261_v56, %v1250_v58  ;;  %v1235_v7 = vadd.f32 %v3268_v42, %v1234_v33 }
 0x262   : > { %v2771_v9 = vpop.f32.mrf.mxu0 }
 0x263   : > { %v1285_v34 = vpack.c.bf16 %v1280_v2, %v1279_v0  ;;  %v1251_v38 = vmax.f32 %v1235_v7, 0.0  ;;  %v1461_v7 = vpop.permute.xlu1 %1460 }
 0x264   : > { %v1237_v36 = vpop.f32.mrf.mxu0 }
 0x265   : > { %v1238_v41 = vadd.f32 %v3268_v42, %v1237_v36  ;;  %2780 = vmatmul.mubr.msk.bf16.vlgmr.msra.gmra.mxu1 %vm651_vm2, %v1285_v34  ;;  %v1281_v3 = vmul.f32 %v1265_v60, %v1251_v38 }
 0x266   : > { %2808 = vmatpush3.bf16.msra.mxu1 %v3002_v11  ;;  %v2772_v44 = vpop.f32.mrf.mxu0  ;;  %2783 = vmatprep.mubr.msk.bf16.mxu1 %vm3022_vm0, %v3021_v1 }
 0x267   : > { %v1252_v61 = vmax.f32 %v1238_v41, 0.0  ;;  %2837 = vmatprep.subr.bf16.mxu1 %v3021_v1 }
 0x268   : > { %v1242_v63 = vpop.f32.mrf.mxu0 }
 0x269   : > { %v1282_v4 = vmul.f32 %v1269_v62, %v1252_v61  ;;  %v1243_v5 = vadd.f32 %v3268_v42, %v1242_v63  ;;  %v1469_v63 = vpop.permute.xlu1 %1468 }
 0x26a   : > { %v2775_v6 = vpop.f32.mrf.mxu0 }
 0x26b   : > { %v1286_v13 = vpack.c.bf16 %v1282_v4, %v1281_v3  ;;  %v1253_v18 = vmax.f32 %v1243_v5, 0.0  ;;  %v1465_v4 = vpop.permute.xlu0 %1464 }
 0x26c   : > { %v1245_v15 = vpop.f32.mrf.mxu0 }
 0x26d   : > { %v1246_v19 = vadd.f32 %v3268_v42, %v1245_v15  ;;  %2784 = vmatmul.mubr.msk.bf16.gmra.mxu1 %vm651_vm2, %v1286_v13  ;;  %v1283_v45 = vmul.f32 %v1273_v40, %v1253_v18 }
 0x26e   : > { %v2776_v20 = vpop.f32.mrf.mxu0  ;;  %2787 = vmatprep.mubr.msk.bf16.mxu1 %vm3022_vm0, %v3021_v1 }
 0x26f   : > { %v1254_v21 = vmax.f32 %v1246_v19, 0.0 }
 0x270   : > { %v1418_v43 = vpop.f32.mrf.mxu0 }
 0x271   : > { %v1284_v46 = vmul.f32 %v1277_v23, %v1254_v21  ;;  %v1419_v47 = vadd.f32 %v3268_v42, %v1418_v43  ;;  %v1645_v43 = vpop.permute.xlu1 %1644 }
 0x272   : > { %v2797_v48 = vpop.f32.mrf.mxu0 }
 0x273   : > { %v1287_v49 = vpack.c.bf16 %v1284_v46, %v1283_v45  ;;  %v1441_v22 = vmax.f32 %v1419_v47, 0.0  ;;  %v1641_v46 = vpop.permute.xlu0 %1640 }
 0x274   : > { %v1421_v51 = vpop.f32.mrf.mxu0 }
 0x275   : > { %v1422_v24 = vadd.f32 %v3268_v42, %v1421_v51  ;;  %2788 = vmatmul.mubr.msk.bf16.gmra.mxu1 %vm651_vm2, %v1287_v49  ;;  %v1471_v26 = vmul.f32 %v1449_v50, %v1441_v22  ;;  %v3004_v22 = vld [vmem:[%s3687_s4 + $0x38] sm:$0xff]  }
 0x276   : > { %v2798_v52 = vpop.f32.mrf.mxu0  ;;  %2809 = vmatprep.mubr.msk.bf16.mxu1 %vm3022_vm0, %v3021_v1 }
 0x277   : > { %v1442_v53 = vmax.f32 %v1422_v24, 0.0 }
 0x278   : > { %v1426_v25 = vpop.f32.mrf.mxu0 }
 0x279   : > { %v1472_v28 = vmul.f32 %v1453_v54, %v1442_v53  ;;  %v1427_v29 = vadd.f32 %v3268_v42, %v1426_v25 }
 0x27a   : > { %v2801_v31 = vpop.f32.mrf.mxu0 }
 0x27b   : > { %v1477_v56 = vpack.c.bf16 %v1472_v28, %v1471_v26  ;;  %v1443_v59 = vmax.f32 %v1427_v29, 0.0  ;;  %v1649_v26 = vpop.permute.xlu1 %1648  ;;  %v1653_v29 = vpop.permute.xlu0 %1652 }
 0x27c   : > { %v1429_v58 = vpop.f32.mrf.mxu0 }
 0x27d   : > { %v1430_v33 = vadd.f32 %v3268_v42, %v1429_v58  ;;  %2810 = vmatmul.mubr.msk.bf16.vlgmr.msra.gmra.mxu1 %vm651_vm2, %v1477_v56  ;;  %v1473_v11 = vmul.f32 %v1457_v14, %v1443_v59 }
 0x27e   : > { %2838 = vmatpush3.bf16.msra.mxu1 %v3003_v17  ;;  %v2802_v0 = vpop.f32.mrf.mxu0  ;;  %2813 = vmatprep.mubr.msk.bf16.mxu1 %vm3022_vm0, %v3021_v1 }
 0x27f   : > { %v1444_v2 = vmax.f32 %v1430_v33, 0.0  ;;  %2867 = vmatprep.subr.bf16.mxu1 %v3021_v1 }
 0x280   : > { %v1434_v9 = vpop.f32.mrf.mxu0 }
 0x281   : > { %v1474_v34 = vmul.f32 %v1461_v7, %v1444_v2  ;;  %v1435_v36 = vadd.f32 %v3268_v42, %v1434_v9  ;;  %v1657_v9 = vpop.permute.xlu1 %1656 }
 0x282   : > { %v2805_v38 = vpop.f32.mrf.mxu0 }
 0x283   : > { %v1478_v41 = vpack.c.bf16 %v1474_v34, %v1473_v11  ;;  %v1445_v60 = vmax.f32 %v1435_v36, 0.0  ;;  %v1661_v34 = vpop.permute.xlu0 %1660 }
 0x284   : > { %v1437_v44 = vpop.f32.mrf.mxu0 }
 0x285   : > { %v1438_v61 = vadd.f32 %v3268_v42, %v1437_v44  ;;  %2814 = vmatmul.mubr.msk.bf16.gmra.mxu1 %vm651_vm2, %v1478_v41  ;;  %v1475_v6 = vmul.f32 %v1465_v4, %v1445_v60 }
 0x286   : > { %v2806_v62 = vpop.f32.mrf.mxu0  ;;  %2817 = vmatprep.mubr.msk.bf16.mxu1 %vm3022_vm0, %v3021_v1 }
 0x287   : > { %v1446_v3 = vmax.f32 %v1438_v61, 0.0  ;;  %v1833_v62 = vpop.permute.xlu1 %1832 }
 0x288   : > { %v1610_v5 = vpop.f32.mrf.mxu0 }
 0x289   : > { %v1476_v13 = vmul.f32 %v1469_v63, %v1446_v3  ;;  %v1611_v15 = vadd.f32 %v3268_v42, %v1610_v5 }
 0x28a   : > { %v2827_v18 = vpop.f32.mrf.mxu0 }
 0x28b   : > { %v1479_v19 = vpack.c.bf16 %v1476_v13, %v1475_v6  ;;  %v1633_v40 = vmax.f32 %v1611_v15, 0.0  ;;  %v1837_v13 = vpop.permute.xlu0 %1836 }
 0x28c   : > { %v1613_v20 = vpop.f32.mrf.mxu0 }
 0x28d   : > { %v1614_v21 = vadd.f32 %v3268_v42, %v1613_v20  ;;  %2818 = vmatmul.mubr.msk.bf16.gmra.mxu1 %vm651_vm2, %v1479_v19  ;;  %v1663_v48 = vmul.f32 %v1641_v46, %v1633_v40  ;;  %v1841_v40 = vpop.permute.xlu1 %1840 }
 0x28e   : > { %v2828_v23 = vpop.f32.mrf.mxu0  ;;  %2839 = vmatprep.mubr.msk.bf16.mxu1 %vm3022_vm0, %v3021_v1 }
 0x28f   : > { %v1634_v45 = vmax.f32 %v1614_v21, 0.0  ;;  %v3005_v23 = vld [vmem:[%s3687_s4 + $0x40] sm:$0xff]  }
 0x290   : > { %v1618_v47 = vpop.f32.mrf.mxu0 }
 0x291   : > { %v1664_v49 = vmul.f32 %v1645_v43, %v1634_v45  ;;  %v1619_v50 = vadd.f32 %v3268_v42, %v1618_v47 }
 0x292   : > { %v2831_v51 = vpop.f32.mrf.mxu0 }
 0x293   : > { %v1669_v24 = vpack.c.bf16 %v1664_v49, %v1663_v48  ;;  %v1635_v53 = vmax.f32 %v1619_v50, 0.0  ;;  %v1845_v50 = vpop.permute.xlu1 %1844 }
 0x294   : > { %v1621_v52 = vpop.f32.mrf.mxu0 }
 0x295   : > { %v1622_v54 = vadd.f32 %v3268_v42, %v1621_v52  ;;  %2840 = vmatmul.mubr.msk.bf16.vlgmr.msra.gmra.mxu1 %vm651_vm2, %v1669_v24  ;;  %v1665_v31 = vmul.f32 %v1649_v26, %v1635_v53  ;;  %v3009_v52 = vld [vmem:[%s3686_s3] ss:$0 sm:$0xff] }
 0x296   : > { %2868 = vmatpush3.bf16.msra.mxu1 %v3004_v22  ;;  %v2832_v25 = vpop.f32.mrf.mxu0  ;;  %2843 = vmatprep.mubr.msk.bf16.mxu1 %vm3022_vm0, %v3021_v1 }
 0x297   : > { %v1636_v28 = vmax.f32 %v1622_v54, 0.0  ;;  %2897 = vmatprep.subr.bf16.mxu1 %v3021_v1 }
 0x298   : > { %v1626_v14 = vpop.f32.mrf.mxu0 }
 0x299   : > { %v1666_v17 = vmul.f32 %v1653_v29, %v1636_v28  ;;  %v1627_v56 = vadd.f32 %v3268_v42, %v1626_v14  ;;  %v1853_v14 = vpop.permute.xlu1 %1852 }
 0x29a   : > { %v2835_v58 = vpop.f32.mrf.mxu0 }
 0x29b   : > { %v1670_v59 = vpack.c.bf16 %v1666_v17, %v1665_v31  ;;  %v1637_v0 = vmax.f32 %v1627_v56, 0.0  ;;  %v1849_v17 = vpop.permute.xlu0 %1848 }
 0x29c   : > { %v1629_v33 = vpop.f32.mrf.mxu0 }
 0x29d   : > { %v1630_v2 = vadd.f32 %v3268_v42, %v1629_v33  ;;  %2844 = vmatmul.mubr.msk.bf16.gmra.mxu1 %vm651_vm2, %v1670_v59  ;;  %v1667_v38 = vmul.f32 %v1657_v9, %v1637_v0 }
 0x29e   : > { %v2836_v7 = vpop.f32.mrf.mxu0  ;;  %2847 = vmatprep.mubr.msk.bf16.mxu1 %vm3022_vm0, %v3021_v1 }
 0x29f   : > { %v1638_v11 = vmax.f32 %v1630_v2, 0.0 }
 0x2a0   : > { %v1802_v36 = vpop.f32.mrf.mxu0 }
 0x2a1   : > { %v1668_v41 = vmul.f32 %v1661_v34, %v1638_v11  ;;  %v1803_v44 = vadd.f32 %v3268_v42, %v1802_v36  ;;  %v2038_v36 = vpop.permute.xlu1 %2037 }
 0x2a2   : > { %v2857_v60 = vpop.f32.mrf.mxu0 }
 0x2a3   : > { %v1671_v61 = vpack.c.bf16 %v1668_v41, %v1667_v38  ;;  %v1825_v3 = vmax.f32 %v1803_v44, 0.0  ;;  %v2034_v41 = vpop.permute.xlu0 %2033 }
 0x2a4   : > { %v1805_v63 = vpop.f32.mrf.mxu0 }
 0x2a5   : > { %v1806_v4 = vadd.f32 %v3268_v42, %v1805_v63  ;;  %2848 = vmatmul.mubr.msk.bf16.gmra.mxu1 %vm651_vm2, %v1671_v61  ;;  %v1855_v18 = vmul.f32 %v1833_v62, %v1825_v3 }
 0x2a6   : > { %v2858_v5 = vpop.f32.mrf.mxu0  ;;  %2869 = vmatprep.mubr.msk.bf16.mxu1 %vm3022_vm0, %v3021_v1 }
 0x2a7   : > { %v1826_v6 = vmax.f32 %v1806_v4, 0.0 }
 0x2a8   : > { %v1810_v15 = vpop.f32.mrf.mxu0 }
 0x2a9   : > { %v1856_v19 = vmul.f32 %v1837_v13, %v1826_v6  ;;  %v1811_v20 = vadd.f32 %v3268_v42, %v1810_v15  ;;  %v2042_v15 = vpop.permute.xlu1 %2041 }
 0x2aa   : > { %v2861_v21 = vpop.f32.mrf.mxu0 }
 0x2ab   : > { %v1861_v43 = vpack.c.bf16 %v1856_v19, %v1855_v18  ;;  %v1827_v46 = vmax.f32 %v1811_v20, 0.0  ;;  %v2046_v19 = vpop.permute.xlu0 %2045 }
 0x2ac   : > { %v1813_v45 = vpop.f32.mrf.mxu0 }
 0x2ad   : > { %v1814_v47 = vadd.f32 %v3268_v42, %v1813_v45  ;;  %2870 = vmatmul.mubr.msk.bf16.vlgmr.msra.gmra.mxu1 %vm651_vm2, %v1861_v43  ;;  %v1857_v22 = vmul.f32 %v1841_v40, %v1827_v46 }
 0x2ae   : > { %2898 = vmatpush3.bf16.msra.mxu1 %v3005_v23  ;;  %v2862_v48 = vpop.f32.mrf.mxu0  ;;  %2873 = vmatprep.mubr.msk.bf16.mxu1 %vm3022_vm0, %v3021_v1 }
 0x2af   : > { %v1828_v49 = vmax.f32 %v1814_v47, 0.0  ;;  %2925 = vmatprep.subr.bf16.mxu1 %v3021_v1 }
 0x2b0   : > { %v1818_v51 = vpop.f32.mrf.mxu0 }
 0x2b1   : > { %v1858_v24 = vmul.f32 %v1845_v50, %v1828_v49  ;;  %v1819_v53 = vadd.f32 %v3009_v52, %v1818_v51  ;;  %v2050_v51 = vpop.permute.xlu1 %2049 }
 0x2b2   : > { %v2865_v42 = vpop.f32.mrf.mxu0 }
 0x2b3   : > { %v1862_v54 = vpack.c.bf16 %v1858_v24, %v1857_v22  ;;  %v1829_v26 = vmax.f32 %v1819_v53, 0.0  ;;  %v2054_v22 = vpop.permute.xlu0 %2053 }
 0x2b4   : > { %v1821_v25 = vpop.f32.mrf.mxu0 }
 0x2b5   : > { %v1822_v28 = vadd.f32 %v3009_v52, %v1821_v25  ;;  %2874 = vmatmul.mubr.msk.bf16.gmra.mxu1 %vm651_vm2, %v1862_v54  ;;  %v1859_v58 = vmul.f32 %v1849_v17, %v1829_v26  ;;  %v3007_v17 = vld [vmem:[%s3691_s8 + $0x8] sm:$0xff]  }
 0x2b6   : > { %v2866_v29 = vpop.f32.mrf.mxu0  ;;  %2877 = vmatprep.mubr.msk.bf16.mxu1 %vm3022_vm0, %v3021_v1 }
 0x2b7   : > { %v1830_v31 = vmax.f32 %v1822_v28, 0.0  ;;  %v771_v28 = vadd.f32 %v3392_v30, %v3480_v10 }
 0x2b8   : > { %v2003_v56 = vpop.f32.mrf.mxu0 }
 0x2b9   : > { %v1860_v59 = vmul.f32 %v1853_v14, %v1830_v31  ;;  %v2004_v33 = vadd.f32 %v3009_v52, %v2003_v56  ;;  %v3006_v31 = vld [vmem:[%s3689_s6] sm:$0xff]  }
 0x2ba   : > { %v2887_v0 = vpop.f32.mrf.mxu0  ;;  %2912 = vmatpush3.bf16.msra.mxu0 %v3006_v31 }
 0x2bb   : > { %v1863_v2 = vpack.c.bf16 %v1860_v59, %v1859_v58  ;;  %v2026_v9 = vmax.f32 %v2004_v33, 0.0  ;;  %v779_v58 = vadd.f32 %v3405_v55, %v3484_v35 }
 0x2bc   : > { %v2006_v7 = vpop.f32.mrf.mxu0 }
 0x2bd   : > { %v2007_v11 = vadd.f32 %v3009_v52, %v2006_v7  ;;  %2878 = vmatmul.mubr.msk.bf16.gmra.mxu1 %vm651_vm2, %v1863_v2  ;;  %v2056_v60 = vmul.f32 %v2034_v41, %v2026_v9  ;;  %v784_v2 = vadd.f32 %v3408_v57, %v3486_v37 }
 0x2be   : > { %v2888_v34 = vpop.f32.mrf.mxu0  ;;  %2899 = vmatprep.mubr.msk.bf16.mxu1 %vm3022_vm0, %v3021_v1 }
 0x2bf   : > { %v2027_v38 = vmax.f32 %v2007_v11, 0.0  ;;  %v787_v11 = vadd.f32 %v3415_v16, %v3488_v39 }
 0x2c0   : > { %v2011_v44 = vpop.f32.mrf.mxu0 }
 0x2c1   : > { %v2057_v61 = vmul.f32 %v2038_v36, %v2027_v38  ;;  %v2012_v62 = vadd.f32 %v3009_v52, %v2011_v44  ;;  %v3010_v36 = vld [vmem:[%s3124_s22 + $0x4] ss:$12 sps:$4 sm:$0xff]  }
 0x2c2   : > { %v2891_v63 = vpop.f32.mrf.mxu0 }
 0x2c3   : > { %v2062_v3 = vpack.c.bf16 %v2057_v61, %v2056_v60  ;;  %v2028_v5 = vmax.f32 %v2012_v62, 0.0  ;;  %v3011_v61 = vld [vmem:[%s3124_s22 + $0x1c] ss:$12 sps:$4 sm:$0xff]  }
 0x2c4   : > { %v2014_v4 = vpop.f32.mrf.mxu0 }
 0x2c5   : > { %v2015_v6 = vadd.f32 %v3009_v52, %v2014_v4  ;;  %2900 = vmatmul.mubr.msk.bf16.vlgmr.msra.gmra.mxu1 %vm651_vm2, %v2062_v3  ;;  %v2058_v40 = vmul.f32 %v2042_v15, %v2028_v5  ;;  %v3012_v5 = vld [vmem:[%s3124_s22 + $0x34] ss:$12 sps:$4 sm:$0xff]  }
 0x2c6   : > { %v2892_v13 = vpop.f32.mrf.mxu0  ;;  %2903 = vmatprep.mubr.msk.bf16.mxu1 %vm3022_vm0, %v3021_v1  ;;  %2926 = vmatpush3.bf16.msra.mxu1 %v3007_v17 }
 0x2c7   : > { %v2029_v18 = vmax.f32 %v2015_v6, 0.0  ;;  %2927 = vmatprep.subr.bf16.mxu1 %v3021_v1 }
 0x2c8   : > { %v2019_v20 = vpop.f32.mrf.mxu0 }
 0x2c9   : > { %v2059_v21 = vmul.f32 %v2046_v19, %v2029_v18  ;;  %v2020_v23 = vadd.f32 %v3009_v52, %v2019_v20 }
 0x2ca   : > { %v2895_v43 = vpop.f32.mrf.mxu0 }
 0x2cb   : > { %v2063_v45 = vpack.c.bf16 %v2059_v21, %v2058_v40  ;;  %v2030_v47 = vmax.f32 %v2020_v23, 0.0 }
 0x2cc   : > { %v2022_v46 = vpop.f32.mrf.mxu0 }
 0x2cd   : > { %v2023_v48 = vadd.f32 %v3009_v52, %v2022_v46  ;;  %2904 = vmatmul.mubr.msk.bf16.gmra.mxu1 %vm651_vm2, %v2063_v45  ;;  %v2060_v24 = vmul.f32 %v2050_v51, %v2030_v47  ;;  %v768_v52 = vadd.f32 %v3381_v27, %v3478_v8  ;;  %v776_v27 = vadd.f32 %v3397_v32, %v3482_v12  ;;  %v3008_v12 = vld [vmem:[%s3691_s8] sm:$0xff]  }
 0x2ce   : > { %v2896_v49 = vpop.f32.mrf.mxu0  ;;  %2907 = vmatprep.mubr.msk.bf16.mxu1 %vm3022_vm0, %v3021_v1  ;;  %2928 = vmatpush3.bf16.msra.mxu1 %v3008_v12 }
 0x2cf   : > { %v2031_v50 = vmax.f32 %v2023_v48, 0.0 }
 0x2d1   : > { %v2061_v53 = vmul.f32 %v2054_v22, %v2031_v50 }
 0x2d3   : > { %v2064_v42 = vpack.c.bf16 %v2061_v53, %v2060_v24 }
 0x2d5   : > { %2908 = vmatmul.mubr.msk.bf16.gmra.mxu1 %vm651_vm2, %v2064_v42 }
 0x2d6   : > { %2929 = vmatprep.mubr.msk.bf16.mxu1 %vm3022_vm0, %v3021_v1 }
 0x2dd   : > { %2930 = vmatmul.mubr.msk.bf16.vlgmr.msra.gmra.mxu1 %vm417_vm1, %v3010_v36 }
 0x2de   : > { %2933 = vmatprep.mubr.msk.bf16.mxu1 %vm3022_vm0, %v3021_v1 }
 0x2e5   : > { %2934 = vmatmul.mubr.msk.bf16.gmra.mxu1 %vm417_vm1, %v3011_v61 }
 0x2e6   : > { %2937 = vmatprep.mubr.msk.bf16.mxu1 %vm3022_vm0, %v3021_v1 }
 0x2ed   : > { %2938 = vmatmul.mubr.msk.bf16.gmra.mxu1 %vm417_vm1, %v3012_v5 }
 0x2f5   : > { %v953_v54 = vpop.f32.mrf.mxu1 }
 0x2f6   : > { %v976_v25 = vadd.f32 %v953_v54, %v768_v52 }
 0x2f7   : > { %v2721_v26 = vpop.f32.mrf.mxu1 }
 0x2f9   : > { %v956_v29 = vpop.f32.mrf.mxu1 }
 0x2fa   : > { %v977_v14 = vadd.f32 %v956_v29, %v771_v28 }
 0x2fb   : > { %v2722_v56 = vpop.f32.mrf.mxu1 }
 0x2fd   : > { %v961_v8 = vpop.f32.mrf.mxu1 }
 0x2fe   : > { %v978_v30 = vadd.f32 %v961_v8, %v776_v27 }
 0x2ff   : > { %v2725_v10 = vpop.f32.mrf.mxu1 }
 0x301   : > { %v964_v59 = vpop.f32.mrf.mxu1 }
 0x302   : > { %v979_v33 = vadd.f32 %v964_v59, %v779_v58 }
 0x303   : > { %v2726_v0 = vpop.f32.mrf.mxu1 }
 0x305   : > { %v969_v7 = vpop.f32.mrf.mxu1 }
 0x306   : > { %v980_v9 = vadd.f32 %v969_v7, %v784_v2 }
 0x307   : > { %v2729_v32 = vpop.f32.mrf.mxu1 }
 0x309   : > { %v972_v34 = vpop.f32.mrf.mxu1 }
 0x30a   : > { %v981_v55 = vadd.f32 %v972_v34, %v787_v11 }
 0x30b   : > { %v2730_v35 = vpop.f32.mrf.mxu1 }
 0x30d   : > { %v1145_v38 = vpop.f32.mrf.mxu1 }
 0x30e   : > { %v1168_v57 = vadd.f32 %v1145_v38, %v976_v25 }
 0x30f   : > { %v2751_v37 = vpop.f32.mrf.mxu1 }
 0x311   : > { %v1148_v41 = vpop.f32.mrf.mxu1 }
 0x312   : > { %v1169_v44 = vadd.f32 %v1148_v41, %v977_v14 }
 0x313   : > { %v2752_v60 = vpop.f32.mrf.mxu1 }
 0x315   : > { %v1153_v16 = vpop.f32.mrf.mxu1 }
 0x316   : > { %v1170_v39 = vadd.f32 %v1153_v16, %v978_v30 }
 0x317   : > { %v2755_v62 = vpop.f32.mrf.mxu1 }
 0x319   : > { %v1156_v63 = vpop.f32.mrf.mxu1 }
 0x31a   : > { %v1171_v3 = vadd.f32 %v1156_v63, %v979_v33 }
 0x31b   : > { %v2756_v4 = vpop.f32.mrf.mxu1 }
 0x31d   : > { %v1161_v6 = vpop.f32.mrf.mxu1 }
 0x31e   : > { %v1172_v13 = vadd.f32 %v1161_v6, %v980_v9 }
 0x31f   : > { %v2759_v15 = vpop.f32.mrf.mxu1 }
 0x321   : > { %v1164_v18 = vpop.f32.mrf.mxu1 }
 0x322   : > { %v1173_v19 = vadd.f32 %v1164_v18, %v981_v55 }
 0x323   : > { %v2760_v20 = vpop.f32.mrf.mxu1 }
 0x325   : > { %v1340_v40 = vpop.f32.mrf.mxu1 }
 0x326   : > { %v1363_v21 = vadd.f32 %v1340_v40, %v1168_v57 }
 0x327   : > { %v2781_v23 = vpop.f32.mrf.mxu1 }
 0x328   : > { %v2525_v23 = vld [vmem:[%s3688_s5] ss:$0 sm:$0xff] }
 0x329   : > { %v1343_v43 = vpop.f32.mrf.mxu1 }
 0x32a   : > { %v1364_v45 = vadd.f32 %v1343_v43, %v1169_v44 }
 0x32b   : > { %v2782_v46 = vpop.f32.mrf.mxu1 }
 0x32d   : > { %v1348_v47 = vpop.f32.mrf.mxu1 }
 0x32e   : > { %v1365_v48 = vadd.f32 %v1348_v47, %v1170_v39 }
 0x32f   : > { %v2785_v49 = vpop.f32.mrf.mxu1 }
 0x331   : > { %v1351_v50 = vpop.f32.mrf.mxu1 }
 0x332   : > { %v1366_v51 = vadd.f32 %v1351_v50, %v1171_v3 }
 0x333   : > { %v2786_v22 = vpop.f32.mrf.mxu1 }
 0x335   : > { %v1356_v24 = vpop.f32.mrf.mxu1 }
 0x336   : > { %v1367_v53 = vadd.f32 %v1356_v24, %v1172_v13 }
 0x337   : > { %v2789_v42 = vpop.f32.mrf.mxu1 }
 0x339   : > { %v1359_v52 = vpop.f32.mrf.mxu1 }
 0x33a   : > { %v1368_v54 = vadd.f32 %v1359_v52, %v1173_v19 }
 0x33b   : > { %v2790_v25 = vpop.f32.mrf.mxu1 }
 0x33d   : > { %v1532_v26 = vpop.f32.mrf.mxu1 }
 0x33e   : > { %v1555_v28 = vadd.f32 %v1532_v26, %v1363_v21 }
 0x33f   : > { %v2811_v29 = vpop.f32.mrf.mxu1 }
 0x341   : > { %v1535_v14 = vpop.f32.mrf.mxu1 }
 0x342   : > { %v1556_v31 = vadd.f32 %v1535_v14, %v1364_v45 }
 0x343   : > { %v2812_v17 = vpop.f32.mrf.mxu1 }
 0x345   : > { %v1540_v56 = vpop.f32.mrf.mxu1 }
 0x346   : > { %v1557_v27 = vadd.f32 %v1540_v56, %v1365_v48 }
 0x347   : > { %v2815_v8 = vpop.f32.mrf.mxu1 }
 0x349   : > { %v1543_v30 = vpop.f32.mrf.mxu1 }
 0x34a   : > { %v1558_v10 = vadd.f32 %v1543_v30, %v1366_v51 }
 0x34b   : > { %v2816_v58 = vpop.f32.mrf.mxu1 }
 0x34d   : > { %v1548_v59 = vpop.f32.mrf.mxu1 }
 0x34e   : > { %v1559_v33 = vadd.f32 %v1548_v59, %v1367_v53 }
 0x34f   : > { %v2819_v0 = vpop.f32.mrf.mxu1 }
 0x351   : > { %v1551_v2 = vpop.f32.mrf.mxu1 }
 0x352   : > { %v1560_v7 = vadd.f32 %v1551_v2, %v1368_v54 }
 0x353   : > { %v2820_v9 = vpop.f32.mrf.mxu1 }
 0x355   : > { %v1724_v32 = vpop.f32.mrf.mxu1 }
 0x356   : > { %v1747_v15 = vadd.f32 %v1724_v32, %v1555_v28 }
 0x357   : > { %v2841_v12 = vpop.f32.mrf.mxu1 }
 0x359   : > { %v1727_v11 = vpop.f32.mrf.mxu1 }
 0x35a   : > { %v1748_v40 = vadd.f32 %v1727_v11, %v1556_v31 }
 0x35b   : > { %v2842_v34 = vpop.f32.mrf.mxu1 }
 0x35d   : > { %v1732_v55 = vpop.f32.mrf.mxu1 }
 0x35e   : > { %v1749_v47 = vadd.f32 %v1732_v55, %v1557_v27 }
 0x35f   : > { %v2845_v35 = vpop.f32.mrf.mxu1 }
 0x361   : > { %v1735_v36 = vpop.f32.mrf.mxu1 }
 0x362   : > { %v1750_v53 = vadd.f32 %v1735_v36, %v1558_v10 }
 0x363   : > { %v2846_v38 = vpop.f32.mrf.mxu1 }
 0x365   : > { %v1740_v57 = vpop.f32.mrf.mxu1 }
 0x366   : > { %v1751_v14 = vadd.f32 %v1740_v57, %v1559_v33 }
 0x367   : > { %v2849_v37 = vpop.f32.mrf.mxu1 }
 0x369   : > { %v1743_v41 = vpop.f32.mrf.mxu1 }
 0x36a   : > { %v1752_v10 = vadd.f32 %v1743_v41, %v1560_v7 }
 0x36b   : > { %v2850_v44 = vpop.f32.mrf.mxu1 }
 0x36d   : > { %v1916_v60 = vpop.f32.mrf.mxu1 }
 0x36e   : > { %v1939_v19 = vadd.f32 %v1916_v60, %v1747_v15 }
 0x36f   : > { %v2871_v61 = vpop.f32.mrf.mxu1 }
 0x371   : > { %v1919_v16 = vpop.f32.mrf.mxu1 }
 0x372   : > { %v1940_v45 = vadd.f32 %v1919_v16, %v1748_v40 }
 0x373   : > { %v2872_v39 = vpop.f32.mrf.mxu1 }
 0x375   : > { %v1924_v62 = vpop.f32.mrf.mxu1 }
 0x376   : > { %v1941_v51 = vadd.f32 %v1924_v62, %v1749_v47 }
 0x377   : > { %v2875_v63 = vpop.f32.mrf.mxu1 }
 0x379   : > { %v1927_v3 = vpop.f32.mrf.mxu1 }
 0x37a   : > { %v1942_v26 = vadd.f32 %v1927_v3, %v1750_v53 }
 0x37b   : > { %v2876_v4 = vpop.f32.mrf.mxu1 }
 0x37c   : > { %v2526_v4 = vld [vmem:[%s3690_s7] ss:$0 sm:$0xff] }
 0x37d   : > { %v1932_v5 = vpop.f32.mrf.mxu1 }
 0x37e   : > { %v1943_v27 = vadd.f32 %v1932_v5, %v1751_v14 }
 0x37f   : > { %v2879_v6 = vpop.f32.mrf.mxu1 }
 0x381   : > { %v1935_v13 = vpop.f32.mrf.mxu1 }
 0x382   : > { %v1944_v9 = vadd.f32 %v1935_v13, %v1752_v10 }
 0x383   : > { %v2880_v18 = vpop.f32.mrf.mxu1 }
 0x385   : > { %v2117_v20 = vpop.f32.mrf.mxu1 }
 0x386   : > { %v2140_v21 = vadd.f32 %v2117_v20, %v1939_v19 }
 0x387   : > { %v2901_v43 = vpop.f32.mrf.mxu1 }
 0x388   : > { %v2153_v48 = vadd.f32 %v2525_v23, %v2140_v21 }
 0x389   : > { %v2120_v46 = vpop.f32.mrf.mxu1 }
 0x38a   : > { %v2141_v49 = vadd.f32 %v2120_v46, %v1940_v45  ;;  %v2159_v42 = vmax.f32 %v2153_v48, 0.0 }
 0x38b   : > { %v2902_v50 = vpop.f32.mrf.mxu1 }
 0x38c   : > { %v2154_v22 = vadd.f32 %v2525_v23, %v2141_v49 }
 0x38d   : > { %v2125_v24 = vpop.f32.mrf.mxu1 }
 0x38e   : > { %v2160_v52 = vmax.f32 %v2154_v22, 0.0  ;;  %v2142_v54 = vadd.f32 %v2125_v24, %v1941_v51 }
 0x38f   : > { %v2905_v25 = vpop.f32.mrf.mxu1 }
 0x390   : > { %v2165_v28 = vpack.c.bf16 %v2160_v52, %v2159_v42  ;;  %v2155_v31 = vadd.f32 %v2525_v23, %v2142_v54 }
 0x391   : > { %v2128_v29 = vpop.f32.mrf.mxu1 }
 0x392   : > { %v2143_v17 = vadd.f32 %v2128_v29, %v1942_v26  ;;  %2914 = vmatmul.mubr.msk.bf16.vlgmr.msra.gmra.mxu0 %vm651_vm2, %v2165_v28  ;;  %v2161_v58 = vmax.f32 %v2155_v31, 0.0 }
 0x393   : > { %v2906_v56 = vpop.f32.mrf.mxu1  ;;  %2917 = vmatprep.mubr.msk.bf16.mxu0 %vm3022_vm0, %v3021_v1 }
 0x394   : > { %v2156_v8 = vadd.f32 %v2525_v23, %v2143_v17 }
 0x395   : > { %v2133_v30 = vpop.f32.mrf.mxu1 }
 0x396   : > { %v2162_v59 = vmax.f32 %v2156_v8, 0.0  ;;  %v2144_v0 = vadd.f32 %v2133_v30, %v1943_v27 }
 0x397   : > { %v2909_v2 = vpop.f32.mrf.mxu1 }
 0x398   : > { %v2166_v32 = vpack.c.bf16 %v2162_v59, %v2161_v58  ;;  %v2157_v33 = vadd.f32 %v2525_v23, %v2144_v0 }
 0x399   : > { %v2136_v12 = vpop.f32.mrf.mxu1 }
 0x39a   : > { %v2145_v11 = vadd.f32 %v2136_v12, %v1944_v9  ;;  %2918 = vmatmul.mubr.msk.bf16.gmra.mxu0 %vm651_vm2, %v2166_v32  ;;  %v2163_v35 = vmax.f32 %v2157_v33, 0.0 }
 0x39b   : > { %v2910_v34 = vpop.f32.mrf.mxu1  ;;  %2921 = vmatprep.mubr.msk.bf16.mxu0 %vm3022_vm0, %v3021_v1  ;;  %v2531_v1 = vld [vmem:[%s3692_s9] ss:$0 sm:$0xff] }
 0x39c   : > { %v2158_v55 = vadd.f32 %v2525_v23, %v2145_v11 }
 0x39d   : > { %v2306_v7 = vpop.f32.mrf.mxu1 }
 0x39e   : > { %v2164_v36 = vmax.f32 %v2158_v55, 0.0  ;;  %v2307_v5 = vadd.f32 %v2531_v1, %v2306_v7 }
 0x39f   : > { %v2931_v57 = vpop.f32.mrf.mxu1 }
 0x3a0   : > { %v2167_v38 = vpack.c.bf16 %v2164_v36, %v2163_v35 }
 0x3a1   : > { %v2309_v37 = vpop.f32.mrf.mxu1 }
 0x3a2   : > { %2922 = vmatmul.mubr.msk.bf16.gmra.mxu0 %vm651_vm2, %v2167_v38  ;;  %v2310_v20 = vadd.f32 %v2531_v1, %v2309_v37 }
 0x3a3   : > { %v2932_v41 = vpop.f32.mrf.mxu1 }
 0x3a5   : > { %v2314_v44 = vpop.f32.mrf.mxu1 }
 0x3a6   : > { %v2315_v45 = vadd.f32 %v2531_v1, %v2314_v44 }
 0x3a7   : > { %v2935_v60 = vpop.f32.mrf.mxu1 }
 0x3a9   : > { %v2317_v61 = vpop.f32.mrf.mxu1 }
 0x3aa   : > { %v2318_v53 = vadd.f32 %v2531_v1, %v2317_v61 }
 0x3ab   : > { %v2936_v16 = vpop.f32.mrf.mxu1 }
 0x3ad   : > { %v2322_v39 = vpop.f32.mrf.mxu1 }
 0x3ae   : > { %v2323_v26 = vadd.f32 %v2531_v1, %v2322_v39 }
 0x3af   : > { %v2939_v62 = vpop.f32.mrf.mxu1 }
 0x3b1   : > { %v2325_v63 = vpop.f32.mrf.mxu1 }
 0x3b2   : > { %v2326_v30 = vadd.f32 %v2531_v1, %v2325_v63 }
 0x3b3   : > { %v2940_v3 = vpop.f32.mrf.mxu1 }
 0x452   : > { %v2226_v6 = vpop.f32.mrf.mxu0 }
 0x453   : > { %v2227_v13 = vadd.f32 %v2526_v4, %v2226_v6 }
 0x454   : > { %v2915_v15 = vpop.f32.mrf.mxu0 }
 0x455   : > { %v2329_v18 = vadd.f32 %v2307_v5, %v2227_v13 }
 0x456   : > { %v2229_v19 = vpop.f32.mrf.mxu0 }
 0x457   : > { %v2335_v40 = vmax.f32 %v2329_v18, 0.0  ;;  %v2230_v21 = vadd.f32 %v2526_v4, %v2229_v19 }
 0x458   : > { %v2916_v23 = vpop.f32.mrf.mxu0 }
 0x459   : > { %v2545_v43 = vpack.c.bf16 %v2335_v40, %v2335_v40  ;;  %v2330_v46 = vadd.f32 %v2310_v20, %v2230_v21 }
 0x45a   : > { %v2234_v47 = vpop.f32.mrf.mxu0 }
 0x45b   : > { %2366 = vst.msk [vmem:[%s3666_s23] sm:$0xf] %vm2365_vm3, %v2545_v43  ;;  %v2336_v48 = vmax.f32 %v2330_v46, 0.0  ;;  %v2235_v49 = vadd.f32 %v2526_v4, %v2234_v47 }
 0x45c   : > { %v2919_v50 = vpop.f32.mrf.mxu0 }
 0x45d   : > { %v2546_v51 = vpack.c.bf16 %v2336_v48, %v2336_v48  ;;  %v2331_v22 = vadd.f32 %v2315_v45, %v2235_v49 }
 0x45e   : > { %v2237_v24 = vpop.f32.mrf.mxu0 }
 0x45f   : > { %2367 = vst.msk [vmem:[%s3666_s23 + $0x4] sm:$0xf] %vm2365_vm3, %v2546_v51  ;;  %v2337_v42 = vmax.f32 %v2331_v22, 0.0  ;;  %v2238_v52 = vadd.f32 %v2526_v4, %v2237_v24 }
 0x460   : > { %v2920_v54 = vpop.f32.mrf.mxu0 }
 0x461   : > { %v2547_v25 = vpack.c.bf16 %v2337_v42, %v2337_v42  ;;  %v2332_v28 = vadd.f32 %v2318_v53, %v2238_v52 }
 0x462   : > { %v2242_v29 = vpop.f32.mrf.mxu0 }
 0x463   : > { %2368 = vst.msk [vmem:[%s3666_s23 + $0x8] sm:$0xf] %vm2365_vm3, %v2547_v25  ;;  %v2338_v14 = vmax.f32 %v2332_v28, 0.0  ;;  %v2243_v31 = vadd.f32 %v2526_v4, %v2242_v29 }
 0x464   : > { %v2923_v17 = vpop.f32.mrf.mxu0 }
 0x465   : > { %v2548_v56 = vpack.c.bf16 %v2338_v14, %v2338_v14  ;;  %v2333_v27 = vadd.f32 %v2323_v26, %v2243_v31 }
 0x466   : > { %v2245_v8 = vpop.f32.mrf.mxu0 }
 0x467   : > { %2369 = vst.msk [vmem:[%s3666_s23 + $0xc] sm:$0xf] %vm2365_vm3, %v2548_v56  ;;  %v2339_v10 = vmax.f32 %v2333_v27, 0.0  ;;  %v2246_v58 = vadd.f32 %v2526_v4, %v2245_v8 }
 0x468   : > { %v2924_v59 = vpop.f32.mrf.mxu0 }
 0x469   : > { %v2549_v0 = vpack.c.bf16 %v2339_v10, %v2339_v10  ;;  %v2334_v2 = vadd.f32 %v2326_v30, %v2246_v58 }
 0x46b   : > { %2370 = vst.msk [vmem:[%s3666_s23 + $0x10] sm:$0xf] %vm2365_vm3, %v2549_v0  ;;  %v2340_v9 = vmax.f32 %v2334_v2, 0.0 }
 0x46d   : > { %v2550_v32 = vpack.c.bf16 %v2340_v9, %v2340_v9 }
 0x46f   : > { %2371 = vst.msk [vmem:[%s3666_s23 + $0x14] sm:$0xf] %vm2365_vm3, %v2550_v32 }
 0x470 PF: > { %s20_s13 = sadd.s32 1, %s3019_s13  }
 0x471   : > { %p17_p4 = scmp.ge.s32.totalorder %s20_s13, 4  }
 0x473   :  { %19 = sbr.rel (!%p17_p4) target bundleno = 1 (0x1), region = 98 }

// kernel: pcb_test_forward.10
= control target key start
LH: loop header
LB: loop body
LE: loop exit
PB: predicated region body
PF: predicated region fallthrough
CT: control target
= control target key end

     0   :  { %s2275_s13 = smov 0   ;;  %s2620_s0 = inlined_call_operand.vmem [shape: bf16[2,12,576], index: 0, kind: input, shape index: {}]   ;;  %s2621_s1 = inlined_call_operand.vmem [shape: f32[1,12,9], index: 1, kind: input, shape index: {}]   ;;  %s2622_s2 = inlined_call_operand.vmem [shape: bf16[64,32], index: 2, kind: input, shape index: {}]   ;;  %s2623_s3 = inlined_call_operand.vmem [shape: f32[1,32], index: 3, kind: input, shape index: {}]   ;;  %s2624_s4 = inlined_call_operand.vmem [shape: bf16[9,32,32], index: 4, kind: input, shape index: {}]   ;;  %s2625_s5 = inlined_call_operand.vmem [shape: f32[1,32], index: 5, kind: input, shape index: {}]   ;;  %s2626_s6 = inlined_call_operand.vmem [shape: bf16[32,128], index: 6, kind: input, shape index: {}]   ;;  %s2627_s7 = inlined_call_operand.vmem [shape: f32[1,128], index: 7, kind: input, shape index: {}]   ;;  %s2628_s8 = inlined_call_operand.vmem [shape: bf16[64,128], index: 8, kind: input, shape index: {}]   ;;  %s2629_s9 = inlined_call_operand.vmem [shape: f32[1,128], index: 9, kind: input, shape index: {}]   ;;  %s2630_s10 = inlined_call_operand.vmem [shape: bf16[2,12,128], index: 10, kind: output, shape index: {}]  }
   0x1 LB: > { %s1744_s14 = sadd.s32 4294967295, %s2206_s13   ;;  %p1748_p0 = scmp.ge.s32.totalorder %s2206_s13, 1  ;;  %s2206_s13 = sphi %s2275_s13, %s20_s13  }
   0x2   : > { %p312_p1 = scmp.lt.s32.totalorder %s2206_s13, 3 }
   0x4   : > { %p313_p2 = pnand %p1748_p0, %p312_p1 }
   0x5   : > { %p350_p3 = scmp.lt.s32.totalorder (!%p313_p2), %s1744_s14, 1  ;;  %s2211_s11 = smov (!%p313_p2), 64  }
   0x6   : > { %316 = sbr.rel (%p313_p2) target bundleno = 2092 (0x82c), region = 60 }
   0xb   : > { %v2286_v0 = vld [vmem:[%s2622_s2 + $0x18] sm:$0xff]   ;;  %v2208_v1 = vmov 0.0   ;;  %s2632_s14 = smov (!%p350_p3, %s1744_s14), 1  ;;  %v2296_v2 = vld [vmem:[%s2622_s2 + $0x10] sm:$0xff]   ;;  %vm2209_vm0 = vmmov 0   ;;  %v2309_v3 = vld [vmem:[%s2622_s2 + $0x8] sm:$0xff]  }
   0xc   : > { %1928 = vmatprep.subr.bf16.mxu0 %v2208_v1  ;;  %1940 = vmatprep.subr.bf16.mxu1 %v2208_v1  ;;  %s2128_s19 = smul.u32 40, %s2632_s14  ;;  %v2210_v4 = vmov 1   ;;  %v2314_v5 = vld [vmem:[%s2621_s1 + $0x8] sm:$0xf]  ;;  %vm413_vm1 = vcmask 523264   ;;  %v2329_v7 = vld [vmem:[%s2622_s2] sm:$0xff]  }
   0xd   : > { %1929 = vmatpush3.bf16.msra.mxu0 %v2286_v0  ;;  %1941 = vmatpush3.bf16.msra.mxu1 %v2286_v0  ;;  %v2335_v8 = vld [vmem:[%s2621_s1] sm:$0xff]  ;;  %v2212_v9 = vmov 0   ;;  %v2213_v10 = vmov 2   ;;  %v2172_v13 = vld [vmem:[%s2624_s4 + $0x18] sm:$0xff]   ;;  %v2173_v14 = vld [vmem:[%s2624_s4 + $0x10] sm:$0xff]   ;;  %v2214_v43 = vmov 3  }
   0xe   : > { %1930 = vmatprep.subr.bf16.mxu0 %v2208_v1  ;;  %1942 = vmatprep.subr.bf16.mxu1 %v2208_v1  ;;  %s2319_s26 = scalar_lea.vmem %s2620_s0, %s2128_s19  ;;  %v2381_v16 = vld [vmem:[%s2623_s3] ss:$0 sm:$0xff]  ;;  %vm553_vm2 = vcmask 261120   ;;  %v2174_v55 = vld [vmem:[%s2624_s4 + $0x8] sm:$0xff]   ;;  %v2178_v61 = vld [vmem:[%s2624_s4 + $0x38] sm:$0xff]   ;;  %v2215_v63 = vmov 4  }
   0xf   : > { %1936 = vmatprep.mubr.msk.bf16.mxu0 %vm2209_vm0, %v2208_v1  ;;  %1948 = vmatprep.mubr.msk.bf16.mxu1 %vm2209_vm0, %v2208_v1  ;;  %v2165_v6 = vld [vmem:[%s2319_s26] ss:$20 sps:$4 sm:$0x3f]   ;;  %v2167_v11 = vld [vmem:[%s2319_s26 + $0x4] ss:$20 sps:$4 sm:$0x3f]  }
  0x10   : > { %2150 = vset.pattern.permute.xlu1 %v2210_v4  ;;  %2149 = vset.pattern.permute.xlu0 %v2210_v4  ;;  %v2175_v57 = vld [vmem:[%s2624_s4] sm:$0xff]   ;;  %v2176_v58 = vld [vmem:[%s2624_s4 + $0x28] sm:$0xff]   ;;  %v2179_v62 = vld [vmem:[%s2624_s4 + $0x30] sm:$0xff]  }
  0x11   : > { %1931 = vmatpush3.bf16.msra.mxu0 %v2296_v2  ;;  %1943 = vmatpush3.bf16.msra.mxu1 %v2296_v2  ;;  %v2177_v59 = vld [vmem:[%s2624_s4 + $0x20] sm:$0xff]   ;;  %v2438_v4 = vld [vmem:[%s2319_s26 + $0x8] ss:$20 sps:$4 sm:$0x3f]  }
  0x12   : > { %1932 = vmatprep.subr.bf16.mxu0 %v2208_v1  ;;  %1944 = vmatprep.subr.bf16.mxu1 %v2208_v1 }
  0x13   : > { %530 = vperm.xlu1 %2150, %v2314_v5   ;;  %477 = vrot.lane.b32.xlu0 %v2165_v6, %s2211_s11 }
  0x15   : > { %1933 = vmatpush3.bf16.msra.mxu0 %v2309_v3  ;;  %1945 = vmatpush3.bf16.msra.mxu1 %v2309_v3 }
  0x16   : > { %1934 = vmatprep.subr.bf16.mxu0 %v2208_v1  ;;  %1946 = vmatprep.subr.bf16.mxu1 %v2208_v1 }
  0x17   : > { %2151 = vset.pattern.permute.xlu1 %v2212_v9  ;;  %526 = vperm.xlu0 %2149, %v2335_v8  }
  0x18   : > { %462 = vperm.xlu1 %2151, %v2335_v8  }
  0x19   : > { %1935 = vmatpush3.bf16.msra.mxu0 %v2329_v7  ;;  %1947 = vmatpush3.bf16.msra.mxu1 %v2329_v7 }
  0x1a   : > { %1968 = vmatprep.subr.bf16.mxu0 %v2208_v1  ;;  %1952 = vmatprep.subr.bf16.mxu1 %v2208_v1 }
  0x1b   : > { %2152 = vset.pattern.permute.xlu0 %v2213_v10 }
  0x1c   : > { %1937 = vmatmul.mubr.msk.bf16.vlgmr.msra.gmra.mxu0 %vm413_vm1, %v2165_v6  ;;  %467 = vperm.xlu1 %2151, %v2314_v5  }
  0x1d   : > { %1969 = vmatpush3.bf16.msra.mxu0 %v2286_v0  ;;  %1976 = vmatprep.mubr.msk.bf16.mxu0 %vm2209_vm0, %v2208_v1 }
  0x1e   : > { %1970 = vmatprep.subr.bf16.mxu0 %v2208_v1  ;;  %704 = vperm.xlu0 %2152, %v2335_v8  }
  0x20   : > { %2153 = vset.pattern.permute.xlu1 %v2213_v10 }
  0x21   : > { %1971 = vmatpush3.bf16.msra.mxu0 %v2296_v2  ;;  %708 = vperm.xlu1 %2153, %v2314_v5  }
  0x22   : > { %1972 = vmatprep.subr.bf16.mxu0 %v2208_v1  ;;  %2154 = vset.pattern.permute.xlu0 %v2214_v43 }
  0x23   : > { %826 = vperm.xlu0 %2154, %v2335_v8  }
  0x25   : > { %1973 = vmatpush3.bf16.msra.mxu0 %v2309_v3  ;;  %777 = vrot.lane.b32.xlu1 %v2167_v11, %s2211_s11 }
  0x26   : > { %1974 = vmatprep.subr.bf16.mxu0 %v2208_v1  ;;  %2155 = vset.pattern.permute.xlu1 %v2214_v43 }
  0x27   : > { %2157 = vset.pattern.permute.xlu0 %v2215_v63 }
  0x28   : > { %955 = vperm.xlu0 %2157, %v2314_v5  }
  0x29   : > { %1975 = vmatpush3.bf16.msra.mxu0 %v2329_v7  ;;  %830 = vperm.xlu1 %2155, %v2314_v5  }
  0x2a   : > { %2000 = vmatprep.subr.bf16.mxu0 %v2208_v1 }
  0x2c   : > { %1977 = vmatmul.mubr.msk.bf16.vlgmr.msra.gmra.mxu0 %vm413_vm1, %v2167_v11 }
  0x2d   : > { %2004 = vmatprep.mubr.msk.bf16.mxu0 %vm2209_vm0, %v2208_v1  ;;  %2001 = vmatpush3.bf16.msra.mxu0 %v2178_v61  ;;  %v2184_v61 = vld [vmem:[%s2624_s4 + $0x58] sm:$0xff]  }
  0x2e   : > { %2002 = vmatprep.subr.bf16.mxu0 %v2208_v1  ;;  %2156 = vset.pattern.permute.xlu1 %v2215_v63  ;;  %v2186_v63 = vld [vmem:[%s2319_s26 + $0xc] ss:$20 sps:$4 sm:$0x3f]  }
  0x2f   : > { %951 = vperm.xlu1 %2156, %v2335_v8  }
  0x31   : > { %2003 = vmatpush3.bf16.msra.mxu0 %v2179_v62  ;;  %v2185_v62 = vld [vmem:[%s2624_s4 + $0x50] sm:$0xff]  }
  0x32   : > { %2008 = vmatprep.subr.bf16.mxu0 %v2208_v1 }
  0x33   : > { %1024 = vrot.lane.b32.xlu1 %v2438_v4, %s2211_s11 }
  0x85   : > { %v478_v12 = vpop.permute.xlu0 %477 }
  0x86   : > { %1949 = vmatmul.mubr.msk.bf16.vlgmr.msra.gmra.mxu1 %vm413_vm1, %v478_v12 }
  0x87   : > { %1956 = vmatprep.mubr.msk.bf16.mxu1 %vm2209_vm0, %v2208_v1  ;;  %1953 = vmatpush3.bf16.msra.mxu1 %v2172_v13 }
  0x88   : > { %1954 = vmatprep.subr.bf16.mxu1 %v2208_v1 }
  0x8b   : > { %1955 = vmatpush3.bf16.msra.mxu1 %v2173_v14 }
  0x8c   : > { %1960 = vmatprep.subr.bf16.mxu1 %v2208_v1 }
  0x8e   : > { %v531_v15 = vpop.permute.xlu1 %530 }
  0x92   : > { %v527_v30 = vpop.permute.xlu0 %526 }
  0x93   : > { %v463_v18 = vpop.permute.xlu1 %462 }
  0x97   : > { %v468_v25 = vpop.permute.xlu1 %467 }
  0x99   : > { %v705_v36 = vpop.permute.xlu0 %704 }
  0x9c   : > { %v709_v39 = vpop.permute.xlu1 %708 }
  0xa0   : > { %v778_v60 = vpop.permute.xlu1 %777 }
  0xdc   : > { %v451_v17 = vpop.f32.mrf.mxu0 }
  0xdd   : > { %v452_v19 = vadd.f32 %v2381_v16, %v451_v17 }
  0xde   : > { %v1938_v20 = vpop.f32.mrf.mxu0 }
  0xdf   : > { %v458_v21 = vmax.f32 %v452_v19, 0.0 }
  0xe0   : > { %v454_v22 = vpop.f32.mrf.mxu0 }
  0xe1   : > { %v455_v23 = vadd.f32 %v2381_v16, %v454_v22  ;;  %v470_v27 = vmul.f32 %v463_v18, %v458_v21 }
  0xe2   : > { %v1939_v24 = vpop.f32.mrf.mxu0 }
  0xe3   : > { %v459_v26 = vmax.f32 %v455_v23, 0.0 }
  0xe5   : > { %v471_v28 = vmul.f32 %v468_v25, %v459_v26 }
  0xe7   : > { %v472_v29 = vpack.c.bf16 %v471_v28, %v470_v27 }
  0xec   : > { %v694_v31 = vpop.f32.mrf.mxu0 }
  0xed   : > { %v695_v32 = vadd.f32 %v2381_v16, %v694_v31 }
  0xee   : > { %v1978_v33 = vpop.f32.mrf.mxu0 }
  0xef   : > { %v701_v34 = vmax.f32 %v695_v32, 0.0  ;;  %v831_v33 = vpop.permute.xlu1 %830 }
  0xf0   : > { %v697_v35 = vpop.f32.mrf.mxu0 }
  0xf1   : > { %v698_v37 = vadd.f32 %v2381_v16, %v697_v35  ;;  %v711_v41 = vmul.f32 %v705_v36, %v701_v34 }
  0xf2   : > { %v1979_v38 = vpop.f32.mrf.mxu0 }
  0xf3   : > { %v702_v40 = vmax.f32 %v698_v37, 0.0  ;;  %v2182_v38 = vld [vmem:[%s2624_s4 + $0x48] sm:$0xff]  }
  0xf5   : > { %v712_v42 = vmul.f32 %v709_v39, %v702_v40  ;;  %v2183_v39 = vld [vmem:[%s2624_s4 + $0x40] sm:$0xff]   ;;  %v2216_v40 = vmov 5  }
  0xf6   : > { %2158 = vset.pattern.permute.xlu1 %v2216_v40  ;;  %2159 = vset.pattern.permute.xlu0 %v2216_v40 }
  0xf7   : > { %v713_v44 = vpack.c.bf16 %v712_v42, %v711_v41  ;;  %1073 = vperm.xlu1 %2158, %v2335_v8   ;;  %1077 = vperm.xlu0 %2159, %v2314_v5  }
  0xfb   : > { %1269 = vrot.lane.b32.xlu0 %v2186_v63, %s2211_s11 }
 0x146   : > { %v516_v45 = vpop.f32.mrf.mxu1 }
 0x147   : > { %v517_v46 = vadd.f32 %v2381_v16, %v516_v45 }
 0x148   : > { %v1950_v47 = vpop.f32.mrf.mxu1 }
 0x149   : > { %v523_v49 = vmax.f32 %v517_v46, 0.0 }
 0x14a   : > { %v519_v48 = vpop.f32.mrf.mxu1 }
 0x14b   : > { %v520_v50 = vadd.f32 %v2381_v16, %v519_v48  ;;  %v533_v54 = vmul.f32 %v527_v30, %v523_v49  ;;  %v827_v30 = vpop.permute.xlu0 %826 }
 0x14c   : > { %v1951_v51 = vpop.f32.mrf.mxu1 }
 0x14d   : > { %v524_v52 = vmax.f32 %v520_v50, 0.0 }
 0x14f   : > { %v534_v53 = vmul.f32 %v531_v15, %v524_v52  ;;  %v952_v52 = vpop.permute.xlu1 %951 }
 0x151   : > { %v535_v56 = vpack.c.bf16 %v534_v53, %v533_v54 }
 0x153   : > { %1957 = vmatmul.mubr.msk.bf16.vlgmr.msra.gmra.mxu1 %vm553_vm2, %v535_v56 }
 0x154   : > { %1961 = vmatpush3.bf16.msra.mxu1 %v2174_v55  ;;  %1964 = vmatprep.mubr.msk.bf16.mxu1 %vm2209_vm0, %v2208_v1  ;;  %v956_v55 = vpop.permute.xlu0 %955 }
 0x155   : > { %1962 = vmatprep.subr.bf16.mxu1 %v2208_v1 }
 0x158   : > { %1963 = vmatpush3.bf16.msra.mxu1 %v2175_v57 }
 0x159   : > { %1980 = vmatprep.subr.bf16.mxu1 %v2208_v1 }
 0x15b   : > { %1965 = vmatmul.mubr.msk.bf16.vlgmr.msra.gmra.mxu1 %vm553_vm2, %v472_v29 }
 0x15c   : > { %1981 = vmatpush3.bf16.msra.mxu1 %v2176_v58  ;;  %1984 = vmatprep.mubr.msk.bf16.mxu1 %vm2209_vm0, %v2208_v1 }
 0x15d   : > { %1982 = vmatprep.subr.bf16.mxu1 %v2208_v1 }
 0x160   : > { %1983 = vmatpush3.bf16.msra.mxu1 %v2177_v59 }
 0x161   : > { %1988 = vmatprep.subr.bf16.mxu1 %v2208_v1 }
 0x163   : > { %1985 = vmatmul.mubr.msk.bf16.vlgmr.msra.gmra.mxu1 %vm553_vm2, %v713_v44 }
 0x164   : > { %1989 = vmatpush3.bf16.msra.mxu1 %v2286_v0  ;;  %1996 = vmatprep.mubr.msk.bf16.mxu1 %vm2209_vm0, %v2208_v1 }
 0x165   : > { %1990 = vmatprep.subr.bf16.mxu1 %v2208_v1 }
 0x168   : > { %1991 = vmatpush3.bf16.msra.mxu1 %v2296_v2 }
 0x169   : > { %1992 = vmatprep.subr.bf16.mxu1 %v2208_v1 }
 0x16c   : > { %1993 = vmatpush3.bf16.msra.mxu1 %v2309_v3 }
 0x16d   : > { %1994 = vmatprep.subr.bf16.mxu1 %v2208_v1 }
 0x170   : > { %1995 = vmatpush3.bf16.msra.mxu1 %v2329_v7 }
 0x171   : > { %2020 = vmatprep.subr.bf16.mxu1 %v2208_v1 }
 0x173   : > { %1997 = vmatmul.mubr.msk.bf16.vlgmr.msra.gmra.mxu1 %vm413_vm1, %v778_v60  ;;  %v1025_v60 = vpop.permute.xlu1 %1024 }
 0x174   : > { %2024 = vmatprep.mubr.msk.bf16.mxu1 %vm2209_vm0, %v2208_v1  ;;  %2021 = vmatpush3.bf16.msra.mxu1 %v2182_v38 }
 0x175   : > { %2022 = vmatprep.subr.bf16.mxu1 %v2208_v1 }
 0x178   : > { %2023 = vmatpush3.bf16.msra.mxu1 %v2183_v39 }
 0x179   : > { %2028 = vmatprep.subr.bf16.mxu1 %v2208_v1 }
 0x213   : > { %v591_v6 = vpop.f32.mrf.mxu1 }
 0x215   : > { %v1958_v9 = vpop.f32.mrf.mxu1 }
 0x217   : > { %v594_v10 = vpop.f32.mrf.mxu1 }
 0x219   : > { %v1959_v11 = vpop.f32.mrf.mxu1 }
 0x21b   : > { %v647_v12 = vpop.f32.mrf.mxu1 }
 0x21c   : > { %v648_v13 = vadd.f32 %v647_v12, %v591_v6  ;;  %v2217_v6 = vmov 6  }
 0x21d   : > { %v1966_v14 = vpop.f32.mrf.mxu1  ;;  %2160 = vset.pattern.permute.xlu1 %v2217_v6 }
 0x21e   : > { %1196 = vperm.xlu1 %2160, %v2335_v8  }
 0x21f   : > { %v650_v15 = vpop.f32.mrf.mxu1 }
 0x220   : > { %v651_v17 = vadd.f32 %v650_v15, %v594_v10 }
 0x221   : > { %v1967_v18 = vpop.f32.mrf.mxu1 }
 0x222   : > { %1200 = vperm.xlu1 %2160, %v2314_v5  }
 0x223   : > { %v768_v19 = vpop.f32.mrf.mxu1 }
 0x224   : > { %v775_v20 = vadd.f32 %v768_v19, %v648_v13 }
 0x225   : > { %v1986_v21 = vpop.f32.mrf.mxu1 }
 0x226   : > { %v1074_v21 = vpop.permute.xlu1 %1073 }
 0x227   : > { %v771_v22 = vpop.f32.mrf.mxu1 }
 0x228   : > { %v776_v23 = vadd.f32 %v771_v22, %v651_v17 }
 0x229   : > { %v1987_v24 = vpop.f32.mrf.mxu1 }
 0x22a   : > { %v1078_v24 = vpop.permute.xlu0 %1077 }
 0x233   : > { %v816_v25 = vpop.f32.mrf.mxu1 }
 0x234   : > { %v817_v26 = vadd.f32 %v2381_v16, %v816_v25 }
 0x235   : > { %v1998_v27 = vpop.f32.mrf.mxu1 }
 0x236   : > { %v823_v29 = vmax.f32 %v817_v26, 0.0 }
 0x237   : > { %v819_v28 = vpop.f32.mrf.mxu1 }
 0x238   : > { %v820_v31 = vadd.f32 %v2381_v16, %v819_v28  ;;  %v833_v35 = vmul.f32 %v827_v30, %v823_v29  ;;  %v2187_v29 = vld [vmem:[%s2624_s4 + $0x68] sm:$0xff]   ;;  %v2188_v30 = vld [vmem:[%s2624_s4 + $0x60] sm:$0xff]  }
 0x239   : > { %v1999_v32 = vpop.f32.mrf.mxu1 }
 0x23a   : > { %v824_v34 = vmax.f32 %v820_v31, 0.0  ;;  %v2218_v31 = vmov 7  }
 0x23b   : > { %2161 = vset.pattern.permute.xlu1 %v2218_v31  ;;  %2162 = vset.pattern.permute.xlu0 %v2218_v31 }
 0x23c   : > { %v834_v36 = vmul.f32 %v831_v33, %v824_v34  ;;  %1318 = vperm.xlu1 %2161, %v2335_v8   ;;  %1322 = vperm.xlu0 %2162, %v2314_v5  }
 0x23e   : > { %v835_v37 = vpack.c.bf16 %v834_v36, %v833_v35 }
 0x240   : > { %2005 = vmatmul.mubr.msk.bf16.vlgmr.msra.gmra.mxu0 %vm553_vm2, %v835_v37 }
 0x241   : > { %2009 = vmatpush3.bf16.msra.mxu0 %v2286_v0  ;;  %2016 = vmatprep.mubr.msk.bf16.mxu0 %vm2209_vm0, %v2208_v1 }
 0x242   : > { %2010 = vmatprep.subr.bf16.mxu0 %v2208_v1 }
 0x245   : > { %2011 = vmatpush3.bf16.msra.mxu0 %v2296_v2 }
 0x246   : > { %2012 = vmatprep.subr.bf16.mxu0 %v2208_v1 }
 0x249   : > { %2013 = vmatpush3.bf16.msra.mxu0 %v2309_v3 }
 0x24a   : > { %2014 = vmatprep.subr.bf16.mxu0 %v2208_v1 }
 0x24d   : > { %2015 = vmatpush3.bf16.msra.mxu0 %v2329_v7 }
 0x24e   : > { %2040 = vmatprep.subr.bf16.mxu0 %v2208_v1 }
 0x250   : > { %2017 = vmatmul.mubr.msk.bf16.vlgmr.msra.gmra.mxu0 %vm413_vm1, %v2438_v4 }
 0x251   : > { %2044 = vmatprep.mubr.msk.bf16.mxu0 %vm2209_vm0, %v2208_v1  ;;  %2041 = vmatpush3.bf16.msra.mxu0 %v2184_v61 }
 0x252   : > { %2042 = vmatprep.subr.bf16.mxu0 %v2208_v1 }
 0x255   : > { %2043 = vmatpush3.bf16.msra.mxu0 %v2185_v62 }
 0x256   : > { %2048 = vmatprep.subr.bf16.mxu0 %v2208_v1 }
 0x299   : > { %v1197_v40 = vpop.permute.xlu1 %1196 }
 0x300   : > { %v890_v41 = vpop.f32.mrf.mxu0 }
 0x301   : > { %v897_v42 = vadd.f32 %v890_v41, %v775_v20 }
 0x302   : > { %v2006_v43 = vpop.f32.mrf.mxu0 }
 0x304   : > { %v893_v44 = vpop.f32.mrf.mxu0 }
 0x305   : > { %v898_v45 = vadd.f32 %v893_v44, %v776_v23 }
 0x306   : > { %v2007_v46 = vpop.f32.mrf.mxu0 }
 0x310   : > { %v941_v47 = vpop.f32.mrf.mxu0 }
 0x311   : > { %v942_v48 = vadd.f32 %v2381_v16, %v941_v47  ;;  %v1201_v47 = vpop.permute.xlu1 %1200 }
 0x312   : > { %v2018_v49 = vpop.f32.mrf.mxu0 }
 0x313   : > { %v948_v51 = vmax.f32 %v942_v48, 0.0 }
 0x314   : > { %v944_v50 = vpop.f32.mrf.mxu0 }
 0x315   : > { %v945_v53 = vadd.f32 %v2381_v16, %v944_v50  ;;  %v958_v57 = vmul.f32 %v952_v52, %v948_v51  ;;  %v1270_v51 = vpop.permute.xlu0 %1269  ;;  %v2189_v52 = vld [vmem:[%s2624_s4 + $0x78] sm:$0xff]  }
 0x316   : > { %v2019_v54 = vpop.f32.mrf.mxu0 }
 0x317   : > { %v949_v56 = vmax.f32 %v945_v53, 0.0  ;;  %v2190_v53 = vld [vmem:[%s2624_s4 + $0x70] sm:$0xff]   ;;  %v2219_v54 = vmov 8  }
 0x318   : > { %2163 = vset.pattern.permute.xlu1 %v2219_v54  ;;  %2164 = vset.pattern.permute.xlu0 %v2219_v54  ;;  %v1835_v54 = vld [vmem:[%s2629_s9] ss:$0 sm:$0xff] }
 0x319   : > { %v959_v58 = vmul.f32 %v956_v55, %v949_v56  ;;  %1443 = vperm.xlu1 %2163, %v2335_v8   ;;  %v1323_v8 = vpop.permute.xlu0 %1322 }
 0x31b   : > { %v960_v59 = vpack.c.bf16 %v959_v58, %v958_v57 }
 0x31d   : > { %2025 = vmatmul.mubr.msk.bf16.vlgmr.msra.gmra.mxu1 %vm553_vm2, %v960_v59  ;;  %1447 = vperm.xlu1 %2163, %v2314_v5  }
 0x31e   : > { %2029 = vmatpush3.bf16.msra.mxu1 %v2286_v0  ;;  %2036 = vmatprep.mubr.msk.bf16.mxu1 %vm2209_vm0, %v2208_v1 }
 0x31f   : > { %2030 = vmatprep.subr.bf16.mxu1 %v2208_v1 }
 0x322   : > { %2031 = vmatpush3.bf16.msra.mxu1 %v2296_v2 }
 0x323   : > { %2032 = vmatprep.subr.bf16.mxu1 %v2208_v1 }
 0x326   : > { %2033 = vmatpush3.bf16.msra.mxu1 %v2309_v3 }
 0x327   : > { %2034 = vmatprep.subr.bf16.mxu1 %v2208_v1 }
 0x32a   : > { %2035 = vmatpush3.bf16.msra.mxu1 %v2329_v7 }
 0x32b   : > { %2060 = vmatprep.subr.bf16.mxu1 %v2208_v1 }
 0x32d   : > { %2037 = vmatmul.mubr.msk.bf16.vlgmr.msra.gmra.mxu1 %vm413_vm1, %v1025_v60 }
 0x32e   : > { %2064 = vmatprep.mubr.msk.bf16.mxu1 %vm2209_vm0, %v2208_v1  ;;  %2061 = vmatpush3.bf16.msra.mxu1 %v2187_v29 }
 0x32f   : > { %2062 = vmatprep.subr.bf16.mxu1 %v2208_v1 }
 0x332   : > { %2063 = vmatpush3.bf16.msra.mxu1 %v2188_v30 }
 0x333   : > { %2068 = vmatprep.subr.bf16.mxu1 %v2208_v1 }
 0x3dd   : > { %v1015_v9 = vpop.f32.mrf.mxu1 }
 0x3de   : > { %v1022_v10 = vadd.f32 %v1015_v9, %v897_v42 }
 0x3df   : > { %v2026_v11 = vpop.f32.mrf.mxu1 }
 0x3e1   : > { %v1018_v12 = vpop.f32.mrf.mxu1 }
 0x3e2   : > { %v1023_v13 = vadd.f32 %v1018_v12, %v898_v45 }
 0x3e3   : > { %v2027_v14 = vpop.f32.mrf.mxu1 }
 0x3ed   : > { %v1063_v15 = vpop.f32.mrf.mxu1 }
 0x3ee   : > { %v1064_v17 = vadd.f32 %v2381_v16, %v1063_v15 }
 0x3ef   : > { %v2038_v18 = vpop.f32.mrf.mxu1 }
 0x3f0   : > { %v1070_v20 = vmax.f32 %v1064_v17, 0.0  ;;  %v2191_v17 = vld [vmem:[%s2319_s26 + $0x10] ss:$20 sps:$4 sm:$0x3f]   ;;  %s1845_s26 = sshll.u32 %s2632_s14, 3 }
 0x3f1   : > { %v1066_v19 = vpop.f32.mrf.mxu1  ;;  %s359_s21 = scalar_lea.vmem %s2630_s10, %s1845_s26 }
 0x3f2   : > { %v1067_v22 = vadd.f32 %v2381_v16, %v1066_v19  ;;  %v1080_v26 = vmul.f32 %v1074_v21, %v1070_v20 }
 0x3f3   : > { %v2039_v23 = vpop.f32.mrf.mxu1 }
 0x3f4   : > { %v1071_v25 = vmax.f32 %v1067_v22, 0.0 }
 0x3f6   : > { %v1081_v27 = vmul.f32 %v1078_v24, %v1071_v25 }
 0x3f8   : > { %v1082_v28 = vpack.c.bf16 %v1081_v27, %v1080_v26 }
 0x3fa   : > { %2045 = vmatmul.mubr.msk.bf16.vlgmr.msra.gmra.mxu0 %vm553_vm2, %v1082_v28 }
 0x3fb   : > { %2049 = vmatpush3.bf16.msra.mxu0 %v2286_v0  ;;  %2056 = vmatprep.mubr.msk.bf16.mxu0 %vm2209_vm0, %v2208_v1 }
 0x3fc   : > { %2050 = vmatprep.subr.bf16.mxu0 %v2208_v1 }
 0x3ff   : > { %2051 = vmatpush3.bf16.msra.mxu0 %v2296_v2 }
 0x400   : > { %2052 = vmatprep.subr.bf16.mxu0 %v2208_v1 }
 0x403   : > { %2053 = vmatpush3.bf16.msra.mxu0 %v2309_v3 }
 0x404   : > { %2054 = vmatprep.subr.bf16.mxu0 %v2208_v1 }
 0x407   : > { %2055 = vmatpush3.bf16.msra.mxu0 %v2329_v7 }
 0x408   : > { %2080 = vmatprep.subr.bf16.mxu0 %v2208_v1 }
 0x40a   : > { %2057 = vmatmul.mubr.msk.bf16.vlgmr.msra.gmra.mxu0 %vm413_vm1, %v2186_v63 }
 0x40b   : > { %2084 = vmatprep.mubr.msk.bf16.mxu0 %vm2209_vm0, %v2208_v1  ;;  %2081 = vmatpush3.bf16.msra.mxu0 %v2189_v52 }
 0x40c   : > { %2082 = vmatprep.subr.bf16.mxu0 %v2208_v1 }
 0x40f   : > { %2083 = vmatpush3.bf16.msra.mxu0 %v2190_v53 }
 0x410   : > { %2088 = vmatprep.subr.bf16.mxu0 %v2208_v1 }
 0x4ba   : > { %v1137_v32 = vpop.f32.mrf.mxu0 }
 0x4bb   : > { %v1144_v33 = vadd.f32 %v1137_v32, %v1022_v10  ;;  %v1319_v10 = vpop.permute.xlu1 %1318 }
 0x4bc   : > { %v2046_v34 = vpop.f32.mrf.mxu0 }
 0x4be   : > { %v1140_v35 = vpop.f32.mrf.mxu0 }
 0x4bf   : > { %v1145_v36 = vadd.f32 %v1140_v35, %v1023_v13  ;;  %v1444_v26 = vpop.permute.xlu1 %1443 }
 0x4c0   : > { %v2047_v37 = vpop.f32.mrf.mxu0 }
 0x4c1   : > { %v2196_v37 = vld [vmem:[%s2628_s8 + $0x8] sm:$0xff]  }
 0x4ca   : > { %v1186_v38 = vpop.f32.mrf.mxu0 }
 0x4cb   : > { %v1187_v39 = vadd.f32 %v2381_v16, %v1186_v38  ;;  %v2198_v38 = vld [vmem:[%s2626_s6 + $0x8] sm:$0xff]  }
 0x4cc   : > { %v2058_v41 = vpop.f32.mrf.mxu0 }
 0x4cd   : > { %v1193_v43 = vmax.f32 %v1187_v39, 0.0  ;;  %v2199_v39 = vld [vmem:[%s2626_s6] sm:$0xff]  }
 0x4ce   : > { %v1189_v42 = vpop.f32.mrf.mxu0 }
 0x4cf   : > { %v1190_v44 = vadd.f32 %v2381_v16, %v1189_v42  ;;  %v1203_v48 = vmul.f32 %v1197_v40, %v1193_v43  ;;  %v1830_v42 = vld [vmem:[%s2625_s5] ss:$0 sm:$0xff] }
 0x4d0   : > { %v2059_v45 = vpop.f32.mrf.mxu0 }
 0x4d1   : > { %v1194_v46 = vmax.f32 %v1190_v44, 0.0 }
 0x4d3   : > { %v1204_v49 = vmul.f32 %v1201_v47, %v1194_v46 }
 0x4d5   : > { %v1205_v50 = vpack.c.bf16 %v1204_v49, %v1203_v48 }
 0x4d7   : > { %2065 = vmatmul.mubr.msk.bf16.vlgmr.msra.gmra.mxu1 %vm553_vm2, %v1205_v50 }
 0x4d8   : > { %2069 = vmatpush3.bf16.msra.mxu1 %v2286_v0  ;;  %2076 = vmatprep.mubr.msk.bf16.mxu1 %vm2209_vm0, %v2208_v1 }
 0x4d9   : > { %2070 = vmatprep.subr.bf16.mxu1 %v2208_v1 }
 0x4dc   : > { %2071 = vmatpush3.bf16.msra.mxu1 %v2296_v2 }
 0x4dd   : > { %2072 = vmatprep.subr.bf16.mxu1 %v2208_v1 }
 0x4e0   : > { %2073 = vmatpush3.bf16.msra.mxu1 %v2309_v3 }
 0x4e1   : > { %2074 = vmatprep.subr.bf16.mxu1 %v2208_v1 }
 0x4e4   : > { %2075 = vmatpush3.bf16.msra.mxu1 %v2329_v7 }
 0x4e5   : > { %2100 = vmatprep.subr.bf16.mxu1 %v2208_v1 }
 0x4e7   : > { %2077 = vmatmul.mubr.msk.bf16.vlgmr.msra.gmra.mxu1 %vm413_vm1, %v1270_v51 }
 0x4e8   : > { %2104 = vmatprep.mubr.msk.bf16.mxu1 %vm2209_vm0, %v2208_v1 }
 0x597   : > { %v1260_v55 = vpop.f32.mrf.mxu1 }
 0x598   : > { %v1267_v56 = vadd.f32 %v1260_v55, %v1144_v33  ;;  %v1448_v33 = vpop.permute.xlu1 %1447  ;;  %v1831_v55 = vld [vmem:[%s2627_s7] ss:$0 sm:$0xff] }
 0x599   : > { %v2066_v57 = vpop.f32.mrf.mxu1 }
 0x59b   : > { %v1263_v58 = vpop.f32.mrf.mxu1 }
 0x59c   : > { %v1268_v59 = vadd.f32 %v1263_v58, %v1145_v36 }
 0x59d   : > { %v2067_v60 = vpop.f32.mrf.mxu1 }
 0x5a7   : > { %v1308_v61 = vpop.f32.mrf.mxu1 }
 0x5a8   : > { %v1309_v62 = vadd.f32 %v2381_v16, %v1308_v61 }
 0x5a9   : > { %v2078_v63 = vpop.f32.mrf.mxu1 }
 0x5aa   : > { %v1315_v9 = vmax.f32 %v1309_v62, 0.0 }
 0x5ab   : > { %v1311_v6 = vpop.f32.mrf.mxu1 }
 0x5ac   : > { %v1312_v11 = vadd.f32 %v2381_v16, %v1311_v6  ;;  %v1325_v5 = vmul.f32 %v1319_v10, %v1315_v9 }
 0x5ad   : > { %v2079_v12 = vpop.f32.mrf.mxu1 }
 0x5ae   : > { %v1316_v13 = vmax.f32 %v1312_v11, 0.0 }
 0x5b0   : > { %v1326_v14 = vmul.f32 %v1323_v8, %v1316_v13 }
 0x5b2   : > { %v1327_v15 = vpack.c.bf16 %v1326_v14, %v1325_v5 }
 0x5b4   : > { %2085 = vmatmul.mubr.msk.bf16.vlgmr.msra.gmra.mxu0 %vm553_vm2, %v1327_v15 }
 0x5b5   : > { %2089 = vmatpush3.bf16.msra.mxu0 %v2286_v0  ;;  %2096 = vmatprep.mubr.msk.bf16.mxu0 %vm2209_vm0, %v2208_v1  ;;  %v2192_v0 = vld [vmem:[%s2624_s4 + $0x88] sm:$0xff]  }
 0x5b6   : > { %2090 = vmatprep.subr.bf16.mxu0 %v2208_v1  ;;  %2101 = vmatpush3.bf16.msra.mxu1 %v2192_v0 }
 0x5b7   : > { %2102 = vmatprep.subr.bf16.mxu1 %v2208_v1 }
 0x5b9   : > { %2091 = vmatpush3.bf16.msra.mxu0 %v2296_v2  ;;  %v2193_v2 = vld [vmem:[%s2624_s4 + $0x80] sm:$0xff]  }
 0x5ba   : > { %2092 = vmatprep.subr.bf16.mxu0 %v2208_v1  ;;  %2103 = vmatpush3.bf16.msra.mxu1 %v2193_v2 }
 0x5bb   : > { %2108 = vmatprep.subr.bf16.mxu1 %v2208_v1 }
 0x5bd   : > { %2093 = vmatpush3.bf16.msra.mxu0 %v2309_v3  ;;  %v2194_v3 = vld [vmem:[%s2628_s8 + $0x18] sm:$0xff]  }
 0x5be   : > { %2094 = vmatprep.subr.bf16.mxu0 %v2208_v1 }
 0x5c1   : > { %2095 = vmatpush3.bf16.msra.mxu0 %v2329_v7  ;;  %v2195_v7 = vld [vmem:[%s2628_s8 + $0x10] sm:$0xff]  }
 0x5c2   : > { %2116 = vmatprep.subr.bf16.mxu0 %v2208_v1 }
 0x5c4   : > { %2097 = vmatmul.mubr.msk.bf16.vlgmr.msra.gmra.mxu0 %vm413_vm1, %v2191_v17 }
 0x5c5   : > { %2124 = vmatprep.mubr.msk.bf16.mxu0 %vm2209_vm0, %v2208_v1  ;;  %2117 = vmatpush3.bf16.msra.mxu0 %v2194_v3 }
 0x5c6   : > { %2118 = vmatprep.subr.bf16.mxu0 %v2208_v1 }
 0x5c9   : > { %2119 = vmatpush3.bf16.msra.mxu0 %v2195_v7 }
 0x5ca   : > { %2120 = vmatprep.subr.bf16.mxu0 %v2208_v1 }
 0x5cd   : > { %2121 = vmatpush3.bf16.msra.mxu0 %v2196_v37 }
 0x5ce   : > { %2122 = vmatprep.subr.bf16.mxu0 %v2208_v1 }
 0x674   : > { %v1382_v18 = vpop.f32.mrf.mxu0 }
 0x675   : > { %v1389_v19 = vadd.f32 %v1382_v18, %v1267_v56 }
 0x676   : > { %v2086_v20 = vpop.f32.mrf.mxu0 }
 0x678   : > { %v1385_v21 = vpop.f32.mrf.mxu0 }
 0x679   : > { %v1390_v22 = vadd.f32 %v1385_v21, %v1268_v59 }
 0x67a   : > { %v2087_v23 = vpop.f32.mrf.mxu0 }
 0x684   : > { %v1433_v24 = vpop.f32.mrf.mxu0 }
 0x685   : > { %v1434_v25 = vadd.f32 %v2381_v16, %v1433_v24 }
 0x686   : > { %v2098_v27 = vpop.f32.mrf.mxu0 }
 0x687   : > { %v1440_v29 = vmax.f32 %v1434_v25, 0.0 }
 0x688   : > { %v1436_v28 = vpop.f32.mrf.mxu0 }
 0x689   : > { %v1437_v30 = vadd.f32 %v2381_v16, %v1436_v28  ;;  %v1450_v34 = vmul.f32 %v1444_v26, %v1440_v29  ;;  %v2197_v16 = vld [vmem:[%s2628_s8] sm:$0xff]  }
 0x68a   : > { %v2099_v31 = vpop.f32.mrf.mxu0  ;;  %2123 = vmatpush3.bf16.msra.mxu0 %v2197_v16 }
 0x68b   : > { %v1441_v32 = vmax.f32 %v1437_v30, 0.0 }
 0x68d   : > { %v1451_v35 = vmul.f32 %v1448_v33, %v1441_v32  ;;  %2125 = vmatmul.mubr.msk.bf16.vlgmr.msra.gmra.mxu0 %vm413_vm1, %v2438_v4 }
 0x68f   : > { %v1452_v36 = vpack.c.bf16 %v1451_v35, %v1450_v34 }
 0x691   : > { %2105 = vmatmul.mubr.msk.bf16.vlgmr.msra.gmra.mxu1 %vm553_vm2, %v1452_v36 }
 0x692   : > { %2112 = vmatprep.mubr.msk.bf16.mxu1 %vm2209_vm0, %v2208_v1  ;;  %2109 = vmatpush3.bf16.msra.mxu1 %v2198_v38 }
 0x693   : > { %2110 = vmatprep.subr.bf16.mxu1 %v2208_v1 }
 0x696   : > { %2111 = vmatpush3.bf16.msra.mxu1 %v2199_v39 }
 0x74d   : > { %v1668_v50 = vpop.f32.mrf.mxu0 }
 0x74e   : > { %v1669_v56 = vadd.f32 %v1835_v54, %v1668_v50 }
 0x74f   : > { %v2126_v51 = vpop.f32.mrf.mxu0 }
 0x751   : > { %v1507_v40 = vpop.f32.mrf.mxu1  ;;  %v1671_v52 = vpop.f32.mrf.mxu0 }
 0x752   : > { %v1514_v41 = vadd.f32 %v1507_v40, %v1389_v19  ;;  %v1672_v62 = vadd.f32 %v1835_v54, %v1671_v52 }
 0x753   : > { %v2106_v43 = vpop.f32.mrf.mxu1  ;;  %v2127_v53 = vpop.f32.mrf.mxu0 }
 0x754   : > { %v1523_v45 = vadd.f32 %v1830_v42, %v1514_v41 }
 0x755   : > { %v1510_v44 = vpop.f32.mrf.mxu1 }
 0x756   : > { %v1515_v46 = vadd.f32 %v1510_v44, %v1390_v22  ;;  %v1525_v48 = vmax.f32 %v1523_v45, 0.0 }
 0x757   : > { %v2107_v47 = vpop.f32.mrf.mxu1 }
 0x758   : > { %v1524_v4 = vadd.f32 %v1830_v42, %v1515_v46 }
 0x75a   : > { %v1526_v1 = vmax.f32 %v1524_v4, 0.0 }
 0x75c   : > { %v1527_v49 = vpack.c.bf16 %v1526_v1, %v1525_v48 }
 0x75e   : > { %2113 = vmatmul.mubr.msk.bf16.vlgmr.msra.gmra.mxu1 %vm553_vm2, %v1527_v49 }
 0x81e   : > { %v1588_v57 = vpop.f32.mrf.mxu1 }
 0x81f   : > { %v1589_v58 = vadd.f32 %v1831_v55, %v1588_v57 }
 0x820   : > { %v2114_v59 = vpop.f32.mrf.mxu1 }
 0x821   : > { %v1675_v60 = vadd.f32 %v1669_v56, %v1589_v58 }
 0x822   : > { %v1591_v61 = vpop.f32.mrf.mxu1 }
 0x823   : > { %v1677_v63 = vmax.f32 %v1675_v60, 0.0  ;;  %v1592_v6 = vadd.f32 %v1831_v55, %v1591_v61 }
 0x824   : > { %v2115_v9 = vpop.f32.mrf.mxu1 }
 0x825   : > { %v1846_v10 = vpack.c.bf16 %v1677_v63, %v1677_v63  ;;  %v1676_v11 = vadd.f32 %v1672_v62, %v1592_v6 }
 0x827   : > { %1687 = vst [vmem:[%s359_s21] sm:$0xf] %v1846_v10  ;;  %v1678_v12 = vmax.f32 %v1676_v11, 0.0 }
 0x829   : > { %v1847_v8 = vpack.c.bf16 %v1678_v12, %v1678_v12 }
 0x82b   : > { %1688 = vst [vmem:[%s359_s21 + $0x4] sm:$0x3] %v1847_v8 }
 0x82c PF: > { %s20_s13 = sadd.s32 1, %s2206_s13  }
 0x82d   : > { %p17_p4 = scmp.ge.s32.totalorder %s20_s13, 4  }
 0x82f   :  { %19 = sbr.rel (!%p17_p4) target bundleno = 1 (0x1), region = 98 }

// kernel: pcb_test_forward.11
= control target key start
LH: loop header
LB: loop body
LE: loop exit
PB: predicated region body
PF: predicated region fallthrough
CT: control target
= control target key end

     0   :  { %s2358_s17 = smov 0   ;;  %s2767_s0 = inlined_call_operand.vmem [shape: bf16[2,18,128], index: 0, kind: input, shape index: {}]   ;;  %s2768_s1 = inlined_call_operand.vmem [shape: f32[1,12,9], index: 1, kind: input, shape index: {}]   ;;  %s2769_s2 = inlined_call_operand.vmem [shape: bf16[128,64], index: 2, kind: input, shape index: {}]   ;;  %s2770_s3 = inlined_call_operand.vmem [shape: f32[1,64], index: 3, kind: input, shape index: {}]   ;;  %s2771_s4 = inlined_call_operand.vmem [shape: bf16[9,64,64], index: 4, kind: input, shape index: {}]   ;;  %s2772_s5 = inlined_call_operand.vmem [shape: f32[1,64], index: 5, kind: input, shape index: {}]   ;;  %s2773_s6 = inlined_call_operand.vmem [shape: bf16[64,256], index: 6, kind: input, shape index: {}]   ;;  %s2774_s7 = inlined_call_operand.vmem [shape: f32[1,256], index: 7, kind: input, shape index: {}]   ;;  %s2775_s8 = inlined_call_operand.vmem [shape: bf16[128,256], index: 8, kind: input, shape index: {}]   ;;  %s2776_s9 = inlined_call_operand.vmem [shape: f32[1,256], index: 9, kind: input, shape index: {}]   ;;  %s2777_s10 = inlined_call_operand.vmem [shape: f32[6,12], index: 10, kind: input, shape index: {}]   ;;  %s2778_s11 = inlined_call_operand.vmem [shape: f32[2,6,256], index: 11, kind: output, shape index: {}]  }
   0x1 LB: > { %s1823_s18 = sadd.s32 4294967295, %s2286_s17   ;;  %p1827_p0 = scmp.ge.s32.totalorder %s2286_s17, 1  ;;  %s2286_s17 = sphi %s2358_s17, %s21_s17  }
   0x2   : > { %p337_p1 = scmp.lt.s32.totalorder %s2286_s17, 3 }
   0x4   : > { %p338_p2 = pnand %p1827_p0, %p337_p1 }
   0x5   : > { %p377_p3 = scmp.lt.s32.totalorder (!%p338_p2), %s1823_s18, 1 }
   0x6   : > { %341 = sbr.rel (%p338_p2) target bundleno = 949 (0x3b5), region = 64 }
   0xb   : > { %v2198_v0 = vld [vmem:[%s2769_s2 + $0x38] sm:$0xff]   ;;  %v2199_v1 = vld [vmem:[%s2769_s2 + $0x30] sm:$0xff]   ;;  %s2780_s18 = smov (!%p377_p3, %s1823_s18), 1  ;;  %v2288_v2 = vmov 0   ;;  %v2200_v3 = vld [vmem:[%s2769_s2 + $0x28] sm:$0xff]   ;;  %v2289_v5 = vmov 1  }
   0xc   : > { %2038 = vmatprep.subr.bf16.mxu0 %v2198_v0  ;;  %2186 = vset.pattern.permute.xlu1 %v2288_v2  ;;  %s2166_s25 = smul.u32 12, %s2780_s18  ;;  %v2201_v4 = vld [vmem:[%s2769_s2 + $0x20] sm:$0xff]   ;;  %v2202_v8 = vld [vmem:[%s2769_s2 + $0x18] sm:$0xff]   ;;  %v392_v9 = vld [vmem:[%s2768_s1 + $0x8] sm:$0xf]  ;;  %v2290_v12 = vmov 2  }
   0xd   : > { %2039 = vmatpush3.bf16.msra.mxu0 %v2198_v0  ;;  %2185 = vset.pattern.permute.xlu0 %v2289_v5  ;;  %v391_v7 = vld [vmem:[%s2768_s1] sm:$0xff]  ;;  %v2203_v10 = vld [vmem:[%s2769_s2 + $0x10] sm:$0xff]   ;;  %v2204_v11 = vld [vmem:[%s2769_s2 + $0x8] sm:$0xff]   ;;  %v2291_v14 = vmov 3   ;;  %v2292_v16 = vmov 5   ;;  %v2293_v17 = vmov 6  }
   0xe   : > { %2040 = vmatprep.subr.bf16.mxu0 %v2199_v1  ;;  %s2382_s28 = scalar_lea.vmem %s2767_s0, %s2166_s25  ;;  %527 = vperm.xlu1 %2186, %v391_v7   ;;  %v2205_v13 = vld [vmem:[%s2769_s2] sm:$0xff]   ;;  %v2294_v18 = vmov 7   ;;  %v2295_v19 = vmov 8   ;;  %v2208_v20 = vld [vmem:[%s2771_s4 + $0x98] sm:$0xff]   ;;  %v2296_v21 = vmov 0.0   ;;  %v2210_v23 = vld [vmem:[%s2771_s4 + $0x90] sm:$0xff]  }
   0xf   : > { %v2388_v6 = vld [vmem:[%s2382_s28] sm:$0xff]   ;;  %547 = vperm.xlu0 %2185, %v391_v7   ;;  %v2207_v15 = vld [vmem:[%s2382_s28 + $0x8] ss:$0 sps:$4 sm:$0x11]   ;;  %2058 = vmatprep.subr.bf16.mxu1 %v2296_v21  ;;  %v2209_v22 = vld [vmem:[%s2771_s4 + $0x38] sm:$0xff]   ;;  %vm2297_vm0 = vmmov 0  }
  0x10   : > { %2054 = vmatprep.mubr.bf16.mxu0 %v2388_v6  ;;  %2059 = vmatpush3.bf16.msra.mxu1 %v2209_v22  ;;  %v2211_v24 = vld [vmem:[%s2771_s4 + $0x30] sm:$0xff]   ;;  %v2212_v25 = vld [vmem:[%s2771_s4 + $0x88] sm:$0xff]   ;;  %v2214_v27 = vld [vmem:[%s2771_s4 + $0x80] sm:$0xff]   ;;  %vm552_vm1 = vcmask 1040384   ;;  %vm999_vm2 = vcmask 1043456   ;;  %vm1190_vm3 = vcmask 1044480  }
  0x11   : > { %2041 = vmatpush3.bf16.msra.mxu0 %v2199_v1  ;;  %2060 = vmatprep.subr.bf16.mxu1 %v2296_v21  ;;  %v2213_v26 = vld [vmem:[%s2771_s4 + $0x28] sm:$0xff]   ;;  %v2215_v28 = vld [vmem:[%s2771_s4 + $0x20] sm:$0xff]   ;;  %vm601_vm4 = vcmask 523264   ;;  %vm1301_vm5 = vcmask 1045504   ;;  %vm720_vm6 = vcmask 1041408   ;;  %vm1685_vm8 = vcmask 97280  }
  0x12   : > { %2042 = vmatprep.subr.bf16.mxu0 %v2200_v3  ;;  %532 = vperm.xlu1 %2186, %v392_v9   ;;  %v2465_v40 = vld [vmem:[%s2770_s3] ss:$0 sm:$0xff]  ;;  %vm1211_vm7 = vsmask.f32 5376  ;;  %s1982_s20 = sshll.u32 %s2780_s18, 4 }
  0x13   : > { %550 = vperm.xlu0 %2185, %v392_v9   ;;  %2066 = vmatprep.mubr.msk.bf16.mxu1 %vm2297_vm0, %v2296_v21  ;;  %s386_s23 = scalar_lea.vmem %s2778_s11, %s1982_s20 }
  0x14   : > { %2061 = vmatpush3.bf16.msra.mxu1 %v2211_v24 }
  0x15   : > { %2043 = vmatpush3.bf16.msra.mxu0 %v2200_v3  ;;  %2062 = vmatprep.subr.bf16.mxu1 %v2296_v21 }
  0x16   : > { %2044 = vmatprep.subr.bf16.mxu0 %v2201_v4  ;;  %2188 = vset.pattern.permute.xlu1 %v2290_v12 }
  0x17   : > { %718 = vperm.xlu1 %2188, %v392_v9   ;;  %2187 = vset.pattern.permute.xlu0 %v2290_v12 }
  0x18   : > { %715 = vperm.xlu0 %2187, %v391_v7   ;;  %2063 = vmatpush3.bf16.msra.mxu1 %v2213_v26 }
  0x19   : > { %2045 = vmatpush3.bf16.msra.mxu0 %v2201_v4  ;;  %2064 = vmatprep.subr.bf16.mxu1 %v2296_v21 }
  0x1a   : > { %2046 = vmatprep.subr.bf16.mxu0 %v2202_v8 }
  0x1b   : > { %2189 = vset.pattern.permute.xlu1 %v2291_v14 }
  0x1c   : > { %811 = vperm.xlu1 %2189, %v391_v7   ;;  %2190 = vset.pattern.permute.xlu0 %v2291_v14 }
  0x1d   : > { %2047 = vmatpush3.bf16.msra.mxu0 %v2202_v8  ;;  %814 = vperm.xlu0 %2190, %v392_v9   ;;  %v2216_v8 = vld [vmem:[%s2771_s4 + $0xd8] sm:$0xff]  }
  0x1e   : > { %2048 = vmatprep.subr.bf16.mxu0 %v2203_v10  ;;  %2065 = vmatpush3.bf16.msra.mxu1 %v2215_v28 }
  0x1f   : > { %2070 = vmatprep.subr.bf16.mxu1 %v2296_v21 }
  0x20   : > { %2191 = vset.pattern.permute.xlu1 %v2292_v16 }
  0x21   : > { %2049 = vmatpush3.bf16.msra.mxu0 %v2203_v10  ;;  %994 = vperm.xlu1 %2191, %v391_v7  }
  0x22   : > { %2050 = vmatprep.subr.bf16.mxu0 %v2204_v11  ;;  %2192 = vset.pattern.permute.xlu0 %v2293_v17 }
  0x23   : > { %1090 = vperm.xlu0 %2192, %v391_v7  }
  0x25   : > { %2051 = vmatpush3.bf16.msra.mxu0 %v2204_v11  ;;  %997 = vperm.xlu1 %2191, %v392_v9  }
  0x26   : > { %2052 = vmatprep.subr.bf16.mxu0 %v2205_v13 }
  0x27   : > { %2195 = vset.pattern.permute.xlu0 %v2294_v18 }
  0x28   : > { %1188 = vperm.xlu0 %2195, %v392_v9  }
  0x29   : > { %2053 = vmatpush3.bf16.msra.mxu0 %v2205_v13  ;;  %2193 = vset.pattern.permute.xlu1 %v2293_v17  ;;  %v2217_v17 = vld [vmem:[%s2771_s4 + $0x18] sm:$0xff]  }
  0x2a   : > { %1093 = vperm.xlu1 %2193, %v392_v9   ;;  %2106 = vmatprep.subr.bf16.mxu0 %v2296_v21 }
  0x2c   : > { %2055 = vmatmul.mubr.bf16.vlgmr.msra.gmra.mxu0 %v2207_v15  ;;  %2197 = vset.pattern.permute.xlu0 %v2295_v19 }
  0x2d   : > { %2107 = vmatpush3.bf16.msra.mxu0 %v2208_v20  ;;  %2114 = vmatprep.mubr.msk.bf16.mxu0 %vm2297_vm0, %v2296_v21 }
  0x2e   : > { %2194 = vset.pattern.permute.xlu1 %v2294_v18  ;;  %2108 = vmatprep.subr.bf16.mxu0 %v2296_v21 }
  0x2f   : > { %1185 = vperm.xlu1 %2194, %v391_v7  }
  0x31   : > { %2109 = vmatpush3.bf16.msra.mxu0 %v2210_v23  ;;  %v2218_v23 = vld [vmem:[%s2771_s4 + $0xd0] sm:$0xff]  }
  0x32   : > { %2110 = vmatprep.subr.bf16.mxu0 %v2296_v21 }
  0x33   : > { %2196 = vset.pattern.permute.xlu1 %v2295_v19 }
  0x34   : > { %1296 = vperm.xlu1 %2196, %v391_v7  }
  0x35   : > { %2111 = vmatpush3.bf16.msra.mxu0 %v2212_v25  ;;  %v2219_v25 = vld [vmem:[%s2771_s4 + $0x10] sm:$0xff]  }
  0x36   : > { %2112 = vmatprep.subr.bf16.mxu0 %v2296_v21 }
  0x38   : > { %1299 = vperm.xlu1 %2196, %v392_v9  }
  0x39   : > { %2113 = vmatpush3.bf16.msra.mxu0 %v2214_v27  ;;  %v2220_v27 = vld [vmem:[%s2771_s4 + $0xc8] sm:$0xff]  }
  0x3a   : > { %2130 = vmatprep.subr.bf16.mxu0 %v2296_v21 }
  0x89   : > { %v2448_v29 = vpop.permute.xlu1 %527 }
  0x8a   : > { %v548_v31 = vpop.permute.xlu0 %547 }
  0x8b   : > { %v553_v46 = vrot.slane %v548_v31, 7  ;;  %v2221_v31 = vld [vmem:[%s2771_s4 + $0x8] sm:$0xff]  }
  0x8d   : > { %v2450_v30 = vpop.permute.xlu1 %532 }
  0x8e   : > { %v551_v33 = vpop.permute.xlu0 %550 }
  0x8f   : > { %v554_v47 = vrot.slane %v551_v33, 7 }
  0x91   : > { %v555_v54 = vsel %vm552_vm1, %v553_v46, %v554_v47 }
  0x92   : > { %v2452_v32 = vpop.permute.xlu1 %718 }
  0x93   : > { %v2456_v35 = vpop.permute.xlu0 %715 }
  0x97   : > { %v2454_v34 = vpop.permute.xlu1 %811 }
  0x98   : > { %v2458_v37 = vpop.permute.xlu0 %814 }
  0x9c   : > { %v995_v36 = vpop.permute.xlu1 %994 }
  0x9d   : > { %v1000_v59 = vrot.slane %v995_v36, 4  ;;  %v2222_v36 = vld [vmem:[%s2771_s4 + $0xc0] sm:$0xff]  }
  0x9e   : > { %v2467_v42 = vpop.permute.xlu0 %1090 }
  0x9f   : > { %v1095_v22 = vrot.slane %v2467_v42, 4  ;;  %v2223_v42 = vld [vmem:[%s2771_s4] sm:$0xff]  }
  0xa0   : > { %v998_v38 = vpop.permute.xlu1 %997 }
  0xa1   : > { %v1001_v53 = vrot.slane %v998_v38, 4 }
  0xa3   : > { %v2473_v51 = vpop.permute.xlu0 %1188  ;;  %v1002_v1 = vsel %vm999_vm2, %v1000_v59, %v1001_v53  ;;  %v722_v53 = vrot.slane %v2452_v32, 6  ;;  %v2227_v32 = vld [vmem:[%s2771_s4 + $0x50] sm:$0xff]  }
  0xa4   : > { %v1192_v61 = vrot.slane %v2473_v51, 3  ;;  %v2242_v51 = vld [vmem:[%s2771_s4 + $0xe8] sm:$0xff]  }
  0xa5   : > { %v1094_v45 = vpop.permute.xlu1 %1093 }
  0xa6   : > { %v1096_v16 = vrot.slane %v1094_v45, 4  ;;  %v2224_v45 = vld [vmem:[%s2771_s4 + $0x118] sm:$0xff]  }
  0xa8   : > { %v1097_v24 = vsel %vm999_vm2, %v1095_v22, %v1096_v16  ;;  %v2233_v16 = vld [vmem:[%s2771_s4 + $0x70] sm:$0xff]  }
  0xaa   : > { %v1186_v55 = vpop.permute.xlu1 %1185 }
  0xab   : > { %v1191_v60 = vrot.slane %v1186_v55, 3  ;;  %v721_v55 = vrot.slane %v2456_v35, 6  ;;  %v2228_v35 = vld [vmem:[%s2771_s4 + $0x108] sm:$0xff]  }
  0xad   : > { %v1193_v3 = vsel %vm1190_vm3, %v1191_v60, %v1192_v61 }
  0xaf   : > { %v1297_v26 = vpop.permute.xlu1 %1296 }
  0xec   : > { %v2460_v39 = vpop.f32.mrf.mxu0 }
  0xee   : > { %v508_v41 = vpop.f32.mrf.mxu0 }
  0xef   : > { %v509_v43 = vadd.f32 %v2465_v40, %v508_v41  ;;  %v1300_v41 = vpop.permute.xlu1 %1299 }
  0xf0   : > { %v2057_v44 = vpop.f32.mrf.mxu0  ;;  %v1303_v47 = vrot.slane %v1300_v41, 2  ;;  %v2243_v41 = vld [vmem:[%s2771_s4 + $0xe0] sm:$0xff]  }
  0xf1   : > { %v2470_v49 = vmax.f32 %v509_v43, 0.0  ;;  %v2542_v44 = vadd.f32 %v2460_v39, %v2465_v40 }
  0xf2   : > { %v511_v48 = vpop.f32.mrf.mxu0 }
  0xf3   : > { %v512_v50 = vadd.f32 %v2465_v40, %v511_v48  ;;  %v558_v57 = vmul.f32 %v553_v46, %v2470_v49  ;;  %v2490_v10 = vmul.f32 %v1000_v59, %v2470_v49  ;;  %v1197_v11 = vmul.f32 %v1191_v60, %v2470_v49  ;;  %v2229_v60 = vld [vmem:[%s2771_s4 + $0x48] sm:$0xff]  }
  0xf4   : > { %v1100_v33 = vmul.f32 %v1095_v22, %v2470_v49  ;;  %v1302_v46 = vrot.slane %v1297_v26, 2  ;;  %v2235_v22 = vld [vmem:[%s2771_s4 + $0x60] sm:$0xff]  }
  0xf5   : > { %v2475_v52 = vmax.f32 %v512_v50, 0.0  ;;  %v535_v50 = vmul.f32 %v2448_v29, %v2470_v49  ;;  %v2226_v29 = vld [vmem:[%s2771_s4 + $0x110] sm:$0xff]   ;;  %v2239_v26 = vld [vmem:[%s2771_s4 + $0xa0] sm:$0xff]  }
  0xf6   : > { %v1304_v39 = vsel %vm1301_vm5, %v1302_v46, %v1303_v47  ;;  %v1308_v59 = vmul.f32 %v1302_v46, %v2470_v49  ;;  %v2249_v46 = vld [vmem:[%s2775_s8 + $0x64] ss:$8 sps:$4 sm:$0xff]  }
  0xf7   : > { %v905_v56 = vpack.c.bf16 %v2475_v52, %v2470_v49  ;;  %v559_v58 = vmul.f32 %v555_v54, %v2475_v52  ;;  %v2494_v14 = vmul.f32 %v1002_v1, %v2475_v52  ;;  %v1198_v15 = vmul.f32 %v1193_v3, %v2475_v52  ;;  %v2230_v1 = vld [vmem:[%s2771_s4 + $0x100] sm:$0xff]  }
  0xf8   : > { %v1101_v28 = vmul.f32 %v1097_v24, %v2475_v52  ;;  %v536_v43 = vmul.f32 %v2450_v30, %v2475_v52  ;;  %v2225_v30 = vld [vmem:[%s2771_s4 + $0x58] sm:$0xff]   ;;  %v524_v54 = vmax.f32 %v2542_v44, 0.0  ;;  %v726_v3 = vmul.f32 %v721_v55, %v2470_v49 }
  0xf9   : > { %v916_v62 = vshrl.u32 %v905_v56, 16  ;;  %v919_v63 = vshll.u32 %v905_v56, 16  ;;  %v560_v0 = vpack.c.bf16 %v559_v58, %v558_v57  ;;  %v1007_v19 = vpack.c.bf16 %v2494_v14, %v2490_v10  ;;  %v2236_v24 = vld [vmem:[%s2771_s4 + $0xb8] sm:$0xff]  }
  0xfa   : > { %v2503_v20 = vpack.c.bf16 %v1198_v15, %v1197_v11  ;;  %v1102_v38 = vpack.c.bf16 %v1101_v28, %v1100_v33  ;;  %v537_v40 = vpack.c.bf16 %v536_v43, %v535_v50  ;;  %v1309_v56 = vmul.f32 %v1304_v39, %v2475_v52  ;;  %v2232_v11 = vld [vmem:[%s2771_s4 + $0x78] sm:$0xff]   ;;  %v2241_v33 = vld [vmem:[%s2771_s4 + $0xf0] sm:$0xff]   ;;  %v2253_v50 = vld [vmem:[%s2775_s8 + $0x40] ss:$8 sps:$4 sm:$0xff]  }
  0xfb   : > { %v918_v4 = vrot.slane %v916_v62, 1  ;;  %v921_v5 = vrot.slane %v919_v63, 2  ;;  %v573_v7 = vshll.u32 %v560_v0, 16  ;;  %v571_v9 = vshrl.u32 %v560_v0, 16  ;;  %v2244_v44 = vld [vmem:[%s2775_s8 + $0x70] ss:$8 sps:$4 sm:$0xff]  }
  0xfc   : > { %v1113_v48 = vrot.slane %v1102_v38, 2  ;;  %v723_v57 = vsel %vm720_vm6, %v721_v55, %v722_v53  ;;  %v1310_v58 = vmul.f32 %v1303_v47, %v524_v54  ;;  %v1311_v62 = vpack.c.bf16 %v1309_v56, %v1308_v59  ;;  %v2247_v47 = vld [vmem:[%s2775_s8 + $0x60] ss:$8 sps:$4 sm:$0xff]   ;;  %v2258_v39 = vld [vmem:[%s2775_s8 + $0x34] ss:$8 sps:$4 sm:$0xff]  }
  0xfd   : > { %v922_v12 = vor.u32 %v921_v5, %v918_v4  ;;  %v575_v13 = vrot.slane %v573_v7, 1  ;;  %v727_v63 = vmul.f32 %v723_v57, %v2475_v52  ;;  %v2231_v4 = vld [vmem:[%s2771_s4 + $0x40] sm:$0xff]   ;;  %v816_v15 = vrot.slane %v2454_v34, 6  ;;  %v2264_v53 = vld [vmem:[%s2773_s6 + $0x34] ss:$8 sps:$4 sm:$0xff]  }
  0xfe   : > { %v1312_v0 = vpack.c.bf16 %v1310_v58, %v1310_v58  ;;  %v1325_v5 = vrot.slane %v1311_v62, 3  ;;  %v1018_v28 = vrot.slane %v1007_v19, 2  ;;  %v1213_v10 = vshrl.u32 %v2503_v20, 16  ;;  %v2259_v55 = vld [vmem:[%s2775_s8 + $0x20] ss:$8 sps:$4 sm:$0xff]  }
  0xff   : > { %2115 = vmatmul.mubr.msk.bf16.vlgmr.msra.gmra.mxu0 %vm601_vm4, %v922_v12  ;;  %v576_v18 = vor.u32 %v575_v13, %v571_v9  ;;  %v728_v7 = vpack.c.bf16 %v727_v63, %v726_v3  ;;  %v817_v13 = vrot.slane %v2458_v37, 6  ;;  %v2234_v37 = vld [vmem:[%s2771_s4 + $0x68] sm:$0xff]   ;;  %v1216_v14 = vshll.u32 %v2503_v20, 16  ;;  %v2267_v57 = vld [vmem:[%s2775_s8 + $0x14] ss:$8 sps:$4 sm:$0xff]  }
 0x100   : > { %2131 = vmatpush3.bf16.msra.mxu0 %v2216_v8  ;;  %2138 = vmatprep.mubr.msk.bf16.mxu0 %vm2297_vm0, %v2296_v21  ;;  %v1326_v8 = vrot.slane %v1312_v0, 3  ;;  %v1548_v56 = vshll.u32 %v2388_v6, 16  ;;  %v2265_v58 = vld [vmem:[%s2775_s8 + $0x10] ss:$8 sps:$4 sm:$0xff]   ;;  %v2268_v59 = vld [vmem:[%s2773_s6 + $0x20] ss:$8 sps:$4 sm:$0xff]  }
 0x101   : > { %2067 = vmatmul.mubr.msk.bf16.vlgmr.msra.gmra.mxu1 %vm601_vm4, %v576_v18  ;;  %2132 = vmatprep.subr.bf16.mxu0 %v2296_v21  ;;  %v739_v12 = vrot.slane %v728_v7, 1  ;;  %v821_v18 = vmul.f32 %v816_v15, %v2470_v49  ;;  %v2237_v49 = vld [vmem:[%s2771_s4 + $0xb0] sm:$0xff]   ;;  %v2273_v62 = vld [vmem:[%s2775_s8 + $0x4] ss:$8 sps:$4 sm:$0xff]   ;;  %v2271_v63 = vld [vmem:[%s2775_s8] ss:$8 sps:$4 sm:$0xff]  }
 0x102   : > { %2071 = vmatpush3.bf16.msra.mxu1 %v2217_v17  ;;  %2078 = vmatprep.mubr.msk.bf16.mxu1 %vm2297_vm0, %v2296_v21  ;;  %v1327_v9 = vsel %vm1190_vm3, %v1325_v5, %v1326_v8  ;;  %v818_v17 = vsel %vm720_vm6, %v816_v15, %v817_v13  ;;  %v2276_v0 = vld [vmem:[%s2773_s6 + $0x14] ss:$8 sps:$4 sm:$0xff]   ;;  %v2279_v5 = vld [vmem:[%s2773_s6 + $0x4] ss:$8 sps:$4 sm:$0xff]  }
 0x103   : > { %2072 = vmatprep.subr.bf16.mxu1 %v2296_v21  ;;  %v822_v34 = vmul.f32 %v818_v17, %v2475_v52  ;;  %v2238_v52 = vld [vmem:[%s2771_s4 + $0xa8] sm:$0xff]  }
 0x104   : > { %2133 = vmatpush3.bf16.msra.mxu0 %v2218_v23 }
 0x105   : > { %2134 = vmatprep.subr.bf16.mxu0 %v2296_v21  ;;  %v823_v23 = vpack.c.bf16 %v822_v34, %v821_v18 }
 0x106   : > { %2073 = vmatpush3.bf16.msra.mxu1 %v2219_v25 }
 0x107   : > { %2074 = vmatprep.subr.bf16.mxu1 %v2296_v21  ;;  %v834_v25 = vrot.slane %v823_v23, 1 }
 0x108   : > { %2135 = vmatpush3.bf16.msra.mxu0 %v2220_v27  ;;  %v2240_v27 = vld [vmem:[%s2771_s4 + $0xf8] sm:$0xff]  }
 0x109   : > { %2136 = vmatprep.subr.bf16.mxu0 %v2296_v21 }
 0x10a   : > { %2075 = vmatpush3.bf16.msra.mxu1 %v2221_v31  ;;  %v1199_v31 = vmul.f32 %v1192_v61, %v524_v54  ;;  %v1215_v61 = vrot.slane %v1213_v10, 2  ;;  %v2256_v54 = vld [vmem:[%s2775_s8 + $0x30] ss:$8 sps:$4 sm:$0xff]  }
 0x10b   : > { %2076 = vmatprep.subr.bf16.mxu1 %v2296_v21 }
 0x10c   : > { %2137 = vmatpush3.bf16.msra.mxu0 %v2222_v36  ;;  %v1201_v19 = vpack.c.bf16 %v1199_v31, %v1199_v31  ;;  %v1218_v36 = vrot.slane %v1216_v14, 3 }
 0x10d   : > { %2154 = vmatprep.subr.bf16.mxu0 %v2296_v21 }
 0x10e   : > { %2077 = vmatpush3.bf16.msra.mxu1 %v2223_v42  ;;  %v1221_v38 = vshll.u32 %v1201_v19, 16  ;;  %v1219_v42 = vor.u32 %v1218_v36, %v1215_v61 }
 0x10f   : > { %2139 = vmatmul.mubr.msk.bf16.vlgmr.msra.gmra.mxu0 %vm601_vm4, %v1113_v48  ;;  %2082 = vmatprep.subr.bf16.mxu1 %v2296_v21  ;;  %v2252_v48 = vld [vmem:[%s2775_s8 + $0x54] ss:$8 sps:$4 sm:$0xff]  }
 0x110   : > { %2155 = vmatpush3.bf16.msra.mxu0 %v2224_v45  ;;  %2162 = vmatprep.mubr.msk.bf16.mxu0 %vm2297_vm0, %v2296_v21  ;;  %v1223_v20 = vrot.slane %v1221_v38, 3  ;;  %v2246_v45 = vld [vmem:[%s2775_s8 + $0x74] ss:$8 sps:$4 sm:$0xff]  }
 0x111   : > { %2079 = vmatmul.mubr.msk.bf16.vlgmr.msra.gmra.mxu1 %vm601_vm4, %v537_v40  ;;  %2156 = vmatprep.subr.bf16.mxu0 %v2296_v21  ;;  %v2262_v40 = vld [vmem:[%s2773_s6 + $0x30] ss:$8 sps:$4 sm:$0xff]  }
 0x112   : > { %2083 = vmatpush3.bf16.msra.mxu1 %v2225_v30  ;;  %2090 = vmatprep.mubr.msk.bf16.mxu1 %vm2297_vm0, %v2296_v21  ;;  %v1224_v43 = vsel %vm1211_vm7, %v1219_v42, %v1223_v20  ;;  %v2255_v30 = vld [vmem:[%s2775_s8 + $0x44] ss:$8 sps:$4 sm:$0xff]  }
 0x113   : > { %2084 = vmatprep.subr.bf16.mxu1 %v2296_v21 }
 0x114   : > { %2157 = vmatpush3.bf16.msra.mxu0 %v2226_v29  ;;  %v2261_v29 = vld [vmem:[%s2775_s8 + $0x24] ss:$8 sps:$4 sm:$0xff]  }
 0x115   : > { %2158 = vmatprep.subr.bf16.mxu0 %v2296_v21 }
 0x116   : > { %2085 = vmatpush3.bf16.msra.mxu1 %v2227_v32  ;;  %v1545_v32 = vshrl.u32 %v2388_v6, 16  ;;  %v1550_v6 = vrot.slane %v1548_v56, 2 }
 0x117   : > { %2086 = vmatprep.subr.bf16.mxu1 %v2296_v21 }
 0x118   : > { %2159 = vmatpush3.bf16.msra.mxu0 %v2228_v35  ;;  %v2270_v35 = vld [vmem:[%s2773_s6 + $0x24] ss:$8 sps:$4 sm:$0xff]  }
 0x119   : > { %2160 = vmatprep.subr.bf16.mxu0 %v2296_v21 }
 0x11a   : > { %2087 = vmatpush3.bf16.msra.mxu1 %v2229_v60  ;;  %v1547_v60 = vrot.slane %v1545_v32, 1  ;;  %v1951_v32 = vld [vmem:[%s2772_s5] ss:$0 sm:$0xff] }
 0x11b   : > { %2088 = vmatprep.subr.bf16.mxu1 %v2296_v21 }
 0x11c   : > { %2161 = vmatpush3.bf16.msra.mxu0 %v2230_v1  ;;  %v2274_v1 = vld [vmem:[%s2773_s6 + $0x10] ss:$8 sps:$4 sm:$0xff]   ;;  %v1551_v3 = vor.u32 %v1550_v6, %v1547_v60 }
 0x11d   : > { %1633 = vmatprep.subr.bf16.mxu0 %v2246_v45 }
 0x11e   : > { %2089 = vmatpush3.bf16.msra.mxu1 %v2231_v4  ;;  %v2277_v4 = vld [vmem:[%s2773_s6] ss:$8 sps:$4 sm:$0xff]  }
 0x11f   : > { %2163 = vmatmul.mubr.msk.bf16.vlgmr.msra.gmra.mxu0 %vm601_vm4, %v1327_v9  ;;  %2094 = vmatprep.subr.bf16.mxu1 %v2296_v21 }
 0x120   : > { %1665 = vmatprep.mubr.bf16.mxu0 %v2288_v2  ;;  %1634 = vmatpush1.bf16.msra.mxu0 %v2244_v44 }
 0x121   : > { %2091 = vmatmul.mubr.msk.bf16.vlgmr.msra.gmra.mxu1 %vm601_vm4, %v739_v12  ;;  %1635 = vmatprep.subr.bf16.mxu0 %v2249_v46 }
 0x122   : > { %2095 = vmatpush3.bf16.msra.mxu1 %v2232_v11  ;;  %2102 = vmatprep.mubr.msk.bf16.mxu1 %vm2297_vm0, %v2296_v21 }
 0x123   : > { %2096 = vmatprep.subr.bf16.mxu1 %v2296_v21 }
 0x124   : > { %1636 = vmatpush1.bf16.msra.mxu0 %v2247_v47 }
 0x125   : > { %1637 = vmatprep.subr.bf16.mxu0 %v2252_v48 }
 0x126   : > { %2097 = vmatpush3.bf16.msra.mxu1 %v2233_v16 }
 0x127   : > { %2098 = vmatprep.subr.bf16.mxu1 %v2296_v21 }
 0x12a   : > { %2099 = vmatpush3.bf16.msra.mxu1 %v2234_v37 }
 0x12b   : > { %2100 = vmatprep.subr.bf16.mxu1 %v2296_v21 }
 0x12e   : > { %2101 = vmatpush3.bf16.msra.mxu1 %v2235_v22 }
 0x12f   : > { %2118 = vmatprep.subr.bf16.mxu1 %v2296_v21 }
 0x131   : > { %2103 = vmatmul.mubr.msk.bf16.vlgmr.msra.gmra.mxu1 %vm601_vm4, %v834_v25 }
 0x132   : > { %2119 = vmatpush3.bf16.msra.mxu1 %v2236_v24  ;;  %2126 = vmatprep.mubr.msk.bf16.mxu1 %vm2297_vm0, %v2296_v21 }
 0x133   : > { %2120 = vmatprep.subr.bf16.mxu1 %v2296_v21 }
 0x136   : > { %2121 = vmatpush3.bf16.msra.mxu1 %v2237_v49 }
 0x137   : > { %2122 = vmatprep.subr.bf16.mxu1 %v2296_v21 }
 0x13a   : > { %2123 = vmatpush3.bf16.msra.mxu1 %v2238_v52 }
 0x13b   : > { %2124 = vmatprep.subr.bf16.mxu1 %v2296_v21 }
 0x13e   : > { %2125 = vmatpush3.bf16.msra.mxu1 %v2239_v26 }
 0x13f   : > { %2142 = vmatprep.subr.bf16.mxu1 %v2296_v21 }
 0x141   : > { %2127 = vmatmul.mubr.msk.bf16.vlgmr.msra.gmra.mxu1 %vm601_vm4, %v1018_v28 }
 0x142   : > { %2143 = vmatpush3.bf16.msra.mxu1 %v2240_v27  ;;  %2150 = vmatprep.mubr.msk.bf16.mxu1 %vm2297_vm0, %v2296_v21 }
 0x143   : > { %2144 = vmatprep.subr.bf16.mxu1 %v2296_v21 }
 0x146   : > { %2145 = vmatpush3.bf16.msra.mxu1 %v2241_v33 }
 0x147   : > { %2146 = vmatprep.subr.bf16.mxu1 %v2296_v21 }
 0x14a   : > { %2147 = vmatpush3.bf16.msra.mxu1 %v2242_v51 }
 0x14b   : > { %2148 = vmatprep.subr.bf16.mxu1 %v2296_v21 }
 0x14e   : > { %2149 = vmatpush3.bf16.msra.mxu1 %v2243_v41 }
 0x14f   : > { %1481 = vmatprep.subr.bf16.mxu1 %v2264_v53 }
 0x151   : > { %2151 = vmatmul.mubr.msk.bf16.vlgmr.msra.gmra.mxu1 %vm601_vm4, %v1224_v43 }
 0x152   : > { %1505 = vmatprep.mubr.bf16.mxu1 %v2288_v2  ;;  %v2250_v2 = vld [vmem:[%s2775_s8 + $0x50] ss:$8 sps:$4 sm:$0xff]   ;;  %1482 = vmatpush1.bf16.msra.mxu1 %v2262_v40 }
 0x153   : > { %1638 = vmatpush1.bf16.msra.mxu0 %v2250_v2  ;;  %1483 = vmatprep.subr.bf16.mxu1 %v2270_v35 }
 0x154   : > { %1639 = vmatprep.subr.bf16.mxu0 %v2255_v30 }
 0x156   : > { %1484 = vmatpush1.bf16.msra.mxu1 %v2268_v59 }
 0x157   : > { %1640 = vmatpush1.bf16.msra.mxu0 %v2253_v50  ;;  %1485 = vmatprep.subr.bf16.mxu1 %v2276_v0  ;;  %v1420_v0 = vlaneseq }
 0x158   : > { %1641 = vmatprep.subr.bf16.mxu0 %v2258_v39 }
 0x15a   : > { %1486 = vmatpush1.bf16.msra.mxu1 %v2274_v1 }
 0x15b   : > { %1642 = vmatpush1.bf16.msra.mxu0 %v2256_v54  ;;  %1487 = vmatprep.subr.bf16.mxu1 %v2279_v5 }
 0x15c   : > { %1643 = vmatprep.subr.bf16.mxu0 %v2261_v29 }
 0x15e   : > { %1488 = vmatpush1.bf16.msra.mxu1 %v2277_v4 }
 0x15f   : > { %1644 = vmatpush1.bf16.msra.mxu0 %v2259_v55 }
 0x160   : > { %1645 = vmatprep.subr.bf16.mxu0 %v2267_v57 }
 0x163   : > { %1646 = vmatpush1.bf16.msra.mxu0 %v2265_v58 }
 0x164   : > { %1647 = vmatprep.subr.bf16.mxu0 %v2273_v62 }
 0x167   : > { %1648 = vmatpush1.bf16.msra.mxu0 %v2271_v63 }
 0x16a   : > { %1666 = vmatmul.mubr.bf16.vlgmr.msra.gmra.mxu0 %v1551_v3  ;;  %v1421_v3 = vshrl.u32 %v1420_v0, 7 }
 0x16c   : > { %v1422_v5 = vsub.s32 0, %v1421_v3 }
 0x1bf   : > { %v984_v7 = vpop.f32.mrf.mxu0 }
 0x1c1   : > { %v639_v8 = vpop.f32.mrf.mxu1  ;;  %v2116_v9 = vpop.f32.mrf.mxu0 }
 0x1c2   : > { %v1418_v9 = vld [vmem:[%s2774_s7] sm:$0x3] }
 0x1c3   : > { %v2068_v11 = vpop.f32.mrf.mxu1  ;;  %v987_v12 = vpop.f32.mrf.mxu0 }
 0x1c5   : > { %v642_v13 = vpop.f32.mrf.mxu1  ;;  %v2117_v15 = vpop.f32.mrf.mxu0 }
 0x1c7   : > { %v2069_v16 = vpop.f32.mrf.mxu1 }
 0x1c8   : > { %v1423_v16 = vrot.slane %v1418_v9, %v1422_v5 }
 0x1cf   : > { %v1175_v17 = vpop.f32.mrf.mxu0 }
 0x1d1   : > { %v707_v37 = vpop.f32.mrf.mxu1  ;;  %v2140_v34 = vpop.f32.mrf.mxu0 }
 0x1d2   : > { %v708_v14 = vadd.f32 %v707_v37, %v639_v8  ;;  %v1426_v8 = vsub.s32 1, %v1421_v3 }
 0x1d3   : > { %v2080_v18 = vpop.f32.mrf.mxu1  ;;  %v1178_v22 = vpop.f32.mrf.mxu0 }
 0x1d5   : > { %v710_v23 = vpop.f32.mrf.mxu1  ;;  %v2141_v24 = vpop.f32.mrf.mxu0 }
 0x1d6   : > { %v711_v61 = vadd.f32 %v710_v23, %v642_v13  ;;  %v1427_v13 = vrot.slane %v1418_v9, %v1426_v8 }
 0x1d7   : > { %v2081_v25 = vpop.f32.mrf.mxu1 }
 0x1df   : > { %v1389_v49 = vpop.f32.mrf.mxu0 }
 0x1e1   : > { %v801_v52 = vpop.f32.mrf.mxu1  ;;  %v2164_v26 = vpop.f32.mrf.mxu0 }
 0x1e2   : > { %v808_v19 = vadd.f32 %v801_v52, %v708_v14 }
 0x1e3   : > { %v2092_v27 = vpop.f32.mrf.mxu1  ;;  %v1392_v28 = vpop.f32.mrf.mxu0 }
 0x1e5   : > { %v804_v31 = vpop.f32.mrf.mxu1  ;;  %v2165_v33 = vpop.f32.mrf.mxu0 }
 0x1e6   : > { %v809_v41 = vadd.f32 %v804_v31, %v711_v61 }
 0x1e7   : > { %v2093_v10 = vpop.f32.mrf.mxu1 }
 0x1f1   : > { %v896_v51 = vpop.f32.mrf.mxu1 }
 0x1f2   : > { %v903_v36 = vadd.f32 %v896_v51, %v808_v19 }
 0x1f3   : > { %v2104_v38 = vpop.f32.mrf.mxu1 }
 0x1f4   : > { %v991_v42 = vadd.f32 %v984_v7, %v903_v36  ;;  %v1532_v7 = vld [vmem:[%s2776_s9] sm:$0x3] }
 0x1f5   : > { %v899_v20 = vpop.f32.mrf.mxu1  ;;  %v1537_v15 = vrot.slane %v1532_v7, %v1422_v5  ;;  %v1684_v36 = vld [vmem:[%s2777_s10] sm:$0x3f] }
 0x1f6   : > { %v904_v43 = vadd.f32 %v899_v20, %v809_v41 }
 0x1f7   : > { %v2105_v44 = vpop.f32.mrf.mxu1 }
 0x1f8   : > { %v992_v45 = vadd.f32 %v987_v12, %v904_v43 }
 0x201   : > { %v1080_v46 = vpop.f32.mrf.mxu1 }
 0x202   : > { %v1087_v47 = vadd.f32 %v1080_v46, %v991_v42 }
 0x203   : > { %v2128_v2 = vpop.f32.mrf.mxu1 }
 0x204   : > { %v1182_v48 = vadd.f32 %v1175_v17, %v1087_v47  ;;  %v1541_v17 = vrot.slane %v1532_v7, %v1426_v8 }
 0x205   : > { %v1083_v50 = vpop.f32.mrf.mxu1 }
 0x206   : > { %v1088_v30 = vadd.f32 %v1083_v50, %v992_v45 }
 0x207   : > { %v2129_v39 = vpop.f32.mrf.mxu1 }
 0x208   : > { %v1183_v40 = vadd.f32 %v1178_v22, %v1088_v30 }
 0x211   : > { %v1286_v53 = vpop.f32.mrf.mxu1 }
 0x212   : > { %v1293_v54 = vadd.f32 %v1286_v53, %v1182_v48 }
 0x213   : > { %v2152_v29 = vpop.f32.mrf.mxu1 }
 0x214   : > { %v1396_v55 = vadd.f32 %v1389_v49, %v1293_v54 }
 0x215   : > { %v1289_v56 = vpop.f32.mrf.mxu1 }
 0x216   : > { %v1294_v57 = vadd.f32 %v1289_v56, %v1183_v40  ;;  %v1405_v35 = vadd.f32 %v1951_v32, %v1396_v55 }
 0x217   : > { %v2153_v58 = vpop.f32.mrf.mxu1 }
 0x218   : > { %v1397_v59 = vadd.f32 %v1392_v28, %v1294_v57  ;;  %v1407_v6 = vmax.f32 %v1405_v35, 0.0 }
 0x21a   : > { %v1406_v60 = vadd.f32 %v1951_v32, %v1397_v59 }
 0x21c   : > { %v1408_v62 = vmax.f32 %v1406_v60, 0.0 }
 0x21e   : > { %v1409_v63 = vpack.c.bf16 %v1408_v62, %v1407_v6 }
 0x220   : > { %1960 = vmatmul.mubr.msk.bf16.vlgmr.msra.gmra.mxu1 %vm601_vm4, %v1409_v63 }
 0x221   : > { %1759 = vmatprep.mubr.f32.mxu1 %v2296_v21 }
 0x22a   : > { %v1667_v1 = vpop.f32.mrf.mxu0 }
 0x22b   : > { %v1668_v23 = vadd.f32 %v1667_v1, %v1537_v15 }
 0x22c   : > { %v1669_v4 = vpop.f32.mrf.mxu0 }
 0x22d   : > { %v1670_v52 = vadd.f32 %v1669_v4, %v1541_v17 }
 0x22e   : > { %v1671_v11 = vpop.f32.mrf.mxu0 }
 0x22f   : > { %v1672_v24 = vadd.f32 %v1671_v11, %v1537_v15 }
 0x230   : > { %v1673_v37 = vpop.f32.mrf.mxu0 }
 0x231   : > { %v1674_v26 = vadd.f32 %v1673_v37, %v1541_v17 }
 0x2e0   : > { %v1507_v12 = vpop.f32.mrf.mxu1 }
 0x2e1   : > { %v1508_v25 = vadd.f32 %v1507_v12, %v1423_v16 }
 0x2e2   : > { %v1509_v21 = vpop.f32.mrf.mxu1 }
 0x2e3   : > { %v1510_v18 = vadd.f32 %v1509_v21, %v1427_v13  ;;  %v1676_v10 = vadd.f32 %v1668_v23, %v1508_v25 }
 0x2e4   : > { %v1511_v34 = vpop.f32.mrf.mxu1 }
 0x2e5   : > { %v1512_v22 = vadd.f32 %v1511_v34, %v1423_v16  ;;  %v1677_v31 = vadd.f32 %v1670_v52, %v1510_v18  ;;  %v1680_v61 = vmax.f32 %v1676_v10, 0.0 }
 0x2e6   : > { %v1513_v49 = vpop.f32.mrf.mxu1 }
 0x2e7   : > { %v1514_v27 = vadd.f32 %v1513_v49, %v1427_v13  ;;  %v1678_v28 = vadd.f32 %v1672_v24, %v1512_v22  ;;  %v1681_v51 = vmax.f32 %v1677_v31, 0.0 }
 0x2e9   : > { %v1679_v33 = vadd.f32 %v1674_v26, %v1514_v27  ;;  %v1682_v19 = vmax.f32 %v1678_v28, 0.0 }
 0x2eb   : > { %v1683_v14 = vmax.f32 %v1679_v33, 0.0 }
 0x2ed   : > { %1977 = vmatprep.subr.msk.mxu1 %vm999_vm2, %v1683_v14 }
 0x2ee   : > { %1978 = vmatpush1.msk.msra.mxu1 %vm999_vm2, %v1682_v19 }
 0x2ef   : > { %1725 = vmatprep.subr.mxu1 %v1681_v51 }
 0x2f0   : > { %1726 = vmatpush1.msra.mxu1 %v1680_v61 }
 0x2f1   : > { %1979 = vmatmul.mubr.msk.f32.vlgmr.msra.gmra.mxu1 %vm1685_vm8, %v1684_v36 }
 0x3b1   : > { %v1761_v38 = vpop.f32.mrf.mxu1 }
 0x3b2   : > { %1766 = vst [vmem:[%s386_s23] sm:$0x3f] %v1761_v38 }
 0x3b3   : > { %v1763_v41 = vpop.f32.mrf.mxu1 }
 0x3b4   : > { %1767 = vst [vmem:[%s386_s23 + $0x8] sm:$0x3f] %v1763_v41 }
 0x3b5 PF: > { %s21_s17 = sadd.s32 1, %s2286_s17  }
 0x3b6   : > { %p18_p4 = scmp.ge.s32.totalorder %s21_s17, 4  }
 0x3b8   :  { %20 = sbr.rel (!%p18_p4) target bundleno = 1 (0x1), region = 102 }

</bundles_post_ra>
